<compile_context>
chip_gen: v7x
topology: tpu7x:2x2x1
jax: 0.10.0
libtpu: 0.0.40
codegen_flags: <defaults>
</compile_context>

<pallas_src>
import functools
import math

import jax
import jax.numpy as jnp
from jax.experimental import pallas as pl
from jax.experimental.pallas import tpu as pltpu

GAMMA = 10 ^ 3        # faithful to the PyTorch source: '^' is XOR, so GAMMA == 9
LANE = 128            # TPU lane width; channel dims are zero-padded to this
ACT_DTYPE = jnp.bfloat16
VMEM_LIMIT = 32 * 1024 * 1024


def _round_up(x, m):
    return (x + m - 1) // m * m


def _cpad(c):
    return _round_up(max(int(c), 1), LANE)


# ----------------------------------------------------------------------------
# Fused 3x3 SAME conv (+bias, +ReLU), one or two accumulated sources
# ----------------------------------------------------------------------------
def _conv3x3_kernel(*refs, n_src, rows, wp, relu):
    x_refs = refs[:n_src]
    w_ref = refs[n_src]          # (9*n_src, Cp, tn) bf16
    b_ref = refs[n_src + 1]      # (1, tn) f32
    o_ref = refs[n_src + 2]      # (rows, tn)

    tn = o_ref.shape[-1]
    acc = jnp.broadcast_to(b_ref[...], (rows, tn)).astype(jnp.float32)
    for s in range(n_src):
        for t in range(9):
            ky, kx = divmod(t, 3)
            d = ky * wp + kx
            xt = x_refs[s][d:d + rows, :].astype(jnp.bfloat16)
            acc = acc + jnp.dot(xt, w_ref[s * 9 + t],
                                preferred_element_type=jnp.float32)
    if relu:
        acc = jnp.maximum(acc, 0.0)
    o_ref[...] = acc.astype(o_ref.dtype)


def conv3x3(srcs, w_taps, bias2d, *, relu=True, out_dtype=ACT_DTYPE):
    """3x3 SAME conv + bias (+ReLU) over one or two NHWC channel-padded sources.

    srcs:   list of (N, H, W, Cp) activations (all same N/H/W/Cp).
    w_taps: (9*len(srcs), Cp, CoutP) bf16 tap-major weights.
    bias2d: (1, CoutP) f32.
    """
    n_src = len(srcs)
    n, h, w, cp = srcs[0].shape
    for s in srcs:
        assert s.shape == (n, h, w, cp)
    coutp = w_taps.shape[-1]
    hp, wp = h + 2, w + 2
    rows = h * wp
    lrows = _round_up(hp * wp + 2, 8)

    # Cheap host prep: spatial zero pad + contiguous flatten (~1.3x, not 9x).
    slabs = []
    for x in srcs:
        xp = jnp.pad(x.astype(jnp.float32), ((0, 0), (1, 1), (1, 1), (0, 0)))
        xf = xp.reshape(n, hp * wp, cp)
        xf = jnp.pad(xf, ((0, 0), (0, lrows - hp * wp), (0, 0)))
        slabs.append(xf)

    tn = LANE
    grid = (n, coutp // tn)

    in_specs = (
        [pl.BlockSpec((None, lrows, cp), lambda b, j: (b, 0, 0))
         for _ in range(n_src)]
        + [pl.BlockSpec((9 * n_src, cp, tn), lambda b, j: (0, 0, j)),
           pl.BlockSpec((1, tn), lambda b, j: (0, j))]
    )
    out_spec = pl.BlockSpec((None, rows, tn), lambda b, j: (b, 0, j))

    flops = int(2 * n * rows * cp * coutp * 9 * n_src)
    bytes_accessed = int(n * lrows * cp * 4 * n_src
                         + 9 * n_src * cp * coutp * 2
                         + coutp * 4
                         + n * rows * coutp * 2)

    out = pl.pallas_call(
        functools.partial(_conv3x3_kernel, n_src=n_src, rows=rows, wp=wp,
                          relu=relu),
        out_shape=jax.ShapeDtypeStruct((n, rows, coutp), out_dtype),
        grid_spec=pltpu.PrefetchScalarGridSpec(
            num_scalar_prefetch=0,
            grid=grid,
            in_specs=in_specs,
            out_specs=out_spec,
        ),
        compiler_params=pltpu.CompilerParams(
            dimension_semantics=("parallel", "parallel"),
            vmem_limit_bytes=VMEM_LIMIT,
        ),
        cost_estimate=pl.CostEstimate(flops=flops, transcendentals=0,
                                      bytes_accessed=bytes_accessed),
    )(*slabs, w_taps, bias2d)

    # Extended output rows carry 2 throw-away columns (width W+2); drop them.
    # TODO(synk): add halo-aware row tiling for large images (whole-image slab
    # per batch element is fine at these sizes but not for 1k x 1k inputs).
    return out.reshape(n, h, wp, coutp)[:, :, :w, :]


# ----------------------------------------------------------------------------
# Tiled matmul + bias (+ReLU): used for 1x1 conv and 2x2 transposed conv
# ----------------------------------------------------------------------------
def _matmul_kernel(a_ref, b_ref, bias_ref, o_ref, acc_ref, *, relu):
    @pl.when(pl.program_id(2) == 0)
    def _():
        acc_ref[...] = jnp.zeros_like(acc_ref)

    acc_ref[...] += jnp.dot(a_ref[...], b_ref[...],
                            preferred_element_type=jnp.float32)

    @pl.when(pl.program_id(2) == pl.num_programs(2) - 1)
    def _():
        out = acc_ref[...] + bias_ref[...]
        if relu:
            out = jnp.maximum(out, 0.0)
        o_ref[...] = out.astype(o_ref.dtype)


def matmul_bias_act(a, b, bias2d, *, relu=False, out_dtype=ACT_DTYPE,
                    tm=128, tn=128):
    m, k = a.shape
    k2, nn = b.shape
    assert k == k2 and nn % tn == 0 and k % LANE == 0
    tk = next(t for t in (512, 256, 128) if k % t == 0)

    mp = _round_up(m, tm)
    a = a.astype(ACT_DTYPE)
    if mp != m:
        a = jnp.pad(a, ((0, mp - m), (0, 0)))
    b = b.astype(ACT_DTYPE)

    grid = (mp // tm, nn // tn, k // tk)
    out = pl.pallas_call(
        functools.partial(_matmul_kernel, relu=relu),
        out_shape=jax.ShapeDtypeStruct((mp, nn), out_dtype),
        grid_spec=pltpu.PrefetchScalarGridSpec(
            num_scalar_prefetch=0,
            grid=grid,
            in_specs=[
                pl.BlockSpec((tm, tk), lambda i, j, kk: (i, kk)),
                pl.BlockSpec((tk, tn), lambda i, j, kk: (kk, j)),
                pl.BlockSpec((1, tn), lambda i, j, kk: (0, j)),
            ],
            out_specs=pl.BlockSpec((tm, tn), lambda i, j, kk: (i, j)),
            scratch_shapes=[pltpu.VMEM((tm, tn), jnp.float32)],
        ),
        compiler_params=pltpu.CompilerParams(
            dimension_semantics=("parallel", "parallel", "arbitrary"),
            vmem_limit_bytes=VMEM_LIMIT,
        ),
        cost_estimate=pl.CostEstimate(
            flops=int(2 * mp * nn * k), transcendentals=0,
            bytes_accessed=int((mp * k + k * nn + mp * nn) * 2 + nn * 4)),
    )(a, b, bias2d)
    return out[:m] if mp != m else out


def conv1x1(x, w2, bias2d):
    n, h, w, cp = x.shape
    coutp = w2.shape[-1]
    y = matmul_bias_act(x.reshape(n * h * w, cp), w2, bias2d, relu=False)
    return y.reshape(n, h, w, coutp)


def conv_transpose2x2(x, w2, bias4):
    # PyTorch ConvTranspose2d(kernel=2, stride=2): non-overlapping pixel shuffle.
    n, h, w, cp = x.shape
    coutp = w2.shape[1] // 4
    y = matmul_bias_act(x.reshape(n * h * w, cp), w2, bias4, relu=False)
    y = y.reshape(n, h, w, 2, 2, coutp)
    return jnp.transpose(y, (0, 1, 3, 2, 4, 5)).reshape(n, 2 * h, 2 * w, coutp)


# ----------------------------------------------------------------------------
# Max-pool 2x2 (gridded, lane-dense, activation dtype)
# ----------------------------------------------------------------------------
def _max4_kernel(a_ref, b_ref, c_ref, d_ref, o_ref):
    o_ref[...] = jnp.maximum(jnp.maximum(a_ref[...], b_ref[...]),
                             jnp.maximum(c_ref[...], d_ref[...]))


def maxpool2x2(x):
    # TODO(synk): fuse the 2x2 max into the preceding conv's epilogue to avoid
    # one extra read+write of the activation tensor in HBM.
    n, h, w, c = x.shape
    ho, wo = h // 2, w // 2
    m = n * ho * wo
    parts = [x[:, dy::2, dx::2, :].reshape(m, c)
             for dy in (0, 1) for dx in (0, 1)]
    mp = _round_up(m, 8)
    if mp != m:
        parts = [jnp.pad(p, ((0, mp - m), (0, 0))) for p in parts]
    tm = next(t for t in (1024, 512, 256, 128, 64, 32, 16, 8) if mp % t == 0)
    out = pl.pallas_call(
        _max4_kernel,
        out_shape=jax.ShapeDtypeStruct((mp, c), x.dtype),
        grid_spec=pltpu.PrefetchScalarGridSpec(
            num_scalar_prefetch=0,
            grid=(mp // tm,),
            in_specs=[pl.BlockSpec((tm, c), lambda i: (i, 0))] * 4,
            out_specs=pl.BlockSpec((tm, c), lambda i: (i, 0)),
        ),
        compiler_params=pltpu.CompilerParams(
            dimension_semantics=("parallel",),
            vmem_limit_bytes=VMEM_LIMIT,
        ),
    )(*parts)
    return out[:m].reshape(n, ho, wo, c)


# ----------------------------------------------------------------------------
# MMD loss (RBF kernel, biased mmd2) used by train_epoch
# ----------------------------------------------------------------------------
def _mmd_kernel(x_ref, y_ref, o_ref, *, gamma, m):
    X = x_ref[...].astype(jnp.float32)
    Y = y_ref[...].astype(jnp.float32)
    dn = (((1,), (1,)), ((), ()))  # contract feature dim -> A @ B.T
    XX = jax.lax.dot_general(X, X, dn, preferred_element_type=jnp.float32)
    XY = jax.lax.dot_general(X, Y, dn, preferred_element_type=jnp.float32)
    YY = jax.lax.dot_general(Y, Y, dn, preferred_element_type=jnp.float32)
    xsq = jnp.sum(X * X, axis=1, keepdims=True)
    ysq = jnp.sum(Y * Y, axis=1, keepdims=True)
    K_XX = jnp.exp(-gamma * (xsq - 2.0 * XX + xsq.T))
    K_XY = jnp.exp(-gamma * (xsq - 2.0 * XY + ysq.T))
    K_YY = jnp.exp(-gamma * (ysq - 2.0 * YY + ysq.T))
    mm = jnp.float32(m * m)
    # biased mmd2 == sum(K_XX)/m^2 + sum(K_YY)/m^2 - 2*sum(K_XY)/m^2
    o_ref[0] = (jnp.sum(K_XX) + jnp.sum(K_YY) - 2.0 * jnp.sum(K_XY)) / mm


def mmd_pallas(source, target):
    """mmd(source, target) from the PyTorch file (single sigma = GAMMA, biased)."""
    # TODO(synk): block the Gram matrices over (i, j) tiles for large batch m;
    # fine as a single block for the tiny batches used here.
    m, _ = source.shape
    sigma = float(GAMMA)
    gamma = 1.0 / (2.0 * sigma ** 2)
    out = pl.pallas_call(
        functools.partial(_mmd_kernel, gamma=gamma, m=m),
        out_shape=jax.ShapeDtypeStruct((1,), jnp.float32),
        out_specs=pl.BlockSpec(memory_space=pltpu.MemorySpace.SMEM),
    )(source.astype(jnp.float32), target.astype(jnp.float32))
    return out[0]


# ----------------------------------------------------------------------------
# Parameter preparation (all layout work hoisted out of the forward pass)
# ----------------------------------------------------------------------------
def _prep_conv3x3(w_oihw, b):
    cout, cin = w_oihw.shape[0], w_oihw.shape[1]
    cinp, coutp = _cpad(cin), _cpad(cout)
    wt = jnp.transpose(w_oihw, (2, 3, 1, 0)).reshape(9, cin, cout)
    wt = jnp.pad(wt, ((0, 0), (0, cinp - cin),
                      (0, coutp - cout))).astype(ACT_DTYPE)
    b2 = jnp.pad(b, (0, coutp - cout)).reshape(1, coutp).astype(jnp.float32)
    return wt, b2


def _prep_conv3x3_dual(w_oihw, b, c_skip):
    # Split input channels into (skip, upsampled); taps [0:9] act on the skip
    # source, taps [9:18] on the upsampled source.  Bias is added once.
    wt_s, b2 = _prep_conv3x3(w_oihw[:, :c_skip], b)
    wt_u, _ = _prep_conv3x3(w_oihw[:, c_skip:], jnp.zeros_like(b))
    return jnp.concatenate([wt_s, wt_u], axis=0), b2


def _prep_deconv(w_iohw, b):
    cin, cout = w_iohw.shape[0], w_iohw.shape[1]
    cinp, coutp = _cpad(cin), _cpad(cout)
    wt = jnp.transpose(w_iohw, (2, 3, 0, 1))                 # (2, 2, cin, cout)
    wt = jnp.pad(wt, ((0, 0), (0, 0), (0, cinp - cin), (0, coutp - cout)))
    w2 = jnp.transpose(wt, (2, 0, 1, 3)).reshape(cinp, 4 * coutp).astype(ACT_DTYPE)
    b4 = jnp.tile(jnp.pad(b, (0, coutp - cout)), 4)
    b4 = b4.reshape(1, 4 * coutp).astype(jnp.float32)
    return w2, b4


def _prep_conv1x1(w_oihw, b):
    cout, cin = w_oihw.shape[0], w_oihw.shape[1]
    cinp, coutp = _cpad(cin), _cpad(cout)
    w2 = jnp.pad(w_oihw.reshape(cout, cin).T,
                 ((0, cinp - cin), (0, coutp - cout))).astype(ACT_DTYPE)
    b2 = jnp.pad(b, (0, coutp - cout)).reshape(1, coutp).astype(jnp.float32)
    return w2, b2


def init_params(key, in_channels, out_channels, feature_maps, levels):
    keys = iter(jax.random.split(key, 8 * levels + 16))

    def raw_conv(cout, cin, k):
        kw, kb = next(keys), next(keys)
        scale = 1.0 / math.sqrt(cin * k * k)
        w = jax.random.normal(kw, (cout, cin, k, k), jnp.float32) * scale
        bb = jax.random.normal(kb, (cout,), jnp.float32) * scale
        return w, bb

    def raw_deconv(cin, cout):
        kw, kb = next(keys), next(keys)
        scale = 1.0 / math.sqrt(cin * 4)
        w = jax.random.normal(kw, (cin, cout, 2, 2), jnp.float32) * scale
        bb = jax.random.normal(kb, (cout,), jnp.float32) * scale
        return w, bb

    enc = []
    cin = in_channels
    for i in range(levels):
        cout = (2 ** i) * feature_maps
        w1, b1 = raw_conv(cout, cin, 3)
        w2, b2 = raw_conv(cout, cout, 3)
        enc.append({"conv1": _prep_conv3x3(w1, b1),
                    "conv2": _prep_conv3x3(w2, b2),
                    "cout": cout})
        cin = cout

    cc = (2 ** levels) * feature_maps
    cw1, cb1 = raw_conv(cc, (2 ** (levels - 1)) * feature_maps, 3)
    cw2, cb2 = raw_conv(cc, cc, 3)
    center = {"conv1": _prep_conv3x3(cw1, cb1),
              "conv2": _prep_conv3x3(cw2, cb2),
              "cout": cc}

    dec = []
    for i in range(levels):
        cin_d = (2 ** (levels - i)) * feature_maps
        cout_d = (2 ** (levels - i - 1)) * feature_maps
        wu, bu = raw_deconv(cin_d, cout_d)
        w1, b1 = raw_conv(cout_d, cin_d, 3)   # input = concat(skip, up)
        w2, b2 = raw_conv(cout_d, cout_d, 3)
        dec.append({"up": _prep_deconv(wu, bu),
                    "conv1": _prep_conv3x3_dual(w1, b1, c_skip=cout_d),
                    "conv2": _prep_conv3x3(w2, b2),
                    "cout": cout_d})

    wo, bo = raw_conv(out_channels, feature_maps, 1)
    return {
        "enc": enc, "center": center, "dec": dec,
        "out": {"conv": _prep_conv1x1(wo, bo), "cout": out_channels},
        "levels": levels, "in_channels": in_channels,
    }


# ----------------------------------------------------------------------------
# Forward pass (mirrors UNet_MMD.forward, group_norm=False)
# ----------------------------------------------------------------------------
def unet_mmd_forward(params, x_nchw):
    """Returns (features, segmentation_outputs) exactly like UNet_MMD.forward."""
    levels = params["levels"]
    x = jnp.transpose(x_nchw, (0, 2, 3, 1)).astype(ACT_DTYPE)   # NCHW -> NHWC
    cin = x.shape[-1]
    x = jnp.pad(x, ((0, 0), (0, 0), (0, 0), (0, _cpad(cin) - cin)))

    # ---------------- encoder ----------------
    enc_outs, enc_real = [], []
    out = x
    for i in range(levels):
        L = params["enc"][i]
        out = conv3x3([out], *L["conv1"], relu=True)
        out = conv3x3([out], *L["conv2"], relu=True)
        enc_outs.append(out)
        enc_real.append(L["cout"])
        out = maxpool2x2(out)
    C = params["center"]
    out = conv3x3([out], *C["conv1"], relu=True)
    encoded = conv3x3([out], *C["conv2"], relu=True)

    # ---------------- decoder (fused skip + upsample convs) ----------------
    # UNetDecoder2D reverses encoder_outputs in place before use; the features
    # list below reflects that (deepest encoder output first).
    skips = enc_outs[::-1]
    skips_real = enc_real[::-1]
    dec_outs, dec_real = [], []
    out = encoded
    for i in range(levels):
        L = params["dec"][i]
        up = conv_transpose2x2(out, *L["up"])
        # cat([encoder, up], channel) folded into one dual-source conv kernel.
        out = conv3x3([skips[i], up], *L["conv1"], relu=True)
        out = conv3x3([out], *L["conv2"], relu=True)
        dec_outs.append(out)
        dec_real.append(L["cout"])
    seg = conv1x1(out, *params["out"]["conv"])

    def finish(t, c_real):   # drop channel padding, back to NCHW f32
        return jnp.transpose(t[..., :c_real], (0, 3, 1, 2)).astype(jnp.float32)

    features = ([finish(t, c) for t, c in zip(skips, skips_real)]
                + [finish(encoded, C["cout"])]
                + [finish(t, c) for t, c in zip(dec_outs, dec_real)])
    return features, finish(seg, params["out"]["cout"])


# ----------------------------------------------------------------------------
if __name__ == "__main__":
    key = jax.random.PRNGKey(0)
    pkey, xkey = jax.random.split(key)

    in_channels, out_channels, feature_maps, levels = 1, 2, 4, 2
    params = init_params(pkey, in_channels, out_channels, feature_maps, levels)

    x = jax.random.normal(xkey, (2, in_channels, 16, 16), jnp.float32)

    fwd = jax.jit(functools.partial(unet_mmd_forward, params))
    features, seg = fwd(x)
    jax.block_until_ready((features, seg))

    # Per-channel MMD loss used in train_epoch, on the first feature map
    # (f[:, s, :, :].view(B, H*W) for two channels), computed in Pallas.
    f = features[0]
    B, C, H, W = f.shape
    src = f[:, 0, :, :].reshape(B, H * W)
    tar = f[:, 1 % C, :, :].reshape(B, H * W)
    loss_mmd = jax.block_until_ready(mmd_pallas(src, tar))

    assert seg.shape == (2, out_channels, 16, 16)
    assert len(features) == 2 * levels + 1
    print("KERNEL_OK")
</pallas_src>

<mosaic_0001>
module attributes {stable_mosaic.version = 11 : i64} {
  func.func @_conv3x3_kernel(%arg0: i32, %arg1: i32, %arg2: memref<1x328x128xf32, #tpu.memory_space<vmem>>, %arg3: memref<9x128x128xbf16, #tpu.memory_space<vmem>>, %arg4: memref<1x128xf32, #tpu.memory_space<vmem>>, %arg5: memref<1x288x128xbf16, #tpu.memory_space<vmem>>) attributes {dimension_semantics = [#tpu.dimension_semantics<parallel>, #tpu.dimension_semantics<parallel>], iteration_bounds = array<i64: 2, 1>, scalar_prefetch = 0 : i64, scratch_operands = 0 : i64, tpu.core_type = #tpu.core_type<tc>, window_params = [{transform_indices = @transform_0, window_bounds = array<i64: 1, 328, 128>}, {transform_indices = @transform_1, window_bounds = array<i64: 9, 128, 128>}, {transform_indices = @transform_2, window_bounds = array<i64: 1, 128>}, {transform_indices = @transform_3, window_bounds = array<i64: 1, 288, 128>}]} {
    %c0 = arith.constant 0 : index
    %c0_0 = arith.constant 0 : index
    %0 = vector.load %arg4[%c0, %c0_0] : memref<1x128xf32, #tpu.memory_space<vmem>>, vector<1x128xf32>
    %1 = vector.shape_cast %0 : vector<1x128xf32> to vector<1x128xf32>
    %2 = vector.broadcast %1 : vector<1x128xf32> to vector<288x128xf32>
    %c0_1 = arith.constant 0 : index
    %c0_2 = arith.constant 0 : index
    %c0_3 = arith.constant 0 : index
    %3 = vector.load %arg2[%c0_1, %c0_2, %c0_3] : memref<1x328x128xf32, #tpu.memory_space<vmem>>, vector<1x288x128xf32>
    %4 = vector.shape_cast %3 : vector<1x288x128xf32> to vector<288x128xf32>
    %5 = arith.truncf %4 : vector<288x128xf32> to vector<288x128xbf16>
    %c0_4 = arith.constant 0 : index
    %c0_5 = arith.constant 0 : index
    %c0_6 = arith.constant 0 : index
    %6 = vector.load %arg3[%c0_4, %c0_5, %c0_6] : memref<9x128x128xbf16, #tpu.memory_space<vmem>>, vector<1x128x128xbf16>
    %7 = vector.shape_cast %6 : vector<1x128x128xbf16> to vector<128x128xbf16>
    %cst = arith.constant dense<0.000000e+00> : vector<288x128xf32>
    %8 = tpu.matmul %5, %7, %cst {dimension_numbers = #tpu.dot_dimension_numbers<[1], [0], [0], [1], [0, 0, 1, 1], [], []>} : vector<288x128xbf16>, vector<128x128xbf16>, vector<288x128xf32> -> vector<288x128xf32>
    %9 = arith.addf %2, %8 : vector<288x128xf32>
    %c0_7 = arith.constant 0 : index
    %c1 = arith.constant 1 : index
    %c0_8 = arith.constant 0 : index
    %10 = vector.load %arg2[%c0_7, %c1, %c0_8] : memref<1x328x128xf32, #tpu.memory_space<vmem>>, vector<1x288x128xf32>
    %11 = vector.shape_cast %10 : vector<1x288x128xf32> to vector<288x128xf32>
    %12 = arith.truncf %11 : vector<288x128xf32> to vector<288x128xbf16>
    %c1_9 = arith.constant 1 : index
    %c0_10 = arith.constant 0 : index
    %c0_11 = arith.constant 0 : index
    %13 = vector.load %arg3[%c1_9, %c0_10, %c0_11] : memref<9x128x128xbf16, #tpu.memory_space<vmem>>, vector<1x128x128xbf16>
    %14 = vector.shape_cast %13 : vector<1x128x128xbf16> to vector<128x128xbf16>
    %cst_12 = arith.constant dense<0.000000e+00> : vector<288x128xf32>
    %15 = tpu.matmul %12, %14, %cst_12 {dimension_numbers = #tpu.dot_dimension_numbers<[1], [0], [0], [1], [0, 0, 1, 1], [], []>} : vector<288x128xbf16>, vector<128x128xbf16>, vector<288x128xf32> -> vector<288x128xf32>
    %16 = arith.addf %9, %15 : vector<288x128xf32>
    %c0_13 = arith.constant 0 : index
    %c2 = arith.constant 2 : index
    %c0_14 = arith.constant 0 : index
    %17 = vector.load %arg2[%c0_13, %c2, %c0_14] : memref<1x328x128xf32, #tpu.memory_space<vmem>>, vector<1x288x128xf32>
    %18 = vector.shape_cast %17 : vector<1x288x128xf32> to vector<288x128xf32>
    %19 = arith.truncf %18 : vector<288x128xf32> to vector<288x128xbf16>
    %c2_15 = arith.constant 2 : index
    %c0_16 = arith.constant 0 : index
    %c0_17 = arith.constant 0 : index
    %20 = vector.load %arg3[%c2_15, %c0_16, %c0_17] : memref<9x128x128xbf16, #tpu.memory_space<vmem>>, vector<1x128x128xbf16>
    %21 = vector.shape_cast %20 : vector<1x128x128xbf16> to vector<128x128xbf16>
    %cst_18 = arith.constant dense<0.000000e+00> : vector<288x128xf32>
    %22 = tpu.matmul %19, %21, %cst_18 {dimension_numbers = #tpu.dot_dimension_numbers<[1], [0], [0], [1], [0, 0, 1, 1], [], []>} : vector<288x128xbf16>, vector<128x128xbf16>, vector<288x128xf32> -> vector<288x128xf32>
    %23 = arith.addf %16, %22 : vector<288x128xf32>
    %c0_19 = arith.constant 0 : index
    %c18 = arith.constant 18 : index
    %c0_20 = arith.constant 0 : index
    %24 = vector.load %arg2[%c0_19, %c18, %c0_20] : memref<1x328x128xf32, #tpu.memory_space<vmem>>, vector<1x288x128xf32>
    %25 = vector.shape_cast %24 : vector<1x288x128xf32> to vector<288x128xf32>
    %26 = arith.truncf %25 : vector<288x128xf32> to vector<288x128xbf16>
    %c3 = arith.constant 3 : index
    %c0_21 = arith.constant 0 : index
    %c0_22 = arith.constant 0 : index
    %27 = vector.load %arg3[%c3, %c0_21, %c0_22] : memref<9x128x128xbf16, #tpu.memory_space<vmem>>, vector<1x128x128xbf16>
    %28 = vector.shape_cast %27 : vector<1x128x128xbf16> to vector<128x128xbf16>
    %cst_23 = arith.constant dense<0.000000e+00> : vector<288x128xf32>
    %29 = tpu.matmul %26, %28, %cst_23 {dimension_numbers = #tpu.dot_dimension_numbers<[1], [0], [0], [1], [0, 0, 1, 1], [], []>} : vector<288x128xbf16>, vector<128x128xbf16>, vector<288x128xf32> -> vector<288x128xf32>
    %30 = arith.addf %23, %29 : vector<288x128xf32>
    %c0_24 = arith.constant 0 : index
    %c19 = arith.constant 19 : index
    %c0_25 = arith.constant 0 : index
    %31 = vector.load %arg2[%c0_24, %c19, %c0_25] : memref<1x328x128xf32, #tpu.memory_space<vmem>>, vector<1x288x128xf32>
    %32 = vector.shape_cast %31 : vector<1x288x128xf32> to vector<288x128xf32>
    %33 = arith.truncf %32 : vector<288x128xf32> to vector<288x128xbf16>
    %c4 = arith.constant 4 : index
    %c0_26 = arith.constant 0 : index
    %c0_27 = arith.constant 0 : index
    %34 = vector.load %arg3[%c4, %c0_26, %c0_27] : memref<9x128x128xbf16, #tpu.memory_space<vmem>>, vector<1x128x128xbf16>
    %35 = vector.shape_cast %34 : vector<1x128x128xbf16> to vector<128x128xbf16>
    %cst_28 = arith.constant dense<0.000000e+00> : vector<288x128xf32>
    %36 = tpu.matmul %33, %35, %cst_28 {dimension_numbers = #tpu.dot_dimension_numbers<[1], [0], [0], [1], [0, 0, 1, 1], [], []>} : vector<288x128xbf16>, vector<128x128xbf16>, vector<288x128xf32> -> vector<288x128xf32>
    %37 = arith.addf %30, %36 : vector<288x128xf32>
    %c0_29 = arith.constant 0 : index
    %c20 = arith.constant 20 : index
    %c0_30 = arith.constant 0 : index
    %38 = vector.load %arg2[%c0_29, %c20, %c0_30] : memref<1x328x128xf32, #tpu.memory_space<vmem>>, vector<1x288x128xf32>
    %39 = vector.shape_cast %38 : vector<1x288x128xf32> to vector<288x128xf32>
    %40 = arith.truncf %39 : vector<288x128xf32> to vector<288x128xbf16>
    %c5 = arith.constant 5 : index
    %c0_31 = arith.constant 0 : index
    %c0_32 = arith.constant 0 : index
    %41 = vector.load %arg3[%c5, %c0_31, %c0_32] : memref<9x128x128xbf16, #tpu.memory_space<vmem>>, vector<1x128x128xbf16>
    %42 = vector.shape_cast %41 : vector<1x128x128xbf16> to vector<128x128xbf16>
    %cst_33 = arith.constant dense<0.000000e+00> : vector<288x128xf32>
    %43 = tpu.matmul %40, %42, %cst_33 {dimension_numbers = #tpu.dot_dimension_numbers<[1], [0], [0], [1], [0, 0, 1, 1], [], []>} : vector<288x128xbf16>, vector<128x128xbf16>, vector<288x128xf32> -> vector<288x128xf32>
    %44 = arith.addf %37, %43 : vector<288x128xf32>
    %c0_34 = arith.constant 0 : index
    %c36 = arith.constant 36 : index
    %c0_35 = arith.constant 0 : index
    %45 = vector.load %arg2[%c0_34, %c36, %c0_35] : memref<1x328x128xf32, #tpu.memory_space<vmem>>, vector<1x288x128xf32>
    %46 = vector.shape_cast %45 : vector<1x288x128xf32> to vector<288x128xf32>
    %47 = arith.truncf %46 : vector<288x128xf32> to vector<288x128xbf16>
    %c6 = arith.constant 6 : index
    %c0_36 = arith.constant 0 : index
    %c0_37 = arith.constant 0 : index
    %48 = vector.load %arg3[%c6, %c0_36, %c0_37] : memref<9x128x128xbf16, #tpu.memory_space<vmem>>, vector<1x128x128xbf16>
    %49 = vector.shape_cast %48 : vector<1x128x128xbf16> to vector<128x128xbf16>
    %cst_38 = arith.constant dense<0.000000e+00> : vector<288x128xf32>
    %50 = tpu.matmul %47, %49, %cst_38 {dimension_numbers = #tpu.dot_dimension_numbers<[1], [0], [0], [1], [0, 0, 1, 1], [], []>} : vector<288x128xbf16>, vector<128x128xbf16>, vector<288x128xf32> -> vector<288x128xf32>
    %51 = arith.addf %44, %50 : vector<288x128xf32>
    %c0_39 = arith.constant 0 : index
    %c37 = arith.constant 37 : index
    %c0_40 = arith.constant 0 : index
    %52 = vector.load %arg2[%c0_39, %c37, %c0_40] : memref<1x328x128xf32, #tpu.memory_space<vmem>>, vector<1x288x128xf32>
    %53 = vector.shape_cast %52 : vector<1x288x128xf32> to vector<288x128xf32>
    %54 = arith.truncf %53 : vector<288x128xf32> to vector<288x128xbf16>
    %c7 = arith.constant 7 : index
    %c0_41 = arith.constant 0 : index
    %c0_42 = arith.constant 0 : index
    %55 = vector.load %arg3[%c7, %c0_41, %c0_42] : memref<9x128x128xbf16, #tpu.memory_space<vmem>>, vector<1x128x128xbf16>
    %56 = vector.shape_cast %55 : vector<1x128x128xbf16> to vector<128x128xbf16>
    %cst_43 = arith.constant dense<0.000000e+00> : vector<288x128xf32>
    %57 = tpu.matmul %54, %56, %cst_43 {dimension_numbers = #tpu.dot_dimension_numbers<[1], [0], [0], [1], [0, 0, 1, 1], [], []>} : vector<288x128xbf16>, vector<128x128xbf16>, vector<288x128xf32> -> vector<288x128xf32>
    %58 = arith.addf %51, %57 : vector<288x128xf32>
    %c0_44 = arith.constant 0 : index
    %c38 = arith.constant 38 : index
    %c0_45 = arith.constant 0 : index
    %59 = vector.load %arg2[%c0_44, %c38, %c0_45] : memref<1x328x128xf32, #tpu.memory_space<vmem>>, vector<1x288x128xf32>
    %60 = vector.shape_cast %59 : vector<1x288x128xf32> to vector<288x128xf32>
    %61 = arith.truncf %60 : vector<288x128xf32> to vector<288x128xbf16>
    %c8 = arith.constant 8 : index
    %c0_46 = arith.constant 0 : index
    %c0_47 = arith.constant 0 : index
    %62 = vector.load %arg3[%c8, %c0_46, %c0_47] : memref<9x128x128xbf16, #tpu.memory_space<vmem>>, vector<1x128x128xbf16>
    %63 = vector.shape_cast %62 : vector<1x128x128xbf16> to vector<128x128xbf16>
    %cst_48 = arith.constant dense<0.000000e+00> : vector<288x128xf32>
    %64 = tpu.matmul %61, %63, %cst_48 {dimension_numbers = #tpu.dot_dimension_numbers<[1], [0], [0], [1], [0, 0, 1, 1], [], []>} : vector<288x128xbf16>, vector<128x128xbf16>, vector<288x128xf32> -> vector<288x128xf32>
    %65 = arith.addf %58, %64 : vector<288x128xf32>
    %cst_49 = arith.constant 0.000000e+00 : f32
    %66 = vector.broadcast %cst_49 : f32 to vector<288x128xf32>
    %67 = arith.maximumf %65, %66 : vector<288x128xf32>
    %68 = arith.truncf %67 : vector<288x128xf32> to vector<288x128xbf16>
    %c0_50 = arith.constant 0 : index
    %c0_51 = arith.constant 0 : index
    %c0_52 = arith.constant 0 : index
    %69 = vector.load %arg5[%c0_50, %c0_51, %c0_52] : memref<1x288x128xbf16, #tpu.memory_space<vmem>>, vector<1x288x128xbf16>
    %70 = vector.shape_cast %69 : vector<1x288x128xbf16> to vector<288x128xbf16>
    %71 = vector.shape_cast %68 : vector<288x128xbf16> to vector<1x288x128xbf16>
    tpu.vector_store %arg5[%c0_50, %c0_51, %c0_52], %71 {strides = array<i32>} : memref<1x288x128xbf16, #tpu.memory_space<vmem>>, vector<1x288x128xbf16>,
    return
  }
  func.func @transform_0(%arg0: i32, %arg1: i32) -> (i32, i32, i32) {
    %c0_i32 = arith.constant 0 : i32
    %c0_i32_0 = arith.constant 0 : i32
    %c0_i32_1 = arith.constant 0 : i32
    return %arg0, %c0_i32, %c0_i32_0 : i32, i32, i32
  }
  func.func @transform_1(%arg0: i32, %arg1: i32) -> (i32, i32, i32) {
    %c0_i32 = arith.constant 0 : i32
    %c0_i32_0 = arith.constant 0 : i32
    %c0_i32_1 = arith.constant 0 : i32
    return %c0_i32, %c0_i32_0, %arg1 : i32, i32, i32
  }
  func.func @transform_2(%arg0: i32, %arg1: i32) -> (i32, i32) {
    %c0_i32 = arith.constant 0 : i32
    %c0_i32_0 = arith.constant 0 : i32
    return %c0_i32, %arg1 : i32, i32
  }
  func.func @transform_3(%arg0: i32, %arg1: i32) -> (i32, i32, i32) {
    %c0_i32 = arith.constant 0 : i32
    %c0_i32_0 = arith.constant 0 : i32
    return %arg0, %c0_i32, %arg1 : i32, i32, i32
  }
}

module attributes {stable_mosaic.version = 11 : i64} {
  func.func @_max4_kernel(%arg0: i32, %arg1: memref<128x128xbf16, #tpu.memory_space<vmem>>, %arg2: memref<128x128xbf16, #tpu.memory_space<vmem>>, %arg3: memref<128x128xbf16, #tpu.memory_space<vmem>>, %arg4: memref<128x128xbf16, #tpu.memory_space<vmem>>, %arg5: memref<128x128xbf16, #tpu.memory_space<vmem>>) attributes {dimension_semantics = [#tpu.dimension_semantics<parallel>], iteration_bounds = array<i64: 1>, scalar_prefetch = 0 : i64, scratch_operands = 0 : i64, tpu.core_type = #tpu.core_type<tc>, window_params = [{transform_indices = @transform_0, window_bounds = array<i64: 128, 128>}, {transform_indices = @transform_1, window_bounds = array<i64: 128, 128>}, {transform_indices = @transform_2, window_bounds = array<i64: 128, 128>}, {transform_indices = @transform_3, window_bounds = array<i64: 128, 128>}, {transform_indices = @transform_4, window_bounds = array<i64: 128, 128>}]} {
    %c0 = arith.constant 0 : index
    %c0_0 = arith.constant 0 : index
    %0 = vector.load %arg1[%c0, %c0_0] : memref<128x128xbf16, #tpu.memory_space<vmem>>, vector<128x128xbf16>
    %c0_1 = arith.constant 0 : index
    %c0_2 = arith.constant 0 : index
    %1 = vector.load %arg2[%c0_1, %c0_2] : memref<128x128xbf16, #tpu.memory_space<vmem>>, vector<128x128xbf16>
    %2 = arith.maximumf %0, %1 : vector<128x128xbf16>
    %c0_3 = arith.constant 0 : index
    %c0_4 = arith.constant 0 : index
    %3 = vector.load %arg3[%c0_3, %c0_4] : memref<128x128xbf16, #tpu.memory_space<vmem>>, vector<128x128xbf16>
    %c0_5 = arith.constant 0 : index
    %c0_6 = arith.constant 0 : index
    %4 = vector.load %arg4[%c0_5, %c0_6] : memref<128x128xbf16, #tpu.memory_space<vmem>>, vector<128x128xbf16>
    %5 = arith.maximumf %3, %4 : vector<128x128xbf16>
    %6 = arith.maximumf %2, %5 : vector<128x128xbf16>
    %c0_7 = arith.constant 0 : index
    %c0_8 = arith.constant 0 : index
    %7 = vector.load %arg5[%c0_7, %c0_8] : memref<128x128xbf16, #tpu.memory_space<vmem>>, vector<128x128xbf16>
    tpu.vector_store %arg5[%c0_7, %c0_8], %6 {strides = array<i32>} : memref<128x128xbf16, #tpu.memory_space<vmem>>, vector<128x128xbf16>,
    return
  }
  func.func @transform_0(%arg0: i32) -> (i32, i32) {
    %c0_i32 = arith.constant 0 : i32
    %c0_i32_0 = arith.constant 0 : i32
    return %arg0, %c0_i32 : i32, i32
  }
  func.func @transform_1(%arg0: i32) -> (i32, i32) {
    %c0_i32 = arith.constant 0 : i32
    %c0_i32_0 = arith.constant 0 : i32
    return %arg0, %c0_i32 : i32, i32
  }
  func.func @transform_2(%arg0: i32) -> (i32, i32) {
    %c0_i32 = arith.constant 0 : i32
    %c0_i32_0 = arith.constant 0 : i32
    return %arg0, %c0_i32 : i32, i32
  }
  func.func @transform_3(%arg0: i32) -> (i32, i32) {
    %c0_i32 = arith.constant 0 : i32
    %c0_i32_0 = arith.constant 0 : i32
    return %arg0, %c0_i32 : i32, i32
  }
  func.func @transform_4(%arg0: i32) -> (i32, i32) {
    %c0_i32 = arith.constant 0 : i32
    %c0_i32_0 = arith.constant 0 : i32
    return %arg0, %c0_i32 : i32, i32
  }
}

module attributes {stable_mosaic.version = 11 : i64} {
  func.func @_conv3x3_kernel(%arg0: i32, %arg1: i32, %arg2: memref<1x104x128xf32, #tpu.memory_space<vmem>>, %arg3: memref<9x128x128xbf16, #tpu.memory_space<vmem>>, %arg4: memref<1x128xf32, #tpu.memory_space<vmem>>, %arg5: memref<1x80x128xbf16, #tpu.memory_space<vmem>>) attributes {dimension_semantics = [#tpu.dimension_semantics<parallel>, #tpu.dimension_semantics<parallel>], iteration_bounds = array<i64: 2, 1>, scalar_prefetch = 0 : i64, scratch_operands = 0 : i64, tpu.core_type = #tpu.core_type<tc>, window_params = [{transform_indices = @transform_0, window_bounds = array<i64: 1, 104, 128>}, {transform_indices = @transform_1, window_bounds = array<i64: 9, 128, 128>}, {transform_indices = @transform_2, window_bounds = array<i64: 1, 128>}, {transform_indices = @transform_3, window_bounds = array<i64: 1, 80, 128>}]} {
    %c0 = arith.constant 0 : index
    %c0_0 = arith.constant 0 : index
    %0 = vector.load %arg4[%c0, %c0_0] : memref<1x128xf32, #tpu.memory_space<vmem>>, vector<1x128xf32>
    %1 = vector.shape_cast %0 : vector<1x128xf32> to vector<1x128xf32>
    %2 = vector.broadcast %1 : vector<1x128xf32> to vector<80x128xf32>
    %c0_1 = arith.constant 0 : index
    %c0_2 = arith.constant 0 : index
    %c0_3 = arith.constant 0 : index
    %3 = vector.load %arg2[%c0_1, %c0_2, %c0_3] : memref<1x104x128xf32, #tpu.memory_space<vmem>>, vector<1x80x128xf32>
    %4 = vector.shape_cast %3 : vector<1x80x128xf32> to vector<80x128xf32>
    %5 = arith.truncf %4 : vector<80x128xf32> to vector<80x128xbf16>
    %c0_4 = arith.constant 0 : index
    %c0_5 = arith.constant 0 : index
    %c0_6 = arith.constant 0 : index
    %6 = vector.load %arg3[%c0_4, %c0_5, %c0_6] : memref<9x128x128xbf16, #tpu.memory_space<vmem>>, vector<1x128x128xbf16>
    %7 = vector.shape_cast %6 : vector<1x128x128xbf16> to vector<128x128xbf16>
    %cst = arith.constant dense<0.000000e+00> : vector<80x128xf32>
    %8 = tpu.matmul %5, %7, %cst {dimension_numbers = #tpu.dot_dimension_numbers<[1], [0], [0], [1], [0, 0, 1, 1], [], []>} : vector<80x128xbf16>, vector<128x128xbf16>, vector<80x128xf32> -> vector<80x128xf32>
    %9 = arith.addf %2, %8 : vector<80x128xf32>
    %c0_7 = arith.constant 0 : index
    %c1 = arith.constant 1 : index
    %c0_8 = arith.constant 0 : index
    %10 = vector.load %arg2[%c0_7, %c1, %c0_8] : memref<1x104x128xf32, #tpu.memory_space<vmem>>, vector<1x80x128xf32>
    %11 = vector.shape_cast %10 : vector<1x80x128xf32> to vector<80x128xf32>
    %12 = arith.truncf %11 : vector<80x128xf32> to vector<80x128xbf16>
    %c1_9 = arith.constant 1 : index
    %c0_10 = arith.constant 0 : index
    %c0_11 = arith.constant 0 : index
    %13 = vector.load %arg3[%c1_9, %c0_10, %c0_11] : memref<9x128x128xbf16, #tpu.memory_space<vmem>>, vector<1x128x128xbf16>
    %14 = vector.shape_cast %13 : vector<1x128x128xbf16> to vector<128x128xbf16>
    %cst_12 = arith.constant dense<0.000000e+00> : vector<80x128xf32>
    %15 = tpu.matmul %12, %14, %cst_12 {dimension_numbers = #tpu.dot_dimension_numbers<[1], [0], [0], [1], [0, 0, 1, 1], [], []>} : vector<80x128xbf16>, vector<128x128xbf16>, vector<80x128xf32> -> vector<80x128xf32>
    %16 = arith.addf %9, %15 : vector<80x128xf32>
    %c0_13 = arith.constant 0 : index
    %c2 = arith.constant 2 : index
    %c0_14 = arith.constant 0 : index
    %17 = vector.load %arg2[%c0_13, %c2, %c0_14] : memref<1x104x128xf32, #tpu.memory_space<vmem>>, vector<1x80x128xf32>
    %18 = vector.shape_cast %17 : vector<1x80x128xf32> to vector<80x128xf32>
    %19 = arith.truncf %18 : vector<80x128xf32> to vector<80x128xbf16>
    %c2_15 = arith.constant 2 : index
    %c0_16 = arith.constant 0 : index
    %c0_17 = arith.constant 0 : index
    %20 = vector.load %arg3[%c2_15, %c0_16, %c0_17] : memref<9x128x128xbf16, #tpu.memory_space<vmem>>, vector<1x128x128xbf16>
    %21 = vector.shape_cast %20 : vector<1x128x128xbf16> to vector<128x128xbf16>
    %cst_18 = arith.constant dense<0.000000e+00> : vector<80x128xf32>
    %22 = tpu.matmul %19, %21, %cst_18 {dimension_numbers = #tpu.dot_dimension_numbers<[1], [0], [0], [1], [0, 0, 1, 1], [], []>} : vector<80x128xbf16>, vector<128x128xbf16>, vector<80x128xf32> -> vector<80x128xf32>
    %23 = arith.addf %16, %22 : vector<80x128xf32>
    %c0_19 = arith.constant 0 : index
    %c10 = arith.constant 10 : index
    %c0_20 = arith.constant 0 : index
    %24 = vector.load %arg2[%c0_19, %c10, %c0_20] : memref<1x104x128xf32, #tpu.memory_space<vmem>>, vector<1x80x128xf32>
    %25 = vector.shape_cast %24 : vector<1x80x128xf32> to vector<80x128xf32>
    %26 = arith.truncf %25 : vector<80x128xf32> to vector<80x128xbf16>
    %c3 = arith.constant 3 : index
    %c0_21 = arith.constant 0 : index
    %c0_22 = arith.constant 0 : index
    %27 = vector.load %arg3[%c3, %c0_21, %c0_22] : memref<9x128x128xbf16, #tpu.memory_space<vmem>>, vector<1x128x128xbf16>
    %28 = vector.shape_cast %27 : vector<1x128x128xbf16> to vector<128x128xbf16>
    %cst_23 = arith.constant dense<0.000000e+00> : vector<80x128xf32>
    %29 = tpu.matmul %26, %28, %cst_23 {dimension_numbers = #tpu.dot_dimension_numbers<[1], [0], [0], [1], [0, 0, 1, 1], [], []>} : vector<80x128xbf16>, vector<128x128xbf16>, vector<80x128xf32> -> vector<80x128xf32>
    %30 = arith.addf %23, %29 : vector<80x128xf32>
    %c0_24 = arith.constant 0 : index
    %c11 = arith.constant 11 : index
    %c0_25 = arith.constant 0 : index
    %31 = vector.load %arg2[%c0_24, %c11, %c0_25] : memref<1x104x128xf32, #tpu.memory_space<vmem>>, vector<1x80x128xf32>
    %32 = vector.shape_cast %31 : vector<1x80x128xf32> to vector<80x128xf32>
    %33 = arith.truncf %32 : vector<80x128xf32> to vector<80x128xbf16>
    %c4 = arith.constant 4 : index
    %c0_26 = arith.constant 0 : index
    %c0_27 = arith.constant 0 : index
    %34 = vector.load %arg3[%c4, %c0_26, %c0_27] : memref<9x128x128xbf16, #tpu.memory_space<vmem>>, vector<1x128x128xbf16>
    %35 = vector.shape_cast %34 : vector<1x128x128xbf16> to vector<128x128xbf16>
    %cst_28 = arith.constant dense<0.000000e+00> : vector<80x128xf32>
    %36 = tpu.matmul %33, %35, %cst_28 {dimension_numbers = #tpu.dot_dimension_numbers<[1], [0], [0], [1], [0, 0, 1, 1], [], []>} : vector<80x128xbf16>, vector<128x128xbf16>, vector<80x128xf32> -> vector<80x128xf32>
    %37 = arith.addf %30, %36 : vector<80x128xf32>
    %c0_29 = arith.constant 0 : index
    %c12 = arith.constant 12 : index
    %c0_30 = arith.constant 0 : index
    %38 = vector.load %arg2[%c0_29, %c12, %c0_30] : memref<1x104x128xf32, #tpu.memory_space<vmem>>, vector<1x80x128xf32>
    %39 = vector.shape_cast %38 : vector<1x80x128xf32> to vector<80x128xf32>
    %40 = arith.truncf %39 : vector<80x128xf32> to vector<80x128xbf16>
    %c5 = arith.constant 5 : index
    %c0_31 = arith.constant 0 : index
    %c0_32 = arith.constant 0 : index
    %41 = vector.load %arg3[%c5, %c0_31, %c0_32] : memref<9x128x128xbf16, #tpu.memory_space<vmem>>, vector<1x128x128xbf16>
    %42 = vector.shape_cast %41 : vector<1x128x128xbf16> to vector<128x128xbf16>
    %cst_33 = arith.constant dense<0.000000e+00> : vector<80x128xf32>
    %43 = tpu.matmul %40, %42, %cst_33 {dimension_numbers = #tpu.dot_dimension_numbers<[1], [0], [0], [1], [0, 0, 1, 1], [], []>} : vector<80x128xbf16>, vector<128x128xbf16>, vector<80x128xf32> -> vector<80x128xf32>
    %44 = arith.addf %37, %43 : vector<80x128xf32>
    %c0_34 = arith.constant 0 : index
    %c20 = arith.constant 20 : index
    %c0_35 = arith.constant 0 : index
    %45 = vector.load %arg2[%c0_34, %c20, %c0_35] : memref<1x104x128xf32, #tpu.memory_space<vmem>>, vector<1x80x128xf32>
    %46 = vector.shape_cast %45 : vector<1x80x128xf32> to vector<80x128xf32>
    %47 = arith.truncf %46 : vector<80x128xf32> to vector<80x128xbf16>
    %c6 = arith.constant 6 : index
    %c0_36 = arith.constant 0 : index
    %c0_37 = arith.constant 0 : index
    %48 = vector.load %arg3[%c6, %c0_36, %c0_37] : memref<9x128x128xbf16, #tpu.memory_space<vmem>>, vector<1x128x128xbf16>
    %49 = vector.shape_cast %48 : vector<1x128x128xbf16> to vector<128x128xbf16>
    %cst_38 = arith.constant dense<0.000000e+00> : vector<80x128xf32>
    %50 = tpu.matmul %47, %49, %cst_38 {dimension_numbers = #tpu.dot_dimension_numbers<[1], [0], [0], [1], [0, 0, 1, 1], [], []>} : vector<80x128xbf16>, vector<128x128xbf16>, vector<80x128xf32> -> vector<80x128xf32>
    %51 = arith.addf %44, %50 : vector<80x128xf32>
    %c0_39 = arith.constant 0 : index
    %c21 = arith.constant 21 : index
    %c0_40 = arith.constant 0 : index
    %52 = vector.load %arg2[%c0_39, %c21, %c0_40] : memref<1x104x128xf32, #tpu.memory_space<vmem>>, vector<1x80x128xf32>
    %53 = vector.shape_cast %52 : vector<1x80x128xf32> to vector<80x128xf32>
    %54 = arith.truncf %53 : vector<80x128xf32> to vector<80x128xbf16>
    %c7 = arith.constant 7 : index
    %c0_41 = arith.constant 0 : index
    %c0_42 = arith.constant 0 : index
    %55 = vector.load %arg3[%c7, %c0_41, %c0_42] : memref<9x128x128xbf16, #tpu.memory_space<vmem>>, vector<1x128x128xbf16>
    %56 = vector.shape_cast %55 : vector<1x128x128xbf16> to vector<128x128xbf16>
    %cst_43 = arith.constant dense<0.000000e+00> : vector<80x128xf32>
    %57 = tpu.matmul %54, %56, %cst_43 {dimension_numbers = #tpu.dot_dimension_numbers<[1], [0], [0], [1], [0, 0, 1, 1], [], []>} : vector<80x128xbf16>, vector<128x128xbf16>, vector<80x128xf32> -> vector<80x128xf32>
    %58 = arith.addf %51, %57 : vector<80x128xf32>
    %c0_44 = arith.constant 0 : index
    %c22 = arith.constant 22 : index
    %c0_45 = arith.constant 0 : index
    %59 = vector.load %arg2[%c0_44, %c22, %c0_45] : memref<1x104x128xf32, #tpu.memory_space<vmem>>, vector<1x80x128xf32>
    %60 = vector.shape_cast %59 : vector<1x80x128xf32> to vector<80x128xf32>
    %61 = arith.truncf %60 : vector<80x128xf32> to vector<80x128xbf16>
    %c8 = arith.constant 8 : index
    %c0_46 = arith.constant 0 : index
    %c0_47 = arith.constant 0 : index
    %62 = vector.load %arg3[%c8, %c0_46, %c0_47] : memref<9x128x128xbf16, #tpu.memory_space<vmem>>, vector<1x128x128xbf16>
    %63 = vector.shape_cast %62 : vector<1x128x128xbf16> to vector<128x128xbf16>
    %cst_48 = arith.constant dense<0.000000e+00> : vector<80x128xf32>
    %64 = tpu.matmul %61, %63, %cst_48 {dimension_numbers = #tpu.dot_dimension_numbers<[1], [0], [0], [1], [0, 0, 1, 1], [], []>} : vector<80x128xbf16>, vector<128x128xbf16>, vector<80x128xf32> -> vector<80x128xf32>
    %65 = arith.addf %58, %64 : vector<80x128xf32>
    %cst_49 = arith.constant 0.000000e+00 : f32
    %66 = vector.broadcast %cst_49 : f32 to vector<80x128xf32>
    %67 = arith.maximumf %65, %66 : vector<80x128xf32>
    %68 = arith.truncf %67 : vector<80x128xf32> to vector<80x128xbf16>
    %c0_50 = arith.constant 0 : index
    %c0_51 = arith.constant 0 : index
    %c0_52 = arith.constant 0 : index
    %69 = vector.load %arg5[%c0_50, %c0_51, %c0_52] : memref<1x80x128xbf16, #tpu.memory_space<vmem>>, vector<1x80x128xbf16>
    %70 = vector.shape_cast %69 : vector<1x80x128xbf16> to vector<80x128xbf16>
    %71 = vector.shape_cast %68 : vector<80x128xbf16> to vector<1x80x128xbf16>
    tpu.vector_store %arg5[%c0_50, %c0_51, %c0_52], %71 {strides = array<i32>} : memref<1x80x128xbf16, #tpu.memory_space<vmem>>, vector<1x80x128xbf16>,
    return
  }
  func.func @transform_0(%arg0: i32, %arg1: i32) -> (i32, i32, i32) {
    %c0_i32 = arith.constant 0 : i32
    %c0_i32_0 = arith.constant 0 : i32
    %c0_i32_1 = arith.constant 0 : i32
    return %arg0, %c0_i32, %c0_i32_0 : i32, i32, i32
  }
  func.func @transform_1(%arg0: i32, %arg1: i32) -> (i32, i32, i32) {
    %c0_i32 = arith.constant 0 : i32
    %c0_i32_0 = arith.constant 0 : i32
    %c0_i32_1 = arith.constant 0 : i32
    return %c0_i32, %c0_i32_0, %arg1 : i32, i32, i32
  }
  func.func @transform_2(%arg0: i32, %arg1: i32) -> (i32, i32) {
    %c0_i32 = arith.constant 0 : i32
    %c0_i32_0 = arith.constant 0 : i32
    return %c0_i32, %arg1 : i32, i32
  }
  func.func @transform_3(%arg0: i32, %arg1: i32) -> (i32, i32, i32) {
    %c0_i32 = arith.constant 0 : i32
    %c0_i32_0 = arith.constant 0 : i32
    return %arg0, %c0_i32, %arg1 : i32, i32, i32
  }
}

module attributes {stable_mosaic.version = 11 : i64} {
  func.func @_max4_kernel(%arg0: i32, %arg1: memref<32x128xbf16, #tpu.memory_space<vmem>>, %arg2: memref<32x128xbf16, #tpu.memory_space<vmem>>, %arg3: memref<32x128xbf16, #tpu.memory_space<vmem>>, %arg4: memref<32x128xbf16, #tpu.memory_space<vmem>>, %arg5: memref<32x128xbf16, #tpu.memory_space<vmem>>) attributes {dimension_semantics = [#tpu.dimension_semantics<parallel>], iteration_bounds = array<i64: 1>, scalar_prefetch = 0 : i64, scratch_operands = 0 : i64, tpu.core_type = #tpu.core_type<tc>, window_params = [{transform_indices = @transform_0, window_bounds = array<i64: 32, 128>}, {transform_indices = @transform_1, window_bounds = array<i64: 32, 128>}, {transform_indices = @transform_2, window_bounds = array<i64: 32, 128>}, {transform_indices = @transform_3, window_bounds = array<i64: 32, 128>}, {transform_indices = @transform_4, window_bounds = array<i64: 32, 128>}]} {
    %c0 = arith.constant 0 : index
    %c0_0 = arith.constant 0 : index
    %0 = vector.load %arg1[%c0, %c0_0] : memref<32x128xbf16, #tpu.memory_space<vmem>>, vector<32x128xbf16>
    %c0_1 = arith.constant 0 : index
    %c0_2 = arith.constant 0 : index
    %1 = vector.load %arg2[%c0_1, %c0_2] : memref<32x128xbf16, #tpu.memory_space<vmem>>, vector<32x128xbf16>
    %2 = arith.maximumf %0, %1 : vector<32x128xbf16>
    %c0_3 = arith.constant 0 : index
    %c0_4 = arith.constant 0 : index
    %3 = vector.load %arg3[%c0_3, %c0_4] : memref<32x128xbf16, #tpu.memory_space<vmem>>, vector<32x128xbf16>
    %c0_5 = arith.constant 0 : index
    %c0_6 = arith.constant 0 : index
    %4 = vector.load %arg4[%c0_5, %c0_6] : memref<32x128xbf16, #tpu.memory_space<vmem>>, vector<32x128xbf16>
    %5 = arith.maximumf %3, %4 : vector<32x128xbf16>
    %6 = arith.maximumf %2, %5 : vector<32x128xbf16>
    %c0_7 = arith.constant 0 : index
    %c0_8 = arith.constant 0 : index
    %7 = vector.load %arg5[%c0_7, %c0_8] : memref<32x128xbf16, #tpu.memory_space<vmem>>, vector<32x128xbf16>
    tpu.vector_store %arg5[%c0_7, %c0_8], %6 {strides = array<i32>} : memref<32x128xbf16, #tpu.memory_space<vmem>>, vector<32x128xbf16>,
    return
  }
  func.func @transform_0(%arg0: i32) -> (i32, i32) {
    %c0_i32 = arith.constant 0 : i32
    %c0_i32_0 = arith.constant 0 : i32
    return %arg0, %c0_i32 : i32, i32
  }
  func.func @transform_1(%arg0: i32) -> (i32, i32) {
    %c0_i32 = arith.constant 0 : i32
    %c0_i32_0 = arith.constant 0 : i32
    return %arg0, %c0_i32 : i32, i32
  }
  func.func @transform_2(%arg0: i32) -> (i32, i32) {
    %c0_i32 = arith.constant 0 : i32
    %c0_i32_0 = arith.constant 0 : i32
    return %arg0, %c0_i32 : i32, i32
  }
  func.func @transform_3(%arg0: i32) -> (i32, i32) {
    %c0_i32 = arith.constant 0 : i32
    %c0_i32_0 = arith.constant 0 : i32
    return %arg0, %c0_i32 : i32, i32
  }
  func.func @transform_4(%arg0: i32) -> (i32, i32) {
    %c0_i32 = arith.constant 0 : i32
    %c0_i32_0 = arith.constant 0 : i32
    return %arg0, %c0_i32 : i32, i32
  }
}

module attributes {stable_mosaic.version = 11 : i64} {
  func.func @_conv3x3_kernel(%arg0: i32, %arg1: i32, %arg2: memref<1x40x128xf32, #tpu.memory_space<vmem>>, %arg3: memref<9x128x128xbf16, #tpu.memory_space<vmem>>, %arg4: memref<1x128xf32, #tpu.memory_space<vmem>>, %arg5: memref<1x24x128xbf16, #tpu.memory_space<vmem>>) attributes {dimension_semantics = [#tpu.dimension_semantics<parallel>, #tpu.dimension_semantics<parallel>], iteration_bounds = array<i64: 2, 1>, scalar_prefetch = 0 : i64, scratch_operands = 0 : i64, tpu.core_type = #tpu.core_type<tc>, window_params = [{transform_indices = @transform_0, window_bounds = array<i64: 1, 40, 128>}, {transform_indices = @transform_1, window_bounds = array<i64: 9, 128, 128>}, {transform_indices = @transform_2, window_bounds = array<i64: 1, 128>}, {transform_indices = @transform_3, window_bounds = array<i64: 1, 24, 128>}]} {
    %c0 = arith.constant 0 : index
    %c0_0 = arith.constant 0 : index
    %0 = vector.load %arg4[%c0, %c0_0] : memref<1x128xf32, #tpu.memory_space<vmem>>, vector<1x128xf32>
    %1 = vector.shape_cast %0 : vector<1x128xf32> to vector<1x128xf32>
    %2 = vector.broadcast %1 : vector<1x128xf32> to vector<24x128xf32>
    %c0_1 = arith.constant 0 : index
    %c0_2 = arith.constant 0 : index
    %c0_3 = arith.constant 0 : index
    %3 = vector.load %arg2[%c0_1, %c0_2, %c0_3] : memref<1x40x128xf32, #tpu.memory_space<vmem>>, vector<1x24x128xf32>
    %4 = vector.shape_cast %3 : vector<1x24x128xf32> to vector<24x128xf32>
    %5 = arith.truncf %4 : vector<24x128xf32> to vector<24x128xbf16>
    %c0_4 = arith.constant 0 : index
    %c0_5 = arith.constant 0 : index
    %c0_6 = arith.constant 0 : index
    %6 = vector.load %arg3[%c0_4, %c0_5, %c0_6] : memref<9x128x128xbf16, #tpu.memory_space<vmem>>, vector<1x128x128xbf16>
    %7 = vector.shape_cast %6 : vector<1x128x128xbf16> to vector<128x128xbf16>
    %cst = arith.constant dense<0.000000e+00> : vector<24x128xf32>
    %8 = tpu.matmul %5, %7, %cst {dimension_numbers = #tpu.dot_dimension_numbers<[1], [0], [0], [1], [0, 0, 1, 1], [], []>} : vector<24x128xbf16>, vector<128x128xbf16>, vector<24x128xf32> -> vector<24x128xf32>
    %9 = arith.addf %2, %8 : vector<24x128xf32>
    %c0_7 = arith.constant 0 : index
    %c1 = arith.constant 1 : index
    %c0_8 = arith.constant 0 : index
    %10 = vector.load %arg2[%c0_7, %c1, %c0_8] : memref<1x40x128xf32, #tpu.memory_space<vmem>>, vector<1x24x128xf32>
    %11 = vector.shape_cast %10 : vector<1x24x128xf32> to vector<24x128xf32>
    %12 = arith.truncf %11 : vector<24x128xf32> to vector<24x128xbf16>
    %c1_9 = arith.constant 1 : index
    %c0_10 = arith.constant 0 : index
    %c0_11 = arith.constant 0 : index
    %13 = vector.load %arg3[%c1_9, %c0_10, %c0_11] : memref<9x128x128xbf16, #tpu.memory_space<vmem>>, vector<1x128x128xbf16>
    %14 = vector.shape_cast %13 : vector<1x128x128xbf16> to vector<128x128xbf16>
    %cst_12 = arith.constant dense<0.000000e+00> : vector<24x128xf32>
    %15 = tpu.matmul %12, %14, %cst_12 {dimension_numbers = #tpu.dot_dimension_numbers<[1], [0], [0], [1], [0, 0, 1, 1], [], []>} : vector<24x128xbf16>, vector<128x128xbf16>, vector<24x128xf32> -> vector<24x128xf32>
    %16 = arith.addf %9, %15 : vector<24x128xf32>
    %c0_13 = arith.constant 0 : index
    %c2 = arith.constant 2 : index
    %c0_14 = arith.constant 0 : index
    %17 = vector.load %arg2[%c0_13, %c2, %c0_14] : memref<1x40x128xf32, #tpu.memory_space<vmem>>, vector<1x24x128xf32>
    %18 = vector.shape_cast %17 : vector<1x24x128xf32> to vector<24x128xf32>
    %19 = arith.truncf %18 : vector<24x128xf32> to vector<24x128xbf16>
    %c2_15 = arith.constant 2 : index
    %c0_16 = arith.constant 0 : index
    %c0_17 = arith.constant 0 : index
    %20 = vector.load %arg3[%c2_15, %c0_16, %c0_17] : memref<9x128x128xbf16, #tpu.memory_space<vmem>>, vector<1x128x128xbf16>
    %21 = vector.shape_cast %20 : vector<1x128x128xbf16> to vector<128x128xbf16>
    %cst_18 = arith.constant dense<0.000000e+00> : vector<24x128xf32>
    %22 = tpu.matmul %19, %21, %cst_18 {dimension_numbers = #tpu.dot_dimension_numbers<[1], [0], [0], [1], [0, 0, 1, 1], [], []>} : vector<24x128xbf16>, vector<128x128xbf16>, vector<24x128xf32> -> vector<24x128xf32>
    %23 = arith.addf %16, %22 : vector<24x128xf32>
    %c0_19 = arith.constant 0 : index
    %c6 = arith.constant 6 : index
    %c0_20 = arith.constant 0 : index
    %24 = vector.load %arg2[%c0_19, %c6, %c0_20] : memref<1x40x128xf32, #tpu.memory_space<vmem>>, vector<1x24x128xf32>
    %25 = vector.shape_cast %24 : vector<1x24x128xf32> to vector<24x128xf32>
    %26 = arith.truncf %25 : vector<24x128xf32> to vector<24x128xbf16>
    %c3 = arith.constant 3 : index
    %c0_21 = arith.constant 0 : index
    %c0_22 = arith.constant 0 : index
    %27 = vector.load %arg3[%c3, %c0_21, %c0_22] : memref<9x128x128xbf16, #tpu.memory_space<vmem>>, vector<1x128x128xbf16>
    %28 = vector.shape_cast %27 : vector<1x128x128xbf16> to vector<128x128xbf16>
    %cst_23 = arith.constant dense<0.000000e+00> : vector<24x128xf32>
    %29 = tpu.matmul %26, %28, %cst_23 {dimension_numbers = #tpu.dot_dimension_numbers<[1], [0], [0], [1], [0, 0, 1, 1], [], []>} : vector<24x128xbf16>, vector<128x128xbf16>, vector<24x128xf32> -> vector<24x128xf32>
    %30 = arith.addf %23, %29 : vector<24x128xf32>
    %c0_24 = arith.constant 0 : index
    %c7 = arith.constant 7 : index
    %c0_25 = arith.constant 0 : index
    %31 = vector.load %arg2[%c0_24, %c7, %c0_25] : memref<1x40x128xf32, #tpu.memory_space<vmem>>, vector<1x24x128xf32>
    %32 = vector.shape_cast %31 : vector<1x24x128xf32> to vector<24x128xf32>
    %33 = arith.truncf %32 : vector<24x128xf32> to vector<24x128xbf16>
    %c4 = arith.constant 4 : index
    %c0_26 = arith.constant 0 : index
    %c0_27 = arith.constant 0 : index
    %34 = vector.load %arg3[%c4, %c0_26, %c0_27] : memref<9x128x128xbf16, #tpu.memory_space<vmem>>, vector<1x128x128xbf16>
    %35 = vector.shape_cast %34 : vector<1x128x128xbf16> to vector<128x128xbf16>
    %cst_28 = arith.constant dense<0.000000e+00> : vector<24x128xf32>
    %36 = tpu.matmul %33, %35, %cst_28 {dimension_numbers = #tpu.dot_dimension_numbers<[1], [0], [0], [1], [0, 0, 1, 1], [], []>} : vector<24x128xbf16>, vector<128x128xbf16>, vector<24x128xf32> -> vector<24x128xf32>
    %37 = arith.addf %30, %36 : vector<24x128xf32>
    %c0_29 = arith.constant 0 : index
    %c8 = arith.constant 8 : index
    %c0_30 = arith.constant 0 : index
    %38 = vector.load %arg2[%c0_29, %c8, %c0_30] : memref<1x40x128xf32, #tpu.memory_space<vmem>>, vector<1x24x128xf32>
    %39 = vector.shape_cast %38 : vector<1x24x128xf32> to vector<24x128xf32>
    %40 = arith.truncf %39 : vector<24x128xf32> to vector<24x128xbf16>
    %c5 = arith.constant 5 : index
    %c0_31 = arith.constant 0 : index
    %c0_32 = arith.constant 0 : index
    %41 = vector.load %arg3[%c5, %c0_31, %c0_32] : memref<9x128x128xbf16, #tpu.memory_space<vmem>>, vector<1x128x128xbf16>
    %42 = vector.shape_cast %41 : vector<1x128x128xbf16> to vector<128x128xbf16>
    %cst_33 = arith.constant dense<0.000000e+00> : vector<24x128xf32>
    %43 = tpu.matmul %40, %42, %cst_33 {dimension_numbers = #tpu.dot_dimension_numbers<[1], [0], [0], [1], [0, 0, 1, 1], [], []>} : vector<24x128xbf16>, vector<128x128xbf16>, vector<24x128xf32> -> vector<24x128xf32>
    %44 = arith.addf %37, %43 : vector<24x128xf32>
    %c0_34 = arith.constant 0 : index
    %c12 = arith.constant 12 : index
    %c0_35 = arith.constant 0 : index
    %45 = vector.load %arg2[%c0_34, %c12, %c0_35] : memref<1x40x128xf32, #tpu.memory_space<vmem>>, vector<1x24x128xf32>
    %46 = vector.shape_cast %45 : vector<1x24x128xf32> to vector<24x128xf32>
    %47 = arith.truncf %46 : vector<24x128xf32> to vector<24x128xbf16>
    %c6_36 = arith.constant 6 : index
    %c0_37 = arith.constant 0 : index
    %c0_38 = arith.constant 0 : index
    %48 = vector.load %arg3[%c6_36, %c0_37, %c0_38] : memref<9x128x128xbf16, #tpu.memory_space<vmem>>, vector<1x128x128xbf16>
    %49 = vector.shape_cast %48 : vector<1x128x128xbf16> to vector<128x128xbf16>
    %cst_39 = arith.constant dense<0.000000e+00> : vector<24x128xf32>
    %50 = tpu.matmul %47, %49, %cst_39 {dimension_numbers = #tpu.dot_dimension_numbers<[1], [0], [0], [1], [0, 0, 1, 1], [], []>} : vector<24x128xbf16>, vector<128x128xbf16>, vector<24x128xf32> -> vector<24x128xf32>
    %51 = arith.addf %44, %50 : vector<24x128xf32>
    %c0_40 = arith.constant 0 : index
    %c13 = arith.constant 13 : index
    %c0_41 = arith.constant 0 : index
    %52 = vector.load %arg2[%c0_40, %c13, %c0_41] : memref<1x40x128xf32, #tpu.memory_space<vmem>>, vector<1x24x128xf32>
    %53 = vector.shape_cast %52 : vector<1x24x128xf32> to vector<24x128xf32>
    %54 = arith.truncf %53 : vector<24x128xf32> to vector<24x128xbf16>
    %c7_42 = arith.constant 7 : index
    %c0_43 = arith.constant 0 : index
    %c0_44 = arith.constant 0 : index
    %55 = vector.load %arg3[%c7_42, %c0_43, %c0_44] : memref<9x128x128xbf16, #tpu.memory_space<vmem>>, vector<1x128x128xbf16>
    %56 = vector.shape_cast %55 : vector<1x128x128xbf16> to vector<128x128xbf16>
    %cst_45 = arith.constant dense<0.000000e+00> : vector<24x128xf32>
    %57 = tpu.matmul %54, %56, %cst_45 {dimension_numbers = #tpu.dot_dimension_numbers<[1], [0], [0], [1], [0, 0, 1, 1], [], []>} : vector<24x128xbf16>, vector<128x128xbf16>, vector<24x128xf32> -> vector<24x128xf32>
    %58 = arith.addf %51, %57 : vector<24x128xf32>
    %c0_46 = arith.constant 0 : index
    %c14 = arith.constant 14 : index
    %c0_47 = arith.constant 0 : index
    %59 = vector.load %arg2[%c0_46, %c14, %c0_47] : memref<1x40x128xf32, #tpu.memory_space<vmem>>, vector<1x24x128xf32>
    %60 = vector.shape_cast %59 : vector<1x24x128xf32> to vector<24x128xf32>
    %61 = arith.truncf %60 : vector<24x128xf32> to vector<24x128xbf16>
    %c8_48 = arith.constant 8 : index
    %c0_49 = arith.constant 0 : index
    %c0_50 = arith.constant 0 : index
    %62 = vector.load %arg3[%c8_48, %c0_49, %c0_50] : memref<9x128x128xbf16, #tpu.memory_space<vmem>>, vector<1x128x128xbf16>
    %63 = vector.shape_cast %62 : vector<1x128x128xbf16> to vector<128x128xbf16>
    %cst_51 = arith.constant dense<0.000000e+00> : vector<24x128xf32>
    %64 = tpu.matmul %61, %63, %cst_51 {dimension_numbers = #tpu.dot_dimension_numbers<[1], [0], [0], [1], [0, 0, 1, 1], [], []>} : vector<24x128xbf16>, vector<128x128xbf16>, vector<24x128xf32> -> vector<24x128xf32>
    %65 = arith.addf %58, %64 : vector<24x128xf32>
    %cst_52 = arith.constant 0.000000e+00 : f32
    %66 = vector.broadcast %cst_52 : f32 to vector<24x128xf32>
    %67 = arith.maximumf %65, %66 : vector<24x128xf32>
    %68 = arith.truncf %67 : vector<24x128xf32> to vector<24x128xbf16>
    %c0_53 = arith.constant 0 : index
    %c0_54 = arith.constant 0 : index
    %c0_55 = arith.constant 0 : index
    %69 = vector.load %arg5[%c0_53, %c0_54, %c0_55] : memref<1x24x128xbf16, #tpu.memory_space<vmem>>, vector<1x24x128xbf16>
    %70 = vector.shape_cast %69 : vector<1x24x128xbf16> to vector<24x128xbf16>
    %71 = vector.shape_cast %68 : vector<24x128xbf16> to vector<1x24x128xbf16>
    tpu.vector_store %arg5[%c0_53, %c0_54, %c0_55], %71 {strides = array<i32>} : memref<1x24x128xbf16, #tpu.memory_space<vmem>>, vector<1x24x128xbf16>,
    return
  }
  func.func @transform_0(%arg0: i32, %arg1: i32) -> (i32, i32, i32) {
    %c0_i32 = arith.constant 0 : i32
    %c0_i32_0 = arith.constant 0 : i32
    %c0_i32_1 = arith.constant 0 : i32
    return %arg0, %c0_i32, %c0_i32_0 : i32, i32, i32
  }
  func.func @transform_1(%arg0: i32, %arg1: i32) -> (i32, i32, i32) {
    %c0_i32 = arith.constant 0 : i32
    %c0_i32_0 = arith.constant 0 : i32
    %c0_i32_1 = arith.constant 0 : i32
    return %c0_i32, %c0_i32_0, %arg1 : i32, i32, i32
  }
  func.func @transform_2(%arg0: i32, %arg1: i32) -> (i32, i32) {
    %c0_i32 = arith.constant 0 : i32
    %c0_i32_0 = arith.constant 0 : i32
    return %c0_i32, %arg1 : i32, i32
  }
  func.func @transform_3(%arg0: i32, %arg1: i32) -> (i32, i32, i32) {
    %c0_i32 = arith.constant 0 : i32
    %c0_i32_0 = arith.constant 0 : i32
    return %arg0, %c0_i32, %arg1 : i32, i32, i32
  }
}

module attributes {stable_mosaic.version = 11 : i64} {
  func.func @_matmul_kernel(%arg0: i32, %arg1: i32, %arg2: i32, %arg3: memref<128x128xbf16, #tpu.memory_space<vmem>>, %arg4: memref<128x128xbf16, #tpu.memory_space<vmem>>, %arg5: memref<1x128xf32, #tpu.memory_space<vmem>>, %arg6: memref<128x128xbf16, #tpu.memory_space<vmem>>, %arg7: memref<128x128xf32, #tpu.memory_space<vmem>>) attributes {dimension_semantics = [#tpu.dimension_semantics<parallel>, #tpu.dimension_semantics<parallel>, #tpu.dimension_semantics<arbitrary>], iteration_bounds = array<i64: 1, 4, 1>, scalar_prefetch = 0 : i64, scratch_operands = 1 : i64, tpu.core_type = #tpu.core_type<tc>, window_params = [{transform_indices = @transform_0, window_bounds = array<i64: 128, 128>}, {transform_indices = @transform_1, window_bounds = array<i64: 128, 128>}, {transform_indices = @transform_2, window_bounds = array<i64: 1, 128>}, {transform_indices = @transform_3, window_bounds = array<i64: 128, 128>}]} {
    %c0_i32 = arith.constant 0 : i32
    %0 = arith.cmpi eq, %arg2, %c0_i32 : i32
    %1 = arith.extui %0 : i1 to i32
    %c0_i32_0 = arith.constant 0 : i32
    %2 = arith.cmpi ne, %1, %c0_i32_0 : i32
    scf.if %2 {
      %cst_10 = arith.constant 0.000000e+00 : f32
      %12 = vector.broadcast %cst_10 : f32 to vector<128x128xf32>
      %c0_11 = arith.constant 0 : index
      %c0_12 = arith.constant 0 : index
      %13 = vector.load %arg7[%c0_11, %c0_12] : memref<128x128xf32, #tpu.memory_space<vmem>>, vector<128x128xf32>
      tpu.vector_store %arg7[%c0_11, %c0_12], %12 {strides = array<i32>} : memref<128x128xf32, #tpu.memory_space<vmem>>, vector<128x128xf32>,
    } else {
    }
    %c0 = arith.constant 0 : index
    %c0_1 = arith.constant 0 : index
    %3 = vector.load %arg7[%c0, %c0_1] : memref<128x128xf32, #tpu.memory_space<vmem>>, vector<128x128xf32>
    %c0_2 = arith.constant 0 : index
    %c0_3 = arith.constant 0 : index
    %4 = vector.load %arg3[%c0_2, %c0_3] : memref<128x128xbf16, #tpu.memory_space<vmem>>, vector<128x128xbf16>
    %c0_4 = arith.constant 0 : index
    %c0_5 = arith.constant 0 : index
    %5 = vector.load %arg4[%c0_4, %c0_5] : memref<128x128xbf16, #tpu.memory_space<vmem>>, vector<128x128xbf16>
    %cst = arith.constant dense<0.000000e+00> : vector<128x128xf32>
    %6 = tpu.matmul %4, %5, %cst {dimension_numbers = #tpu.dot_dimension_numbers<[1], [0], [0], [1], [0, 0, 1, 1], [], []>} : vector<128x128xbf16>, vector<128x128xbf16>, vector<128x128xf32> -> vector<128x128xf32>
    %7 = arith.addf %3, %6 : vector<128x128xf32>
    %c0_6 = arith.constant 0 : index
    %c0_7 = arith.constant 0 : index
    %8 = vector.load %arg7[%c0_6, %c0_7] : memref<128x128xf32, #tpu.memory_space<vmem>>, vector<128x128xf32>
    tpu.vector_store %arg7[%c0_6, %c0_7], %7 {strides = array<i32>} : memref<128x128xf32, #tpu.memory_space<vmem>>, vector<128x128xf32>,
    %c0_i32_8 = arith.constant 0 : i32
    %9 = arith.cmpi eq, %arg2, %c0_i32_8 : i32
    %10 = arith.extui %9 : i1 to i32
    %c0_i32_9 = arith.constant 0 : i32
    %11 = arith.cmpi ne, %10, %c0_i32_9 : i32
    scf.if %11 {
      %c0_10 = arith.constant 0 : index
      %c0_11 = arith.constant 0 : index
      %12 = vector.load %arg7[%c0_10, %c0_11] : memref<128x128xf32, #tpu.memory_space<vmem>>, vector<128x128xf32>
      %c0_12 = arith.constant 0 : index
      %c0_13 = arith.constant 0 : index
      %13 = vector.load %arg5[%c0_12, %c0_13] : memref<1x128xf32, #tpu.memory_space<vmem>>, vector<1x128xf32>
      %14 = vector.broadcast %13 : vector<1x128xf32> to vector<128x128xf32>
      %15 = arith.addf %12, %14 : vector<128x128xf32>
      %16 = arith.truncf %15 : vector<128x128xf32> to vector<128x128xbf16>
      %c0_14 = arith.constant 0 : index
      %c0_15 = arith.constant 0 : index
      %17 = vector.load %arg6[%c0_14, %c0_15] : memref<128x128xbf16, #tpu.memory_space<vmem>>, vector<128x128xbf16>
      tpu.vector_store %arg6[%c0_14, %c0_15], %16 {strides = array<i32>} : memref<128x128xbf16, #tpu.memory_space<vmem>>, vector<128x128xbf16>,
    } else {
    }
    return
  }
  func.func @transform_0(%arg0: i32, %arg1: i32, %arg2: i32) -> (i32, i32) {
    %c0_i32 = arith.constant 0 : i32
    return %arg0, %arg2 : i32, i32
  }
  func.func @transform_1(%arg0: i32, %arg1: i32, %arg2: i32) -> (i32, i32) {
    %c0_i32 = arith.constant 0 : i32
    return %arg2, %arg1 : i32, i32
  }
  func.func @transform_2(%arg0: i32, %arg1: i32, %arg2: i32) -> (i32, i32) {
    %c0_i32 = arith.constant 0 : i32
    %c0_i32_0 = arith.constant 0 : i32
    return %c0_i32, %arg1 : i32, i32
  }
  func.func @transform_3(%arg0: i32, %arg1: i32, %arg2: i32) -> (i32, i32) {
    %c0_i32 = arith.constant 0 : i32
    return %arg0, %arg1 : i32, i32
  }
}

module attributes {stable_mosaic.version = 11 : i64} {
  func.func @_conv3x3_kernel(%arg0: i32, %arg1: i32, %arg2: memref<1x104x128xf32, #tpu.memory_space<vmem>>, %arg3: memref<1x104x128xf32, #tpu.memory_space<vmem>>, %arg4: memref<18x128x128xbf16, #tpu.memory_space<vmem>>, %arg5: memref<1x128xf32, #tpu.memory_space<vmem>>, %arg6: memref<1x80x128xbf16, #tpu.memory_space<vmem>>) attributes {dimension_semantics = [#tpu.dimension_semantics<parallel>, #tpu.dimension_semantics<parallel>], iteration_bounds = array<i64: 2, 1>, scalar_prefetch = 0 : i64, scratch_operands = 0 : i64, tpu.core_type = #tpu.core_type<tc>, window_params = [{transform_indices = @transform_0, window_bounds = array<i64: 1, 104, 128>}, {transform_indices = @transform_1, window_bounds = array<i64: 1, 104, 128>}, {transform_indices = @transform_2, window_bounds = array<i64: 18, 128, 128>}, {transform_indices = @transform_3, window_bounds = array<i64: 1, 128>}, {transform_indices = @transform_4, window_bounds = array<i64: 1, 80, 128>}]} {
    %c0 = arith.constant 0 : index
    %c0_0 = arith.constant 0 : index
    %0 = vector.load %arg5[%c0, %c0_0] : memref<1x128xf32, #tpu.memory_space<vmem>>, vector<1x128xf32>
    %1 = vector.shape_cast %0 : vector<1x128xf32> to vector<1x128xf32>
    %2 = vector.broadcast %1 : vector<1x128xf32> to vector<80x128xf32>
    %c0_1 = arith.constant 0 : index
    %c0_2 = arith.constant 0 : index
    %c0_3 = arith.constant 0 : index
    %3 = vector.load %arg2[%c0_1, %c0_2, %c0_3] : memref<1x104x128xf32, #tpu.memory_space<vmem>>, vector<1x80x128xf32>
    %4 = vector.shape_cast %3 : vector<1x80x128xf32> to vector<80x128xf32>
    %5 = arith.truncf %4 : vector<80x128xf32> to vector<80x128xbf16>
    %c0_4 = arith.constant 0 : index
    %c0_5 = arith.constant 0 : index
    %c0_6 = arith.constant 0 : index
    %6 = vector.load %arg4[%c0_4, %c0_5, %c0_6] : memref<18x128x128xbf16, #tpu.memory_space<vmem>>, vector<1x128x128xbf16>
    %7 = vector.shape_cast %6 : vector<1x128x128xbf16> to vector<128x128xbf16>
    %cst = arith.constant dense<0.000000e+00> : vector<80x128xf32>
    %8 = tpu.matmul %5, %7, %cst {dimension_numbers = #tpu.dot_dimension_numbers<[1], [0], [0], [1], [0, 0, 1, 1], [], []>} : vector<80x128xbf16>, vector<128x128xbf16>, vector<80x128xf32> -> vector<80x128xf32>
    %9 = arith.addf %2, %8 : vector<80x128xf32>
    %c0_7 = arith.constant 0 : index
    %c1 = arith.constant 1 : index
    %c0_8 = arith.constant 0 : index
    %10 = vector.load %arg2[%c0_7, %c1, %c0_8] : memref<1x104x128xf32, #tpu.memory_space<vmem>>, vector<1x80x128xf32>
    %11 = vector.shape_cast %10 : vector<1x80x128xf32> to vector<80x128xf32>
    %12 = arith.truncf %11 : vector<80x128xf32> to vector<80x128xbf16>
    %c1_9 = arith.constant 1 : index
    %c0_10 = arith.constant 0 : index
    %c0_11 = arith.constant 0 : index
    %13 = vector.load %arg4[%c1_9, %c0_10, %c0_11] : memref<18x128x128xbf16, #tpu.memory_space<vmem>>, vector<1x128x128xbf16>
    %14 = vector.shape_cast %13 : vector<1x128x128xbf16> to vector<128x128xbf16>
    %cst_12 = arith.constant dense<0.000000e+00> : vector<80x128xf32>
    %15 = tpu.matmul %12, %14, %cst_12 {dimension_numbers = #tpu.dot_dimension_numbers<[1], [0], [0], [1], [0, 0, 1, 1], [], []>} : vector<80x128xbf16>, vector<128x128xbf16>, vector<80x128xf32> -> vector<80x128xf32>
    %16 = arith.addf %9, %15 : vector<80x128xf32>
    %c0_13 = arith.constant 0 : index
    %c2 = arith.constant 2 : index
    %c0_14 = arith.constant 0 : index
    %17 = vector.load %arg2[%c0_13, %c2, %c0_14] : memref<1x104x128xf32, #tpu.memory_space<vmem>>, vector<1x80x128xf32>
    %18 = vector.shape_cast %17 : vector<1x80x128xf32> to vector<80x128xf32>
    %19 = arith.truncf %18 : vector<80x128xf32> to vector<80x128xbf16>
    %c2_15 = arith.constant 2 : index
    %c0_16 = arith.constant 0 : index
    %c0_17 = arith.constant 0 : index
    %20 = vector.load %arg4[%c2_15, %c0_16, %c0_17] : memref<18x128x128xbf16, #tpu.memory_space<vmem>>, vector<1x128x128xbf16>
    %21 = vector.shape_cast %20 : vector<1x128x128xbf16> to vector<128x128xbf16>
    %cst_18 = arith.constant dense<0.000000e+00> : vector<80x128xf32>
    %22 = tpu.matmul %19, %21, %cst_18 {dimension_numbers = #tpu.dot_dimension_numbers<[1], [0], [0], [1], [0, 0, 1, 1], [], []>} : vector<80x128xbf16>, vector<128x128xbf16>, vector<80x128xf32> -> vector<80x128xf32>
    %23 = arith.addf %16, %22 : vector<80x128xf32>
    %c0_19 = arith.constant 0 : index
    %c10 = arith.constant 10 : index
    %c0_20 = arith.constant 0 : index
    %24 = vector.load %arg2[%c0_19, %c10, %c0_20] : memref<1x104x128xf32, #tpu.memory_space<vmem>>, vector<1x80x128xf32>
    %25 = vector.shape_cast %24 : vector<1x80x128xf32> to vector<80x128xf32>
    %26 = arith.truncf %25 : vector<80x128xf32> to vector<80x128xbf16>
    %c3 = arith.constant 3 : index
    %c0_21 = arith.constant 0 : index
    %c0_22 = arith.constant 0 : index
    %27 = vector.load %arg4[%c3, %c0_21, %c0_22] : memref<18x128x128xbf16, #tpu.memory_space<vmem>>, vector<1x128x128xbf16>
    %28 = vector.shape_cast %27 : vector<1x128x128xbf16> to vector<128x128xbf16>
    %cst_23 = arith.constant dense<0.000000e+00> : vector<80x128xf32>
    %29 = tpu.matmul %26, %28, %cst_23 {dimension_numbers = #tpu.dot_dimension_numbers<[1], [0], [0], [1], [0, 0, 1, 1], [], []>} : vector<80x128xbf16>, vector<128x128xbf16>, vector<80x128xf32> -> vector<80x128xf32>
    %30 = arith.addf %23, %29 : vector<80x128xf32>
    %c0_24 = arith.constant 0 : index
    %c11 = arith.constant 11 : index
    %c0_25 = arith.constant 0 : index
    %31 = vector.load %arg2[%c0_24, %c11, %c0_25] : memref<1x104x128xf32, #tpu.memory_space<vmem>>, vector<1x80x128xf32>
    %32 = vector.shape_cast %31 : vector<1x80x128xf32> to vector<80x128xf32>
    %33 = arith.truncf %32 : vector<80x128xf32> to vector<80x128xbf16>
    %c4 = arith.constant 4 : index
    %c0_26 = arith.constant 0 : index
    %c0_27 = arith.constant 0 : index
    %34 = vector.load %arg4[%c4, %c0_26, %c0_27] : memref<18x128x128xbf16, #tpu.memory_space<vmem>>, vector<1x128x128xbf16>
    %35 = vector.shape_cast %34 : vector<1x128x128xbf16> to vector<128x128xbf16>
    %cst_28 = arith.constant dense<0.000000e+00> : vector<80x128xf32>
    %36 = tpu.matmul %33, %35, %cst_28 {dimension_numbers = #tpu.dot_dimension_numbers<[1], [0], [0], [1], [0, 0, 1, 1], [], []>} : vector<80x128xbf16>, vector<128x128xbf16>, vector<80x128xf32> -> vector<80x128xf32>
    %37 = arith.addf %30, %36 : vector<80x128xf32>
    %c0_29 = arith.constant 0 : index
    %c12 = arith.constant 12 : index
    %c0_30 = arith.constant 0 : index
    %38 = vector.load %arg2[%c0_29, %c12, %c0_30] : memref<1x104x128xf32, #tpu.memory_space<vmem>>, vector<1x80x128xf32>
    %39 = vector.shape_cast %38 : vector<1x80x128xf32> to vector<80x128xf32>
    %40 = arith.truncf %39 : vector<80x128xf32> to vector<80x128xbf16>
    %c5 = arith.constant 5 : index
    %c0_31 = arith.constant 0 : index
    %c0_32 = arith.constant 0 : index
    %41 = vector.load %arg4[%c5, %c0_31, %c0_32] : memref<18x128x128xbf16, #tpu.memory_space<vmem>>, vector<1x128x128xbf16>
    %42 = vector.shape_cast %41 : vector<1x128x128xbf16> to vector<128x128xbf16>
    %cst_33 = arith.constant dense<0.000000e+00> : vector<80x128xf32>
    %43 = tpu.matmul %40, %42, %cst_33 {dimension_numbers = #tpu.dot_dimension_numbers<[1], [0], [0], [1], [0, 0, 1, 1], [], []>} : vector<80x128xbf16>, vector<128x128xbf16>, vector<80x128xf32> -> vector<80x128xf32>
    %44 = arith.addf %37, %43 : vector<80x128xf32>
    %c0_34 = arith.constant 0 : index
    %c20 = arith.constant 20 : index
    %c0_35 = arith.constant 0 : index
    %45 = vector.load %arg2[%c0_34, %c20, %c0_35] : memref<1x104x128xf32, #tpu.memory_space<vmem>>, vector<1x80x128xf32>
    %46 = vector.shape_cast %45 : vector<1x80x128xf32> to vector<80x128xf32>
    %47 = arith.truncf %46 : vector<80x128xf32> to vector<80x128xbf16>
    %c6 = arith.constant 6 : index
    %c0_36 = arith.constant 0 : index
    %c0_37 = arith.constant 0 : index
    %48 = vector.load %arg4[%c6, %c0_36, %c0_37] : memref<18x128x128xbf16, #tpu.memory_space<vmem>>, vector<1x128x128xbf16>
    %49 = vector.shape_cast %48 : vector<1x128x128xbf16> to vector<128x128xbf16>
    %cst_38 = arith.constant dense<0.000000e+00> : vector<80x128xf32>
    %50 = tpu.matmul %47, %49, %cst_38 {dimension_numbers = #tpu.dot_dimension_numbers<[1], [0], [0], [1], [0, 0, 1, 1], [], []>} : vector<80x128xbf16>, vector<128x128xbf16>, vector<80x128xf32> -> vector<80x128xf32>
    %51 = arith.addf %44, %50 : vector<80x128xf32>
    %c0_39 = arith.constant 0 : index
    %c21 = arith.constant 21 : index
    %c0_40 = arith.constant 0 : index
    %52 = vector.load %arg2[%c0_39, %c21, %c0_40] : memref<1x104x128xf32, #tpu.memory_space<vmem>>, vector<1x80x128xf32>
    %53 = vector.shape_cast %52 : vector<1x80x128xf32> to vector<80x128xf32>
    %54 = arith.truncf %53 : vector<80x128xf32> to vector<80x128xbf16>
    %c7 = arith.constant 7 : index
    %c0_41 = arith.constant 0 : index
    %c0_42 = arith.constant 0 : index
    %55 = vector.load %arg4[%c7, %c0_41, %c0_42] : memref<18x128x128xbf16, #tpu.memory_space<vmem>>, vector<1x128x128xbf16>
    %56 = vector.shape_cast %55 : vector<1x128x128xbf16> to vector<128x128xbf16>
    %cst_43 = arith.constant dense<0.000000e+00> : vector<80x128xf32>
    %57 = tpu.matmul %54, %56, %cst_43 {dimension_numbers = #tpu.dot_dimension_numbers<[1], [0], [0], [1], [0, 0, 1, 1], [], []>} : vector<80x128xbf16>, vector<128x128xbf16>, vector<80x128xf32> -> vector<80x128xf32>
    %58 = arith.addf %51, %57 : vector<80x128xf32>
    %c0_44 = arith.constant 0 : index
    %c22 = arith.constant 22 : index
    %c0_45 = arith.constant 0 : index
    %59 = vector.load %arg2[%c0_44, %c22, %c0_45] : memref<1x104x128xf32, #tpu.memory_space<vmem>>, vector<1x80x128xf32>
    %60 = vector.shape_cast %59 : vector<1x80x128xf32> to vector<80x128xf32>
    %61 = arith.truncf %60 : vector<80x128xf32> to vector<80x128xbf16>
    %c8 = arith.constant 8 : index
    %c0_46 = arith.constant 0 : index
    %c0_47 = arith.constant 0 : index
    %62 = vector.load %arg4[%c8, %c0_46, %c0_47] : memref<18x128x128xbf16, #tpu.memory_space<vmem>>, vector<1x128x128xbf16>
    %63 = vector.shape_cast %62 : vector<1x128x128xbf16> to vector<128x128xbf16>
    %cst_48 = arith.constant dense<0.000000e+00> : vector<80x128xf32>
    %64 = tpu.matmul %61, %63, %cst_48 {dimension_numbers = #tpu.dot_dimension_numbers<[1], [0], [0], [1], [0, 0, 1, 1], [], []>} : vector<80x128xbf16>, vector<128x128xbf16>, vector<80x128xf32> -> vector<80x128xf32>
    %65 = arith.addf %58, %64 : vector<80x128xf32>
    %c0_49 = arith.constant 0 : index
    %c0_50 = arith.constant 0 : index
    %c0_51 = arith.constant 0 : index
    %66 = vector.load %arg3[%c0_49, %c0_50, %c0_51] : memref<1x104x128xf32, #tpu.memory_space<vmem>>, vector<1x80x128xf32>
    %67 = vector.shape_cast %66 : vector<1x80x128xf32> to vector<80x128xf32>
    %68 = arith.truncf %67 : vector<80x128xf32> to vector<80x128xbf16>
    %c9 = arith.constant 9 : index
    %c0_52 = arith.constant 0 : index
    %c0_53 = arith.constant 0 : index
    %69 = vector.load %arg4[%c9, %c0_52, %c0_53] : memref<18x128x128xbf16, #tpu.memory_space<vmem>>, vector<1x128x128xbf16>
    %70 = vector.shape_cast %69 : vector<1x128x128xbf16> to vector<128x128xbf16>
    %cst_54 = arith.constant dense<0.000000e+00> : vector<80x128xf32>
    %71 = tpu.matmul %68, %70, %cst_54 {dimension_numbers = #tpu.dot_dimension_numbers<[1], [0], [0], [1], [0, 0, 1, 1], [], []>} : vector<80x128xbf16>, vector<128x128xbf16>, vector<80x128xf32> -> vector<80x128xf32>
    %72 = arith.addf %65, %71 : vector<80x128xf32>
    %c0_55 = arith.constant 0 : index
    %c1_56 = arith.constant 1 : index
    %c0_57 = arith.constant 0 : index
    %73 = vector.load %arg3[%c0_55, %c1_56, %c0_57] : memref<1x104x128xf32, #tpu.memory_space<vmem>>, vector<1x80x128xf32>
    %74 = vector.shape_cast %73 : vector<1x80x128xf32> to vector<80x128xf32>
    %75 = arith.truncf %74 : vector<80x128xf32> to vector<80x128xbf16>
    %c10_58 = arith.constant 10 : index
    %c0_59 = arith.constant 0 : index
    %c0_60 = arith.constant 0 : index
    %76 = vector.load %arg4[%c10_58, %c0_59, %c0_60] : memref<18x128x128xbf16, #tpu.memory_space<vmem>>, vector<1x128x128xbf16>
    %77 = vector.shape_cast %76 : vector<1x128x128xbf16> to vector<128x128xbf16>
    %cst_61 = arith.constant dense<0.000000e+00> : vector<80x128xf32>
    %78 = tpu.matmul %75, %77, %cst_61 {dimension_numbers = #tpu.dot_dimension_numbers<[1], [0], [0], [1], [0, 0, 1, 1], [], []>} : vector<80x128xbf16>, vector<128x128xbf16>, vector<80x128xf32> -> vector<80x128xf32>
    %79 = arith.addf %72, %78 : vector<80x128xf32>
    %c0_62 = arith.constant 0 : index
    %c2_63 = arith.constant 2 : index
    %c0_64 = arith.constant 0 : index
    %80 = vector.load %arg3[%c0_62, %c2_63, %c0_64] : memref<1x104x128xf32, #tpu.memory_space<vmem>>, vector<1x80x128xf32>
    %81 = vector.shape_cast %80 : vector<1x80x128xf32> to vector<80x128xf32>
    %82 = arith.truncf %81 : vector<80x128xf32> to vector<80x128xbf16>
    %c11_65 = arith.constant 11 : index
    %c0_66 = arith.constant 0 : index
    %c0_67 = arith.constant 0 : index
    %83 = vector.load %arg4[%c11_65, %c0_66, %c0_67] : memref<18x128x128xbf16, #tpu.memory_space<vmem>>, vector<1x128x128xbf16>
    %84 = vector.shape_cast %83 : vector<1x128x128xbf16> to vector<128x128xbf16>
    %cst_68 = arith.constant dense<0.000000e+00> : vector<80x128xf32>
    %85 = tpu.matmul %82, %84, %cst_68 {dimension_numbers = #tpu.dot_dimension_numbers<[1], [0], [0], [1], [0, 0, 1, 1], [], []>} : vector<80x128xbf16>, vector<128x128xbf16>, vector<80x128xf32> -> vector<80x128xf32>
    %86 = arith.addf %79, %85 : vector<80x128xf32>
    %c0_69 = arith.constant 0 : index
    %c10_70 = arith.constant 10 : index
    %c0_71 = arith.constant 0 : index
    %87 = vector.load %arg3[%c0_69, %c10_70, %c0_71] : memref<1x104x128xf32, #tpu.memory_space<vmem>>, vector<1x80x128xf32>
    %88 = vector.shape_cast %87 : vector<1x80x128xf32> to vector<80x128xf32>
    %89 = arith.truncf %88 : vector<80x128xf32> to vector<80x128xbf16>
    %c12_72 = arith.constant 12 : index
    %c0_73 = arith.constant 0 : index
    %c0_74 = arith.constant 0 : index
    %90 = vector.load %arg4[%c12_72, %c0_73, %c0_74] : memref<18x128x128xbf16, #tpu.memory_space<vmem>>, vector<1x128x128xbf16>
    %91 = vector.shape_cast %90 : vector<1x128x128xbf16> to vector<128x128xbf16>
    %cst_75 = arith.constant dense<0.000000e+00> : vector<80x128xf32>
    %92 = tpu.matmul %89, %91, %cst_75 {dimension_numbers = #tpu.dot_dimension_numbers<[1], [0], [0], [1], [0, 0, 1, 1], [], []>} : vector<80x128xbf16>, vector<128x128xbf16>, vector<80x128xf32> -> vector<80x128xf32>
    %93 = arith.addf %86, %92 : vector<80x128xf32>
    %c0_76 = arith.constant 0 : index
    %c11_77 = arith.constant 11 : index
    %c0_78 = arith.constant 0 : index
    %94 = vector.load %arg3[%c0_76, %c11_77, %c0_78] : memref<1x104x128xf32, #tpu.memory_space<vmem>>, vector<1x80x128xf32>
    %95 = vector.shape_cast %94 : vector<1x80x128xf32> to vector<80x128xf32>
    %96 = arith.truncf %95 : vector<80x128xf32> to vector<80x128xbf16>
    %c13 = arith.constant 13 : index
    %c0_79 = arith.constant 0 : index
    %c0_80 = arith.constant 0 : index
    %97 = vector.load %arg4[%c13, %c0_79, %c0_80] : memref<18x128x128xbf16, #tpu.memory_space<vmem>>, vector<1x128x128xbf16>
    %98 = vector.shape_cast %97 : vector<1x128x128xbf16> to vector<128x128xbf16>
    %cst_81 = arith.constant dense<0.000000e+00> : vector<80x128xf32>
    %99 = tpu.matmul %96, %98, %cst_81 {dimension_numbers = #tpu.dot_dimension_numbers<[1], [0], [0], [1], [0, 0, 1, 1], [], []>} : vector<80x128xbf16>, vector<128x128xbf16>, vector<80x128xf32> -> vector<80x128xf32>
    %100 = arith.addf %93, %99 : vector<80x128xf32>
    %c0_82 = arith.constant 0 : index
    %c12_83 = arith.constant 12 : index
    %c0_84 = arith.constant 0 : index
    %101 = vector.load %arg3[%c0_82, %c12_83, %c0_84] : memref<1x104x128xf32, #tpu.memory_space<vmem>>, vector<1x80x128xf32>
    %102 = vector.shape_cast %101 : vector<1x80x128xf32> to vector<80x128xf32>
    %103 = arith.truncf %102 : vector<80x128xf32> to vector<80x128xbf16>
    %c14 = arith.constant 14 : index
    %c0_85 = arith.constant 0 : index
    %c0_86 = arith.constant 0 : index
    %104 = vector.load %arg4[%c14, %c0_85, %c0_86] : memref<18x128x128xbf16, #tpu.memory_space<vmem>>, vector<1x128x128xbf16>
    %105 = vector.shape_cast %104 : vector<1x128x128xbf16> to vector<128x128xbf16>
    %cst_87 = arith.constant dense<0.000000e+00> : vector<80x128xf32>
    %106 = tpu.matmul %103, %105, %cst_87 {dimension_numbers = #tpu.dot_dimension_numbers<[1], [0], [0], [1], [0, 0, 1, 1], [], []>} : vector<80x128xbf16>, vector<128x128xbf16>, vector<80x128xf32> -> vector<80x128xf32>
    %107 = arith.addf %100, %106 : vector<80x128xf32>
    %c0_88 = arith.constant 0 : index
    %c20_89 = arith.constant 20 : index
    %c0_90 = arith.constant 0 : index
    %108 = vector.load %arg3[%c0_88, %c20_89, %c0_90] : memref<1x104x128xf32, #tpu.memory_space<vmem>>, vector<1x80x128xf32>
    %109 = vector.shape_cast %108 : vector<1x80x128xf32> to vector<80x128xf32>
    %110 = arith.truncf %109 : vector<80x128xf32> to vector<80x128xbf16>
    %c15 = arith.constant 15 : index
    %c0_91 = arith.constant 0 : index
    %c0_92 = arith.constant 0 : index
    %111 = vector.load %arg4[%c15, %c0_91, %c0_92] : memref<18x128x128xbf16, #tpu.memory_space<vmem>>, vector<1x128x128xbf16>
    %112 = vector.shape_cast %111 : vector<1x128x128xbf16> to vector<128x128xbf16>
    %cst_93 = arith.constant dense<0.000000e+00> : vector<80x128xf32>
    %113 = tpu.matmul %110, %112, %cst_93 {dimension_numbers = #tpu.dot_dimension_numbers<[1], [0], [0], [1], [0, 0, 1, 1], [], []>} : vector<80x128xbf16>, vector<128x128xbf16>, vector<80x128xf32> -> vector<80x128xf32>
    %114 = arith.addf %107, %113 : vector<80x128xf32>
    %c0_94 = arith.constant 0 : index
    %c21_95 = arith.constant 21 : index
    %c0_96 = arith.constant 0 : index
    %115 = vector.load %arg3[%c0_94, %c21_95, %c0_96] : memref<1x104x128xf32, #tpu.memory_space<vmem>>, vector<1x80x128xf32>
    %116 = vector.shape_cast %115 : vector<1x80x128xf32> to vector<80x128xf32>
    %117 = arith.truncf %116 : vector<80x128xf32> to vector<80x128xbf16>
    %c16 = arith.constant 16 : index
    %c0_97 = arith.constant 0 : index
    %c0_98 = arith.constant 0 : index
    %118 = vector.load %arg4[%c16, %c0_97, %c0_98] : memref<18x128x128xbf16, #tpu.memory_space<vmem>>, vector<1x128x128xbf16>
    %119 = vector.shape_cast %118 : vector<1x128x128xbf16> to vector<128x128xbf16>
    %cst_99 = arith.constant dense<0.000000e+00> : vector<80x128xf32>
    %120 = tpu.matmul %117, %119, %cst_99 {dimension_numbers = #tpu.dot_dimension_numbers<[1], [0], [0], [1], [0, 0, 1, 1], [], []>} : vector<80x128xbf16>, vector<128x128xbf16>, vector<80x128xf32> -> vector<80x128xf32>
    %121 = arith.addf %114, %120 : vector<80x128xf32>
    %c0_100 = arith.constant 0 : index
    %c22_101 = arith.constant 22 : index
    %c0_102 = arith.constant 0 : index
    %122 = vector.load %arg3[%c0_100, %c22_101, %c0_102] : memref<1x104x128xf32, #tpu.memory_space<vmem>>, vector<1x80x128xf32>
    %123 = vector.shape_cast %122 : vector<1x80x128xf32> to vector<80x128xf32>
    %124 = arith.truncf %123 : vector<80x128xf32> to vector<80x128xbf16>
    %c17 = arith.constant 17 : index
    %c0_103 = arith.constant 0 : index
    %c0_104 = arith.constant 0 : index
    %125 = vector.load %arg4[%c17, %c0_103, %c0_104] : memref<18x128x128xbf16, #tpu.memory_space<vmem>>, vector<1x128x128xbf16>
    %126 = vector.shape_cast %125 : vector<1x128x128xbf16> to vector<128x128xbf16>
    %cst_105 = arith.constant dense<0.000000e+00> : vector<80x128xf32>
    %127 = tpu.matmul %124, %126, %cst_105 {dimension_numbers = #tpu.dot_dimension_numbers<[1], [0], [0], [1], [0, 0, 1, 1], [], []>} : vector<80x128xbf16>, vector<128x128xbf16>, vector<80x128xf32> -> vector<80x128xf32>
    %128 = arith.addf %121, %127 : vector<80x128xf32>
    %cst_106 = arith.constant 0.000000e+00 : f32
    %129 = vector.broadcast %cst_106 : f32 to vector<80x128xf32>
    %130 = arith.maximumf %128, %129 : vector<80x128xf32>
    %131 = arith.truncf %130 : vector<80x128xf32> to vector<80x128xbf16>
    %c0_107 = arith.constant 0 : index
    %c0_108 = arith.constant 0 : index
    %c0_109 = arith.constant 0 : index
    %132 = vector.load %arg6[%c0_107, %c0_108, %c0_109] : memref<1x80x128xbf16, #tpu.memory_space<vmem>>, vector<1x80x128xbf16>
    %133 = vector.shape_cast %132 : vector<1x80x128xbf16> to vector<80x128xbf16>
    %134 = vector.shape_cast %131 : vector<80x128xbf16> to vector<1x80x128xbf16>
    tpu.vector_store %arg6[%c0_107, %c0_108, %c0_109], %134 {strides = array<i32>} : memref<1x80x128xbf16, #tpu.memory_space<vmem>>, vector<1x80x128xbf16>,
    return
  }
  func.func @transform_0(%arg0: i32, %arg1: i32) -> (i32, i32, i32) {
    %c0_i32 = arith.constant 0 : i32
    %c0_i32_0 = arith.constant 0 : i32
    %c0_i32_1 = arith.constant 0 : i32
    return %arg0, %c0_i32, %c0_i32_0 : i32, i32, i32
  }
  func.func @transform_1(%arg0: i32, %arg1: i32) -> (i32, i32, i32) {
    %c0_i32 = arith.constant 0 : i32
    %c0_i32_0 = arith.constant 0 : i32
    %c0_i32_1 = arith.constant 0 : i32
    return %arg0, %c0_i32, %c0_i32_0 : i32, i32, i32
  }
  func.func @transform_2(%arg0: i32, %arg1: i32) -> (i32, i32, i32) {
    %c0_i32 = arith.constant 0 : i32
    %c0_i32_0 = arith.constant 0 : i32
    %c0_i32_1 = arith.constant 0 : i32
    return %c0_i32, %c0_i32_0, %arg1 : i32, i32, i32
  }
  func.func @transform_3(%arg0: i32, %arg1: i32) -> (i32, i32) {
    %c0_i32 = arith.constant 0 : i32
    %c0_i32_0 = arith.constant 0 : i32
    return %c0_i32, %arg1 : i32, i32
  }
  func.func @transform_4(%arg0: i32, %arg1: i32) -> (i32, i32, i32) {
    %c0_i32 = arith.constant 0 : i32
    %c0_i32_0 = arith.constant 0 : i32
    return %arg0, %c0_i32, %arg1 : i32, i32, i32
  }
}

module attributes {stable_mosaic.version = 11 : i64} {
  func.func @_conv3x3_kernel(%arg0: i32, %arg1: i32, %arg2: memref<1x328x128xf32, #tpu.memory_space<vmem>>, %arg3: memref<1x328x128xf32, #tpu.memory_space<vmem>>, %arg4: memref<18x128x128xbf16, #tpu.memory_space<vmem>>, %arg5: memref<1x128xf32, #tpu.memory_space<vmem>>, %arg6: memref<1x288x128xbf16, #tpu.memory_space<vmem>>) attributes {dimension_semantics = [#tpu.dimension_semantics<parallel>, #tpu.dimension_semantics<parallel>], iteration_bounds = array<i64: 2, 1>, scalar_prefetch = 0 : i64, scratch_operands = 0 : i64, tpu.core_type = #tpu.core_type<tc>, window_params = [{transform_indices = @transform_0, window_bounds = array<i64: 1, 328, 128>}, {transform_indices = @transform_1, window_bounds = array<i64: 1, 328, 128>}, {transform_indices = @transform_2, window_bounds = array<i64: 18, 128, 128>}, {transform_indices = @transform_3, window_bounds = array<i64: 1, 128>}, {transform_indices = @transform_4, window_bounds = array<i64: 1, 288, 128>}]} {
    %c0 = arith.constant 0 : index
    %c0_0 = arith.constant 0 : index
    %0 = vector.load %arg5[%c0, %c0_0] : memref<1x128xf32, #tpu.memory_space<vmem>>, vector<1x128xf32>
    %1 = vector.shape_cast %0 : vector<1x128xf32> to vector<1x128xf32>
    %2 = vector.broadcast %1 : vector<1x128xf32> to vector<288x128xf32>
    %c0_1 = arith.constant 0 : index
    %c0_2 = arith.constant 0 : index
    %c0_3 = arith.constant 0 : index
    %3 = vector.load %arg2[%c0_1, %c0_2, %c0_3] : memref<1x328x128xf32, #tpu.memory_space<vmem>>, vector<1x288x128xf32>
    %4 = vector.shape_cast %3 : vector<1x288x128xf32> to vector<288x128xf32>
    %5 = arith.truncf %4 : vector<288x128xf32> to vector<288x128xbf16>
    %c0_4 = arith.constant 0 : index
    %c0_5 = arith.constant 0 : index
    %c0_6 = arith.constant 0 : index
    %6 = vector.load %arg4[%c0_4, %c0_5, %c0_6] : memref<18x128x128xbf16, #tpu.memory_space<vmem>>, vector<1x128x128xbf16>
    %7 = vector.shape_cast %6 : vector<1x128x128xbf16> to vector<128x128xbf16>
    %cst = arith.constant dense<0.000000e+00> : vector<288x128xf32>
    %8 = tpu.matmul %5, %7, %cst {dimension_numbers = #tpu.dot_dimension_numbers<[1], [0], [0], [1], [0, 0, 1, 1], [], []>} : vector<288x128xbf16>, vector<128x128xbf16>, vector<288x128xf32> -> vector<288x128xf32>
    %9 = arith.addf %2, %8 : vector<288x128xf32>
    %c0_7 = arith.constant 0 : index
    %c1 = arith.constant 1 : index
    %c0_8 = arith.constant 0 : index
    %10 = vector.load %arg2[%c0_7, %c1, %c0_8] : memref<1x328x128xf32, #tpu.memory_space<vmem>>, vector<1x288x128xf32>
    %11 = vector.shape_cast %10 : vector<1x288x128xf32> to vector<288x128xf32>
    %12 = arith.truncf %11 : vector<288x128xf32> to vector<288x128xbf16>
    %c1_9 = arith.constant 1 : index
    %c0_10 = arith.constant 0 : index
    %c0_11 = arith.constant 0 : index
    %13 = vector.load %arg4[%c1_9, %c0_10, %c0_11] : memref<18x128x128xbf16, #tpu.memory_space<vmem>>, vector<1x128x128xbf16>
    %14 = vector.shape_cast %13 : vector<1x128x128xbf16> to vector<128x128xbf16>
    %cst_12 = arith.constant dense<0.000000e+00> : vector<288x128xf32>
    %15 = tpu.matmul %12, %14, %cst_12 {dimension_numbers = #tpu.dot_dimension_numbers<[1], [0], [0], [1], [0, 0, 1, 1], [], []>} : vector<288x128xbf16>, vector<128x128xbf16>, vector<288x128xf32> -> vector<288x128xf32>
    %16 = arith.addf %9, %15 : vector<288x128xf32>
    %c0_13 = arith.constant 0 : index
    %c2 = arith.constant 2 : index
    %c0_14 = arith.constant 0 : index
    %17 = vector.load %arg2[%c0_13, %c2, %c0_14] : memref<1x328x128xf32, #tpu.memory_space<vmem>>, vector<1x288x128xf32>
    %18 = vector.shape_cast %17 : vector<1x288x128xf32> to vector<288x128xf32>
    %19 = arith.truncf %18 : vector<288x128xf32> to vector<288x128xbf16>
    %c2_15 = arith.constant 2 : index
    %c0_16 = arith.constant 0 : index
    %c0_17 = arith.constant 0 : index
    %20 = vector.load %arg4[%c2_15, %c0_16, %c0_17] : memref<18x128x128xbf16, #tpu.memory_space<vmem>>, vector<1x128x128xbf16>
    %21 = vector.shape_cast %20 : vector<1x128x128xbf16> to vector<128x128xbf16>
    %cst_18 = arith.constant dense<0.000000e+00> : vector<288x128xf32>
    %22 = tpu.matmul %19, %21, %cst_18 {dimension_numbers = #tpu.dot_dimension_numbers<[1], [0], [0], [1], [0, 0, 1, 1], [], []>} : vector<288x128xbf16>, vector<128x128xbf16>, vector<288x128xf32> -> vector<288x128xf32>
    %23 = arith.addf %16, %22 : vector<288x128xf32>
    %c0_19 = arith.constant 0 : index
    %c18 = arith.constant 18 : index
    %c0_20 = arith.constant 0 : index
    %24 = vector.load %arg2[%c0_19, %c18, %c0_20] : memref<1x328x128xf32, #tpu.memory_space<vmem>>, vector<1x288x128xf32>
    %25 = vector.shape_cast %24 : vector<1x288x128xf32> to vector<288x128xf32>
    %26 = arith.truncf %25 : vector<288x128xf32> to vector<288x128xbf16>
    %c3 = arith.constant 3 : index
    %c0_21 = arith.constant 0 : index
    %c0_22 = arith.constant 0 : index
    %27 = vector.load %arg4[%c3, %c0_21, %c0_22] : memref<18x128x128xbf16, #tpu.memory_space<vmem>>, vector<1x128x128xbf16>
    %28 = vector.shape_cast %27 : vector<1x128x128xbf16> to vector<128x128xbf16>
    %cst_23 = arith.constant dense<0.000000e+00> : vector<288x128xf32>
    %29 = tpu.matmul %26, %28, %cst_23 {dimension_numbers = #tpu.dot_dimension_numbers<[1], [0], [0], [1], [0, 0, 1, 1], [], []>} : vector<288x128xbf16>, vector<128x128xbf16>, vector<288x128xf32> -> vector<288x128xf32>
    %30 = arith.addf %23, %29 : vector<288x128xf32>
    %c0_24 = arith.constant 0 : index
    %c19 = arith.constant 19 : index
    %c0_25 = arith.constant 0 : index
    %31 = vector.load %arg2[%c0_24, %c19, %c0_25] : memref<1x328x128xf32, #tpu.memory_space<vmem>>, vector<1x288x128xf32>
    %32 = vector.shape_cast %31 : vector<1x288x128xf32> to vector<288x128xf32>
    %33 = arith.truncf %32 : vector<288x128xf32> to vector<288x128xbf16>
    %c4 = arith.constant 4 : index
    %c0_26 = arith.constant 0 : index
    %c0_27 = arith.constant 0 : index
    %34 = vector.load %arg4[%c4, %c0_26, %c0_27] : memref<18x128x128xbf16, #tpu.memory_space<vmem>>, vector<1x128x128xbf16>
    %35 = vector.shape_cast %34 : vector<1x128x128xbf16> to vector<128x128xbf16>
    %cst_28 = arith.constant dense<0.000000e+00> : vector<288x128xf32>
    %36 = tpu.matmul %33, %35, %cst_28 {dimension_numbers = #tpu.dot_dimension_numbers<[1], [0], [0], [1], [0, 0, 1, 1], [], []>} : vector<288x128xbf16>, vector<128x128xbf16>, vector<288x128xf32> -> vector<288x128xf32>
    %37 = arith.addf %30, %36 : vector<288x128xf32>
    %c0_29 = arith.constant 0 : index
    %c20 = arith.constant 20 : index
    %c0_30 = arith.constant 0 : index
    %38 = vector.load %arg2[%c0_29, %c20, %c0_30] : memref<1x328x128xf32, #tpu.memory_space<vmem>>, vector<1x288x128xf32>
    %39 = vector.shape_cast %38 : vector<1x288x128xf32> to vector<288x128xf32>
    %40 = arith.truncf %39 : vector<288x128xf32> to vector<288x128xbf16>
    %c5 = arith.constant 5 : index
    %c0_31 = arith.constant 0 : index
    %c0_32 = arith.constant 0 : index
    %41 = vector.load %arg4[%c5, %c0_31, %c0_32] : memref<18x128x128xbf16, #tpu.memory_space<vmem>>, vector<1x128x128xbf16>
    %42 = vector.shape_cast %41 : vector<1x128x128xbf16> to vector<128x128xbf16>
    %cst_33 = arith.constant dense<0.000000e+00> : vector<288x128xf32>
    %43 = tpu.matmul %40, %42, %cst_33 {dimension_numbers = #tpu.dot_dimension_numbers<[1], [0], [0], [1], [0, 0, 1, 1], [], []>} : vector<288x128xbf16>, vector<128x128xbf16>, vector<288x128xf32> -> vector<288x128xf32>
    %44 = arith.addf %37, %43 : vector<288x128xf32>
    %c0_34 = arith.constant 0 : index
    %c36 = arith.constant 36 : index
    %c0_35 = arith.constant 0 : index
    %45 = vector.load %arg2[%c0_34, %c36, %c0_35] : memref<1x328x128xf32, #tpu.memory_space<vmem>>, vector<1x288x128xf32>
    %46 = vector.shape_cast %45 : vector<1x288x128xf32> to vector<288x128xf32>
    %47 = arith.truncf %46 : vector<288x128xf32> to vector<288x128xbf16>
    %c6 = arith.constant 6 : index
    %c0_36 = arith.constant 0 : index
    %c0_37 = arith.constant 0 : index
    %48 = vector.load %arg4[%c6, %c0_36, %c0_37] : memref<18x128x128xbf16, #tpu.memory_space<vmem>>, vector<1x128x128xbf16>
    %49 = vector.shape_cast %48 : vector<1x128x128xbf16> to vector<128x128xbf16>
    %cst_38 = arith.constant dense<0.000000e+00> : vector<288x128xf32>
    %50 = tpu.matmul %47, %49, %cst_38 {dimension_numbers = #tpu.dot_dimension_numbers<[1], [0], [0], [1], [0, 0, 1, 1], [], []>} : vector<288x128xbf16>, vector<128x128xbf16>, vector<288x128xf32> -> vector<288x128xf32>
    %51 = arith.addf %44, %50 : vector<288x128xf32>
    %c0_39 = arith.constant 0 : index
    %c37 = arith.constant 37 : index
    %c0_40 = arith.constant 0 : index
    %52 = vector.load %arg2[%c0_39, %c37, %c0_40] : memref<1x328x128xf32, #tpu.memory_space<vmem>>, vector<1x288x128xf32>
    %53 = vector.shape_cast %52 : vector<1x288x128xf32> to vector<288x128xf32>
    %54 = arith.truncf %53 : vector<288x128xf32> to vector<288x128xbf16>
    %c7 = arith.constant 7 : index
    %c0_41 = arith.constant 0 : index
    %c0_42 = arith.constant 0 : index
    %55 = vector.load %arg4[%c7, %c0_41, %c0_42] : memref<18x128x128xbf16, #tpu.memory_space<vmem>>, vector<1x128x128xbf16>
    %56 = vector.shape_cast %55 : vector<1x128x128xbf16> to vector<128x128xbf16>
    %cst_43 = arith.constant dense<0.000000e+00> : vector<288x128xf32>
    %57 = tpu.matmul %54, %56, %cst_43 {dimension_numbers = #tpu.dot_dimension_numbers<[1], [0], [0], [1], [0, 0, 1, 1], [], []>} : vector<288x128xbf16>, vector<128x128xbf16>, vector<288x128xf32> -> vector<288x128xf32>
    %58 = arith.addf %51, %57 : vector<288x128xf32>
    %c0_44 = arith.constant 0 : index
    %c38 = arith.constant 38 : index
    %c0_45 = arith.constant 0 : index
    %59 = vector.load %arg2[%c0_44, %c38, %c0_45] : memref<1x328x128xf32, #tpu.memory_space<vmem>>, vector<1x288x128xf32>
    %60 = vector.shape_cast %59 : vector<1x288x128xf32> to vector<288x128xf32>
    %61 = arith.truncf %60 : vector<288x128xf32> to vector<288x128xbf16>
    %c8 = arith.constant 8 : index
    %c0_46 = arith.constant 0 : index
    %c0_47 = arith.constant 0 : index
    %62 = vector.load %arg4[%c8, %c0_46, %c0_47] : memref<18x128x128xbf16, #tpu.memory_space<vmem>>, vector<1x128x128xbf16>
    %63 = vector.shape_cast %62 : vector<1x128x128xbf16> to vector<128x128xbf16>
    %cst_48 = arith.constant dense<0.000000e+00> : vector<288x128xf32>
    %64 = tpu.matmul %61, %63, %cst_48 {dimension_numbers = #tpu.dot_dimension_numbers<[1], [0], [0], [1], [0, 0, 1, 1], [], []>} : vector<288x128xbf16>, vector<128x128xbf16>, vector<288x128xf32> -> vector<288x128xf32>
    %65 = arith.addf %58, %64 : vector<288x128xf32>
    %c0_49 = arith.constant 0 : index
    %c0_50 = arith.constant 0 : index
    %c0_51 = arith.constant 0 : index
    %66 = vector.load %arg3[%c0_49, %c0_50, %c0_51] : memref<1x328x128xf32, #tpu.memory_space<vmem>>, vector<1x288x128xf32>
    %67 = vector.shape_cast %66 : vector<1x288x128xf32> to vector<288x128xf32>
    %68 = arith.truncf %67 : vector<288x128xf32> to vector<288x128xbf16>
    %c9 = arith.constant 9 : index
    %c0_52 = arith.constant 0 : index
    %c0_53 = arith.constant 0 : index
    %69 = vector.load %arg4[%c9, %c0_52, %c0_53] : memref<18x128x128xbf16, #tpu.memory_space<vmem>>, vector<1x128x128xbf16>
    %70 = vector.shape_cast %69 : vector<1x128x128xbf16> to vector<128x128xbf16>
    %cst_54 = arith.constant dense<0.000000e+00> : vector<288x128xf32>
    %71 = tpu.matmul %68, %70, %cst_54 {dimension_numbers = #tpu.dot_dimension_numbers<[1], [0], [0], [1], [0, 0, 1, 1], [], []>} : vector<288x128xbf16>, vector<128x128xbf16>, vector<288x128xf32> -> vector<288x128xf32>
    %72 = arith.addf %65, %71 : vector<288x128xf32>
    %c0_55 = arith.constant 0 : index
    %c1_56 = arith.constant 1 : index
    %c0_57 = arith.constant 0 : index
    %73 = vector.load %arg3[%c0_55, %c1_56, %c0_57] : memref<1x328x128xf32, #tpu.memory_space<vmem>>, vector<1x288x128xf32>
    %74 = vector.shape_cast %73 : vector<1x288x128xf32> to vector<288x128xf32>
    %75 = arith.truncf %74 : vector<288x128xf32> to vector<288x128xbf16>
    %c10 = arith.constant 10 : index
    %c0_58 = arith.constant 0 : index
    %c0_59 = arith.constant 0 : index
    %76 = vector.load %arg4[%c10, %c0_58, %c0_59] : memref<18x128x128xbf16, #tpu.memory_space<vmem>>, vector<1x128x128xbf16>
    %77 = vector.shape_cast %76 : vector<1x128x128xbf16> to vector<128x128xbf16>
    %cst_60 = arith.constant dense<0.000000e+00> : vector<288x128xf32>
    %78 = tpu.matmul %75, %77, %cst_60 {dimension_numbers = #tpu.dot_dimension_numbers<[1], [0], [0], [1], [0, 0, 1, 1], [], []>} : vector<288x128xbf16>, vector<128x128xbf16>, vector<288x128xf32> -> vector<288x128xf32>
    %79 = arith.addf %72, %78 : vector<288x128xf32>
    %c0_61 = arith.constant 0 : index
    %c2_62 = arith.constant 2 : index
    %c0_63 = arith.constant 0 : index
    %80 = vector.load %arg3[%c0_61, %c2_62, %c0_63] : memref<1x328x128xf32, #tpu.memory_space<vmem>>, vector<1x288x128xf32>
    %81 = vector.shape_cast %80 : vector<1x288x128xf32> to vector<288x128xf32>
    %82 = arith.truncf %81 : vector<288x128xf32> to vector<288x128xbf16>
    %c11 = arith.constant 11 : index
    %c0_64 = arith.constant 0 : index
    %c0_65 = arith.constant 0 : index
    %83 = vector.load %arg4[%c11, %c0_64, %c0_65] : memref<18x128x128xbf16, #tpu.memory_space<vmem>>, vector<1x128x128xbf16>
    %84 = vector.shape_cast %83 : vector<1x128x128xbf16> to vector<128x128xbf16>
    %cst_66 = arith.constant dense<0.000000e+00> : vector<288x128xf32>
    %85 = tpu.matmul %82, %84, %cst_66 {dimension_numbers = #tpu.dot_dimension_numbers<[1], [0], [0], [1], [0, 0, 1, 1], [], []>} : vector<288x128xbf16>, vector<128x128xbf16>, vector<288x128xf32> -> vector<288x128xf32>
    %86 = arith.addf %79, %85 : vector<288x128xf32>
    %c0_67 = arith.constant 0 : index
    %c18_68 = arith.constant 18 : index
    %c0_69 = arith.constant 0 : index
    %87 = vector.load %arg3[%c0_67, %c18_68, %c0_69] : memref<1x328x128xf32, #tpu.memory_space<vmem>>, vector<1x288x128xf32>
    %88 = vector.shape_cast %87 : vector<1x288x128xf32> to vector<288x128xf32>
    %89 = arith.truncf %88 : vector<288x128xf32> to vector<288x128xbf16>
    %c12 = arith.constant 12 : index
    %c0_70 = arith.constant 0 : index
    %c0_71 = arith.constant 0 : index
    %90 = vector.load %arg4[%c12, %c0_70, %c0_71] : memref<18x128x128xbf16, #tpu.memory_space<vmem>>, vector<1x128x128xbf16>
    %91 = vector.shape_cast %90 : vector<1x128x128xbf16> to vector<128x128xbf16>
    %cst_72 = arith.constant dense<0.000000e+00> : vector<288x128xf32>
    %92 = tpu.matmul %89, %91, %cst_72 {dimension_numbers = #tpu.dot_dimension_numbers<[1], [0], [0], [1], [0, 0, 1, 1], [], []>} : vector<288x128xbf16>, vector<128x128xbf16>, vector<288x128xf32> -> vector<288x128xf32>
    %93 = arith.addf %86, %92 : vector<288x128xf32>
    %c0_73 = arith.constant 0 : index
    %c19_74 = arith.constant 19 : index
    %c0_75 = arith.constant 0 : index
    %94 = vector.load %arg3[%c0_73, %c19_74, %c0_75] : memref<1x328x128xf32, #tpu.memory_space<vmem>>, vector<1x288x128xf32>
    %95 = vector.shape_cast %94 : vector<1x288x128xf32> to vector<288x128xf32>
    %96 = arith.truncf %95 : vector<288x128xf32> to vector<288x128xbf16>
    %c13 = arith.constant 13 : index
    %c0_76 = arith.constant 0 : index
    %c0_77 = arith.constant 0 : index
    %97 = vector.load %arg4[%c13, %c0_76, %c0_77] : memref<18x128x128xbf16, #tpu.memory_space<vmem>>, vector<1x128x128xbf16>
    %98 = vector.shape_cast %97 : vector<1x128x128xbf16> to vector<128x128xbf16>
    %cst_78 = arith.constant dense<0.000000e+00> : vector<288x128xf32>
    %99 = tpu.matmul %96, %98, %cst_78 {dimension_numbers = #tpu.dot_dimension_numbers<[1], [0], [0], [1], [0, 0, 1, 1], [], []>} : vector<288x128xbf16>, vector<128x128xbf16>, vector<288x128xf32> -> vector<288x128xf32>
    %100 = arith.addf %93, %99 : vector<288x128xf32>
    %c0_79 = arith.constant 0 : index
    %c20_80 = arith.constant 20 : index
    %c0_81 = arith.constant 0 : index
    %101 = vector.load %arg3[%c0_79, %c20_80, %c0_81] : memref<1x328x128xf32, #tpu.memory_space<vmem>>, vector<1x288x128xf32>
    %102 = vector.shape_cast %101 : vector<1x288x128xf32> to vector<288x128xf32>
    %103 = arith.truncf %102 : vector<288x128xf32> to vector<288x128xbf16>
    %c14 = arith.constant 14 : index
    %c0_82 = arith.constant 0 : index
    %c0_83 = arith.constant 0 : index
    %104 = vector.load %arg4[%c14, %c0_82, %c0_83] : memref<18x128x128xbf16, #tpu.memory_space<vmem>>, vector<1x128x128xbf16>
    %105 = vector.shape_cast %104 : vector<1x128x128xbf16> to vector<128x128xbf16>
    %cst_84 = arith.constant dense<0.000000e+00> : vector<288x128xf32>
    %106 = tpu.matmul %103, %105, %cst_84 {dimension_numbers = #tpu.dot_dimension_numbers<[1], [0], [0], [1], [0, 0, 1, 1], [], []>} : vector<288x128xbf16>, vector<128x128xbf16>, vector<288x128xf32> -> vector<288x128xf32>
    %107 = arith.addf %100, %106 : vector<288x128xf32>
    %c0_85 = arith.constant 0 : index
    %c36_86 = arith.constant 36 : index
    %c0_87 = arith.constant 0 : index
    %108 = vector.load %arg3[%c0_85, %c36_86, %c0_87] : memref<1x328x128xf32, #tpu.memory_space<vmem>>, vector<1x288x128xf32>
    %109 = vector.shape_cast %108 : vector<1x288x128xf32> to vector<288x128xf32>
    %110 = arith.truncf %109 : vector<288x128xf32> to vector<288x128xbf16>
    %c15 = arith.constant 15 : index
    %c0_88 = arith.constant 0 : index
    %c0_89 = arith.constant 0 : index
    %111 = vector.load %arg4[%c15, %c0_88, %c0_89] : memref<18x128x128xbf16, #tpu.memory_space<vmem>>, vector<1x128x128xbf16>
    %112 = vector.shape_cast %111 : vector<1x128x128xbf16> to vector<128x128xbf16>
    %cst_90 = arith.constant dense<0.000000e+00> : vector<288x128xf32>
    %113 = tpu.matmul %110, %112, %cst_90 {dimension_numbers = #tpu.dot_dimension_numbers<[1], [0], [0], [1], [0, 0, 1, 1], [], []>} : vector<288x128xbf16>, vector<128x128xbf16>, vector<288x128xf32> -> vector<288x128xf32>
    %114 = arith.addf %107, %113 : vector<288x128xf32>
    %c0_91 = arith.constant 0 : index
    %c37_92 = arith.constant 37 : index
    %c0_93 = arith.constant 0 : index
    %115 = vector.load %arg3[%c0_91, %c37_92, %c0_93] : memref<1x328x128xf32, #tpu.memory_space<vmem>>, vector<1x288x128xf32>
    %116 = vector.shape_cast %115 : vector<1x288x128xf32> to vector<288x128xf32>
    %117 = arith.truncf %116 : vector<288x128xf32> to vector<288x128xbf16>
    %c16 = arith.constant 16 : index
    %c0_94 = arith.constant 0 : index
    %c0_95 = arith.constant 0 : index
    %118 = vector.load %arg4[%c16, %c0_94, %c0_95] : memref<18x128x128xbf16, #tpu.memory_space<vmem>>, vector<1x128x128xbf16>
    %119 = vector.shape_cast %118 : vector<1x128x128xbf16> to vector<128x128xbf16>
    %cst_96 = arith.constant dense<0.000000e+00> : vector<288x128xf32>
    %120 = tpu.matmul %117, %119, %cst_96 {dimension_numbers = #tpu.dot_dimension_numbers<[1], [0], [0], [1], [0, 0, 1, 1], [], []>} : vector<288x128xbf16>, vector<128x128xbf16>, vector<288x128xf32> -> vector<288x128xf32>
    %121 = arith.addf %114, %120 : vector<288x128xf32>
    %c0_97 = arith.constant 0 : index
    %c38_98 = arith.constant 38 : index
    %c0_99 = arith.constant 0 : index
    %122 = vector.load %arg3[%c0_97, %c38_98, %c0_99] : memref<1x328x128xf32, #tpu.memory_space<vmem>>, vector<1x288x128xf32>
    %123 = vector.shape_cast %122 : vector<1x288x128xf32> to vector<288x128xf32>
    %124 = arith.truncf %123 : vector<288x128xf32> to vector<288x128xbf16>
    %c17 = arith.constant 17 : index
    %c0_100 = arith.constant 0 : index
    %c0_101 = arith.constant 0 : index
    %125 = vector.load %arg4[%c17, %c0_100, %c0_101] : memref<18x128x128xbf16, #tpu.memory_space<vmem>>, vector<1x128x128xbf16>
    %126 = vector.shape_cast %125 : vector<1x128x128xbf16> to vector<128x128xbf16>
    %cst_102 = arith.constant dense<0.000000e+00> : vector<288x128xf32>
    %127 = tpu.matmul %124, %126, %cst_102 {dimension_numbers = #tpu.dot_dimension_numbers<[1], [0], [0], [1], [0, 0, 1, 1], [], []>} : vector<288x128xbf16>, vector<128x128xbf16>, vector<288x128xf32> -> vector<288x128xf32>
    %128 = arith.addf %121, %127 : vector<288x128xf32>
    %cst_103 = arith.constant 0.000000e+00 : f32
    %129 = vector.broadcast %cst_103 : f32 to vector<288x128xf32>
    %130 = arith.maximumf %128, %129 : vector<288x128xf32>
    %131 = arith.truncf %130 : vector<288x128xf32> to vector<288x128xbf16>
    %c0_104 = arith.constant 0 : index
    %c0_105 = arith.constant 0 : index
    %c0_106 = arith.constant 0 : index
    %132 = vector.load %arg6[%c0_104, %c0_105, %c0_106] : memref<1x288x128xbf16, #tpu.memory_space<vmem>>, vector<1x288x128xbf16>
    %133 = vector.shape_cast %132 : vector<1x288x128xbf16> to vector<288x128xbf16>
    %134 = vector.shape_cast %131 : vector<288x128xbf16> to vector<1x288x128xbf16>
    tpu.vector_store %arg6[%c0_104, %c0_105, %c0_106], %134 {strides = array<i32>} : memref<1x288x128xbf16, #tpu.memory_space<vmem>>, vector<1x288x128xbf16>,
    return
  }
  func.func @transform_0(%arg0: i32, %arg1: i32) -> (i32, i32, i32) {
    %c0_i32 = arith.constant 0 : i32
    %c0_i32_0 = arith.constant 0 : i32
    %c0_i32_1 = arith.constant 0 : i32
    return %arg0, %c0_i32, %c0_i32_0 : i32, i32, i32
  }
  func.func @transform_1(%arg0: i32, %arg1: i32) -> (i32, i32, i32) {
    %c0_i32 = arith.constant 0 : i32
    %c0_i32_0 = arith.constant 0 : i32
    %c0_i32_1 = arith.constant 0 : i32
    return %arg0, %c0_i32, %c0_i32_0 : i32, i32, i32
  }
  func.func @transform_2(%arg0: i32, %arg1: i32) -> (i32, i32, i32) {
    %c0_i32 = arith.constant 0 : i32
    %c0_i32_0 = arith.constant 0 : i32
    %c0_i32_1 = arith.constant 0 : i32
    return %c0_i32, %c0_i32_0, %arg1 : i32, i32, i32
  }
  func.func @transform_3(%arg0: i32, %arg1: i32) -> (i32, i32) {
    %c0_i32 = arith.constant 0 : i32
    %c0_i32_0 = arith.constant 0 : i32
    return %c0_i32, %arg1 : i32, i32
  }
  func.func @transform_4(%arg0: i32, %arg1: i32) -> (i32, i32, i32) {
    %c0_i32 = arith.constant 0 : i32
    %c0_i32_0 = arith.constant 0 : i32
    return %arg0, %c0_i32, %arg1 : i32, i32, i32
  }
}

module attributes {stable_mosaic.version = 11 : i64} {
  func.func @_matmul_kernel(%arg0: i32, %arg1: i32, %arg2: i32, %arg3: memref<128x128xbf16, #tpu.memory_space<vmem>>, %arg4: memref<128x128xbf16, #tpu.memory_space<vmem>>, %arg5: memref<1x128xf32, #tpu.memory_space<vmem>>, %arg6: memref<128x128xbf16, #tpu.memory_space<vmem>>, %arg7: memref<128x128xf32, #tpu.memory_space<vmem>>) attributes {dimension_semantics = [#tpu.dimension_semantics<parallel>, #tpu.dimension_semantics<parallel>, #tpu.dimension_semantics<arbitrary>], iteration_bounds = array<i64: 4, 1, 1>, scalar_prefetch = 0 : i64, scratch_operands = 1 : i64, tpu.core_type = #tpu.core_type<tc>, window_params = [{transform_indices = @transform_0, window_bounds = array<i64: 128, 128>}, {transform_indices = @transform_1, window_bounds = array<i64: 128, 128>}, {transform_indices = @transform_2, window_bounds = array<i64: 1, 128>}, {transform_indices = @transform_3, window_bounds = array<i64: 128, 128>}]} {
    %c0_i32 = arith.constant 0 : i32
    %0 = arith.cmpi eq, %arg2, %c0_i32 : i32
    %1 = arith.extui %0 : i1 to i32
    %c0_i32_0 = arith.constant 0 : i32
    %2 = arith.cmpi ne, %1, %c0_i32_0 : i32
    scf.if %2 {
      %cst_10 = arith.constant 0.000000e+00 : f32
      %12 = vector.broadcast %cst_10 : f32 to vector<128x128xf32>
      %c0_11 = arith.constant 0 : index
      %c0_12 = arith.constant 0 : index
      %13 = vector.load %arg7[%c0_11, %c0_12] : memref<128x128xf32, #tpu.memory_space<vmem>>, vector<128x128xf32>
      tpu.vector_store %arg7[%c0_11, %c0_12], %12 {strides = array<i32>} : memref<128x128xf32, #tpu.memory_space<vmem>>, vector<128x128xf32>,
    } else {
    }
    %c0 = arith.constant 0 : index
    %c0_1 = arith.constant 0 : index
    %3 = vector.load %arg7[%c0, %c0_1] : memref<128x128xf32, #tpu.memory_space<vmem>>, vector<128x128xf32>
    %c0_2 = arith.constant 0 : index
    %c0_3 = arith.constant 0 : index
    %4 = vector.load %arg3[%c0_2, %c0_3] : memref<128x128xbf16, #tpu.memory_space<vmem>>, vector<128x128xbf16>
    %c0_4 = arith.constant 0 : index
    %c0_5 = arith.constant 0 : index
    %5 = vector.load %arg4[%c0_4, %c0_5] : memref<128x128xbf16, #tpu.memory_space<vmem>>, vector<128x128xbf16>
    %cst = arith.constant dense<0.000000e+00> : vector<128x128xf32>
    %6 = tpu.matmul %4, %5, %cst {dimension_numbers = #tpu.dot_dimension_numbers<[1], [0], [0], [1], [0, 0, 1, 1], [], []>} : vector<128x128xbf16>, vector<128x128xbf16>, vector<128x128xf32> -> vector<128x128xf32>
    %7 = arith.addf %3, %6 : vector<128x128xf32>
    %c0_6 = arith.constant 0 : index
    %c0_7 = arith.constant 0 : index
    %8 = vector.load %arg7[%c0_6, %c0_7] : memref<128x128xf32, #tpu.memory_space<vmem>>, vector<128x128xf32>
    tpu.vector_store %arg7[%c0_6, %c0_7], %7 {strides = array<i32>} : memref<128x128xf32, #tpu.memory_space<vmem>>, vector<128x128xf32>,
    %c0_i32_8 = arith.constant 0 : i32
    %9 = arith.cmpi eq, %arg2, %c0_i32_8 : i32
    %10 = arith.extui %9 : i1 to i32
    %c0_i32_9 = arith.constant 0 : i32
    %11 = arith.cmpi ne, %10, %c0_i32_9 : i32
    scf.if %11 {
      %c0_10 = arith.constant 0 : index
      %c0_11 = arith.constant 0 : index
      %12 = vector.load %arg7[%c0_10, %c0_11] : memref<128x128xf32, #tpu.memory_space<vmem>>, vector<128x128xf32>
      %c0_12 = arith.constant 0 : index
      %c0_13 = arith.constant 0 : index
      %13 = vector.load %arg5[%c0_12, %c0_13] : memref<1x128xf32, #tpu.memory_space<vmem>>, vector<1x128xf32>
      %14 = vector.broadcast %13 : vector<1x128xf32> to vector<128x128xf32>
      %15 = arith.addf %12, %14 : vector<128x128xf32>
      %16 = arith.truncf %15 : vector<128x128xf32> to vector<128x128xbf16>
      %c0_14 = arith.constant 0 : index
      %c0_15 = arith.constant 0 : index
      %17 = vector.load %arg6[%c0_14, %c0_15] : memref<128x128xbf16, #tpu.memory_space<vmem>>, vector<128x128xbf16>
      tpu.vector_store %arg6[%c0_14, %c0_15], %16 {strides = array<i32>} : memref<128x128xbf16, #tpu.memory_space<vmem>>, vector<128x128xbf16>,
    } else {
    }
    return
  }
  func.func @transform_0(%arg0: i32, %arg1: i32, %arg2: i32) -> (i32, i32) {
    %c0_i32 = arith.constant 0 : i32
    return %arg0, %arg2 : i32, i32
  }
  func.func @transform_1(%arg0: i32, %arg1: i32, %arg2: i32) -> (i32, i32) {
    %c0_i32 = arith.constant 0 : i32
    return %arg2, %arg1 : i32, i32
  }
  func.func @transform_2(%arg0: i32, %arg1: i32, %arg2: i32) -> (i32, i32) {
    %c0_i32 = arith.constant 0 : i32
    %c0_i32_0 = arith.constant 0 : i32
    return %c0_i32, %arg1 : i32, i32
  }
  func.func @transform_3(%arg0: i32, %arg1: i32, %arg2: i32) -> (i32, i32) {
    %c0_i32 = arith.constant 0 : i32
    return %arg0, %arg1 : i32, i32
  }
}

</mosaic_0001>

<bundles_post_ra>
// kernel: unet_mmd_forward.17
= control target key start
LH: loop header
LB: loop body
LE: loop exit
PB: predicated region body
PF: predicated region fallthrough
CT: control target
= control target key end

     0   :  { %s445_s0 = inlined_call_operand.vmem [shape: bf16[128,128], index: 0, kind: input, shape index: {}]   ;;  %s446_s1 = inlined_call_operand.vmem [shape: bf16[128,128], index: 1, kind: input, shape index: {}]   ;;  %s447_s2 = inlined_call_operand.vmem [shape: bf16[128,128], index: 2, kind: input, shape index: {}]   ;;  %s448_s3 = inlined_call_operand.vmem [shape: bf16[128,128], index: 3, kind: input, shape index: {}]   ;;  %s449_s4 = inlined_call_operand.vmem [shape: bf16[128,128], index: 4, kind: output, shape index: {}]  }
   0x1   :  { %v17_v0 = vld [vmem:[%s445_s0] sm:$0xf]  ;;  %v18_v1 = vld [vmem:[%s445_s0 + $0x4] sm:$0xf]  ;;  %v19_v10 = vld [vmem:[%s445_s0 + $0x8] sm:$0xf] }
   0x2   :  { %v33_v2 = vld [vmem:[%s446_s1] sm:$0xf]  ;;  %v34_v3 = vld [vmem:[%s446_s1 + $0x4] sm:$0xf]  ;;  %v20_v13 = vld [vmem:[%s445_s0 + $0xc] sm:$0xf] }
   0x3   :  { %v49_v4 = vmax.bf16 %v33_v2, %v17_v0  ;;  %v65_v5 = vld [vmem:[%s447_s2] sm:$0xf]  ;;  %v66_v6 = vld [vmem:[%s447_s2 + $0x4] sm:$0xf]  ;;  %v50_v7 = vmax.bf16 %v34_v3, %v18_v1  ;;  %v35_v14 = vld [vmem:[%s446_s1 + $0x8] sm:$0xf] }
   0x4   :  { %v81_v8 = vld [vmem:[%s448_s3] sm:$0xf]  ;;  %v82_v9 = vld [vmem:[%s448_s3 + $0x4] sm:$0xf]  ;;  %v36_v15 = vld [vmem:[%s446_s1 + $0xc] sm:$0xf]  ;;  %v51_v16 = vmax.bf16 %v35_v14, %v19_v10 }
   0x5   :  { %v97_v11 = vmax.bf16 %v81_v8, %v65_v5  ;;  %v98_v12 = vmax.bf16 %v82_v9, %v66_v6  ;;  %v52_v17 = vmax.bf16 %v36_v15, %v20_v13  ;;  %v67_v18 = vld [vmem:[%s447_s2 + $0x8] sm:$0xf]  ;;  %v68_v19 = vld [vmem:[%s447_s2 + $0xc] sm:$0xf]  ;;  %v21_v25 = vld [vmem:[%s445_s0 + $0x10] sm:$0xf] }
   0x6   :  { %v83_v20 = vld [vmem:[%s448_s3 + $0x8] sm:$0xf]  ;;  %v84_v23 = vld [vmem:[%s448_s3 + $0xc] sm:$0xf]  ;;  %v22_v26 = vld [vmem:[%s445_s0 + $0x14] sm:$0xf] }
   0x7   :  { %v113_v21 = vmax.bf16 %v97_v11, %v49_v4  ;;  %v114_v22 = vmax.bf16 %v98_v12, %v50_v7  ;;  %v99_v24 = vmax.bf16 %v83_v20, %v67_v18  ;;  %v100_v27 = vmax.bf16 %v84_v23, %v68_v19  ;;  %v37_v28 = vld [vmem:[%s446_s1 + $0x10] sm:$0xf]  ;;  %v38_v29 = vld [vmem:[%s446_s1 + $0x14] sm:$0xf]  ;;  %v23_v41 = vld [vmem:[%s445_s0 + $0x18] sm:$0xf] }
   0x8   :  { %v69_v30 = vld [vmem:[%s447_s2 + $0x10] sm:$0xf]  ;;  %v53_v33 = vmax.bf16 %v37_v28, %v21_v25  ;;  %v54_v34 = vmax.bf16 %v38_v29, %v22_v26  ;;  %v70_v35 = vld [vmem:[%s447_s2 + $0x14] sm:$0xf]  ;;  %v24_v42 = vld [vmem:[%s445_s0 + $0x1c] sm:$0xf] }
   0x9   :  { %v189_v31 = vcombine.low %v113_v21, %v114_v22  ;;  %v115_v32 = vmax.bf16 %v99_v24, %v51_v16  ;;  %v85_v36 = vld [vmem:[%s448_s3 + $0x10] sm:$0xf]  ;;  %v86_v37 = vld [vmem:[%s448_s3 + $0x14] sm:$0xf]  ;;  %v116_v38 = vmax.bf16 %v100_v27, %v52_v17  ;;  %v39_v43 = vld [vmem:[%s446_s1 + $0x18] sm:$0xf] }
   0xa   :  { %v101_v39 = vmax.bf16 %v85_v36, %v69_v30  ;;  %v102_v40 = vmax.bf16 %v86_v37, %v70_v35  ;;  %v40_v44 = vld [vmem:[%s446_s1 + $0x1c] sm:$0xf]  ;;  %v55_v45 = vmax.bf16 %v39_v43, %v23_v41  ;;  %v71_v46 = vld [vmem:[%s447_s2 + $0x18] sm:$0xf]  ;;  %v25_v54 = vld [vmem:[%s445_s0 + $0x20] sm:$0xf] }
   0xb   :  { %153 = vst [vmem:[%s449_s4] sm:$0xff] %v189_v31   ;;  %v72_v47 = vld [vmem:[%s447_s2 + $0x1c] sm:$0xf]  ;;  %v190_v48 = vcombine.low %v115_v32, %v116_v38  ;;  %v56_v51 = vmax.bf16 %v40_v44, %v24_v42  ;;  %v87_v52 = vld [vmem:[%s448_s3 + $0x18] sm:$0xf]  ;;  %v26_v57 = vld [vmem:[%s445_s0 + $0x24] sm:$0xf] }
   0xc   :  { %v117_v49 = vmax.bf16 %v101_v39, %v53_v33  ;;  %v118_v50 = vmax.bf16 %v102_v40, %v54_v34  ;;  %v88_v53 = vld [vmem:[%s448_s3 + $0x1c] sm:$0xf]  ;;  %v103_v55 = vmax.bf16 %v87_v52, %v71_v46  ;;  %v41_v58 = vld [vmem:[%s446_s1 + $0x20] sm:$0xf]  ;;  %v42_v59 = vld [vmem:[%s446_s1 + $0x24] sm:$0xf] }
   0xd   :  { %v104_v56 = vmax.bf16 %v88_v53, %v72_v47  ;;  %191 = vst [vmem:[%s449_s4 + $0x8] sm:$0xff] %v190_v48   ;;  %v57_v61 = vmax.bf16 %v41_v58, %v25_v54  ;;  %v58_v62 = vmax.bf16 %v42_v59, %v26_v57  ;;  %v73_v63 = vld [vmem:[%s447_s2 + $0x20] sm:$0xf]  ;;  %v74_v0 = vld [vmem:[%s447_s2 + $0x24] sm:$0xf] }
   0xe   :  { %v192_v60 = vcombine.low %v117_v49, %v118_v50  ;;  %v89_v1 = vld [vmem:[%s448_s3 + $0x20] sm:$0xf]  ;;  %v119_v2 = vmax.bf16 %v103_v55, %v55_v45  ;;  %v90_v4 = vld [vmem:[%s448_s3 + $0x24] sm:$0xf]  ;;  %v27_v6 = vld [vmem:[%s445_s0 + $0x28] sm:$0xf] }
   0xf   :  { %v120_v3 = vmax.bf16 %v104_v56, %v56_v51  ;;  %v105_v5 = vmax.bf16 %v89_v1, %v73_v63  ;;  %v28_v7 = vld [vmem:[%s445_s0 + $0x2c] sm:$0xf]  ;;  %v106_v8 = vmax.bf16 %v90_v4, %v74_v0  ;;  %v43_v9 = vld [vmem:[%s446_s1 + $0x28] sm:$0xf]  ;;  %v29_v22 = vld [vmem:[%s445_s0 + $0x30] sm:$0xf] }
  0x10   :  { %193 = vst [vmem:[%s449_s4 + $0x10] sm:$0xff] %v192_v60   ;;  %v44_v10 = vld [vmem:[%s446_s1 + $0x2c] sm:$0xf]  ;;  %v75_v11 = vld [vmem:[%s447_s2 + $0x28] sm:$0xf]  ;;  %v59_v14 = vmax.bf16 %v43_v9, %v27_v6 }
  0x11   :  { %v194_v12 = vcombine.low %v119_v2, %v120_v3  ;;  %v121_v13 = vmax.bf16 %v105_v5, %v57_v61  ;;  %v60_v15 = vmax.bf16 %v44_v10, %v28_v7  ;;  %v76_v16 = vld [vmem:[%s447_s2 + $0x2c] sm:$0xf]  ;;  %v91_v17 = vld [vmem:[%s448_s3 + $0x28] sm:$0xf]  ;;  %v122_v19 = vmax.bf16 %v106_v8, %v58_v62  ;;  %v30_v23 = vld [vmem:[%s445_s0 + $0x34] sm:$0xf] }
  0x12   :  { %v92_v18 = vld [vmem:[%s448_s3 + $0x2c] sm:$0xf]  ;;  %v107_v20 = vmax.bf16 %v91_v17, %v75_v11  ;;  %v45_v24 = vld [vmem:[%s446_s1 + $0x30] sm:$0xf]  ;;  %v46_v25 = vld [vmem:[%s446_s1 + $0x34] sm:$0xf] }
  0x13   :  { %v108_v21 = vmax.bf16 %v92_v18, %v76_v16  ;;  %195 = vst [vmem:[%s449_s4 + $0x18] sm:$0xff] %v194_v12   ;;  %v61_v26 = vmax.bf16 %v45_v24, %v29_v22  ;;  %v77_v27 = vld [vmem:[%s447_s2 + $0x30] sm:$0xf]  ;;  %v78_v28 = vld [vmem:[%s447_s2 + $0x34] sm:$0xf]  ;;  %v196_v29 = vcombine.low %v121_v13, %v122_v19  ;;  %v62_v32 = vmax.bf16 %v46_v25, %v30_v23 }
  0x14   :  { %v123_v30 = vmax.bf16 %v107_v20, %v59_v14  ;;  %v93_v33 = vld [vmem:[%s448_s3 + $0x30] sm:$0xf]  ;;  %v94_v34 = vld [vmem:[%s448_s3 + $0x34] sm:$0xf]  ;;  %v31_v35 = vld [vmem:[%s445_s0 + $0x38] sm:$0xf] }
  0x15   :  { %v124_v31 = vmax.bf16 %v108_v21, %v60_v15  ;;  %v109_v36 = vmax.bf16 %v93_v33, %v77_v27  ;;  %v110_v37 = vmax.bf16 %v94_v34, %v78_v28  ;;  %v32_v38 = vld [vmem:[%s445_s0 + $0x3c] sm:$0xf]  ;;  %v47_v39 = vld [vmem:[%s446_s1 + $0x38] sm:$0xf]  ;;  %197 = vst [vmem:[%s449_s4 + $0x20] sm:$0xff] %v196_v29  }
  0x16   :  { %v48_v40 = vld [vmem:[%s446_s1 + $0x3c] sm:$0xf]  ;;  %v63_v42 = vmax.bf16 %v47_v39, %v31_v35  ;;  %v79_v44 = vld [vmem:[%s447_s2 + $0x38] sm:$0xf] }
  0x17   :  { %v198_v41 = vcombine.low %v123_v30, %v124_v31  ;;  %v64_v43 = vmax.bf16 %v48_v40, %v32_v38  ;;  %v80_v45 = vld [vmem:[%s447_s2 + $0x3c] sm:$0xf]  ;;  %v95_v46 = vld [vmem:[%s448_s3 + $0x38] sm:$0xf]  ;;  %v125_v47 = vmax.bf16 %v109_v36, %v61_v26  ;;  %v126_v48 = vmax.bf16 %v110_v37, %v62_v32 }
  0x18   :  { %v96_v49 = vld [vmem:[%s448_s3 + $0x3c] sm:$0xf]  ;;  %v111_v50 = vmax.bf16 %v95_v46, %v79_v44 }
  0x19   :  { %199 = vst [vmem:[%s449_s4 + $0x28] sm:$0xff] %v198_v41   ;;  %v112_v51 = vmax.bf16 %v96_v49, %v80_v45  ;;  %v200_v52 = vcombine.low %v125_v47, %v126_v48 }
  0x1a   :  { %v127_v53 = vmax.bf16 %v111_v50, %v63_v42 }
  0x1b   :  { %v128_v54 = vmax.bf16 %v112_v51, %v64_v43  ;;  %201 = vst [vmem:[%s449_s4 + $0x30] sm:$0xff] %v200_v52  }
  0x1d   :  { %v202_v55 = vcombine.low %v127_v53, %v128_v54 }
  0x1f   :  { %203 = vst [vmem:[%s449_s4 + $0x38] sm:$0xff] %v202_v55  }

// kernel: unet_mmd_forward.15
= control target key start
LH: loop header
LB: loop body
LE: loop exit
PB: predicated region body
PF: predicated region fallthrough
CT: control target
= control target key end

     0   :  { %s5121_s12 = smov 0   ;;  %s5123_s13 = smov 0   ;;  %s5885_s0 = inlined_call_operand.vmem [shape: f32[2,328,128], index: 0, kind: input, shape index: {}]   ;;  %s5886_s1 = inlined_call_operand.vmem [shape: bf16[9,128,128], index: 1, kind: input, shape index: {}]   ;;  %s5887_s2 = inlined_call_operand.vmem [shape: f32[1,128], index: 2, kind: input, shape index: {}]   ;;  %s5888_s3 = inlined_call_operand.vmem [shape: bf16[2,288,128], index: 3, kind: output, shape index: {}]  }
   0x1   :  { %s5125_s14 = smov 0  }
   0x2 LB: > { %s25_s15 = sadd.s32 1, %s5095_s13  ;;  %p3544_p0 = scmp.ge.s32.totalorder %s5099_s14, 1  ;;  %s5099_s14 = sphi %s5125_s14, %s13_s14   ;;  %s5095_s13 = sphi %s5123_s13, %s5890_s13   ;;  %s5091_s12 = sphi %s5121_s12, %s5889_s12  }
   0x3   : > { %p27_p1 = scmp.ge.s32.totalorder %s25_s15, 2  ;;  %p168_p2 = scmp.lt.s32.totalorder %s5099_s14, 3 }
   0x5   : > { %s5892_s15 = smov (%p27_p1, %s25_s15), 0  ;;  %p169_p3 = pnand %p3544_p0, %p168_p2 }
   0x6   : > { %v4997_v0 = vld [vmem:[%s5886_s1] sm:$0xff] (!%p169_p3)   ;;  %p202_p4 = scmp.lt.s32.totalorder (!%p169_p3), %s5091_s12, 1  ;;  %v4999_v2 = vld [vmem:[%s5886_s1 + $0x8] sm:$0xff] (!%p169_p3)   ;;  %v5001_v4 = vld [vmem:[%s5886_s1 + $0x10] sm:$0xff] (!%p169_p3)  }
   0x7   : > { %172 = sbr.rel (%p169_p3) target bundleno = 583 (0x247), region = 32  ;;  %v4998_v1 = vld [vmem:[%s5886_s1 + $0x100] sm:$0xff] (!%p169_p3)   ;;  %4163 = vmatprep.subr.bf16.mxu1 (!%p169_p3), %v4997_v0  ;;  %v5000_v3 = vld [vmem:[%s5886_s1 + $0x108] sm:$0xff] (!%p169_p3)   ;;  %v5002_v5 = vld [vmem:[%s5886_s1 + $0x110] sm:$0xff] (!%p169_p3)  }
   0x8   : > { %4371 = vmatprep.subr.bf16.mxu0 (!%p169_p3), %v4998_v1  ;;  %4164 = vmatpush3.bf16.msra.mxu1 (!%p169_p3), %v4997_v0  ;;  %v5003_v6 = vld [vmem:[%s5886_s1 + $0x18] sm:$0xff] (!%p169_p3)   ;;  %v5005_v8 = vld [vmem:[%s5886_s1 + $0x20] sm:$0xff] (!%p169_p3)   ;;  %v5007_v10 = vld [vmem:[%s5886_s1 + $0x28] sm:$0xff] (!%p169_p3)  }
   0x9   : > { %4372 = vmatpush3.bf16.msra.mxu0 (!%p169_p3), %v4998_v1  ;;  %4165 = vmatprep.subr.bf16.mxu1 (!%p169_p3), %v4999_v2  ;;  %v5004_v7 = vld [vmem:[%s5886_s1 + $0x118] sm:$0xff] (!%p169_p3)   ;;  %v5006_v9 = vld [vmem:[%s5886_s1 + $0x120] sm:$0xff] (!%p169_p3)   ;;  %v5008_v14 = vld [vmem:[%s5886_s1 + $0x128] sm:$0xff] (!%p169_p3)  }
   0xa   : > { %4373 = vmatprep.subr.bf16.mxu0 (!%p169_p3), %v5000_v3  ;;  %v5009_v18 = vld [vmem:[%s5886_s1 + $0x30] sm:$0xff] (!%p169_p3)   ;;  %v5011_v20 = vld [vmem:[%s5886_s1 + $0x38] sm:$0xff] (!%p169_p3)   ;;  %v5013_v24 = vld [vmem:[%s5886_s1 + $0x40] sm:$0xff] (!%p169_p3)  }
   0xb   : > { %v5010_v19 = vld [vmem:[%s5886_s1 + $0x130] sm:$0xff] (!%p169_p3)   ;;  %v5012_v21 = vld [vmem:[%s5886_s1 + $0x138] sm:$0xff] (!%p169_p3)   ;;  %v5014_v27 = vld [vmem:[%s5886_s1 + $0x140] sm:$0xff] (!%p169_p3)  }
   0xc   : > { %4166 = vmatpush3.bf16.msra.mxu1 (!%p169_p3), %v4999_v2  ;;  %v5015_v35 = vld [vmem:[%s5886_s1 + $0x148] sm:$0xff] (!%p169_p3)   ;;  %v5016_v43 = vld [vmem:[%s5886_s1 + $0x150] sm:$0xff] (!%p169_p3)   ;;  %v5018_v52 = vld [vmem:[%s5886_s1 + $0x158] sm:$0xff] (!%p169_p3)  }
   0xd   : > { %4374 = vmatpush3.bf16.msra.mxu0 (!%p169_p3), %v5000_v3  ;;  %4167 = vmatprep.subr.bf16.mxu1 (!%p169_p3), %v5001_v4  ;;  %v5017_v41 = vld [vmem:[%s5886_s1 + $0x48] sm:$0xff] (!%p169_p3)   ;;  %v5020_v46 = vld [vmem:[%s5886_s1 + $0x50] sm:$0xff] (!%p169_p3)   ;;  %v5023_v55 = vld [vmem:[%s5886_s1 + $0x58] sm:$0xff] (!%p169_p3)  }
   0xe   : > { %s5894_s12 = smov (!%p202_p4, %s5091_s12), 1  ;;  %4375 = vmatprep.subr.bf16.mxu0 %v5002_v5  ;;  %v5019_v58 = vld [vmem:[%s5886_s1 + $0x160] sm:$0xff]  }
   0xf   : > { %s4971_s5 = smul.u32 328, %s5894_s12  ;;  %v5025_v0 = vld [vmem:[%s5886_s1 + $0x60] sm:$0xff]  }
  0x10   : > { %4168 = vmatpush3.bf16.msra.mxu1 %v5001_v4  ;;  %v5021_v4 = vld [vmem:[%s5886_s1 + $0x168] sm:$0xff]   ;;  %s4972_s26 = smul.u32 144, %s5894_s12 }
  0x11   : > { %4376 = vmatpush3.bf16.msra.mxu0 %v5002_v5  ;;  %4169 = vmatprep.subr.bf16.mxu1 %v5003_v6  ;;  %s5175_s16 = scalar_lea.vmem %s5885_s0, %s4971_s5 }
  0x12   : > { %4377 = vmatprep.subr.bf16.mxu0 %v5004_v7  ;;  %v230_v11 = vld [vmem:[%s5175_s16] sm:$0xff]  ;;  %v231_v12 = vld [vmem:[%s5175_s16 + $0x8] sm:$0xff]  ;;  %v1557_v13 = vld [vmem:[%s5175_s16 + $0x13] sm:$0xff]  ;;  %s5820_s29 = scalar_lea.vmem %s5888_s3, %s4972_s26 }
  0x13   : > { %v266_v15 = vpack.c.bf16 %v231_v12, %v230_v11  ;;  %v1558_v16 = vld [vmem:[%s5175_s16 + $0x1b] sm:$0xff]  ;;  %v232_v22 = vld [vmem:[%s5175_s16 + $0x10] sm:$0xff]  ;;  %v1559_v25 = vld [vmem:[%s5175_s16 + $0x23] sm:$0xff] }
  0x14   : > { %4170 = vmatpush3.bf16.msra.mxu1 %v5003_v6  ;;  %v1593_v17 = vpack.c.bf16 %v1558_v16, %v1557_v13  ;;  %v233_v23 = vld [vmem:[%s5175_s16 + $0x18] sm:$0xff]  ;;  %v1560_v26 = vld [vmem:[%s5175_s16 + $0x2b] sm:$0xff]  ;;  %v234_v28 = vld [vmem:[%s5175_s16 + $0x20] sm:$0xff] }
  0x15   : > { %4378 = vmatpush3.bf16.msra.mxu0 %v5004_v7  ;;  %4171 = vmatprep.subr.bf16.mxu1 %v5005_v8  ;;  %v235_v29 = vld [vmem:[%s5175_s16 + $0x28] sm:$0xff]  ;;  %v1561_v30 = vld [vmem:[%s5175_s16 + $0x33] sm:$0xff]  ;;  %v267_v31 = vpack.c.bf16 %v233_v23, %v232_v22  ;;  %v1562_v32 = vld [vmem:[%s5175_s16 + $0x3b] sm:$0xff]  ;;  %v1594_v33 = vpack.c.bf16 %v1560_v26, %v1559_v25 }
  0x16   : > { %4379 = vmatprep.subr.bf16.mxu0 %v5006_v9  ;;  %4179 = vmatprep.mubr.bf16.mxu1 %v266_v15  ;;  %v268_v34 = vpack.c.bf16 %v235_v29, %v234_v28  ;;  %v1595_v36 = vpack.c.bf16 %v1562_v32, %v1561_v30  ;;  %v236_v37 = vld [vmem:[%s5175_s16 + $0x30] sm:$0xff]  ;;  %v237_v38 = vld [vmem:[%s5175_s16 + $0x38] sm:$0xff]  ;;  %v1563_v39 = vld [vmem:[%s5175_s16 + $0x43] sm:$0xff] }
  0x17   : > { %4387 = vmatprep.mubr.bf16.mxu0 %v1593_v17  ;;  %v1564_v40 = vld [vmem:[%s5175_s16 + $0x4b] sm:$0xff]  ;;  %v238_v42 = vld [vmem:[%s5175_s16 + $0x40] sm:$0xff]  ;;  %v1565_v45 = vld [vmem:[%s5175_s16 + $0x53] sm:$0xff]  ;;  %v269_v48 = vpack.c.bf16 %v237_v38, %v236_v37 }
  0x18   : > { %4172 = vmatpush3.bf16.msra.mxu1 %v5005_v8  ;;  %v239_v44 = vld [vmem:[%s5175_s16 + $0x48] sm:$0xff]  ;;  %v1566_v47 = vld [vmem:[%s5175_s16 + $0x5b] sm:$0xff]  ;;  %v1596_v49 = vpack.c.bf16 %v1564_v40, %v1563_v39  ;;  %v240_v53 = vld [vmem:[%s5175_s16 + $0x50] sm:$0xff] }
  0x19   : > { %4380 = vmatpush3.bf16.msra.mxu0 %v5006_v9  ;;  %4173 = vmatprep.subr.bf16.mxu1 %v5007_v10  ;;  %v270_v50 = vpack.c.bf16 %v239_v44, %v238_v42  ;;  %v1597_v51 = vpack.c.bf16 %v1566_v47, %v1565_v45  ;;  %v241_v54 = vld [vmem:[%s5175_s16 + $0x58] sm:$0xff]  ;;  %v1567_v56 = vld [vmem:[%s5175_s16 + $0x63] sm:$0xff]  ;;  %v1568_v57 = vld [vmem:[%s5175_s16 + $0x6b] sm:$0xff] }
  0x1a   : > { %4381 = vmatprep.subr.bf16.mxu0 %v5008_v14  ;;  %v242_v59 = vld [vmem:[%s5175_s16 + $0x60] sm:$0xff]  ;;  %v243_v60 = vld [vmem:[%s5175_s16 + $0x68] sm:$0xff]  ;;  %v1569_v61 = vld [vmem:[%s5175_s16 + $0x73] sm:$0xff]  ;;  %v271_v63 = vpack.c.bf16 %v241_v54, %v240_v53  ;;  %v1598_v1 = vpack.c.bf16 %v1568_v57, %v1567_v56 }
  0x1b   : > { %v1570_v62 = vld [vmem:[%s5175_s16 + $0x7b] sm:$0xff]  ;;  %v272_v2 = vpack.c.bf16 %v243_v60, %v242_v59  ;;  %v244_v5 = vld [vmem:[%s5175_s16 + $0x70] sm:$0xff]  ;;  %v5027_v6 = vld [vmem:[%s5886_s1 + $0x68] sm:$0xff]  }
  0x1c   : > { %4174 = vmatpush3.bf16.msra.mxu1 %v5007_v10  ;;  %v1599_v3 = vpack.c.bf16 %v1570_v62, %v1569_v61  ;;  %v245_v7 = vld [vmem:[%s5175_s16 + $0x78] sm:$0xff]  ;;  %v1571_v8 = vld [vmem:[%s5175_s16 + $0x83] sm:$0xff]  ;;  %v1572_v9 = vld [vmem:[%s5175_s16 + $0x8b] sm:$0xff] }
  0x1d   : > { %4382 = vmatpush3.bf16.msra.mxu0 %v5008_v14  ;;  %4175 = vmatprep.subr.bf16.mxu1 %v5009_v18  ;;  %v246_v10 = vld [vmem:[%s5175_s16 + $0x80] sm:$0xff]  ;;  %v247_v11 = vld [vmem:[%s5175_s16 + $0x88] sm:$0xff]  ;;  %v5022_v12 = vld [vmem:[%s5886_s1 + $0x170] sm:$0xff]   ;;  %v273_v15 = vpack.c.bf16 %v245_v7, %v244_v5  ;;  %v1600_v17 = vpack.c.bf16 %v1572_v9, %v1571_v8 }
  0x1e   : > { %4383 = vmatprep.subr.bf16.mxu0 %v5010_v19  ;;  %v1889_v13 = vld [vmem:[%s5175_s16 + $0x14] sm:$0xff]  ;;  %v1890_v14 = vld [vmem:[%s5175_s16 + $0x1c] sm:$0xff]  ;;  %v1892_v25 = vld [vmem:[%s5175_s16 + $0x2c] sm:$0xff] }
  0x1f   : > { %v5029_v16 = vld [vmem:[%s5886_s1 + $0x70] sm:$0xff]   ;;  %v249_v22 = vld [vmem:[%s5175_s16 + $0x98] sm:$0xff]  ;;  %v250_v26 = vld [vmem:[%s5175_s16 + $0xa0] sm:$0xff] }
  0x20   : > { %4176 = vmatpush3.bf16.msra.mxu1 %v5009_v18  ;;  %v274_v18 = vpack.c.bf16 %v247_v11, %v246_v10  ;;  %v5031_v23 = vld [vmem:[%s5886_s1 + $0x78] sm:$0xff]   ;;  %v5026_v30 = vld [vmem:[%s5886_s1 + $0x180] sm:$0xff]   ;;  %v252_v37 = vld [vmem:[%s5175_s16 + $0xb0] sm:$0xff] }
  0x21   : > { %4384 = vmatpush3.bf16.msra.mxu0 %v5010_v19  ;;  %4177 = vmatprep.subr.bf16.mxu1 %v5011_v20  ;;  %v1925_v19 = vpack.c.bf16 %v1890_v14, %v1889_v13  ;;  %v1893_v28 = vld [vmem:[%s5175_s16 + $0x34] sm:$0xff]  ;;  %v1894_v29 = vld [vmem:[%s5175_s16 + $0x3c] sm:$0xff]  ;;  %v1895_v39 = vld [vmem:[%s5175_s16 + $0x44] sm:$0xff] }
  0x22   : > { %4385 = vmatprep.subr.bf16.mxu0 %v5012_v21  ;;  %v5293_v32 = vld [vmem:[%s5886_s1 + $0x80] sm:$0xff]   ;;  %v253_v38 = vld [vmem:[%s5175_s16 + $0xb8] sm:$0xff]  ;;  %v1896_v40 = vld [vmem:[%s5175_s16 + $0x4c] sm:$0xff] }
  0x23   : > { %v255_v42 = vld [vmem:[%s5175_s16 + $0xc8] sm:$0xff]  ;;  %v1898_v44 = vld [vmem:[%s5175_s16 + $0x5c] sm:$0xff]  ;;  %v5030_v45 = vld [vmem:[%s5886_s1 + $0x190] sm:$0xff]   ;;  %v5316_v47 = vpack.c.bf16 %v1896_v40, %v1895_v39 }
  0x24   : > { %4178 = vmatpush3.bf16.msra.mxu1 %v5011_v20  ;;  %v5024_v20 = vld [vmem:[%s5886_s1 + $0x178] sm:$0xff]   ;;  %v1899_v53 = vld [vmem:[%s5175_s16 + $0x64] sm:$0xff]  ;;  %v1900_v54 = vld [vmem:[%s5175_s16 + $0x6c] sm:$0xff] }
  0x25   : > { %4386 = vmatpush3.bf16.msra.mxu0 %v5012_v21  ;;  %4215 = vmatprep.subr.bf16.mxu1 %v5013_v24  ;;  %v248_v21 = vld [vmem:[%s5175_s16 + $0x90] sm:$0xff]  ;;  %v259_v56 = vld [vmem:[%s5175_s16 + $0xe8] sm:$0xff]  ;;  %v5034_v59 = vld [vmem:[%s5886_s1 + $0x1a0] sm:$0xff]   ;;  %v5336_v61 = vpack.c.bf16 %v1900_v54, %v1899_v53 }
  0x26   : > { %4423 = vmatprep.subr.bf16.mxu0 %v5014_v27  ;;  %v1901_v57 = vld [vmem:[%s5175_s16 + $0x74] sm:$0xff]  ;;  %v262_v5 = vld [vmem:[%s5175_s16 + $0x100] sm:$0xff] }
  0x27   : > { %4180 = vmatmul.mubr.bf16.vlgmr.msra.gmra.mrb[0].mxu1 %v267_v31  ;;  %v275_v31 = vpack.c.bf16 %v249_v22, %v248_v21  ;;  %v1905_v7 = vld [vmem:[%s5175_s16 + $0x94] sm:$0xff]  ;;  %v1906_v8 = vld [vmem:[%s5175_s16 + $0x9c] sm:$0xff] }
  0x28   : > { %4388 = vmatmul.mubr.bf16.vlgmr.msra.gmra.mrb[0].mxu0 %v1594_v33  ;;  %4216 = vmatpush3.bf16.msra.mxu1 %v5013_v24  ;;  %v1891_v24 = vld [vmem:[%s5175_s16 + $0x24] sm:$0xff]  ;;  %v5038_v9 = vld [vmem:[%s5886_s1 + $0x1b0] sm:$0xff]   ;;  %v5358_v13 = vpack.c.bf16 %v1906_v8, %v1905_v7  ;;  %v1910_v22 = vld [vmem:[%s5175_s16 + $0xbc] sm:$0xff] }
  0x29   : > { %4424 = vmatpush3.bf16.msra.mxu0 %v5014_v27  ;;  %4183 = vmatprep.mubr.bf16.mxu1 %v268_v34  ;;  %v251_v27 = vld [vmem:[%s5175_s16 + $0xa8] sm:$0xff]  ;;  %v5295_v33 = vpack.c.bf16 %v1892_v25, %v1891_v24  ;;  %v264_v14 = vld [vmem:[%s5175_s16 + $0x110] sm:$0xff]  ;;  %v1918_v54 = vld [vmem:[%s5175_s16 + $0xfc] sm:$0xff] }
  0x2a   : > { %4425 = vmatprep.subr.bf16.mxu0 %v5015_v35  ;;  %4391 = vmatprep.mubr.bf16.mxu0 %v1595_v36  ;;  %v276_v34 = vpack.c.bf16 %v251_v27, %v250_v26  ;;  %v5028_v36 = vld [vmem:[%s5886_s1 + $0x188] sm:$0xff]   ;;  %v1909_v21 = vld [vmem:[%s5175_s16 + $0xb4] sm:$0xff] }
  0x2b   : > { %4217 = vmatprep.subr.bf16.mxu1 %v5017_v41  ;;  %v5380_v27 = vpack.c.bf16 %v1910_v22, %v1909_v21  ;;  %v1917_v53 = vld [vmem:[%s5175_s16 + $0xf4] sm:$0xff] }
  0x2c   : > { %4218 = vmatpush3.bf16.msra.mxu1 %v5017_v41  ;;  %v254_v41 = vld [vmem:[%s5175_s16 + $0xc0] sm:$0xff] }
  0x2d   : > { %4426 = vmatpush3.bf16.msra.mxu0 %v5015_v35  ;;  %4219 = vmatprep.subr.bf16.mxu1 %v5020_v46  ;;  %v5297_v35 = vpack.c.bf16 %v1894_v29, %v1893_v28  ;;  %v563_v28 = vld [vmem:[%s5175_s16 + $0x11] sm:$0xff]  ;;  %v564_v29 = vld [vmem:[%s5175_s16 + $0x19] sm:$0xff] }
  0x2e   : > { %4427 = vmatprep.subr.bf16.mxu0 %v5016_v43  ;;  %v598_v39 = vpack.c.bf16 %v564_v29, %v563_v28  ;;  %v580_v28 = vld [vmem:[%s5175_s16 + $0x99] sm:$0xff]  ;;  %v581_v29 = vld [vmem:[%s5175_s16 + $0xa1] sm:$0xff] }
  0x2f   : > { %4184 = vmatmul.mubr.bf16.gmra.mrb[4].mxu1 %v269_v48  ;;  %v278_v48 = vpack.c.bf16 %v255_v42, %v254_v41 }
  0x30   : > { %4392 = vmatmul.mubr.bf16.gmra.mrb[4].mxu0 %v1596_v49  ;;  %4187 = vmatprep.mubr.bf16.mxu1 %v270_v50  ;;  %v256_v50 = vld [vmem:[%s5175_s16 + $0xd0] sm:$0xff] }
  0x31   : > { %4428 = vmatpush3.bf16.msra.mxu0 %v5016_v43  ;;  %4395 = vmatprep.mubr.bf16.mxu0 %v1597_v51  ;;  %v1897_v43 = vld [vmem:[%s5175_s16 + $0x54] sm:$0xff] }
  0x32   : > { %4429 = vmatprep.subr.bf16.mxu0 %v5018_v52  ;;  %4220 = vmatpush3.bf16.msra.mxu1 %v5020_v46  ;;  %v277_v46 = vpack.c.bf16 %v253_v38, %v252_v37  ;;  %v5318_v49 = vpack.c.bf16 %v1898_v44, %v1897_v43  ;;  %v257_v51 = vld [vmem:[%s5175_s16 + $0xd8] sm:$0xff]  ;;  %v5035_v43 = vld [vmem:[%s5886_s1 + $0x88] sm:$0xff]  }
  0x33   : > { %4221 = vmatprep.subr.bf16.mxu1 %v5023_v55  ;;  %v279_v60 = vpack.c.bf16 %v257_v51, %v256_v50  ;;  %v1913_v37 = vld [vmem:[%s5175_s16 + $0xd4] sm:$0xff]  ;;  %v1914_v38 = vld [vmem:[%s5175_s16 + $0xdc] sm:$0xff]  ;;  %v570_v51 = vld [vmem:[%s5175_s16 + $0x49] sm:$0xff] }
  0x34   : > { %v5395_v42 = vpack.c.bf16 %v1914_v38, %v1913_v37  ;;  %v567_v44 = vld [vmem:[%s5175_s16 + $0x31] sm:$0xff]  ;;  %v569_v50 = vld [vmem:[%s5175_s16 + $0x41] sm:$0xff]  ;;  %v584_v38 = vld [vmem:[%s5175_s16 + $0xb9] sm:$0xff] }
  0x35   : > { %4430 = vmatpush3.bf16.msra.mxu0 %v5018_v52  ;;  %v5032_v52 = vld [vmem:[%s5886_s1 + $0x198] sm:$0xff]   ;;  %v5044_v37 = vld [vmem:[%s5886_s1 + $0x1c8] sm:$0xff]  }
  0x36   : > { %4431 = vmatprep.subr.bf16.mxu0 %v5019_v58  ;;  %4222 = vmatpush3.bf16.msra.mxu1 %v5023_v55  ;;  %v258_v55 = vld [vmem:[%s5175_s16 + $0xe0] sm:$0xff] }
  0x37   : > { %4188 = vmatmul.mubr.bf16.gmra.mrb[8].mxu1 %v271_v63  ;;  %4223 = vmatprep.subr.bf16.mxu1 %v5025_v0  ;;  %v280_v62 = vpack.c.bf16 %v259_v56, %v258_v55  ;;  %v601_v56 = vpack.c.bf16 %v570_v51, %v569_v50  ;;  %v5050_v50 = vld [vmem:[%s5886_s1 + $0x1e0] sm:$0xff]  }
  0x38   : > { %4396 = vmatmul.mubr.bf16.gmra.mrb[8].mxu0 %v1598_v1  ;;  %4191 = vmatprep.mubr.bf16.mxu1 %v272_v2  ;;  %v261_v1 = vld [vmem:[%s5175_s16 + $0xf8] sm:$0xff]  ;;  %v5036_v2 = vld [vmem:[%s5886_s1 + $0x1a8] sm:$0xff]  }
  0x39   : > { %4432 = vmatpush3.bf16.msra.mxu0 %v5019_v58  ;;  %4399 = vmatprep.mubr.bf16.mxu0 %v1599_v3  ;;  %v1902_v58 = vld [vmem:[%s5175_s16 + $0x7c] sm:$0xff]  ;;  %v1903_v3 = vld [vmem:[%s5175_s16 + $0x84] sm:$0xff] }
  0x3a   : > { %4433 = vmatprep.subr.bf16.mxu0 %v5021_v4  ;;  %4224 = vmatpush3.bf16.msra.mxu1 %v5025_v0  ;;  %v5338_v63 = vpack.c.bf16 %v1902_v58, %v1901_v57  ;;  %v260_v0 = vld [vmem:[%s5175_s16 + $0xf0] sm:$0xff]  ;;  %v5416_v57 = vpack.c.bf16 %v1918_v54, %v1917_v53  ;;  %v5039_v58 = vld [vmem:[%s5886_s1 + $0x98] sm:$0xff]   ;;  %v593_v54 = vld [vmem:[%s5175_s16 + $0x101] sm:$0xff] }
  0x3b   : > { %4225 = vmatprep.subr.bf16.mxu1 %v5027_v6  ;;  %v281_v10 = vpack.c.bf16 %v261_v1, %v260_v0  ;;  %v1920_v0 = vld [vmem:[%s5175_s16 + $0x10c] sm:$0xff]  ;;  %v573_v1 = vld [vmem:[%s5175_s16 + $0x61] sm:$0xff]  ;;  %v592_v53 = vld [vmem:[%s5175_s16 + $0xf9] sm:$0xff] }
  0x3d   : > { %4434 = vmatpush3.bf16.msra.mxu0 %v5021_v4  ;;  %v1904_v4 = vld [vmem:[%s5175_s16 + $0x8c] sm:$0xff] }
  0x3e   : > { %4435 = vmatprep.subr.bf16.mxu0 %v5022_v12  ;;  %4226 = vmatpush3.bf16.msra.mxu1 %v5027_v6  ;;  %v263_v6 = vld [vmem:[%s5175_s16 + $0x108] sm:$0xff]  ;;  %v5356_v11 = vpack.c.bf16 %v1904_v4, %v1903_v3  ;;  %v1921_v3 = vld [vmem:[%s5175_s16 + $0x114] sm:$0xff]  ;;  %v1922_v4 = vld [vmem:[%s5175_s16 + $0x11c] sm:$0xff] }
  0x3f   : > { %4192 = vmatmul.mubr.bf16.gmra.mrb[12].mxu1 %v273_v15  ;;  %4227 = vmatprep.subr.bf16.mxu1 %v5029_v16  ;;  %v5040_v15 = vld [vmem:[%s5886_s1 + $0x1b8] sm:$0xff]  }
  0x40   : > { %4400 = vmatmul.mubr.bf16.gmra.mrb[12].mxu0 %v1600_v17  ;;  %4195 = vmatprep.mubr.bf16.mxu1 %v274_v18  ;;  %v1907_v17 = vld [vmem:[%s5175_s16 + $0xa4] sm:$0xff]  ;;  %v1908_v18 = vld [vmem:[%s5175_s16 + $0xac] sm:$0xff] }
  0x41   : > { %4436 = vmatpush3.bf16.msra.mxu0 %v5022_v12  ;;  %4439 = vmatprep.mubr.bf16.mxu0 %v1925_v19  ;;  %v282_v12 = vpack.c.bf16 %v263_v6, %v262_v5  ;;  %v561_v19 = vld [vmem:[%s5175_s16 + $0x1] sm:$0xff]  ;;  %v5378_v25 = vpack.c.bf16 %v1908_v18, %v1907_v17  ;;  %v578_v18 = vld [vmem:[%s5175_s16 + $0x89] sm:$0xff] }
  0x42   : > { %4437 = vmatprep.subr.bf16.mxu0 %v5024_v20  ;;  %4228 = vmatpush3.bf16.msra.mxu1 %v5029_v16  ;;  %v265_v16 = vld [vmem:[%s5175_s16 + $0x118] sm:$0xff]  ;;  %v5041_v5 = vld [vmem:[%s5886_s1 + $0xa0] sm:$0xff]  }
  0x43   : > { %4229 = vmatprep.subr.bf16.mxu1 %v5031_v23  ;;  %v283_v24 = vpack.c.bf16 %v265_v16, %v264_v14  ;;  %v576_v14 = vld [vmem:[%s5175_s16 + $0x79] sm:$0xff]  ;;  %v1924_v16 = vld [vmem:[%s5175_s16 + $0x12c] sm:$0xff]  ;;  %v577_v17 = vld [vmem:[%s5175_s16 + $0x81] sm:$0xff] }
  0x44   : > { %v605_v22 = vpack.c.bf16 %v578_v18, %v577_v17  ;;  %v5055_v17 = vld [vmem:[%s5886_s1 + $0xd8] sm:$0xff]  }
  0x45   : > { %4438 = vmatpush3.bf16.msra.mxu0 %v5024_v20  ;;  %v562_v20 = vld [vmem:[%s5175_s16 + $0x9] sm:$0xff]  ;;  %v904_v18 = vld [vmem:[%s5175_s16 + $0x5a] sm:$0xff] }
  0x46   : > { %4475 = vmatprep.subr.bf16.mxu0 %v5026_v30  ;;  %4230 = vmatpush3.bf16.msra.mxu1 %v5031_v23  ;;  %v5376_v23 = vld [vmem:[%s5886_s1 + $0x1c0] sm:$0xff]   ;;  %v597_v26 = vpack.c.bf16 %v562_v20, %v561_v19  ;;  %v5045_v19 = vld [vmem:[%s5886_s1 + $0xb0] sm:$0xff]  }
  0x47   : > { %4196 = vmatmul.mubr.bf16.gmra.mrb[16].mxu1 %v275_v31  ;;  %4267 = vmatprep.subr.bf16.mxu1 %v5293_v32  ;;  %v1912_v31 = vld [vmem:[%s5175_s16 + $0xcc] sm:$0xff] }
  0x48   : > { %4440 = vmatmul.mubr.bf16.vlgmr.msra.gmra.mrb[0].mxu0 %v5295_v33  ;;  %4199 = vmatprep.mubr.bf16.mxu1 %v276_v34  ;;  %v565_v34 = vld [vmem:[%s5175_s16 + $0x21] sm:$0xff] }
  0x49   : > { %4443 = vmatprep.mubr.bf16.mxu0 %v5297_v35  ;;  %4476 = vmatpush3.bf16.msra.mxu0 %v5026_v30  ;;  %v1911_v30 = vld [vmem:[%s5175_s16 + $0xc4] sm:$0xff] }
  0x4a   : > { %4477 = vmatprep.subr.bf16.mxu0 %v5028_v36  ;;  %v5393_v40 = vpack.c.bf16 %v1912_v31, %v1911_v30  ;;  %v582_v30 = vld [vmem:[%s5175_s16 + $0xa9] sm:$0xff]  ;;  %v5466_v31 = vld [vmem:[%s5886_s1 + $0xc0] sm:$0xff]  }
  0x4d   : > { %4478 = vmatpush3.bf16.msra.mxu0 %v5028_v36  ;;  %v566_v36 = vld [vmem:[%s5175_s16 + $0x29] sm:$0xff] }
  0x4e   : > { %4479 = vmatprep.subr.bf16.mxu0 %v5030_v45  ;;  %v599_v41 = vpack.c.bf16 %v566_v36, %v565_v34  ;;  %v607_v36 = vpack.c.bf16 %v582_v30, %v581_v29  ;;  %v2255_v29 = vld [vmem:[%s5175_s16 + $0x134] sm:$0xff]  ;;  %v2256_v30 = vld [vmem:[%s5175_s16 + $0x13c] sm:$0xff] }
  0x4f   : > { %4200 = vmatmul.mubr.bf16.gmra.mrb[20].mxu1 %v277_v46  ;;  %v1915_v46 = vld [vmem:[%s5175_s16 + $0xe4] sm:$0xff] }
  0x50   : > { %4444 = vmatmul.mubr.bf16.gmra.mrb[4].mxu0 %v5316_v47  ;;  %4203 = vmatprep.mubr.bf16.mxu1 %v278_v48  ;;  %v1916_v48 = vld [vmem:[%s5175_s16 + $0xec] sm:$0xff] }
  0x51   : > { %4447 = vmatprep.mubr.bf16.mxu0 %v5318_v49  ;;  %4480 = vmatpush3.bf16.msra.mxu0 %v5030_v45  ;;  %v568_v45 = vld [vmem:[%s5175_s16 + $0x39] sm:$0xff]  ;;  %v5414_v55 = vpack.c.bf16 %v1916_v48, %v1915_v46  ;;  %v589_v46 = vld [vmem:[%s5175_s16 + $0xe1] sm:$0xff]  ;;  %v590_v48 = vld [vmem:[%s5175_s16 + $0xe9] sm:$0xff] }
  0x52   : > { %4481 = vmatprep.subr.bf16.mxu0 %v5032_v52 }
  0x55   : > { %4482 = vmatpush3.bf16.msra.mxu0 %v5032_v52  ;;  %v5037_v52 = vld [vmem:[%s5886_s1 + $0x90] sm:$0xff]  }
  0x56   : > { %4483 = vmatprep.subr.bf16.mxu0 %v5034_v59 }
  0x57   : > { %4204 = vmatmul.mubr.bf16.gmra.mrb[24].mxu1 %v279_v60  ;;  %v572_v60 = vld [vmem:[%s5175_s16 + $0x59] sm:$0xff] }
  0x58   : > { %4448 = vmatmul.mubr.bf16.gmra.mrb[8].mxu0 %v5336_v61  ;;  %4207 = vmatprep.mubr.bf16.mxu1 %v280_v62  ;;  %v1919_v62 = vld [vmem:[%s5175_s16 + $0x104] sm:$0xff] }
  0x59   : > { %4451 = vmatprep.mubr.bf16.mxu0 %v5338_v63  ;;  %4484 = vmatpush3.bf16.msra.mxu0 %v5034_v59  ;;  %v571_v59 = vld [vmem:[%s5175_s16 + $0x51] sm:$0xff]  ;;  %v5434_v7 = vpack.c.bf16 %v1920_v0, %v1919_v62  ;;  %v893_v62 = vld [vmem:[%s5175_s16 + $0x2] sm:$0xff] }
  0x5a   : > { %4485 = vmatprep.subr.bf16.mxu0 %v5036_v2  ;;  %v602_v6 = vpack.c.bf16 %v572_v60, %v571_v59  ;;  %v596_v60 = vld [vmem:[%s5175_s16 + $0x119] sm:$0xff]  ;;  %v894_v0 = vld [vmem:[%s5175_s16 + $0xa] sm:$0xff] }
  0x5d   : > { %4486 = vmatpush3.bf16.msra.mxu0 %v5036_v2  ;;  %v574_v2 = vld [vmem:[%s5175_s16 + $0x69] sm:$0xff] }
  0x5e   : > { %4487 = vmatprep.subr.bf16.mxu0 %v5038_v9  ;;  %v603_v8 = vpack.c.bf16 %v574_v2, %v573_v1  ;;  %v5518_v1 = vld [vmem:[%s5886_s1 + $0x200] sm:$0xff]  }
  0x5f   : > { %4208 = vmatmul.mubr.bf16.gmra.mrb[28].mxu1 %v281_v10  ;;  %v5043_v10 = vld [vmem:[%s5886_s1 + $0xa8] sm:$0xff]  }
  0x60   : > { %4452 = vmatmul.mubr.bf16.gmra.mrb[12].mxu0 %v5356_v11  ;;  %4211 = vmatprep.mubr.bf16.mxu1 %v282_v12  ;;  %v575_v12 = vld [vmem:[%s5175_s16 + $0x71] sm:$0xff] }
  0x61   : > { %4455 = vmatprep.mubr.bf16.mxu0 %v5358_v13  ;;  %4488 = vmatpush3.bf16.msra.mxu0 %v5038_v9  ;;  %v5436_v9 = vpack.c.bf16 %v1922_v4, %v1921_v3  ;;  %v604_v20 = vpack.c.bf16 %v576_v14, %v575_v12  ;;  %v896_v3 = vld [vmem:[%s5175_s16 + $0x1a] sm:$0xff]  ;;  %v897_v4 = vld [vmem:[%s5175_s16 + $0x22] sm:$0xff]  ;;  %v902_v14 = vld [vmem:[%s5175_s16 + $0x4a] sm:$0xff] }
  0x62   : > { %4489 = vmatprep.subr.bf16.mxu0 %v5040_v15  ;;  %v900_v12 = vld [vmem:[%s5175_s16 + $0x3a] sm:$0xff] }
  0x65   : > { %4490 = vmatpush3.bf16.msra.mxu0 %v5040_v15  ;;  %v1923_v15 = vld [vmem:[%s5175_s16 + $0x124] sm:$0xff] }
  0x66   : > { %4527 = vmatprep.subr.bf16.mxu0 %v5376_v23  ;;  %v5452_v21 = vpack.c.bf16 %v1924_v16, %v1923_v15  ;;  %v5053_v15 = vld [vmem:[%s5886_s1 + $0xd0] sm:$0xff]  }
  0x67   : > { %4212 = vmatmul.mubr.bf16.gmra.mrb[32].mxu1 %v283_v24  ;;  %v5047_v24 = vld [vmem:[%s5886_s1 + $0xb8] sm:$0xff]  }
  0x68   : > { %4456 = vmatmul.mubr.bf16.gmra.mrb[16].mxu0 %v5378_v25  ;;  %4231 = vmatprep.mubr.bf16.mxu1 %v597_v26  ;;  %v579_v26 = vld [vmem:[%s5175_s16 + $0x91] sm:$0xff] }
  0x69   : > { %4459 = vmatprep.mubr.bf16.mxu0 %v5380_v27  ;;  %v606_v34 = vpack.c.bf16 %v580_v28, %v579_v26  ;;  %v907_v26 = vld [vmem:[%s5175_s16 + $0x72] sm:$0xff]  ;;  %v908_v28 = vld [vmem:[%s5175_s16 + $0x7a] sm:$0xff] }
  0x6f   : > { %4232 = vmatmul.mubr.bf16.vlgmr.msra.gmra.mrb[0].mxu1 %v598_v39  ;;  %v585_v39 = vld [vmem:[%s5175_s16 + $0xc1] sm:$0xff] }
  0x70   : > { %4460 = vmatmul.mubr.bf16.gmra.mrb[20].mxu0 %v5393_v40  ;;  %4268 = vmatpush3.bf16.msra.mxu1 %v5293_v32  ;;  %v600_v32 = vpack.c.bf16 %v568_v45, %v567_v44  ;;  %v5048_v45 = vld [vmem:[%s5886_s1 + $0x1d8] sm:$0xff]  }
  0x71   : > { %4235 = vmatprep.mubr.bf16.mxu1 %v599_v41  ;;  %4463 = vmatprep.mubr.bf16.mxu0 %v5395_v42  ;;  %v586_v41 = vld [vmem:[%s5175_s16 + $0xc9] sm:$0xff] }
  0x72   : > { %4269 = vmatprep.subr.bf16.mxu1 %v5035_v43 }
  0x74   : > { %4270 = vmatpush3.bf16.msra.mxu1 %v5035_v43  ;;  %v5046_v43 = vld [vmem:[%s5886_s1 + $0x1d0] sm:$0xff]  }
  0x75   : > { %4271 = vmatprep.subr.bf16.mxu1 %v5037_v52 }
  0x77   : > { %4236 = vmatmul.mubr.bf16.gmra.mrb[4].mxu1 %v600_v32  ;;  %v594_v32 = vld [vmem:[%s5175_s16 + $0x109] sm:$0xff] }
  0x78   : > { %4464 = vmatmul.mubr.bf16.gmra.mrb[24].mxu0 %v5414_v55  ;;  %4239 = vmatprep.mubr.bf16.mxu1 %v601_v56  ;;  %v5054_v56 = vld [vmem:[%s5886_s1 + $0x1f0] sm:$0xff]   ;;  %v613_v59 = vpack.c.bf16 %v594_v32, %v593_v54  ;;  %v916_v32 = vld [vmem:[%s5175_s16 + $0xba] sm:$0xff] }
  0x79   : > { %4467 = vmatprep.mubr.bf16.mxu0 %v5416_v57  ;;  %4272 = vmatpush3.bf16.msra.mxu1 %v5037_v52  ;;  %v611_v52 = vpack.c.bf16 %v590_v48, %v589_v46  ;;  %v2557_v46 = vld [vmem:[%s5175_s16 + $0x45] sm:$0xff]  ;;  %v2558_v48 = vld [vmem:[%s5175_s16 + $0x4d] sm:$0xff] }
  0x7a   : > { %4273 = vmatprep.subr.bf16.mxu1 %v5039_v58  ;;  %v915_v54 = vld [vmem:[%s5175_s16 + $0xb2] sm:$0xff] }
  0x7d   : > { %4274 = vmatpush3.bf16.msra.mxu1 %v5039_v58 }
  0x7e   : > { %4275 = vmatprep.subr.bf16.mxu1 %v5041_v5 }
  0x7f   : > { %4240 = vmatmul.mubr.bf16.gmra.mrb[8].mxu1 %v602_v6 }
  0x80   : > { %4468 = vmatmul.mubr.bf16.gmra.mrb[28].mxu0 %v5434_v7  ;;  %4243 = vmatprep.mubr.bf16.mxu1 %v603_v8 }
  0x81   : > { %4471 = vmatprep.mubr.bf16.mxu0 %v5436_v9  ;;  %4276 = vmatpush3.bf16.msra.mxu1 %v5041_v5  ;;  %v898_v5 = vld [vmem:[%s5175_s16 + $0x2a] sm:$0xff] }
  0x82   : > { %4277 = vmatprep.subr.bf16.mxu1 %v5043_v10  ;;  %v5529_v8 = vpack.c.bf16 %v898_v5, %v897_v4  ;;  %v920_v4 = vld [vmem:[%s5175_s16 + $0xda] sm:$0xff] }
  0x83   : > { %v2563_v5 = vld [vmem:[%s5175_s16 + $0x75] sm:$0xff] }
  0x85   : > { %4278 = vmatpush3.bf16.msra.mxu1 %v5043_v10  ;;  %v5051_v10 = vld [vmem:[%s5886_s1 + $0xc8] sm:$0xff]  }
  0x86   : > { %4279 = vmatprep.subr.bf16.mxu1 %v5045_v19 }
  0x87   : > { %4244 = vmatmul.mubr.bf16.gmra.mrb[12].mxu1 %v604_v20  ;;  %v906_v20 = vld [vmem:[%s5175_s16 + $0x6a] sm:$0xff] }
  0x88   : > { %4472 = vmatmul.mubr.bf16.gmra.mrb[32].mxu0 %v5452_v21  ;;  %4247 = vmatprep.mubr.bf16.mxu1 %v605_v22 }
  0x89   : > { %4491 = vmatprep.mubr.bf16.mxu0 %v5295_v33  ;;  %4280 = vmatpush3.bf16.msra.mxu1 %v5045_v19  ;;  %v583_v33 = vld [vmem:[%s5175_s16 + $0xb1] sm:$0xff]  ;;  %v905_v19 = vld [vmem:[%s5175_s16 + $0x62] sm:$0xff] }
  0x8a   : > { %4281 = vmatprep.subr.bf16.mxu1 %v5047_v24  ;;  %v608_v44 = vpack.c.bf16 %v584_v38, %v583_v33  ;;  %v5586_v33 = vpack.c.bf16 %v908_v28, %v907_v26  ;;  %v2567_v26 = vld [vmem:[%s5175_s16 + $0x95] sm:$0xff]  ;;  %v2568_v28 = vld [vmem:[%s5175_s16 + $0x9d] sm:$0xff] }
  0x8d   : > { %4282 = vmatpush3.bf16.msra.mxu1 %v5047_v24  ;;  %v5566_v24 = vpack.c.bf16 %v906_v20, %v905_v19  ;;  %v5066_v20 = vld [vmem:[%s5886_s1 + $0x228] sm:$0xff]  }
  0x8e   : > { %4319 = vmatprep.subr.bf16.mxu1 %v5466_v31 }
  0x8f   : > { %4248 = vmatmul.mubr.bf16.gmra.mrb[16].mxu1 %v606_v34  ;;  %v910_v34 = vld [vmem:[%s5175_s16 + $0x8a] sm:$0xff] }
  0x90   : > { %4492 = vmatmul.mubr.bf16.vlgmr.msra.gmra.mrb[0].mxu0 %v5297_v35  ;;  %4251 = vmatprep.mubr.bf16.mxu1 %v607_v36  ;;  %v609_v35 = vpack.c.bf16 %v586_v41, %v585_v39  ;;  %v2553_v36 = vld [vmem:[%s5175_s16 + $0x25] sm:$0xff]  ;;  %v5063_v41 = vld [vmem:[%s5886_s1 + $0xf8] sm:$0xff]  }
  0x91   : > { %4495 = vmatprep.mubr.bf16.mxu0 %v5316_v47  ;;  %4528 = vmatpush3.bf16.msra.mxu0 %v5376_v23  ;;  %v587_v47 = vld [vmem:[%s5175_s16 + $0xd1] sm:$0xff]  ;;  %v588_v23 = vld [vmem:[%s5175_s16 + $0xd9] sm:$0xff] }
  0x92   : > { %4529 = vmatprep.subr.bf16.mxu0 %v5044_v37  ;;  %v610_v51 = vpack.c.bf16 %v588_v23, %v587_v47  ;;  %v913_v47 = vld [vmem:[%s5175_s16 + $0xa2] sm:$0xff]  ;;  %v914_v23 = vld [vmem:[%s5175_s16 + $0xaa] sm:$0xff] }
  0x95   : > { %4530 = vmatpush3.bf16.msra.mxu0 %v5044_v37  ;;  %v2554_v37 = vld [vmem:[%s5175_s16 + $0x2d] sm:$0xff] }
  0x96   : > { %4531 = vmatprep.subr.bf16.mxu0 %v5046_v43  ;;  %v2589_v39 = vpack.c.bf16 %v2554_v37, %v2553_v36  ;;  %v5067_v36 = vld [vmem:[%s5886_s1 + $0x230] sm:$0xff]  }
  0x97   : > { %4252 = vmatmul.mubr.bf16.gmra.mrb[20].mxu1 %v608_v44  ;;  %v912_v44 = vld [vmem:[%s5175_s16 + $0x9a] sm:$0xff] }
  0x98   : > { %4496 = vmatmul.mubr.bf16.gmra.mrb[4].mxu0 %v5318_v49  ;;  %4255 = vmatprep.mubr.bf16.mxu1 %v609_v35  ;;  %v5052_v49 = vld [vmem:[%s5886_s1 + $0x1e8] sm:$0xff]   ;;  %v2555_v35 = vld [vmem:[%s5175_s16 + $0x35] sm:$0xff] }
  0x99   : > { %4499 = vmatprep.mubr.bf16.mxu0 %v5336_v61  ;;  %4532 = vmatpush3.bf16.msra.mxu0 %v5046_v43  ;;  %v591_v61 = vld [vmem:[%s5175_s16 + $0xf1] sm:$0xff] }
  0x9a   : > { %4533 = vmatprep.subr.bf16.mxu0 %v5048_v45  ;;  %v612_v58 = vpack.c.bf16 %v592_v53, %v591_v61  ;;  %v911_v43 = vld [vmem:[%s5175_s16 + $0x92] sm:$0xff]  ;;  %v5060_v61 = vld [vmem:[%s5886_s1 + $0x208] sm:$0xff]   ;;  %v5613_v53 = vld [vmem:[%s5886_s1 + $0x100] sm:$0xff]  }
  0x9d   : > { %4534 = vmatpush3.bf16.msra.mxu0 %v5048_v45  ;;  %v2556_v45 = vld [vmem:[%s5175_s16 + $0x3d] sm:$0xff] }
  0x9e   : > { %4535 = vmatprep.subr.bf16.mxu0 %v5050_v50 }
  0x9f   : > { %4256 = vmatmul.mubr.bf16.gmra.mrb[24].mxu1 %v610_v51  ;;  %v2590_v51 = vpack.c.bf16 %v2556_v45, %v2555_v35  ;;  %v2571_v35 = vld [vmem:[%s5175_s16 + $0xb5] sm:$0xff]  ;;  %v2572_v45 = vld [vmem:[%s5175_s16 + $0xbd] sm:$0xff] }
  0xa0   : > { %4500 = vmatmul.mubr.bf16.gmra.mrb[8].mxu0 %v5338_v63  ;;  %4259 = vmatprep.mubr.bf16.mxu1 %v611_v52  ;;  %v5056_v63 = vld [vmem:[%s5886_s1 + $0x1f8] sm:$0xff]   ;;  %v5605_v52 = vpack.c.bf16 %v914_v23, %v913_v47  ;;  %v2573_v47 = vld [vmem:[%s5175_s16 + $0xc5] sm:$0xff]  ;;  %v2574_v23 = vld [vmem:[%s5175_s16 + $0xcd] sm:$0xff] }
  0xa1   : > { %4503 = vmatprep.mubr.bf16.mxu0 %v5356_v11  ;;  %4536 = vmatpush3.bf16.msra.mxu0 %v5050_v50  ;;  %v595_v11 = vld [vmem:[%s5175_s16 + $0x111] sm:$0xff]  ;;  %v5603_v50 = vpack.c.bf16 %v912_v44, %v911_v43  ;;  %v928_v44 = vld [vmem:[%s5175_s16 + $0x11a] sm:$0xff] }
  0xa2   : > { %4537 = vmatprep.subr.bf16.mxu0 %v5052_v49  ;;  %v614_v2 = vpack.c.bf16 %v596_v60, %v595_v11  ;;  %v2561_v11 = vld [vmem:[%s5175_s16 + $0x65] sm:$0xff]  ;;  %v2562_v60 = vld [vmem:[%s5175_s16 + $0x6d] sm:$0xff] }
  0xa3   : > { %v927_v43 = vld [vmem:[%s5175_s16 + $0x112] sm:$0xff] }
  0xa5   : > { %4538 = vmatpush3.bf16.msra.mxu0 %v5052_v49  ;;  %v2591_v49 = vpack.c.bf16 %v2558_v48, %v2557_v46  ;;  %v5685_v46 = vpack.c.bf16 %v928_v44, %v927_v43  ;;  %v2598_v48 = vpack.c.bf16 %v2572_v45, %v2571_v35  ;;  %v2902_v43 = vld [vmem:[%s5175_s16 + $0xae] sm:$0xff] }
  0xa6   : > { %4539 = vmatprep.subr.bf16.mxu0 %v5054_v56  ;;  %v1260_v45 = vld [vmem:[%s5175_s16 + $0x12a] sm:$0xff] }
  0xa7   : > { %4260 = vmatmul.mubr.bf16.gmra.mrb[28].mxu1 %v612_v58  ;;  %v2560_v58 = vld [vmem:[%s5175_s16 + $0x5d] sm:$0xff] }
  0xa8   : > { %4504 = vmatmul.mubr.bf16.gmra.mrb[12].mxu0 %v5358_v13  ;;  %4263 = vmatprep.mubr.bf16.mxu1 %v613_v59  ;;  %v929_v13 = vpack.c.bf16 %v894_v0, %v893_v62  ;;  %v917_v59 = vld [vmem:[%s5175_s16 + $0xc2] sm:$0xff]  ;;  %v5062_v62 = vld [vmem:[%s5886_s1 + $0x210] sm:$0xff]   ;;  %v5630_v0 = vpack.c.bf16 %v916_v32, %v915_v54 }
  0xa9   : > { %4507 = vmatprep.mubr.bf16.mxu0 %v5378_v25  ;;  %4540 = vmatpush3.bf16.msra.mxu0 %v5054_v56  ;;  %v895_v25 = vld [vmem:[%s5175_s16 + $0x12] sm:$0xff]  ;;  %v2577_v54 = vld [vmem:[%s5175_s16 + $0xe5] sm:$0xff] }
  0xaa   : > { %4541 = vmatprep.subr.bf16.mxu0 %v5056_v63  ;;  %v5527_v6 = vpack.c.bf16 %v896_v3, %v895_v25  ;;  %v2559_v56 = vld [vmem:[%s5175_s16 + $0x55] sm:$0xff]  ;;  %v2578_v32 = vld [vmem:[%s5175_s16 + $0xed] sm:$0xff] }
  0xab   : > { %v5064_v25 = vld [vmem:[%s5886_s1 + $0x218] sm:$0xff]  }
  0xac   : > { %v919_v3 = vld [vmem:[%s5175_s16 + $0xd2] sm:$0xff] }
  0xad   : > { %4542 = vmatpush3.bf16.msra.mxu0 %v5056_v63  ;;  %v918_v63 = vld [vmem:[%s5175_s16 + $0xca] sm:$0xff] }
  0xae   : > { %4579 = vmatprep.subr.bf16.mxu0 %v5518_v1 }
  0xaf   : > { %4264 = vmatmul.mubr.bf16.gmra.mrb[32].mxu1 %v614_v2  ;;  %v2592_v2 = vpack.c.bf16 %v2560_v58, %v2559_v56  ;;  %v2601_v58 = vpack.c.bf16 %v2578_v32, %v2577_v54  ;;  %v1575_v32 = vld [vmem:[%s5175_s16 + $0xa3] sm:$0xff] }
  0xb0   : > { %4508 = vmatmul.mubr.bf16.gmra.mrb[16].mxu0 %v5380_v27  ;;  %4283 = vmatprep.mubr.bf16.mxu1 %v929_v13  ;;  %v899_v27 = vld [vmem:[%s5175_s16 + $0x32] sm:$0xff]  ;;  %v5632_v13 = vpack.c.bf16 %v918_v63, %v917_v59  ;;  %v5070_v63 = vld [vmem:[%s5886_s1 + $0x108] sm:$0xff]  }
  0xb1   : > { %4511 = vmatprep.mubr.bf16.mxu0 %v5393_v40  ;;  %v901_v40 = vld [vmem:[%s5175_s16 + $0x42] sm:$0xff]  ;;  %v2579_v59 = vld [vmem:[%s5175_s16 + $0xf5] sm:$0xff] }
  0xb2   : > { %v5548_v16 = vpack.c.bf16 %v902_v14, %v901_v40  ;;  %v2565_v40 = vld [vmem:[%s5175_s16 + $0x85] sm:$0xff]  ;;  %v2566_v14 = vld [vmem:[%s5175_s16 + $0x8d] sm:$0xff] }
  0xb3   : > { %v2595_v19 = vpack.c.bf16 %v2566_v14, %v2565_v40  ;;  %v5074_v40 = vld [vmem:[%s5886_s1 + $0x128] sm:$0xff]  }
  0xb7   : > { %4284 = vmatmul.mubr.bf16.vlgmr.msra.gmra.mrb[0].mxu1 %v5527_v6 }
  0xb8   : > { %4512 = vmatmul.mubr.bf16.gmra.mrb[20].mxu0 %v5395_v42  ;;  %4320 = vmatpush3.bf16.msra.mxu1 %v5466_v31  ;;  %v5546_v42 = vpack.c.bf16 %v900_v12, %v899_v27  ;;  %v909_v31 = vld [vmem:[%s5175_s16 + $0x82] sm:$0xff]  ;;  %v922_v12 = vld [vmem:[%s5175_s16 + $0xea] sm:$0xff] }
  0xb9   : > { %4287 = vmatprep.mubr.bf16.mxu1 %v5529_v8  ;;  %4515 = vmatprep.mubr.bf16.mxu0 %v5414_v55  ;;  %v903_v55 = vld [vmem:[%s5175_s16 + $0x52] sm:$0xff]  ;;  %v5588_v38 = vpack.c.bf16 %v910_v34, %v909_v31  ;;  %v921_v27 = vld [vmem:[%s5175_s16 + $0xe2] sm:$0xff] }
  0xba   : > { %4321 = vmatprep.subr.bf16.mxu1 %v5051_v10  ;;  %v5564_v22 = vpack.c.bf16 %v904_v18, %v903_v55  ;;  %v5652_v18 = vpack.c.bf16 %v922_v12, %v921_v27  ;;  %v2569_v31 = vld [vmem:[%s5175_s16 + $0xa5] sm:$0xff]  ;;  %v2570_v34 = vld [vmem:[%s5175_s16 + $0xad] sm:$0xff] }
  0xbb   : > { %v2885_v27 = vld [vmem:[%s5175_s16 + $0x26] sm:$0xff]  ;;  %v2886_v12 = vld [vmem:[%s5175_s16 + $0x2e] sm:$0xff] }
  0xbc   : > { %4322 = vmatpush3.bf16.msra.mxu1 %v5051_v10  ;;  %v2564_v10 = vld [vmem:[%s5175_s16 + $0x7d] sm:$0xff] }
  0xbd   : > { %4323 = vmatprep.subr.bf16.mxu1 %v5053_v15  ;;  %v2594_v55 = vpack.c.bf16 %v2564_v10, %v2563_v5  ;;  %v2587_v5 = vld [vmem:[%s5175_s16 + $0x135] sm:$0xff]  ;;  %v2588_v10 = vld [vmem:[%s5175_s16 + $0x13d] sm:$0xff] }
  0xbe   : > { %v2606_v14 = vpack.c.bf16 %v2588_v10, %v2587_v5  ;;  %v2914_v5 = vld [vmem:[%s5175_s16 + $0x10e] sm:$0xff] }
  0xbf   : > { %4288 = vmatmul.mubr.bf16.gmra.mrb[4].mxu1 %v5546_v42 }
  0xc0   : > { %4516 = vmatmul.mubr.bf16.gmra.mrb[24].mxu0 %v5416_v57  ;;  %4291 = vmatprep.mubr.bf16.mxu1 %v5548_v16  ;;  %v5057_v57 = vld [vmem:[%s5886_s1 + $0xe0] sm:$0xff]  }
  0xc1   : > { %4519 = vmatprep.mubr.bf16.mxu0 %v5434_v7  ;;  %4324 = vmatpush3.bf16.msra.mxu1 %v5053_v15  ;;  %v5059_v7 = vld [vmem:[%s5886_s1 + $0xe8] sm:$0xff]   ;;  %v5065_v15 = vld [vmem:[%s5886_s1 + $0x220] sm:$0xff]  }
  0xc2   : > { %4325 = vmatprep.subr.bf16.mxu1 %v5055_v17 }
  0xc5   : > { %4326 = vmatpush3.bf16.msra.mxu1 %v5055_v17  ;;  %v5650_v17 = vpack.c.bf16 %v920_v4, %v919_v3  ;;  %v5072_v3 = vld [vmem:[%s5886_s1 + $0x118] sm:$0xff]  }
  0xc6   : > { %4327 = vmatprep.subr.bf16.mxu1 %v5057_v57 }
  0xc7   : > { %4292 = vmatmul.mubr.bf16.gmra.mrb[8].mxu1 %v5564_v22 }
  0xc8   : > { %4520 = vmatmul.mubr.bf16.gmra.mrb[28].mxu0 %v5436_v9  ;;  %4295 = vmatprep.mubr.bf16.mxu1 %v5566_v24  ;;  %v5061_v9 = vld [vmem:[%s5886_s1 + $0xf0] sm:$0xff]  }
  0xc9   : > { %4523 = vmatprep.mubr.bf16.mxu0 %v5452_v21  ;;  %4328 = vmatpush3.bf16.msra.mxu1 %v5057_v57  ;;  %v2274_v21 = vpack.c.bf16 %v2256_v30, %v2255_v29  ;;  %v923_v57 = vld [vmem:[%s5175_s16 + $0xf2] sm:$0xff]  ;;  %v925_v29 = vld [vmem:[%s5175_s16 + $0x102] sm:$0xff]  ;;  %v926_v30 = vld [vmem:[%s5175_s16 + $0x10a] sm:$0xff] }
  0xca   : > { %4329 = vmatprep.subr.bf16.mxu1 %v5059_v7 }
  0xcd   : > { %4330 = vmatpush3.bf16.msra.mxu1 %v5059_v7  ;;  %v924_v7 = vld [vmem:[%s5175_s16 + $0xfa] sm:$0xff] }
  0xce   : > { %4331 = vmatprep.subr.bf16.mxu1 %v5061_v9  ;;  %v5670_v37 = vpack.c.bf16 %v924_v7, %v923_v57  ;;  %v5076_v57 = vld [vmem:[%s5886_s1 + $0x138] sm:$0xff]  }
  0xcf   : > { %4296 = vmatmul.mubr.bf16.gmra.mrb[12].mxu1 %v5586_v33 }
  0xd0   : > { %4524 = vmatmul.mubr.bf16.gmra.mrb[32].mxu0 %v2274_v21  ;;  %4299 = vmatprep.mubr.bf16.mxu1 %v5588_v38  ;;  %v5672_v21 = vpack.c.bf16 %v926_v30, %v925_v29  ;;  %v2894_v29 = vld [vmem:[%s5175_s16 + $0x6e] sm:$0xff] }
  0xd1   : > { %4543 = vmatprep.mubr.bf16.mxu0 %v2589_v39  ;;  %4332 = vmatpush3.bf16.msra.mxu1 %v5061_v9  ;;  %v2596_v9 = vpack.c.bf16 %v2568_v28, %v2567_v26  ;;  %v2597_v39 = vpack.c.bf16 %v2570_v34, %v2569_v31  ;;  %v2892_v26 = vld [vmem:[%s5175_s16 + $0x5e] sm:$0xff]  ;;  %v2893_v28 = vld [vmem:[%s5175_s16 + $0x66] sm:$0xff] }
  0xd2   : > { %4333 = vmatprep.subr.bf16.mxu1 %v5063_v41  ;;  %v2925_v31 = vpack.c.bf16 %v2894_v29, %v2893_v28  ;;  %v2896_v34 = vld [vmem:[%s5175_s16 + $0x7e] sm:$0xff]  ;;  %v1588_v29 = vld [vmem:[%s5175_s16 + $0x10b] sm:$0xff] }
  0xd3   : > { %v1587_v28 = vld [vmem:[%s5175_s16 + $0x103] sm:$0xff] }
  0xd5   : > { %4334 = vmatpush3.bf16.msra.mxu1 %v5063_v41  ;;  %v5068_v41 = vld [vmem:[%s5886_s1 + $0x238] sm:$0xff]  }
  0xd6   : > { %4631 = vmatprep.subr.bf16.mxu1 %v5613_v53 }
  0xd7   : > { %4300 = vmatmul.mubr.bf16.gmra.mrb[16].mxu1 %v5603_v50 }
  0xd8   : > { %4544 = vmatmul.mubr.bf16.vlgmr.msra.gmra.mrb[0].mxu0 %v2590_v51  ;;  %4303 = vmatprep.mubr.bf16.mxu1 %v5605_v52  ;;  %v2599_v51 = vpack.c.bf16 %v2574_v23, %v2573_v47  ;;  %v2904_v47 = vld [vmem:[%s5175_s16 + $0xbe] sm:$0xff]  ;;  %v1573_v23 = vld [vmem:[%s5175_s16 + $0x93] sm:$0xff] }
  0xd9   : > { %4547 = vmatprep.mubr.bf16.mxu0 %v2591_v49  ;;  %4580 = vmatpush3.bf16.msra.mxu0 %v5518_v1  ;;  %v2593_v1 = vpack.c.bf16 %v2562_v60, %v2561_v11  ;;  %v2575_v49 = vld [vmem:[%s5175_s16 + $0xd5] sm:$0xff]  ;;  %v2581_v11 = vld [vmem:[%s5175_s16 + $0x105] sm:$0xff]  ;;  %v2582_v60 = vld [vmem:[%s5175_s16 + $0x10d] sm:$0xff] }
  0xda   : > { %4581 = vmatprep.subr.bf16.mxu0 %v5060_v61 }
  0xdd   : > { %4582 = vmatpush3.bf16.msra.mxu0 %v5060_v61  ;;  %v2576_v61 = vld [vmem:[%s5175_s16 + $0xdd] sm:$0xff] }
  0xde   : > { %4583 = vmatprep.subr.bf16.mxu0 %v5062_v62  ;;  %v2600_v56 = vpack.c.bf16 %v2576_v61, %v2575_v49  ;;  %v2906_v49 = vld [vmem:[%s5175_s16 + $0xce] sm:$0xff] }
  0xdf   : > { %4304 = vmatmul.mubr.bf16.gmra.mrb[20].mxu1 %v5630_v0 }
  0xe0   : > { %4548 = vmatmul.mubr.bf16.gmra.mrb[4].mxu0 %v2592_v2  ;;  %4307 = vmatprep.mubr.bf16.mxu1 %v5632_v13  ;;  %v2584_v2 = vld [vmem:[%s5175_s16 + $0x11d] sm:$0xff] }
  0xe1   : > { %4551 = vmatprep.mubr.bf16.mxu0 %v2593_v1  ;;  %4584 = vmatpush3.bf16.msra.mxu0 %v5062_v62  ;;  %v2603_v62 = vpack.c.bf16 %v2582_v60, %v2581_v11  ;;  %v2585_v1 = vld [vmem:[%s5175_s16 + $0x125] sm:$0xff]  ;;  %v2910_v60 = vld [vmem:[%s5175_s16 + $0xee] sm:$0xff] }
  0xe2   : > { %4585 = vmatprep.subr.bf16.mxu0 %v5064_v25  ;;  %v2909_v11 = vld [vmem:[%s5175_s16 + $0xe6] sm:$0xff] }
  0xe5   : > { %4586 = vmatpush3.bf16.msra.mxu0 %v5064_v25  ;;  %v2586_v25 = vld [vmem:[%s5175_s16 + $0x12d] sm:$0xff] }
  0xe6   : > { %4587 = vmatprep.subr.bf16.mxu0 %v5065_v15 }
  0xe7   : > { %4308 = vmatmul.mubr.bf16.gmra.mrb[24].mxu1 %v5650_v17 }
  0xe8   : > { %4552 = vmatmul.mubr.bf16.gmra.mrb[8].mxu0 %v2594_v55  ;;  %4311 = vmatprep.mubr.bf16.mxu1 %v5652_v18  ;;  %v2888_v55 = vld [vmem:[%s5175_s16 + $0x3e] sm:$0xff] }
  0xe9   : > { %4555 = vmatprep.mubr.bf16.mxu0 %v2595_v19  ;;  %4588 = vmatpush3.bf16.msra.mxu0 %v5065_v15  ;;  %v2887_v15 = vld [vmem:[%s5175_s16 + $0x36] sm:$0xff]  ;;  %v2889_v19 = vld [vmem:[%s5175_s16 + $0x46] sm:$0xff] }
  0xea   : > { %4589 = vmatprep.subr.bf16.mxu0 %v5066_v20  ;;  %v2922_v7 = vpack.c.bf16 %v2888_v55, %v2887_v15  ;;  %v2916_v15 = vld [vmem:[%s5175_s16 + $0x11e] sm:$0xff]  ;;  %v1585_v55 = vld [vmem:[%s5175_s16 + $0xf3] sm:$0xff] }
  0xed   : > { %4590 = vmatpush3.bf16.msra.mxu0 %v5066_v20  ;;  %v2890_v20 = vld [vmem:[%s5175_s16 + $0x4e] sm:$0xff] }
  0xee   : > { %4591 = vmatprep.subr.bf16.mxu0 %v5067_v36 }
  0xef   : > { %4312 = vmatmul.mubr.bf16.gmra.mrb[28].mxu1 %v5670_v37 }
  0xf0   : > { %4556 = vmatmul.mubr.bf16.gmra.mrb[12].mxu0 %v2596_v9  ;;  %4315 = vmatprep.mubr.bf16.mxu1 %v5672_v21 }
  0xf1   : > { %4559 = vmatprep.mubr.bf16.mxu0 %v2597_v39  ;;  %4592 = vmatpush3.bf16.msra.mxu0 %v5067_v36  ;;  %v2898_v36 = vld [vmem:[%s5175_s16 + $0x8e] sm:$0xff] }
  0xf2   : > { %4593 = vmatprep.subr.bf16.mxu0 %v5068_v41 }
  0xf5   : > { %4594 = vmatpush3.bf16.msra.mxu0 %v5068_v41  ;;  %v2901_v41 = vld [vmem:[%s5175_s16 + $0xa6] sm:$0xff] }
  0xf6   : > { %v2929_v35 = vpack.c.bf16 %v2902_v43, %v2901_v41 }
  0xf7   : > { %4316 = vmatmul.mubr.bf16.gmra.mrb[32].mxu1 %v5685_v46 }
  0xf8   : > { %4560 = vmatmul.mubr.bf16.gmra.mrb[16].mxu0 %v2598_v48  ;;  %4335 = vmatprep.mubr.bf16.mxu1 %v5527_v6  ;;  %v2580_v6 = vld [vmem:[%s5175_s16 + $0xfd] sm:$0xff] }
  0xf9   : > { %4563 = vmatprep.mubr.bf16.mxu0 %v2599_v51  ;;  %v1574_v48 = vld [vmem:[%s5175_s16 + $0x9b] sm:$0xff]  ;;  %v2905_v51 = vld [vmem:[%s5175_s16 + $0xc6] sm:$0xff] }
  0xfa   : > { %v2931_v54 = vpack.c.bf16 %v2906_v49, %v2905_v51 }
  0xff   : > { %4336 = vmatmul.mubr.bf16.vlgmr.msra.gmra.mrb[0].mxu1 %v5529_v8  ;;  %v2602_v8 = vpack.c.bf16 %v2580_v6, %v2579_v59  ;;  %v2908_v59 = vld [vmem:[%s5175_s16 + $0xde] sm:$0xff]  ;;  %v1577_v6 = vld [vmem:[%s5175_s16 + $0xb3] sm:$0xff] }
 0x100   : > { %4564 = vmatmul.mubr.bf16.gmra.mrb[20].mxu0 %v2600_v56  ;;  %4639 = vmatpush3.bf16.msra.mxu1 %v5613_v53  ;;  %v2583_v53 = vld [vmem:[%s5175_s16 + $0x115] sm:$0xff]  ;;  %v1576_v56 = vld [vmem:[%s5175_s16 + $0xab] sm:$0xff] }
 0x101   : > { %4339 = vmatprep.mubr.bf16.mxu1 %v5546_v42  ;;  %4567 = vmatprep.mubr.bf16.mxu0 %v2601_v58  ;;  %v5071_v42 = vld [vmem:[%s5886_s1 + $0x110] sm:$0xff]   ;;  %v2604_v4 = vpack.c.bf16 %v2584_v2, %v2583_v53  ;;  %v2933_v53 = vpack.c.bf16 %v2910_v60, %v2909_v11  ;;  %v1579_v2 = vld [vmem:[%s5175_s16 + $0xc3] sm:$0xff] }
 0x102   : > { %4632 = vmatprep.subr.bf16.mxu1 %v5070_v63  ;;  %v2907_v58 = vld [vmem:[%s5175_s16 + $0xd6] sm:$0xff] }
 0x104   : > { %4640 = vmatpush3.bf16.msra.mxu1 %v5070_v63  ;;  %v1578_v63 = vld [vmem:[%s5175_s16 + $0xbb] sm:$0xff] }
 0x105   : > { %4633 = vmatprep.subr.bf16.mxu1 %v5071_v42 }
 0x107   : > { %4340 = vmatmul.mubr.bf16.gmra.mrb[4].mxu1 %v5548_v16  ;;  %v2605_v16 = vpack.c.bf16 %v2586_v25, %v2585_v1  ;;  %v1580_v1 = vld [vmem:[%s5175_s16 + $0xcb] sm:$0xff]  ;;  %v2911_v25 = vld [vmem:[%s5175_s16 + $0xf6] sm:$0xff] }
 0x108   : > { %4568 = vmatmul.mubr.bf16.gmra.mrb[24].mxu0 %v2602_v8  ;;  %4343 = vmatprep.mubr.bf16.mxu1 %v5564_v22  ;;  %v5073_v22 = vld [vmem:[%s5886_s1 + $0x120] sm:$0xff]   ;;  %v1602_v8 = vpack.c.bf16 %v1576_v56, %v1575_v32  ;;  %v1604_v10 = vpack.c.bf16 %v1580_v1, %v1579_v2 }
 0x109   : > { %4571 = vmatprep.mubr.bf16.mxu0 %v2603_v62  ;;  %4641 = vmatpush3.bf16.msra.mxu1 %v5071_v42  ;;  %v2932_v62 = vpack.c.bf16 %v2908_v59, %v2907_v58  ;;  %v1603_v42 = vpack.c.bf16 %v1578_v63, %v1577_v6  ;;  %v5810_v32 = vld [vmem:[%s5887_s2] ss:$0 sm:$0xff] }
 0x10a   : > { %4634 = vmatprep.subr.bf16.mxu1 %v5072_v3 }
 0x10d   : > { %4642 = vmatpush3.bf16.msra.mxu1 %v5072_v3  ;;  %v2912_v3 = vld [vmem:[%s5175_s16 + $0xfe] sm:$0xff] }
 0x10e   : > { %4635 = vmatprep.subr.bf16.mxu1 %v5073_v22 }
 0x10f   : > { %4344 = vmatmul.mubr.bf16.gmra.mrb[8].mxu1 %v5566_v24  ;;  %v2921_v24 = vpack.c.bf16 %v2886_v12, %v2885_v27  ;;  %v2934_v27 = vpack.c.bf16 %v2912_v3, %v2911_v25 }
 0x110   : > { %4572 = vmatmul.mubr.bf16.gmra.mrb[28].mxu0 %v2604_v4  ;;  %4347 = vmatprep.mubr.bf16.mxu1 %v5586_v33  ;;  %v5075_v33 = vld [vmem:[%s5886_s1 + $0x130] sm:$0xff]  }
 0x111   : > { %4575 = vmatprep.mubr.bf16.mxu0 %v2605_v16  ;;  %4643 = vmatpush3.bf16.msra.mxu1 %v5073_v22  ;;  %v1581_v4 = vld [vmem:[%s5175_s16 + $0xd3] sm:$0xff]  ;;  %v1582_v16 = vld [vmem:[%s5175_s16 + $0xdb] sm:$0xff]  ;;  %v2913_v22 = vld [vmem:[%s5175_s16 + $0x106] sm:$0xff] }
 0x112   : > { %4636 = vmatprep.subr.bf16.mxu1 %v5074_v40  ;;  %v1605_v12 = vpack.c.bf16 %v1582_v16, %v1581_v4 }
 0x115   : > { %4644 = vmatpush3.bf16.msra.mxu1 %v5074_v40  ;;  %v2935_v40 = vpack.c.bf16 %v2914_v5, %v2913_v22 }
 0x116   : > { %4637 = vmatprep.subr.bf16.mxu1 %v5075_v33 }
 0x117   : > { %4348 = vmatmul.mubr.bf16.gmra.mrb[12].mxu1 %v5588_v38  ;;  %v2923_v38 = vpack.c.bf16 %v2890_v20, %v2889_v19  ;;  %v1586_v19 = vld [vmem:[%s5175_s16 + $0xfb] sm:$0xff]  ;;  %v2917_v20 = vld [vmem:[%s5175_s16 + $0x126] sm:$0xff] }
 0x118   : > { %4576 = vmatmul.mubr.bf16.gmra.mrb[32].mxu0 %v2606_v14  ;;  %4351 = vmatprep.mubr.bf16.mxu1 %v5603_v50  ;;  %v2891_v50 = vld [vmem:[%s5175_s16 + $0x56] sm:$0xff]  ;;  %v1583_v14 = vld [vmem:[%s5175_s16 + $0xe3] sm:$0xff] }
 0x119   : > { %4595 = vmatprep.mubr.bf16.mxu0 %v2921_v24  ;;  %4645 = vmatpush3.bf16.msra.mxu1 %v5075_v33  ;;  %v2924_v30 = vpack.c.bf16 %v2892_v26, %v2891_v50  ;;  %v1584_v24 = vld [vmem:[%s5175_s16 + $0xeb] sm:$0xff]  ;;  %v2915_v33 = vld [vmem:[%s5175_s16 + $0x116] sm:$0xff]  ;;  %v1607_v50 = vpack.c.bf16 %v1586_v19, %v1585_v55 }
 0x11a   : > { %4638 = vmatprep.subr.bf16.mxu1 %v5076_v57 }
 0x11d   : > { %4646 = vmatpush3.bf16.msra.mxu1 %v5076_v57  ;;  %v2918_v57 = vld [vmem:[%s5175_s16 + $0x12e] sm:$0xff] }
 0x11e   : > { %v2937_v26 = vpack.c.bf16 %v2918_v57, %v2917_v20 }
 0x11f   : > { %4352 = vmatmul.mubr.bf16.gmra.mrb[16].mxu1 %v5605_v52  ;;  %v2895_v52 = vld [vmem:[%s5175_s16 + $0x76] sm:$0xff] }
 0x120   : > { %4596 = vmatmul.mubr.bf16.vlgmr.msra.gmra.mrb[0].mxu0 %v2922_v7  ;;  %4355 = vmatprep.mubr.bf16.mxu1 %v5630_v0  ;;  %v2897_v0 = vld [vmem:[%s5175_s16 + $0x86] sm:$0xff]  ;;  %v2926_v9 = vpack.c.bf16 %v2896_v34, %v2895_v52  ;;  %v1606_v7 = vpack.c.bf16 %v1584_v24, %v1583_v14  ;;  %v1589_v52 = vld [vmem:[%s5175_s16 + $0x113] sm:$0xff]  ;;  %v1590_v34 = vld [vmem:[%s5175_s16 + $0x11b] sm:$0xff] }
 0x121   : > { %4599 = vmatprep.mubr.bf16.mxu0 %v2923_v38  ;;  %v2927_v39 = vpack.c.bf16 %v2898_v36, %v2897_v0  ;;  %v2936_v38 = vpack.c.bf16 %v2916_v15, %v2915_v33  ;;  %v1608_v0 = vpack.c.bf16 %v1588_v29, %v1587_v28 }
 0x127   : > { %4356 = vmatmul.mubr.bf16.gmra.mrb[20].mxu1 %v5632_v13  ;;  %v2899_v13 = vld [vmem:[%s5175_s16 + $0x96] sm:$0xff] }
 0x128   : > { %4600 = vmatmul.mubr.bf16.gmra.mrb[4].mxu0 %v2924_v30  ;;  %4359 = vmatprep.mubr.bf16.mxu1 %v5650_v17  ;;  %v2900_v17 = vld [vmem:[%s5175_s16 + $0x9e] sm:$0xff]  ;;  %v2919_v30 = vld [vmem:[%s5175_s16 + $0x136] sm:$0xff] }
 0x129   : > { %4603 = vmatprep.mubr.bf16.mxu0 %v2925_v31  ;;  %v2928_v44 = vpack.c.bf16 %v2900_v17, %v2899_v13  ;;  %v2920_v31 = vld [vmem:[%s5175_s16 + $0x13e] sm:$0xff]  ;;  %v1592_v13 = vld [vmem:[%s5175_s16 + $0x12b] sm:$0xff] }
 0x12a   : > { %v2938_v36 = vpack.c.bf16 %v2920_v31, %v2919_v30 }
 0x12f   : > { %4360 = vmatmul.mubr.bf16.gmra.mrb[24].mxu1 %v5652_v18  ;;  %v1259_v18 = vld [vmem:[%s5175_s16 + $0x122] sm:$0xff] }
 0x130   : > { %4604 = vmatmul.mubr.bf16.gmra.mrb[8].mxu0 %v2926_v9  ;;  %4363 = vmatprep.mubr.bf16.mxu1 %v5670_v37  ;;  %v2903_v37 = vld [vmem:[%s5175_s16 + $0xb6] sm:$0xff]  ;;  %v1609_v9 = vpack.c.bf16 %v1590_v34, %v1589_v52 }
 0x131   : > { %4607 = vmatprep.mubr.bf16.mxu0 %v2927_v39  ;;  %v2930_v61 = vpack.c.bf16 %v2904_v47, %v2903_v37  ;;  %v1591_v39 = vld [vmem:[%s5175_s16 + $0x123] sm:$0xff] }
 0x132   : > { %v1610_v17 = vpack.c.bf16 %v1592_v13, %v1591_v39 }
 0x137   : > { %4364 = vmatmul.mubr.bf16.gmra.mrb[28].mxu1 %v5672_v21  ;;  %v1278_v21 = vpack.c.bf16 %v1260_v45, %v1259_v18 }
 0x138   : > { %4608 = vmatmul.mubr.bf16.gmra.mrb[12].mxu0 %v2928_v44  ;;  %4367 = vmatprep.mubr.bf16.mxu1 %v5685_v46  ;;  %v1601_v46 = vpack.c.bf16 %v1574_v48, %v1573_v23 }
 0x139   : > { %4611 = vmatprep.mubr.bf16.mxu0 %v2929_v35 }
 0x13f   : > { %4368 = vmatmul.mubr.bf16.gmra.mrb[32].mxu1 %v1278_v21 }
 0x140   : > { %4612 = vmatmul.mubr.bf16.gmra.mrb[16].mxu0 %v2930_v61  ;;  %4403 = vmatprep.mubr.bf16.mxu1 %v1601_v46 }
 0x141   : > { %4615 = vmatprep.mubr.bf16.mxu0 %v2931_v54 }
 0x147   : > { %4404 = vmatmul.mubr.bf16.vlgmr.msra.gmra.mrb[16].mxu1 %v1602_v8 }
 0x148   : > { %4616 = vmatmul.mubr.bf16.gmra.mrb[20].mxu0 %v2932_v62  ;;  %4407 = vmatprep.mubr.bf16.mxu1 %v1603_v42 }
 0x149   : > { %4619 = vmatprep.mubr.bf16.mxu0 %v2933_v53 }
 0x14f   : > { %4408 = vmatmul.mubr.bf16.gmra.mrb[20].mxu1 %v1604_v10 }
 0x150   : > { %4620 = vmatmul.mubr.bf16.gmra.mrb[24].mxu0 %v2934_v27  ;;  %4411 = vmatprep.mubr.bf16.mxu1 %v1605_v12 }
 0x151   : > { %4623 = vmatprep.mubr.bf16.mxu0 %v2935_v40 }
 0x157   : > { %4412 = vmatmul.mubr.bf16.gmra.mrb[24].mxu1 %v1606_v7 }
 0x158   : > { %4624 = vmatmul.mubr.bf16.gmra.mrb[28].mxu0 %v2936_v38  ;;  %4415 = vmatprep.mubr.bf16.mxu1 %v1607_v50 }
 0x159   : > { %4627 = vmatprep.mubr.bf16.mxu0 %v2937_v26 }
 0x15f   : > { %4416 = vmatmul.mubr.bf16.gmra.mrb[28].mxu1 %v1608_v0 }
 0x160   : > { %4628 = vmatmul.mubr.bf16.gmra.mrb[32].mxu0 %v2938_v36  ;;  %4419 = vmatprep.mubr.bf16.mxu1 %v1609_v9 }
 0x167   : > { %4420 = vmatmul.mubr.bf16.gmra.mrb[32].mxu1 %v1610_v17 }
 0x1d2   : > { %v4337_v41 = vpop.f32.mrb[0].mxu1 }
 0x1d3   : > { %v1378_v43 = vpop.f32.mrb[1].mxu1  ;;  %v4647_v56 = vadd.f32 %v4337_v41, %v5810_v32 }
 0x1d4   : > { %v4338_v44 = vpop.f32.mrb[2].mxu1  ;;  %v4649_v58 = vadd.f32 %v5810_v32, %v1378_v43 }
 0x1d5   : > { %v1381_v35 = vpop.f32.mrb[3].mxu1  ;;  %v4651_v6 = vadd.f32 %v4338_v44, %v5810_v32 }
 0x1d6   : > { %v4653_v60 = vadd.f32 %v5810_v32, %v1381_v35 }
 0x1da   : > { %v4341_v18 = vpop.f32.mrb[4].mxu1 }
 0x1db   : > { %v1394_v45 = vpop.f32.mrb[5].mxu1  ;;  %v4655_v16 = vadd.f32 %v4341_v18, %v5810_v32 }
 0x1dc   : > { %v4342_v37 = vpop.f32.mrb[6].mxu1  ;;  %v4657_v5 = vadd.f32 %v5810_v32, %v1394_v45 }
 0x1dd   : > { %v1397_v47 = vpop.f32.mrb[7].mxu1  ;;  %v4659_v12 = vadd.f32 %v4342_v37, %v5810_v32 }
 0x1de   : > { %v4661_v24 = vadd.f32 %v5810_v32, %v1397_v47 }
 0x1e2   : > { %v4345_v23 = vpop.f32.mrb[8].mxu1 }
 0x1e3   : > { %v1410_v48 = vpop.f32.mrb[9].mxu1  ;;  %v4663_v26 = vadd.f32 %v4345_v23, %v5810_v32 }
 0x1e4   : > { %v4346_v51 = vpop.f32.mrb[10].mxu1  ;;  %v4665_v29 = vadd.f32 %v5810_v32, %v1410_v48 }
 0x1e5   : > { %v1413_v49 = vpop.f32.mrb[11].mxu1  ;;  %v4667_v52 = vadd.f32 %v4346_v51, %v5810_v32 }
 0x1e6   : > { %v4669_v36 = vadd.f32 %v5810_v32, %v1413_v49 }
 0x1ea   : > { %v5799_v21 = vpop.f32.mrb[12].mxu1 }
 0x1eb   : > { %v5801_v61 = vpop.f32.mrb[13].mxu1  ;;  %v4671_v45 = vadd.f32 %v5799_v21, %v5810_v32 }
 0x1ec   : > { %v5803_v46 = vpop.f32.mrb[14].mxu1  ;;  %v4673_v47 = vadd.f32 %v5810_v32, %v5801_v61 }
 0x1ed   : > { %v5805_v54 = vpop.f32.mrb[15].mxu1  ;;  %v4675_v51 = vadd.f32 %v5803_v46, %v5810_v32 }
 0x1f3   : > { %v4597_v59 = vpop.f32.mrb[0].mxu0 }
 0x1f4   : > { %v4648_v63 = vadd.f32 %v4647_v56, %v4597_v59  ;;  %v3038_v11 = vpop.f32.mrb[1].mxu0 }
 0x1f5   : > { %v4650_v8 = vadd.f32 %v4649_v58, %v3038_v11  ;;  %v4598_v62 = vpop.f32.mrb[2].mxu0  ;;  %v4677_v58 = vadd.f32 %v5810_v32, %v5805_v54 }
 0x1f6   : > { %v4652_v42 = vadd.f32 %v4651_v6, %v4598_v62  ;;  %v3041_v53 = vpop.f32.mrb[3].mxu0  ;;  %v3219_v1 = vmax.f32 %v4648_v63, 0.0 }
 0x1f7   : > { %v4654_v2 = vadd.f32 %v4653_v60, %v3041_v53  ;;  %v3217_v3 = vmax.f32 %v4650_v8, 0.0 }
 0x1f8   : > { %v3220_v25 = vmax.f32 %v4652_v42, 0.0 }
 0x1f9   : > { %v3218_v4 = vmax.f32 %v4654_v2, 0.0 }
 0x1fa   : > { %v3830_v22 = vpack.c.bf16 %v3220_v25, %v3219_v1 }
 0x1fb   : > { %v3825_v10 = vpack.c.bf16 %v3218_v4, %v3217_v3  ;;  %v4601_v27 = vpop.f32.mrb[4].mxu0 }
 0x1fc   : > { %3912 = vst [vmem:[%s5820_s29 + $0x8] sm:$0xff] %v3830_v22   ;;  %v4656_v40 = vadd.f32 %v4655_v16, %v4601_v27  ;;  %v3054_v14 = vpop.f32.mrb[5].mxu0 }
 0x1fd   : > { %3826 = vst [vmem:[%s5820_s29] sm:$0xff] %v3825_v10   ;;  %v4658_v33 = vadd.f32 %v4657_v5, %v3054_v14  ;;  %v4602_v15 = vpop.f32.mrb[6].mxu0 }
 0x1fe   : > { %v4660_v55 = vadd.f32 %v4659_v12, %v4602_v15  ;;  %v3057_v19 = vpop.f32.mrb[7].mxu0  ;;  %v3223_v57 = vmax.f32 %v4656_v40, 0.0 }
 0x1ff   : > { %v4662_v20 = vadd.f32 %v4661_v24, %v3057_v19  ;;  %v3221_v38 = vmax.f32 %v4658_v33, 0.0 }
 0x200   : > { %v3224_v7 = vmax.f32 %v4660_v55, 0.0 }
 0x201   : > { %v3222_v50 = vmax.f32 %v4662_v20, 0.0 }
 0x202   : > { %v3840_v28 = vpack.c.bf16 %v3224_v7, %v3223_v57 }
 0x203   : > { %v3835_v30 = vpack.c.bf16 %v3222_v50, %v3221_v38  ;;  %v4605_v31 = vpop.f32.mrb[8].mxu0 }
 0x204   : > { %3914 = vst [vmem:[%s5820_s29 + $0x18] sm:$0xff] %v3840_v28   ;;  %v4664_v34 = vadd.f32 %v4663_v26, %v4605_v31  ;;  %v3070_v0 = vpop.f32.mrb[9].mxu0 }
 0x205   : > { %3913 = vst [vmem:[%s5820_s29 + $0x10] sm:$0xff] %v3835_v30   ;;  %v4666_v9 = vadd.f32 %v4665_v29, %v3070_v0  ;;  %v4606_v39 = vpop.f32.mrb[10].mxu0 }
 0x206   : > { %v4668_v13 = vadd.f32 %v4667_v52, %v4606_v39  ;;  %v3073_v17 = vpop.f32.mrb[11].mxu0  ;;  %v3227_v43 = vmax.f32 %v4664_v34, 0.0 }
 0x207   : > { %v4670_v41 = vadd.f32 %v4669_v36, %v3073_v17  ;;  %v3225_v35 = vmax.f32 %v4666_v9, 0.0 }
 0x208   : > { %v3228_v44 = vmax.f32 %v4668_v13, 0.0 }
 0x209   : > { %v3226_v18 = vmax.f32 %v4670_v41, 0.0 }
 0x20a   : > { %v3850_v37 = vpack.c.bf16 %v3228_v44, %v3227_v43 }
 0x20b   : > { %v3845_v23 = vpack.c.bf16 %v3226_v18, %v3225_v35  ;;  %v4609_v48 = vpop.f32.mrb[12].mxu0 }
 0x20c   : > { %3916 = vst [vmem:[%s5820_s29 + $0x28] sm:$0xff] %v3850_v37   ;;  %v4672_v49 = vadd.f32 %v4671_v45, %v4609_v48  ;;  %v3086_v56 = vpop.f32.mrb[13].mxu0 }
 0x20d   : > { %3915 = vst [vmem:[%s5820_s29 + $0x20] sm:$0xff] %v3845_v23   ;;  %v4674_v59 = vadd.f32 %v4673_v47, %v3086_v56  ;;  %v4610_v21 = vpop.f32.mrb[14].mxu0 }
 0x20e   : > { %v4676_v6 = vadd.f32 %v4675_v51, %v4610_v21  ;;  %v3089_v63 = vpop.f32.mrb[15].mxu0  ;;  %v3231_v61 = vmax.f32 %v4672_v49, 0.0 }
 0x20f   : > { %v4678_v11 = vadd.f32 %v4677_v58, %v3089_v63  ;;  %v3229_v8 = vmax.f32 %v4674_v59, 0.0 }
 0x210   : > { %v3232_v60 = vmax.f32 %v4676_v6, 0.0 }
 0x211   : > { %v3230_v62 = vmax.f32 %v4678_v11, 0.0 }
 0x212   : > { %v3860_v42 = vpack.c.bf16 %v3232_v60, %v3231_v61 }
 0x213   : > { %v3855_v46 = vpack.c.bf16 %v3230_v62, %v3229_v8  ;;  %v4613_v53 = vpop.f32.mrb[16].mxu0 }
 0x214   : > { %3918 = vst [vmem:[%s5820_s29 + $0x38] sm:$0xff] %v3860_v42   ;;  %v3102_v2 = vpop.f32.mrb[17].mxu0 }
 0x215   : > { %3917 = vst [vmem:[%s5820_s29 + $0x30] sm:$0xff] %v3855_v46   ;;  %v4614_v1 = vpop.f32.mrb[18].mxu0 }
 0x216   : > { %v3105_v25 = vpop.f32.mrb[19].mxu0 }
 0x21a   : > { %v4405_v54 = vpop.f32.mrb[16].mxu1 }
 0x21b   : > { %v4679_v3 = vadd.f32 %v4405_v54, %v5810_v32  ;;  %v4617_v4 = vpop.f32.mrb[20].mxu0  ;;  %v1774_v16 = vpop.f32.mrb[17].mxu1 }
 0x21c   : > { %v4681_v22 = vadd.f32 %v5810_v32, %v1774_v16  ;;  %v3118_v5 = vpop.f32.mrb[21].mxu0  ;;  %v4406_v10 = vpop.f32.mrb[18].mxu1 }
 0x21d   : > { %v4680_v27 = vadd.f32 %v4679_v3, %v4613_v53  ;;  %v4683_v12 = vadd.f32 %v4406_v10, %v5810_v32  ;;  %v4618_v40 = vpop.f32.mrb[22].mxu0  ;;  %v1777_v14 = vpop.f32.mrb[19].mxu1 }
 0x21e   : > { %v4682_v24 = vadd.f32 %v4681_v22, %v3102_v2  ;;  %v4685_v33 = vadd.f32 %v5810_v32, %v1777_v14  ;;  %v3121_v15 = vpop.f32.mrb[23].mxu0 }
 0x21f   : > { %v4684_v55 = vadd.f32 %v4683_v12, %v4614_v1  ;;  %v3235_v20 = vmax.f32 %v4680_v27, 0.0 }
 0x220   : > { %v4686_v19 = vadd.f32 %v4685_v33, %v3105_v25  ;;  %v3233_v7 = vmax.f32 %v4682_v24, 0.0 }
 0x221   : > { %v3236_v57 = vmax.f32 %v4684_v55, 0.0 }
 0x222   : > { %v3234_v38 = vmax.f32 %v4686_v19, 0.0  ;;  %v4409_v50 = vpop.f32.mrb[20].mxu1 }
 0x223   : > { %v3870_v26 = vpack.c.bf16 %v3236_v57, %v3235_v20  ;;  %v4687_v28 = vadd.f32 %v4409_v50, %v5810_v32  ;;  %v4621_v29 = vpop.f32.mrb[24].mxu0  ;;  %v1790_v30 = vpop.f32.mrb[21].mxu1 }
 0x224   : > { %v3865_v31 = vpack.c.bf16 %v3234_v38, %v3233_v7  ;;  %v4689_v52 = vadd.f32 %v5810_v32, %v1790_v30  ;;  %v3134_v34 = vpop.f32.mrb[25].mxu0  ;;  %v4410_v0 = vpop.f32.mrb[22].mxu1 }
 0x225   : > { %3920 = vst [vmem:[%s5820_s29 + $0x48] sm:$0xff] %v3870_v26   ;;  %v4688_v36 = vadd.f32 %v4687_v28, %v4617_v4  ;;  %v4691_v9 = vadd.f32 %v4410_v0, %v5810_v32  ;;  %v4622_v39 = vpop.f32.mrb[26].mxu0  ;;  %v1793_v13 = vpop.f32.mrb[23].mxu1 }
 0x226   : > { %3919 = vst [vmem:[%s5820_s29 + $0x40] sm:$0xff] %v3865_v31   ;;  %v4690_v17 = vadd.f32 %v4689_v52, %v3118_v5  ;;  %v4693_v41 = vadd.f32 %v5810_v32, %v1793_v13  ;;  %v3137_v43 = vpop.f32.mrb[27].mxu0 }
 0x227   : > { %v4692_v44 = vadd.f32 %v4691_v9, %v4618_v40  ;;  %v3239_v18 = vmax.f32 %v4688_v36, 0.0 }
 0x228   : > { %v4694_v35 = vadd.f32 %v4693_v41, %v3121_v15  ;;  %v3237_v37 = vmax.f32 %v4690_v17, 0.0 }
 0x229   : > { %v3240_v45 = vmax.f32 %v4692_v44, 0.0 }
 0x22a   : > { %v3238_v47 = vmax.f32 %v4694_v35, 0.0  ;;  %v4413_v23 = vpop.f32.mrb[24].mxu1 }
 0x22b   : > { %v3880_v48 = vpack.c.bf16 %v3240_v45, %v3239_v18  ;;  %v4695_v51 = vadd.f32 %v4413_v23, %v5810_v32  ;;  %v4625_v49 = vpop.f32.mrb[28].mxu0  ;;  %v1806_v56 = vpop.f32.mrb[25].mxu1 }
 0x22c   : > { %v3875_v58 = vpack.c.bf16 %v3238_v47, %v3237_v37  ;;  %v4697_v59 = vadd.f32 %v5810_v32, %v1806_v56  ;;  %v3150_v21 = vpop.f32.mrb[29].mxu0  ;;  %v4414_v6 = vpop.f32.mrb[26].mxu1 }
 0x22d   : > { %3922 = vst [vmem:[%s5820_s29 + $0x58] sm:$0xff] %v3880_v48   ;;  %v4696_v63 = vadd.f32 %v4695_v51, %v4621_v29  ;;  %v4699_v11 = vadd.f32 %v4414_v6, %v5810_v32  ;;  %v4626_v61 = vpop.f32.mrb[30].mxu0  ;;  %v1809_v60 = vpop.f32.mrb[27].mxu1 }
 0x22e   : > { %3921 = vst [vmem:[%s5820_s29 + $0x50] sm:$0xff] %v3875_v58   ;;  %v4698_v8 = vadd.f32 %v4697_v59, %v3134_v34  ;;  %v4701_v62 = vadd.f32 %v5810_v32, %v1809_v60  ;;  %v3153_v42 = vpop.f32.mrb[31].mxu0 }
 0x22f   : > { %v4700_v46 = vadd.f32 %v4699_v11, %v4622_v39  ;;  %v3243_v2 = vmax.f32 %v4696_v63, 0.0 }
 0x230   : > { %v4702_v53 = vadd.f32 %v4701_v62, %v3137_v43  ;;  %v3241_v25 = vmax.f32 %v4698_v8, 0.0 }
 0x231   : > { %v3244_v1 = vmax.f32 %v4700_v46, 0.0 }
 0x232   : > { %v3242_v54 = vmax.f32 %v4702_v53, 0.0  ;;  %v4417_v3 = vpop.f32.mrb[28].mxu1 }
 0x233   : > { %v3890_v4 = vpack.c.bf16 %v3244_v1, %v3243_v2  ;;  %v4703_v16 = vadd.f32 %v4417_v3, %v5810_v32  ;;  %v4629_v22 = vpop.f32.mrb[32].mxu0  ;;  %v1822_v5 = vpop.f32.mrb[29].mxu1 }
 0x234   : > { %v3885_v10 = vpack.c.bf16 %v3242_v54, %v3241_v25  ;;  %v4705_v27 = vadd.f32 %v5810_v32, %v1822_v5  ;;  %v3166_v12 = vpop.f32.mrb[33].mxu0  ;;  %v4418_v40 = vpop.f32.mrb[30].mxu1 }
 0x235   : > { %3924 = vst [vmem:[%s5820_s29 + $0x68] sm:$0xff] %v3890_v4   ;;  %v4704_v14 = vadd.f32 %v4703_v16, %v4625_v49  ;;  %v4707_v24 = vadd.f32 %v4418_v40, %v5810_v32  ;;  %v4630_v33 = vpop.f32.mrb[34].mxu0  ;;  %v1825_v15 = vpop.f32.mrb[31].mxu1 }
 0x236   : > { %3923 = vst [vmem:[%s5820_s29 + $0x60] sm:$0xff] %v3885_v10   ;;  %v4706_v55 = vadd.f32 %v4705_v27, %v3150_v21  ;;  %v4709_v19 = vadd.f32 %v5810_v32, %v1825_v15  ;;  %v3169_v20 = vpop.f32.mrb[35].mxu0 }
 0x237   : > { %v4708_v57 = vadd.f32 %v4707_v24, %v4626_v61  ;;  %v3247_v38 = vmax.f32 %v4704_v14, 0.0 }
 0x238   : > { %v4710_v7 = vadd.f32 %v4709_v19, %v3153_v42  ;;  %v3245_v26 = vmax.f32 %v4706_v55, 0.0 }
 0x239   : > { %v3248_v50 = vmax.f32 %v4708_v57, 0.0 }
 0x23a   : > { %v3246_v28 = vmax.f32 %v4710_v7, 0.0  ;;  %v4421_v29 = vpop.f32.mrb[32].mxu1 }
 0x23b   : > { %v3900_v30 = vpack.c.bf16 %v3248_v50, %v3247_v38  ;;  %v4711_v31 = vadd.f32 %v4421_v29, %v5810_v32  ;;  %v1838_v52 = vpop.f32.mrb[33].mxu1 }
 0x23c   : > { %v3895_v34 = vpack.c.bf16 %v3246_v28, %v3245_v26  ;;  %v4713_v0 = vadd.f32 %v5810_v32, %v1838_v52  ;;  %v4422_v36 = vpop.f32.mrb[34].mxu1 }
 0x23d   : > { %3926 = vst [vmem:[%s5820_s29 + $0x78] sm:$0xff] %v3900_v30   ;;  %v4712_v9 = vadd.f32 %v4711_v31, %v4629_v22  ;;  %v4715_v39 = vadd.f32 %v4422_v36, %v5810_v32  ;;  %v1841_v13 = vpop.f32.mrb[35].mxu1 }
 0x23e   : > { %3925 = vst [vmem:[%s5820_s29 + $0x70] sm:$0xff] %v3895_v34   ;;  %v4714_v17 = vadd.f32 %v4713_v0, %v3166_v12  ;;  %v4717_v41 = vadd.f32 %v5810_v32, %v1841_v13 }
 0x23f   : > { %v4716_v43 = vadd.f32 %v4715_v39, %v4630_v33  ;;  %v3251_v35 = vmax.f32 %v4712_v9, 0.0 }
 0x240   : > { %v4718_v44 = vadd.f32 %v4717_v41, %v3169_v20  ;;  %v3249_v45 = vmax.f32 %v4714_v17, 0.0 }
 0x241   : > { %v3252_v18 = vmax.f32 %v4716_v43, 0.0 }
 0x242   : > { %v3250_v37 = vmax.f32 %v4718_v44, 0.0 }
 0x243   : > { %v3910_v47 = vpack.c.bf16 %v3252_v18, %v3251_v35 }
 0x244   : > { %v3905_v23 = vpack.c.bf16 %v3250_v37, %v3249_v45 }
 0x245   : > { %3928 = vst [vmem:[%s5820_s29 + $0x88] sm:$0xff] %v3910_v47  }
 0x246   : > { %3927 = vst [vmem:[%s5820_s29 + $0x80] sm:$0xff] %v3905_v23  }
 0x247 PF: > { %s13_s14 = sadd.s32 1, %s5099_s14   ;;  %s5889_s12 = smov %s5095_s13 }
 0x248   : > { %p10_p5 = scmp.ge.s32.totalorder %s13_s14, 4   ;;  %s5890_s13 = smov %s5892_s15 }
 0x24a   :  { %12 = sbr.rel (!%p10_p5) target bundleno = 2 (0x2), region = 76 }

// kernel: unet_mmd_forward.18
= control target key start
LH: loop header
LB: loop body
LE: loop exit
PB: predicated region body
PF: predicated region fallthrough
CT: control target
= control target key end

     0   :  { %s2881_s12 = smov 0   ;;  %s2883_s13 = smov 0   ;;  %s3482_s0 = inlined_call_operand.vmem [shape: f32[2,104,128], index: 0, kind: input, shape index: {}]   ;;  %s3483_s1 = inlined_call_operand.vmem [shape: bf16[9,128,128], index: 1, kind: input, shape index: {}]   ;;  %s3484_s2 = inlined_call_operand.vmem [shape: f32[1,128], index: 2, kind: input, shape index: {}]   ;;  %s3485_s3 = inlined_call_operand.vmem [shape: bf16[2,80,128], index: 3, kind: output, shape index: {}]  }
   0x1   :  { %s2885_s14 = smov 0  }
   0x2 LB: > { %s25_s15 = sadd.s32 1, %s2853_s13  ;;  %p1867_p0 = scmp.ge.s32.totalorder %s2857_s14, 1  ;;  %s2857_s14 = sphi %s2885_s14, %s13_s14   ;;  %s2853_s13 = sphi %s2883_s13, %s3487_s13   ;;  %s2849_s12 = sphi %s2881_s12, %s3486_s12  }
   0x3   : > { %p27_p1 = scmp.ge.s32.totalorder %s25_s15, 2  ;;  %p168_p2 = scmp.lt.s32.totalorder %s2857_s14, 3 }
   0x5   : > { %s3489_s15 = smov (%p27_p1, %s25_s15), 0  ;;  %p169_p3 = pnand %p1867_p0, %p168_p2 }
   0x6   : > { %v2763_v0 = vld [vmem:[%s3483_s1] sm:$0xff] (!%p169_p3)   ;;  %v2859_v1 = vmov (!%p169_p3), 0.0   ;;  %v2765_v3 = vld [vmem:[%s3483_s1 + $0x8] sm:$0xff] (!%p169_p3)   ;;  %vm2860_vm0 = vmmov (!%p169_p3), 0   ;;  %v2767_v5 = vld [vmem:[%s3483_s1 + $0x10] sm:$0xff] (!%p169_p3)   ;;  %p202_p4 = scmp.lt.s32.totalorder (!%p169_p3), %s2849_s12, 1 }
   0x7   : > { %172 = sbr.rel (%p169_p3) target bundleno = 437 (0x1b5), region = 32  ;;  %2239 = vmatprep.subr.bf16.mxu1 (!%p169_p3), %v2859_v1  ;;  %2383 = vmatprep.subr.bf16.mxu0 (!%p169_p3), %v2859_v1  ;;  %v2764_v2 = vld [vmem:[%s3483_s1 + $0x100] sm:$0xff] (!%p169_p3)   ;;  %v2766_v4 = vld [vmem:[%s3483_s1 + $0x108] sm:$0xff] (!%p169_p3)   ;;  %v2768_v6 = vld [vmem:[%s3483_s1 + $0x110] sm:$0xff] (!%p169_p3)  }
   0x8   : > { %2240 = vmatpush3.bf16.msra.mxu1 (!%p169_p3), %v2763_v0  ;;  %2255 = vmatprep.mubr.msk.bf16.mxu1 (!%p169_p3), %vm2860_vm0, %v2859_v1  ;;  %v2769_v7 = vld [vmem:[%s3483_s1 + $0x18] sm:$0xff] (!%p169_p3)   ;;  %v2771_v9 = vld [vmem:[%s3483_s1 + $0x20] sm:$0xff] (!%p169_p3)   ;;  %v2773_v11 = vld [vmem:[%s3483_s1 + $0x28] sm:$0xff] (!%p169_p3)  }
   0x9   : > { %2384 = vmatpush3.bf16.msra.mxu0 (!%p169_p3), %v2764_v2  ;;  %2241 = vmatprep.subr.bf16.mxu1 (!%p169_p3), %v2859_v1  ;;  %v2770_v8 = vld [vmem:[%s3483_s1 + $0x118] sm:$0xff] (!%p169_p3)   ;;  %v2772_v10 = vld [vmem:[%s3483_s1 + $0x120] sm:$0xff] (!%p169_p3)   ;;  %v2774_v12 = vld [vmem:[%s3483_s1 + $0x128] sm:$0xff] (!%p169_p3)  }
   0xa   : > { %2385 = vmatprep.subr.bf16.mxu0 (!%p169_p3), %v2859_v1  ;;  %2399 = vmatprep.mubr.msk.bf16.mxu0 (!%p169_p3), %vm2860_vm0, %v2859_v1  ;;  %v2775_v13 = vld [vmem:[%s3483_s1 + $0x30] sm:$0xff] (!%p169_p3)   ;;  %v2777_v15 = vld [vmem:[%s3483_s1 + $0x38] sm:$0xff] (!%p169_p3)   ;;  %v2779_v23 = vld [vmem:[%s3483_s1 + $0x140] sm:$0xff] (!%p169_p3)  }
   0xb   : > { %v2776_v14 = vld [vmem:[%s3483_s1 + $0x130] sm:$0xff] (!%p169_p3)   ;;  %v2778_v17 = vld [vmem:[%s3483_s1 + $0x138] sm:$0xff] (!%p169_p3)   ;;  %v2781_v24 = vld [vmem:[%s3483_s1 + $0x40] sm:$0xff] (!%p169_p3)  }
   0xc   : > { %2242 = vmatpush3.bf16.msra.mxu1 (!%p169_p3), %v2765_v3  ;;  %v2780_v25 = vld [vmem:[%s3483_s1 + $0x148] sm:$0xff] (!%p169_p3)   ;;  %v2782_v33 = vld [vmem:[%s3483_s1 + $0x150] sm:$0xff] (!%p169_p3)   ;;  %v2784_v39 = vld [vmem:[%s3483_s1 + $0x158] sm:$0xff] (!%p169_p3)  }
   0xd   : > { %2386 = vmatpush3.bf16.msra.mxu0 (!%p169_p3), %v2766_v4  ;;  %2243 = vmatprep.subr.bf16.mxu1 (!%p169_p3), %v2859_v1  ;;  %v2783_v30 = vld [vmem:[%s3483_s1 + $0x48] sm:$0xff] (!%p169_p3)   ;;  %v2785_v34 = vld [vmem:[%s3483_s1 + $0x50] sm:$0xff] (!%p169_p3)   ;;  %v2786_v40 = vld [vmem:[%s3483_s1 + $0x58] sm:$0xff] (!%p169_p3)  }
   0xe   : > { %2387 = vmatprep.subr.bf16.mxu0 %v2859_v1  ;;  %s3491_s12 = smov (!%p202_p4, %s2849_s12), 1  ;;  %v2787_v43 = vld [vmem:[%s3483_s1 + $0x160] sm:$0xff]   ;;  %v2789_v49 = vld [vmem:[%s3483_s1 + $0x168] sm:$0xff]   ;;  %v2791_v53 = vld [vmem:[%s3483_s1 + $0x170] sm:$0xff]  }
   0xf   : > { %s2735_s9 = smul.u32 104, %s3491_s12  ;;  %v2788_v45 = vld [vmem:[%s3483_s1 + $0x60] sm:$0xff]   ;;  %v2790_v50 = vld [vmem:[%s3483_s1 + $0x68] sm:$0xff]   ;;  %v2792_v54 = vld [vmem:[%s3483_s1 + $0x70] sm:$0xff]  }
  0x10   : > { %2244 = vmatpush3.bf16.msra.mxu1 %v2767_v5  ;;  %v2793_v59 = vld [vmem:[%s3483_s1 + $0x178] sm:$0xff]  }
  0x11   : > { %2388 = vmatpush3.bf16.msra.mxu0 %v2768_v6  ;;  %2245 = vmatprep.subr.bf16.mxu1 %v2859_v1  ;;  %s2961_s20 = scalar_lea.vmem %s3482_s0, %s2735_s9  ;;  %v2794_v60 = vld [vmem:[%s3483_s1 + $0x78] sm:$0xff]   ;;  %v2795_v6 = vld [vmem:[%s3483_s1 + $0x180] sm:$0xff]  }
  0x12   : > { %2389 = vmatprep.subr.bf16.mxu0 %v2859_v1  ;;  %v230_v16 = vld [vmem:[%s2961_s20] sm:$0xff]  ;;  %v231_v18 = vld [vmem:[%s2961_s20 + $0x8] sm:$0xff]  ;;  %v882_v20 = vld [vmem:[%s2961_s20 + $0x13] sm:$0xff] }
  0x13   : > { %v881_v19 = vld [vmem:[%s2961_s20 + $0xb] sm:$0xff]  ;;  %v240_v21 = vpack.c.bf16 %v231_v18, %v230_v16  ;;  %v233_v27 = vld [vmem:[%s2961_s20 + $0x18] sm:$0xff]  ;;  %v884_v29 = vld [vmem:[%s2961_s20 + $0x23] sm:$0xff] }
  0x14   : > { %2246 = vmatpush3.bf16.msra.mxu1 %v2769_v7  ;;  %v891_v22 = vpack.c.bf16 %v882_v20, %v881_v19  ;;  %v232_v26 = vld [vmem:[%s2961_s20 + $0x10] sm:$0xff]  ;;  %v883_v28 = vld [vmem:[%s2961_s20 + $0x1b] sm:$0xff]  ;;  %v235_v36 = vld [vmem:[%s2961_s20 + $0x28] sm:$0xff] }
  0x15   : > { %2390 = vmatpush3.bf16.msra.mxu0 %v2770_v8  ;;  %2247 = vmatprep.subr.bf16.mxu1 %v2859_v1  ;;  %v241_v31 = vpack.c.bf16 %v233_v27, %v232_v26  ;;  %v892_v32 = vpack.c.bf16 %v884_v29, %v883_v28  ;;  %v234_v35 = vld [vmem:[%s2961_s20 + $0x20] sm:$0xff]  ;;  %v885_v37 = vld [vmem:[%s2961_s20 + $0x2b] sm:$0xff]  ;;  %v886_v38 = vld [vmem:[%s2961_s20 + $0x33] sm:$0xff] }
  0x16   : > { %2391 = vmatprep.subr.bf16.mxu0 %v2859_v1  ;;  %v242_v41 = vpack.c.bf16 %v235_v36, %v234_v35  ;;  %v893_v42 = vpack.c.bf16 %v886_v38, %v885_v37  ;;  %v236_v44 = vld [vmem:[%s2961_s20 + $0x30] sm:$0xff]  ;;  %v237_v46 = vld [vmem:[%s2961_s20 + $0x38] sm:$0xff]  ;;  %v888_v48 = vld [vmem:[%s2961_s20 + $0x43] sm:$0xff] }
  0x17   : > { %v887_v47 = vld [vmem:[%s2961_s20 + $0x3b] sm:$0xff]  ;;  %v243_v51 = vpack.c.bf16 %v237_v46, %v236_v44  ;;  %v239_v56 = vld [vmem:[%s2961_s20 + $0x48] sm:$0xff]  ;;  %v890_v58 = vld [vmem:[%s2961_s20 + $0x53] sm:$0xff] }
  0x18   : > { %2248 = vmatpush3.bf16.msra.mxu1 %v2771_v9  ;;  %v894_v52 = vpack.c.bf16 %v888_v48, %v887_v47  ;;  %v238_v55 = vld [vmem:[%s2961_s20 + $0x40] sm:$0xff]  ;;  %v889_v57 = vld [vmem:[%s2961_s20 + $0x4b] sm:$0xff]  ;;  %v3089_v3 = vld [vmem:[%s2961_s20 + $0x14] sm:$0xff] }
  0x19   : > { %2392 = vmatpush3.bf16.msra.mxu0 %v2772_v10  ;;  %2249 = vmatprep.subr.bf16.mxu1 %v2859_v1  ;;  %v244_v61 = vpack.c.bf16 %v239_v56, %v238_v55  ;;  %v895_v62 = vpack.c.bf16 %v890_v58, %v889_v57  ;;  %v392_v63 = vld [vmem:[%s2961_s20 + $0x1] sm:$0xff]  ;;  %v393_v0 = vld [vmem:[%s2961_s20 + $0x9] sm:$0xff]  ;;  %v394_v7 = vld [vmem:[%s2961_s20 + $0x11] sm:$0xff] }
  0x1a   : > { %2393 = vmatprep.subr.bf16.mxu0 %v2859_v1  ;;  %v1044_v2 = vld [vmem:[%s2961_s20 + $0xc] sm:$0xff]  ;;  %v402_v4 = vpack.c.bf16 %v393_v0, %v392_v63  ;;  %v2797_v8 = vld [vmem:[%s3483_s1 + $0x80] sm:$0xff]   ;;  %v2818_v63 = vld [vmem:[%s3483_s1 + $0xd8] sm:$0xff]  }
  0x1b   : > { %v1054_v5 = vpack.c.bf16 %v3089_v3, %v1044_v2  ;;  %v2796_v9 = vld [vmem:[%s3483_s1 + $0x188] sm:$0xff]   ;;  %v395_v10 = vld [vmem:[%s2961_s20 + $0x19] sm:$0xff]  ;;  %v2798_v16 = vld [vmem:[%s3483_s1 + $0x190] sm:$0xff]  }
  0x1c   : > { %2250 = vmatpush3.bf16.msra.mxu1 %v2773_v11  ;;  %v3106_v11 = vld [vmem:[%s2961_s20 + $0x1c] sm:$0xff]  ;;  %v397_v19 = vld [vmem:[%s2961_s20 + $0x29] sm:$0xff]  ;;  %v398_v28 = vld [vmem:[%s2961_s20 + $0x31] sm:$0xff] }
  0x1d   : > { %2394 = vmatpush3.bf16.msra.mxu0 %v2774_v12  ;;  %2251 = vmatprep.subr.bf16.mxu1 %v2859_v1  ;;  %v3111_v12 = vld [vmem:[%s2961_s20 + $0x24] sm:$0xff]  ;;  %v3133_v20 = vld [vmem:[%s2961_s20 + $0x2c] sm:$0xff]  ;;  %v399_v29 = vld [vmem:[%s2961_s20 + $0x39] sm:$0xff] }
  0x1e   : > { %2395 = vmatprep.subr.bf16.mxu0 %v2859_v1  ;;  %v396_v18 = vld [vmem:[%s2961_s20 + $0x21] sm:$0xff]  ;;  %v2807_v36 = vld [vmem:[%s3483_s1 + $0x1b0] sm:$0xff]   ;;  %v1218_v57 = vpack.c.bf16 %v3133_v20, %v3111_v12 }
  0x1f   : > { %v2803_v26 = vld [vmem:[%s3483_s1 + $0x1a0] sm:$0xff]   ;;  %v2808_v37 = vld [vmem:[%s3483_s1 + $0xb0] sm:$0xff]   ;;  %v2815_v55 = vld [vmem:[%s3483_s1 + $0xc8] sm:$0xff]  }
  0x20   : > { %2252 = vmatpush3.bf16.msra.mxu1 %v2775_v13  ;;  %v2799_v13 = vld [vmem:[%s3483_s1 + $0x88] sm:$0xff]   ;;  %v2804_v27 = vld [vmem:[%s3483_s1 + $0xa0] sm:$0xff]   ;;  %v2814_v58 = vld [vmem:[%s3483_s1 + $0x1d0] sm:$0xff]  }
  0x21   : > { %2396 = vmatpush3.bf16.msra.mxu0 %v2776_v14  ;;  %2253 = vmatprep.subr.bf16.mxu1 %v2859_v1  ;;  %v403_v14 = vpack.c.bf16 %v395_v10, %v394_v7  ;;  %v400_v38 = vld [vmem:[%s2961_s20 + $0x41] sm:$0xff]  ;;  %v3216_v47 = vld [vmem:[%s2961_s20 + $0xa] sm:$0xff] }
  0x22   : > { %2397 = vmatprep.subr.bf16.mxu0 %v2859_v1  ;;  %v555_v46 = vld [vmem:[%s2961_s20 + $0x2] sm:$0xff] }
  0x23   : > { %v565_v48 = vpack.c.bf16 %v3216_v47, %v555_v46  ;;  %v2821_v7 = vld [vmem:[%s3483_s1 + $0x1e8] sm:$0xff]   ;;  %v2834_v46 = vld [vmem:[%s3483_s1 + $0x238] sm:$0xff]  }
  0x24   : > { %2254 = vmatpush3.bf16.msra.mxu1 %v2777_v15  ;;  %v1055_v15 = vpack.c.bf16 %v3111_v12, %v3106_v11  ;;  %v2824_v12 = vld [vmem:[%s3483_s1 + $0xf0] sm:$0xff]  }
  0x25   : > { %2398 = vmatpush3.bf16.msra.mxu0 %v2778_v17  ;;  %2275 = vmatprep.subr.bf16.mxu1 %v2859_v1  ;;  %v2801_v17 = vld [vmem:[%s3483_s1 + $0x90] sm:$0xff]  }
  0x26   : > { %2419 = vmatprep.subr.bf16.mxu0 %v2859_v1 }
  0x27   : > { %2256 = vmatmul.mubr.bf16.vlgmr.msra.gmra.mrb[0].mxu1 %v240_v21  ;;  %v3138_v21 = vld [vmem:[%s2961_s20 + $0x34] sm:$0xff] }
  0x28   : > { %2400 = vmatmul.mubr.bf16.vlgmr.msra.gmra.mrb[0].mxu0 %v891_v22  ;;  %2259 = vmatprep.mubr.msk.bf16.mxu1 %vm2860_vm0, %v2859_v1  ;;  %v2800_v22 = vld [vmem:[%s3483_s1 + $0x198] sm:$0xff]  }
  0x29   : > { %2420 = vmatpush3.bf16.msra.mxu0 %v2779_v23  ;;  %2403 = vmatprep.mubr.msk.bf16.mxu0 %vm2860_vm0, %v2859_v1  ;;  %v2802_v23 = vld [vmem:[%s3483_s1 + $0x98] sm:$0xff]  }
  0x2a   : > { %2421 = vmatprep.subr.bf16.mxu0 %v2859_v1  ;;  %2276 = vmatpush3.bf16.msra.mxu1 %v2781_v24  ;;  %v404_v24 = vpack.c.bf16 %v397_v19, %v396_v18 }
  0x2b   : > { %2277 = vmatprep.subr.bf16.mxu1 %v2859_v1 }
  0x2d   : > { %2422 = vmatpush3.bf16.msra.mxu0 %v2780_v25  ;;  %v1056_v25 = vpack.c.bf16 %v3138_v21, %v3133_v20  ;;  %v1370_v20 = vld [vmem:[%s2961_s20 + $0x15] sm:$0xff] }
  0x2e   : > { %2423 = vmatprep.subr.bf16.mxu0 %v2859_v1  ;;  %2278 = vmatpush3.bf16.msra.mxu1 %v2783_v30  ;;  %v3163_v30 = vld [vmem:[%s2961_s20 + $0x3c] sm:$0xff] }
  0x2f   : > { %2260 = vmatmul.mubr.bf16.gmra.mrb[4].mxu1 %v241_v31  ;;  %2279 = vmatprep.subr.bf16.mxu1 %v2859_v1  ;;  %v3168_v31 = vld [vmem:[%s2961_s20 + $0x44] sm:$0xff]  ;;  %v1219_v2 = vpack.c.bf16 %v3163_v30, %v3138_v21 }
  0x30   : > { %2404 = vmatmul.mubr.bf16.gmra.mrb[4].mxu0 %v892_v32  ;;  %2263 = vmatprep.mubr.msk.bf16.mxu1 %vm2860_vm0, %v2859_v1  ;;  %v2805_v32 = vld [vmem:[%s3483_s1 + $0x1a8] sm:$0xff]   ;;  %v1057_v35 = vpack.c.bf16 %v3168_v31, %v3163_v30  ;;  %v1371_v21 = vld [vmem:[%s2961_s20 + $0x1d] sm:$0xff]  ;;  %v2829_v30 = vld [vmem:[%s3483_s1 + $0x210] sm:$0xff]  }
  0x31   : > { %2424 = vmatpush3.bf16.msra.mxu0 %v2782_v33  ;;  %2407 = vmatprep.mubr.msk.bf16.mxu0 %vm2860_vm0, %v2859_v1  ;;  %v2806_v33 = vld [vmem:[%s3483_s1 + $0xa8] sm:$0xff]  }
  0x32   : > { %2425 = vmatprep.subr.bf16.mxu0 %v2859_v1  ;;  %2280 = vmatpush3.bf16.msra.mxu1 %v2785_v34  ;;  %v405_v34 = vpack.c.bf16 %v399_v29, %v398_v28 }
  0x33   : > { %2281 = vmatprep.subr.bf16.mxu1 %v2859_v1 }
  0x35   : > { %2426 = vmatpush3.bf16.msra.mxu0 %v2784_v39  ;;  %v401_v39 = vld [vmem:[%s2961_s20 + $0x49] sm:$0xff] }
  0x36   : > { %2427 = vmatprep.subr.bf16.mxu0 %v2859_v1  ;;  %2282 = vmatpush3.bf16.msra.mxu1 %v2786_v40  ;;  %v3195_v40 = vld [vmem:[%s2961_s20 + $0x4c] sm:$0xff]  ;;  %v406_v44 = vpack.c.bf16 %v401_v39, %v400_v38 }
  0x37   : > { %2264 = vmatmul.mubr.bf16.gmra.mrb[8].mxu1 %v242_v41  ;;  %2283 = vmatprep.subr.bf16.mxu1 %v2859_v1  ;;  %v3198_v41 = vld [vmem:[%s2961_s20 + $0x54] sm:$0xff]  ;;  %v1220_v10 = vpack.c.bf16 %v3195_v40, %v3168_v31  ;;  %v2832_v39 = vld [vmem:[%s3483_s1 + $0x228] sm:$0xff]  }
  0x38   : > { %2408 = vmatmul.mubr.bf16.gmra.mrb[8].mxu0 %v893_v42  ;;  %2267 = vmatprep.mubr.msk.bf16.mxu1 %vm2860_vm0, %v2859_v1  ;;  %v2809_v42 = vld [vmem:[%s3483_s1 + $0x1b8] sm:$0xff]   ;;  %v1377_v38 = vld [vmem:[%s2961_s20 + $0x4d] sm:$0xff] }
  0x39   : > { %2428 = vmatpush3.bf16.msra.mxu0 %v2787_v43  ;;  %2411 = vmatprep.mubr.msk.bf16.mxu0 %vm2860_vm0, %v2859_v1  ;;  %v2810_v43 = vld [vmem:[%s3483_s1 + $0xb8] sm:$0xff]  }
  0x3a   : > { %2284 = vmatpush3.bf16.msra.mxu1 %v2788_v45  ;;  %2429 = vmatprep.subr.bf16.mxu0 %v2859_v1  ;;  %v1058_v45 = vpack.c.bf16 %v3198_v41, %v3195_v40  ;;  %v1374_v31 = vld [vmem:[%s2961_s20 + $0x35] sm:$0xff] }
  0x3b   : > { %2285 = vmatprep.subr.bf16.mxu1 %v2859_v1 }
  0x3d   : > { %2430 = vmatpush3.bf16.msra.mxu0 %v2789_v49  ;;  %v1217_v49 = vpack.c.bf16 %v3106_v11, %v3089_v3  ;;  %v2819_v3 = vld [vmem:[%s3483_s1 + $0x1e0] sm:$0xff]   ;;  %v2823_v11 = vld [vmem:[%s3483_s1 + $0x1f0] sm:$0xff]  }
  0x3e   : > { %2286 = vmatpush3.bf16.msra.mxu1 %v2790_v50  ;;  %2431 = vmatprep.subr.bf16.mxu0 %v2859_v1  ;;  %v2811_v50 = vld [vmem:[%s3483_s1 + $0x1c0] sm:$0xff]  }
  0x3f   : > { %2268 = vmatmul.mubr.bf16.gmra.mrb[12].mxu1 %v243_v51  ;;  %2287 = vmatprep.subr.bf16.mxu1 %v2859_v1  ;;  %v2813_v51 = vld [vmem:[%s3483_s1 + $0xc0] sm:$0xff]  }
  0x40   : > { %2412 = vmatmul.mubr.bf16.gmra.mrb[12].mxu0 %v894_v52  ;;  %2271 = vmatprep.mubr.msk.bf16.mxu1 %vm2860_vm0, %v2859_v1  ;;  %v3232_v52 = vld [vmem:[%s2961_s20 + $0x12] sm:$0xff] }
  0x41   : > { %2415 = vmatprep.mubr.msk.bf16.mxu0 %vm2860_vm0, %v2859_v1  ;;  %2432 = vmatpush3.bf16.msra.mxu0 %v2791_v53  ;;  %v3235_v53 = vld [vmem:[%s2961_s20 + $0x1a] sm:$0xff] }
  0x42   : > { %2288 = vmatpush3.bf16.msra.mxu1 %v2792_v54  ;;  %2433 = vmatprep.subr.bf16.mxu0 %v2859_v1  ;;  %v2812_v54 = vld [vmem:[%s3483_s1 + $0x1c8] sm:$0xff]   ;;  %v566_v56 = vpack.c.bf16 %v3235_v53, %v3232_v52 }
  0x43   : > { %2289 = vmatprep.subr.bf16.mxu1 %v2859_v1 }
  0x45   : > { %2434 = vmatpush3.bf16.msra.mxu0 %v2793_v59  ;;  %v2817_v59 = vld [vmem:[%s3483_s1 + $0xd0] sm:$0xff]  }
  0x46   : > { %2290 = vmatpush3.bf16.msra.mxu1 %v2794_v60  ;;  %2455 = vmatprep.subr.bf16.mxu0 %v2859_v1  ;;  %v3262_v60 = vld [vmem:[%s2961_s20 + $0x22] sm:$0xff] }
  0x47   : > { %2272 = vmatmul.mubr.bf16.gmra.mrb[16].mxu1 %v244_v61  ;;  %2311 = vmatprep.subr.bf16.mxu1 %v2859_v1  ;;  %v3265_v61 = vld [vmem:[%s2961_s20 + $0x2a] sm:$0xff]  ;;  %v729_v28 = vpack.c.bf16 %v3262_v60, %v3235_v53 }
  0x48   : > { %2416 = vmatmul.mubr.bf16.gmra.mrb[16].mxu0 %v895_v62  ;;  %2291 = vmatprep.mubr.msk.bf16.mxu1 %vm2860_vm0, %v2859_v1  ;;  %v2816_v62 = vld [vmem:[%s3483_s1 + $0x1d8] sm:$0xff]   ;;  %v567_v0 = vpack.c.bf16 %v3265_v61, %v3262_v60 }
  0x49   : > { %2435 = vmatprep.mubr.msk.bf16.mxu0 %vm2860_vm0, %v2859_v1 }
  0x4f   : > { %2292 = vmatmul.mubr.bf16.vlgmr.msra.gmra.mrb[0].mxu1 %v402_v4  ;;  %v2820_v4 = vld [vmem:[%s3483_s1 + $0xe0] sm:$0xff]  }
  0x50   : > { %2436 = vmatmul.mubr.bf16.vlgmr.msra.gmra.mrb[0].mxu0 %v1054_v5  ;;  %2295 = vmatprep.mubr.msk.bf16.mxu1 %vm2860_vm0, %v2859_v1  ;;  %v3292_v5 = vld [vmem:[%s2961_s20 + $0x32] sm:$0xff] }
  0x51   : > { %2456 = vmatpush3.bf16.msra.mxu0 %v2795_v6  ;;  %2439 = vmatprep.mubr.msk.bf16.mxu0 %vm2860_vm0, %v2859_v1  ;;  %v3295_v6 = vld [vmem:[%s2961_s20 + $0x3a] sm:$0xff] }
  0x52   : > { %2457 = vmatprep.subr.bf16.mxu0 %v2859_v1  ;;  %2312 = vmatpush3.bf16.msra.mxu1 %v2797_v8  ;;  %v2822_v8 = vld [vmem:[%s3483_s1 + $0xe8] sm:$0xff]  }
  0x53   : > { %2313 = vmatprep.subr.bf16.mxu1 %v2859_v1 }
  0x55   : > { %2458 = vmatpush3.bf16.msra.mxu0 %v2796_v9  ;;  %v568_v9 = vpack.c.bf16 %v3295_v6, %v3292_v5 }
  0x56   : > { %2459 = vmatprep.subr.bf16.mxu0 %v2859_v1  ;;  %2314 = vmatpush3.bf16.msra.mxu1 %v2799_v13  ;;  %v3322_v13 = vld [vmem:[%s2961_s20 + $0x42] sm:$0xff] }
  0x57   : > { %2296 = vmatmul.mubr.bf16.gmra.mrb[4].mxu1 %v403_v14  ;;  %2315 = vmatprep.subr.bf16.mxu1 %v2859_v1  ;;  %v3325_v14 = vld [vmem:[%s2961_s20 + $0x4a] sm:$0xff]  ;;  %v731_v40 = vpack.c.bf16 %v3322_v13, %v3295_v6 }
  0x58   : > { %2440 = vmatmul.mubr.bf16.gmra.mrb[4].mxu0 %v1055_v15  ;;  %2299 = vmatprep.mubr.msk.bf16.mxu1 %vm2860_vm0, %v2859_v1  ;;  %v1216_v15 = vld [vmem:[%s2961_s20 + $0x5c] sm:$0xff]  ;;  %v569_v18 = vpack.c.bf16 %v3325_v14, %v3322_v13 }
  0x59   : > { %2460 = vmatpush3.bf16.msra.mxu0 %v2798_v16  ;;  %2443 = vmatprep.mubr.msk.bf16.mxu0 %vm2860_vm0, %v2859_v1  ;;  %v2825_v16 = vld [vmem:[%s3483_s1 + $0x1f8] sm:$0xff]   ;;  %v1221_v19 = vpack.c.bf16 %v1216_v15, %v3198_v41 }
  0x5a   : > { %2461 = vmatprep.subr.bf16.mxu0 %v2859_v1  ;;  %2316 = vmatpush3.bf16.msra.mxu1 %v2801_v17  ;;  %v2826_v17 = vld [vmem:[%s3483_s1 + $0xf8] sm:$0xff]  }
  0x5b   : > { %2317 = vmatprep.subr.bf16.mxu1 %v2859_v1 }
  0x5d   : > { %2462 = vmatpush3.bf16.msra.mxu0 %v2800_v22  ;;  %v728_v22 = vpack.c.bf16 %v3232_v52, %v3216_v47  ;;  %v1534_v52 = vld [vmem:[%s2961_s20 + $0x1e] sm:$0xff] }
  0x5e   : > { %2463 = vmatprep.subr.bf16.mxu0 %v2859_v1  ;;  %2318 = vmatpush3.bf16.msra.mxu1 %v2802_v23  ;;  %v1380_v23 = vpack.c.bf16 %v1371_v21, %v1370_v20 }
  0x5f   : > { %2300 = vmatmul.mubr.bf16.gmra.mrb[8].mxu1 %v404_v24  ;;  %2319 = vmatprep.subr.bf16.mxu1 %v2859_v1  ;;  %v2827_v24 = vld [vmem:[%s3483_s1 + $0x200] sm:$0xff]  }
  0x60   : > { %2444 = vmatmul.mubr.bf16.gmra.mrb[8].mxu0 %v1056_v25  ;;  %2303 = vmatprep.mubr.msk.bf16.mxu1 %vm2860_vm0, %v2859_v1  ;;  %v2828_v25 = vld [vmem:[%s3483_s1 + $0x208] sm:$0xff]  }
  0x61   : > { %2464 = vmatpush3.bf16.msra.mxu0 %v2803_v26  ;;  %2447 = vmatprep.mubr.msk.bf16.mxu0 %vm2860_vm0, %v2859_v1  ;;  %v1372_v26 = vld [vmem:[%s2961_s20 + $0x25] sm:$0xff] }
  0x62   : > { %2320 = vmatpush3.bf16.msra.mxu1 %v2804_v27  ;;  %2465 = vmatprep.subr.bf16.mxu0 %v2859_v1  ;;  %v1373_v27 = vld [vmem:[%s2961_s20 + $0x2d] sm:$0xff] }
  0x63   : > { %2321 = vmatprep.subr.bf16.mxu1 %v2859_v1  ;;  %v1381_v29 = vpack.c.bf16 %v1373_v27, %v1372_v26 }
  0x65   : > { %2466 = vmatpush3.bf16.msra.mxu0 %v2805_v32  ;;  %v1375_v32 = vld [vmem:[%s2961_s20 + $0x3d] sm:$0xff] }
  0x66   : > { %2322 = vmatpush3.bf16.msra.mxu1 %v2806_v33  ;;  %2467 = vmatprep.subr.bf16.mxu0 %v2859_v1  ;;  %v2830_v33 = vld [vmem:[%s3483_s1 + $0x218] sm:$0xff]  }
  0x67   : > { %2304 = vmatmul.mubr.bf16.gmra.mrb[12].mxu1 %v405_v34  ;;  %2323 = vmatprep.subr.bf16.mxu1 %v2859_v1  ;;  %v730_v34 = vpack.c.bf16 %v3292_v5, %v3265_v61  ;;  %v1537_v61 = vld [vmem:[%s2961_s20 + $0x36] sm:$0xff] }
  0x68   : > { %2448 = vmatmul.mubr.bf16.gmra.mrb[12].mxu0 %v1057_v35  ;;  %2307 = vmatprep.mubr.msk.bf16.mxu1 %vm2860_vm0, %v2859_v1  ;;  %v1382_v35 = vpack.c.bf16 %v1375_v32, %v1374_v31 }
  0x69   : > { %2451 = vmatprep.mubr.msk.bf16.mxu0 %vm2860_vm0, %v2859_v1  ;;  %2468 = vmatpush3.bf16.msra.mxu0 %v2807_v36  ;;  %v2831_v36 = vld [vmem:[%s3483_s1 + $0x220] sm:$0xff]  }
  0x6a   : > { %2324 = vmatpush3.bf16.msra.mxu1 %v2808_v37  ;;  %2469 = vmatprep.subr.bf16.mxu0 %v2859_v1  ;;  %v1376_v37 = vld [vmem:[%s2961_s20 + $0x45] sm:$0xff] }
  0x6b   : > { %2325 = vmatprep.subr.bf16.mxu1 %v2859_v1  ;;  %v1383_v41 = vpack.c.bf16 %v1377_v38, %v1376_v37 }
  0x6d   : > { %2470 = vmatpush3.bf16.msra.mxu0 %v2809_v42  ;;  %v2833_v42 = vld [vmem:[%s3483_s1 + $0x230] sm:$0xff]  }
  0x6e   : > { %2326 = vmatpush3.bf16.msra.mxu1 %v2810_v43  ;;  %2491 = vmatprep.subr.bf16.mxu0 %v2859_v1  ;;  %v727_v43 = vld [vmem:[%s2961_s20 + $0x52] sm:$0xff] }
  0x6f   : > { %2308 = vmatmul.mubr.bf16.gmra.mrb[16].mxu1 %v406_v44  ;;  %2347 = vmatprep.subr.bf16.mxu1 %v2859_v1  ;;  %v1378_v44 = vld [vmem:[%s2961_s20 + $0x55] sm:$0xff]  ;;  %v732_v47 = vpack.c.bf16 %v727_v43, %v3325_v14 }
  0x70   : > { %2452 = vmatmul.mubr.bf16.gmra.mrb[16].mxu0 %v1058_v45  ;;  %2327 = vmatprep.mubr.msk.bf16.mxu1 %vm2860_vm0, %v2859_v1  ;;  %v1379_v45 = vld [vmem:[%s2961_s20 + $0x5d] sm:$0xff] }
  0x71   : > { %2471 = vmatprep.mubr.msk.bf16.mxu0 %vm2860_vm0, %v2859_v1 }
  0x77   : > { %2328 = vmatmul.mubr.bf16.vlgmr.msra.gmra.mrb[0].mxu1 %v565_v48  ;;  %v1384_v48 = vpack.c.bf16 %v1379_v45, %v1378_v44 }
  0x78   : > { %2472 = vmatmul.mubr.bf16.vlgmr.msra.gmra.mrb[0].mxu0 %v1217_v49  ;;  %2331 = vmatprep.mubr.msk.bf16.mxu1 %vm2860_vm0, %v2859_v1  ;;  %v1539_v49 = vld [vmem:[%s2961_s20 + $0x46] sm:$0xff] }
  0x79   : > { %2492 = vmatpush3.bf16.msra.mxu0 %v2811_v50  ;;  %2475 = vmatprep.mubr.msk.bf16.mxu0 %vm2860_vm0, %v2859_v1  ;;  %v1540_v50 = vld [vmem:[%s2961_s20 + $0x4e] sm:$0xff] }
  0x7a   : > { %2493 = vmatprep.subr.bf16.mxu0 %v2859_v1  ;;  %2348 = vmatpush3.bf16.msra.mxu1 %v2813_v51  ;;  %v1533_v51 = vld [vmem:[%s2961_s20 + $0x16] sm:$0xff]  ;;  %v1546_v53 = vpack.c.bf16 %v1540_v50, %v1539_v49 }
  0x7b   : > { %2349 = vmatprep.subr.bf16.mxu1 %v2859_v1 }
  0x7d   : > { %2494 = vmatpush3.bf16.msra.mxu0 %v2812_v54  ;;  %v1543_v54 = vpack.c.bf16 %v1534_v52, %v1533_v51 }
  0x7e   : > { %2495 = vmatprep.subr.bf16.mxu0 %v2859_v1  ;;  %2350 = vmatpush3.bf16.msra.mxu1 %v2815_v55  ;;  %v1541_v55 = vld [vmem:[%s2961_s20 + $0x56] sm:$0xff] }
  0x7f   : > { %2332 = vmatmul.mubr.bf16.gmra.mrb[4].mxu1 %v566_v56  ;;  %2351 = vmatprep.subr.bf16.mxu1 %v2859_v1  ;;  %v1542_v56 = vld [vmem:[%s2961_s20 + $0x5e] sm:$0xff] }
  0x80   : > { %2476 = vmatmul.mubr.bf16.gmra.mrb[4].mxu0 %v1218_v57  ;;  %2335 = vmatprep.mubr.msk.bf16.mxu1 %vm2860_vm0, %v2859_v1  ;;  %v1535_v57 = vld [vmem:[%s2961_s20 + $0x26] sm:$0xff] }
  0x81   : > { %2496 = vmatpush3.bf16.msra.mxu0 %v2814_v58  ;;  %2479 = vmatprep.mubr.msk.bf16.mxu0 %vm2860_vm0, %v2859_v1  ;;  %v1536_v58 = vld [vmem:[%s2961_s20 + $0x2e] sm:$0xff] }
  0x82   : > { %2497 = vmatprep.subr.bf16.mxu0 %v2859_v1  ;;  %2352 = vmatpush3.bf16.msra.mxu1 %v2817_v59  ;;  %v1547_v59 = vpack.c.bf16 %v1542_v56, %v1541_v55  ;;  %v1544_v60 = vpack.c.bf16 %v1536_v58, %v1535_v57 }
  0x83   : > { %2353 = vmatprep.subr.bf16.mxu1 %v2859_v1 }
  0x85   : > { %2498 = vmatpush3.bf16.msra.mxu0 %v2816_v62  ;;  %v1538_v62 = vld [vmem:[%s2961_s20 + $0x3e] sm:$0xff]  ;;  %s2736_s20 = smul.u32 40, %s3491_s12 }
  0x86   : > { %2499 = vmatprep.subr.bf16.mxu0 %v2859_v1  ;;  %2354 = vmatpush3.bf16.msra.mxu1 %v2818_v63  ;;  %v1545_v63 = vpack.c.bf16 %v1538_v62, %v1537_v61 }
  0x87   : > { %2336 = vmatmul.mubr.bf16.gmra.mrb[8].mxu1 %v567_v0  ;;  %2355 = vmatprep.subr.bf16.mxu1 %v2859_v1  ;;  %s3460_s8 = scalar_lea.vmem %s3485_s3, %s2736_s20 }
  0x88   : > { %2480 = vmatmul.mubr.bf16.gmra.mrb[8].mxu0 %v1219_v2  ;;  %2339 = vmatprep.mubr.msk.bf16.mxu1 %vm2860_vm0, %v2859_v1 }
  0x89   : > { %2500 = vmatpush3.bf16.msra.mxu0 %v2819_v3  ;;  %2483 = vmatprep.mubr.msk.bf16.mxu0 %vm2860_vm0, %v2859_v1 }
  0x8a   : > { %2356 = vmatpush3.bf16.msra.mxu1 %v2820_v4  ;;  %2501 = vmatprep.subr.bf16.mxu0 %v2859_v1 }
  0x8b   : > { %2357 = vmatprep.subr.bf16.mxu1 %v2859_v1 }
  0x8d   : > { %2502 = vmatpush3.bf16.msra.mxu0 %v2821_v7 }
  0x8e   : > { %2358 = vmatpush3.bf16.msra.mxu1 %v2822_v8  ;;  %2503 = vmatprep.subr.bf16.mxu0 %v2859_v1 }
  0x8f   : > { %2340 = vmatmul.mubr.bf16.gmra.mrb[12].mxu1 %v568_v9  ;;  %2359 = vmatprep.subr.bf16.mxu1 %v2859_v1 }
  0x90   : > { %2484 = vmatmul.mubr.bf16.gmra.mrb[12].mxu0 %v1220_v10  ;;  %2343 = vmatprep.mubr.msk.bf16.mxu1 %vm2860_vm0, %v2859_v1 }
  0x91   : > { %2487 = vmatprep.mubr.msk.bf16.mxu0 %vm2860_vm0, %v2859_v1  ;;  %2504 = vmatpush3.bf16.msra.mxu0 %v2823_v11 }
  0x92   : > { %2360 = vmatpush3.bf16.msra.mxu1 %v2824_v12  ;;  %2505 = vmatprep.subr.bf16.mxu0 %v2859_v1 }
  0x93   : > { %2361 = vmatprep.subr.bf16.mxu1 %v2859_v1 }
  0x95   : > { %2506 = vmatpush3.bf16.msra.mxu0 %v2825_v16 }
  0x96   : > { %2362 = vmatpush3.bf16.msra.mxu1 %v2826_v17  ;;  %2527 = vmatprep.subr.bf16.mxu0 %v2859_v1 }
  0x97   : > { %2344 = vmatmul.mubr.bf16.gmra.mrb[16].mxu1 %v569_v18  ;;  %2563 = vmatprep.subr.bf16.mxu1 %v2859_v1 }
  0x98   : > { %2488 = vmatmul.mubr.bf16.gmra.mrb[16].mxu0 %v1221_v19  ;;  %2363 = vmatprep.mubr.msk.bf16.mxu1 %vm2860_vm0, %v2859_v1 }
  0x99   : > { %2507 = vmatprep.mubr.msk.bf16.mxu0 %vm2860_vm0, %v2859_v1 }
  0x9f   : > { %2364 = vmatmul.mubr.bf16.vlgmr.msra.gmra.mrb[0].mxu1 %v728_v22 }
  0xa0   : > { %2508 = vmatmul.mubr.bf16.vlgmr.msra.gmra.mrb[0].mxu0 %v1380_v23  ;;  %2367 = vmatprep.mubr.msk.bf16.mxu1 %vm2860_vm0, %v2859_v1 }
  0xa1   : > { %2528 = vmatpush3.bf16.msra.mxu0 %v2827_v24  ;;  %2511 = vmatprep.mubr.msk.bf16.mxu0 %vm2860_vm0, %v2859_v1 }
  0xa2   : > { %2529 = vmatprep.subr.bf16.mxu0 %v2859_v1  ;;  %2571 = vmatpush3.bf16.msra.mxu1 %v2827_v24 }
  0xa3   : > { %2564 = vmatprep.subr.bf16.mxu1 %v2859_v1 }
  0xa5   : > { %2530 = vmatpush3.bf16.msra.mxu0 %v2828_v25 }
  0xa6   : > { %2531 = vmatprep.subr.bf16.mxu0 %v2859_v1  ;;  %2572 = vmatpush3.bf16.msra.mxu1 %v2828_v25 }
  0xa7   : > { %2368 = vmatmul.mubr.bf16.gmra.mrb[4].mxu1 %v729_v28  ;;  %2565 = vmatprep.subr.bf16.mxu1 %v2859_v1 }
  0xa8   : > { %2512 = vmatmul.mubr.bf16.gmra.mrb[4].mxu0 %v1381_v29  ;;  %2371 = vmatprep.mubr.msk.bf16.mxu1 %vm2860_vm0, %v2859_v1 }
  0xa9   : > { %2532 = vmatpush3.bf16.msra.mxu0 %v2829_v30  ;;  %2515 = vmatprep.mubr.msk.bf16.mxu0 %vm2860_vm0, %v2859_v1 }
  0xaa   : > { %2533 = vmatprep.subr.bf16.mxu0 %v2859_v1  ;;  %2573 = vmatpush3.bf16.msra.mxu1 %v2829_v30 }
  0xab   : > { %2566 = vmatprep.subr.bf16.mxu1 %v2859_v1 }
  0xad   : > { %2534 = vmatpush3.bf16.msra.mxu0 %v2830_v33 }
  0xae   : > { %2535 = vmatprep.subr.bf16.mxu0 %v2859_v1  ;;  %2574 = vmatpush3.bf16.msra.mxu1 %v2830_v33 }
  0xaf   : > { %2372 = vmatmul.mubr.bf16.gmra.mrb[8].mxu1 %v730_v34  ;;  %2567 = vmatprep.subr.bf16.mxu1 %v2859_v1 }
  0xb0   : > { %2516 = vmatmul.mubr.bf16.gmra.mrb[8].mxu0 %v1382_v35  ;;  %2375 = vmatprep.mubr.msk.bf16.mxu1 %vm2860_vm0, %v2859_v1 }
  0xb1   : > { %2536 = vmatpush3.bf16.msra.mxu0 %v2831_v36  ;;  %2519 = vmatprep.mubr.msk.bf16.mxu0 %vm2860_vm0, %v2859_v1 }
  0xb2   : > { %2575 = vmatpush3.bf16.msra.mxu1 %v2831_v36  ;;  %2537 = vmatprep.subr.bf16.mxu0 %v2859_v1 }
  0xb3   : > { %2568 = vmatprep.subr.bf16.mxu1 %v2859_v1 }
  0xb5   : > { %2538 = vmatpush3.bf16.msra.mxu0 %v2832_v39 }
  0xb6   : > { %2576 = vmatpush3.bf16.msra.mxu1 %v2832_v39  ;;  %2539 = vmatprep.subr.bf16.mxu0 %v2859_v1 }
  0xb7   : > { %2376 = vmatmul.mubr.bf16.gmra.mrb[12].mxu1 %v731_v40  ;;  %2569 = vmatprep.subr.bf16.mxu1 %v2859_v1 }
  0xb8   : > { %2520 = vmatmul.mubr.bf16.gmra.mrb[12].mxu0 %v1383_v41  ;;  %2379 = vmatprep.mubr.msk.bf16.mxu1 %vm2860_vm0, %v2859_v1 }
  0xb9   : > { %2523 = vmatprep.mubr.msk.bf16.mxu0 %vm2860_vm0, %v2859_v1  ;;  %2540 = vmatpush3.bf16.msra.mxu0 %v2833_v42 }
  0xba   : > { %2577 = vmatpush3.bf16.msra.mxu1 %v2833_v42  ;;  %2541 = vmatprep.subr.bf16.mxu0 %v2859_v1 }
  0xbb   : > { %2570 = vmatprep.subr.bf16.mxu1 %v2859_v1 }
  0xbd   : > { %2542 = vmatpush3.bf16.msra.mxu0 %v2834_v46 }
  0xbe   : > { %2578 = vmatpush3.bf16.msra.mxu1 %v2834_v46 }
  0xbf   : > { %2380 = vmatmul.mubr.bf16.gmra.mrb[16].mxu1 %v732_v47 }
  0xc0   : > { %2524 = vmatmul.mubr.bf16.gmra.mrb[16].mxu0 %v1384_v48  ;;  %2555 = vmatprep.mubr.msk.bf16.mxu1 %vm2860_vm0, %v2859_v1 }
  0xc1   : > { %2543 = vmatprep.mubr.msk.bf16.mxu0 %vm2860_vm0, %v2859_v1 }
  0xc7   : > { %2556 = vmatmul.mubr.bf16.vlgmr.msra.gmra.mrb[20].mxu1 %v1546_v53 }
  0xc8   : > { %2544 = vmatmul.mubr.bf16.vlgmr.msra.gmra.mrb[0].mxu0 %v1543_v54  ;;  %2559 = vmatprep.mubr.msk.bf16.mxu1 %vm2860_vm0, %v2859_v1 }
  0xc9   : > { %2547 = vmatprep.mubr.msk.bf16.mxu0 %vm2860_vm0, %v2859_v1 }
  0xcf   : > { %2560 = vmatmul.mubr.bf16.gmra.mrb[24].mxu1 %v1547_v59 }
  0xd0   : > { %2548 = vmatmul.mubr.bf16.gmra.mrb[4].mxu0 %v1544_v60 }
  0xd1   : > { %2551 = vmatprep.mubr.msk.bf16.mxu0 %vm2860_vm0, %v2859_v1  ;;  %v3448_v1 = vld [vmem:[%s3484_s2] ss:$0 sm:$0xff] }
  0xd8   : > { %2552 = vmatmul.mubr.bf16.gmra.mrb[8].mxu0 %v1545_v63 }
 0x172   : > { %v832_v0 = vpop.f32.mrb[0].mxu1 }
 0x173   : > { %v2365_v2 = vpop.f32.mrb[1].mxu1  ;;  %v2579_v37 = vadd.f32 %v3448_v1, %v832_v0 }
 0x174   : > { %v835_v3 = vpop.f32.mrb[2].mxu1 }
 0x175   : > { %v2366_v4 = vpop.f32.mrb[3].mxu1  ;;  %v2581_v42 = vadd.f32 %v3448_v1, %v835_v3 }
 0x17a   : > { %v840_v5 = vpop.f32.mrb[4].mxu1 }
 0x17b   : > { %v2369_v6 = vpop.f32.mrb[5].mxu1  ;;  %v2583_v56 = vadd.f32 %v3448_v1, %v840_v5 }
 0x17c   : > { %v843_v7 = vpop.f32.mrb[6].mxu1 }
 0x17d   : > { %v2370_v8 = vpop.f32.mrb[7].mxu1  ;;  %v2585_v62 = vadd.f32 %v3448_v1, %v843_v7 }
 0x182   : > { %v3441_v9 = vpop.f32.mrb[8].mxu1 }
 0x183   : > { %v2373_v10 = vpop.f32.mrb[9].mxu1  ;;  %v2587_v7 = vadd.f32 %v3448_v1, %v3441_v9 }
 0x184   : > { %v3443_v11 = vpop.f32.mrb[10].mxu1 }
 0x185   : > { %v2374_v12 = vpop.f32.mrb[11].mxu1 }
 0x18a   : > { %v856_v13 = vpop.f32.mrb[12].mxu1 }
 0x18b   : > { %v2591_v14 = vadd.f32 %v3448_v1, %v856_v13  ;;  %v1508_v15 = vpop.f32.mrb[12].mxu0  ;;  %v2377_v16 = vpop.f32.mrb[13].mxu1 }
 0x18c   : > { %v2521_v17 = vpop.f32.mrb[13].mxu0  ;;  %v859_v18 = vpop.f32.mrb[14].mxu1 }
 0x18d   : > { %v2592_v19 = vadd.f32 %v2591_v14, %v1508_v15  ;;  %v2594_v20 = vadd.f32 %v3448_v1, %v859_v18  ;;  %v1511_v21 = vpop.f32.mrb[14].mxu0  ;;  %v2378_v22 = vpop.f32.mrb[15].mxu1  ;;  %v2589_v18 = vadd.f32 %v3448_v1, %v3443_v11 }
 0x18e   : > { %v2522_v23 = vpop.f32.mrb[15].mxu0 }
 0x18f   : > { %v2595_v24 = vadd.f32 %v2594_v20, %v1511_v21 }
 0x192   : > { %v864_v25 = vpop.f32.mrb[16].mxu1 }
 0x193   : > { %v2597_v26 = vadd.f32 %v3448_v1, %v864_v25  ;;  %v1516_v27 = vpop.f32.mrb[16].mxu0  ;;  %v2381_v28 = vpop.f32.mrb[17].mxu1 }
 0x194   : > { %v2525_v29 = vpop.f32.mrb[17].mxu0  ;;  %v867_v30 = vpop.f32.mrb[18].mxu1 }
 0x195   : > { %v2598_v31 = vadd.f32 %v2597_v26, %v1516_v27  ;;  %v2600_v32 = vadd.f32 %v3448_v1, %v867_v30  ;;  %v1519_v33 = vpop.f32.mrb[18].mxu0  ;;  %v2382_v34 = vpop.f32.mrb[19].mxu1 }
 0x196   : > { %v2526_v35 = vpop.f32.mrb[19].mxu0 }
 0x197   : > { %v2601_v36 = vadd.f32 %v2600_v32, %v1519_v33 }
 0x19a   : > { %v1671_v38 = vpop.f32.mrb[20].mxu1 }
 0x19b   : > { %v1647_v39 = vpop.f32.mrb[0].mxu0  ;;  %v2593_v40 = vadd.f32 %v2592_v19, %v1671_v38  ;;  %v2557_v41 = vpop.f32.mrb[21].mxu1 }
 0x19c   : > { %v2580_v43 = vadd.f32 %v2579_v37, %v1647_v39  ;;  %v2545_v44 = vpop.f32.mrb[1].mxu0  ;;  %v1674_v45 = vpop.f32.mrb[22].mxu1 }
 0x19d   : > { %v1650_v46 = vpop.f32.mrb[2].mxu0  ;;  %v2596_v47 = vadd.f32 %v2595_v24, %v1674_v45  ;;  %v2558_v48 = vpop.f32.mrb[23].mxu1  ;;  %v1702_v51 = vmax.f32 %v2593_v40, 0.0 }
 0x19e   : > { %v2582_v49 = vadd.f32 %v2581_v42, %v1650_v46  ;;  %v2546_v50 = vpop.f32.mrb[3].mxu0  ;;  %v1696_v53 = vmax.f32 %v2580_v43, 0.0 }
 0x19f   : > { %v1703_v52 = vmax.f32 %v2596_v47, 0.0 }
 0x1a0   : > { %v1697_v54 = vmax.f32 %v2582_v49, 0.0 }
 0x1a1   : > { %v2111_v55 = vpack.c.bf16 %v1703_v52, %v1702_v51 }
 0x1a2   : > { %v2096_v57 = vpack.c.bf16 %v1697_v54, %v1696_v53  ;;  %v1679_v58 = vpop.f32.mrb[24].mxu1 }
 0x1a3   : > { %2120 = vst [vmem:[%s3460_s8 + $0x18] sm:$0xff] %v2111_v55   ;;  %v1655_v59 = vpop.f32.mrb[4].mxu0  ;;  %v2599_v60 = vadd.f32 %v2598_v31, %v1679_v58  ;;  %v2561_v61 = vpop.f32.mrb[25].mxu1 }
 0x1a4   : > { %2097 = vst [vmem:[%s3460_s8] sm:$0xff] %v2096_v57   ;;  %v2584_v63 = vadd.f32 %v2583_v56, %v1655_v59  ;;  %v2549_v0 = vpop.f32.mrb[5].mxu0  ;;  %v1682_v2 = vpop.f32.mrb[26].mxu1 }
 0x1a5   : > { %v1658_v3 = vpop.f32.mrb[6].mxu0  ;;  %v2602_v4 = vadd.f32 %v2601_v36, %v1682_v2  ;;  %v2562_v6 = vpop.f32.mrb[27].mxu1  ;;  %v1704_v5 = vmax.f32 %v2599_v60, 0.0 }
 0x1a6   : > { %v2586_v8 = vadd.f32 %v2585_v62, %v1658_v3  ;;  %v2550_v10 = vpop.f32.mrb[7].mxu0  ;;  %v1698_v13 = vmax.f32 %v2584_v63, 0.0 }
 0x1a7   : > { %v1705_v12 = vmax.f32 %v2602_v4, 0.0 }
 0x1a8   : > { %v1699_v14 = vmax.f32 %v2586_v8, 0.0 }
 0x1a9   : > { %v2116_v15 = vpack.c.bf16 %v1705_v12, %v1704_v5 }
 0x1aa   : > { %v2101_v16 = vpack.c.bf16 %v1699_v14, %v1698_v13 }
 0x1ab   : > { %2121 = vst [vmem:[%s3460_s8 + $0x20] sm:$0xff] %v2116_v15   ;;  %v1663_v17 = vpop.f32.mrb[8].mxu0 }
 0x1ac   : > { %2118 = vst [vmem:[%s3460_s8 + $0x8] sm:$0xff] %v2101_v16   ;;  %v2588_v19 = vadd.f32 %v2587_v7, %v1663_v17  ;;  %v2553_v20 = vpop.f32.mrb[9].mxu0 }
 0x1ad   : > { %v1666_v21 = vpop.f32.mrb[10].mxu0 }
 0x1ae   : > { %v2590_v22 = vadd.f32 %v2589_v18, %v1666_v21  ;;  %v2554_v23 = vpop.f32.mrb[11].mxu0  ;;  %v1700_v24 = vmax.f32 %v2588_v19, 0.0 }
 0x1b0   : > { %v1701_v25 = vmax.f32 %v2590_v22, 0.0 }
 0x1b2   : > { %v2106_v26 = vpack.c.bf16 %v1701_v25, %v1700_v24 }
 0x1b4   : > { %2119 = vst [vmem:[%s3460_s8 + $0x10] sm:$0xff] %v2106_v26  }
 0x1b5 PF: > { %s13_s14 = sadd.s32 1, %s2857_s14   ;;  %s3486_s12 = smov %s2853_s13 }
 0x1b6   : > { %p10_p5 = scmp.ge.s32.totalorder %s13_s14, 4   ;;  %s3487_s13 = smov %s3489_s15 }
 0x1b8   :  { %12 = sbr.rel (!%p10_p5) target bundleno = 2 (0x2), region = 76 }

// kernel: unet_mmd_forward.20
= control target key start
LH: loop header
LB: loop body
LE: loop exit
PB: predicated region body
PF: predicated region fallthrough
CT: control target
= control target key end

     0   :  { %s145_s0 = inlined_call_operand.vmem [shape: bf16[32,128], index: 0, kind: input, shape index: {}]   ;;  %s146_s1 = inlined_call_operand.vmem [shape: bf16[32,128], index: 1, kind: input, shape index: {}]   ;;  %s147_s2 = inlined_call_operand.vmem [shape: bf16[32,128], index: 2, kind: input, shape index: {}]   ;;  %s148_s3 = inlined_call_operand.vmem [shape: bf16[32,128], index: 3, kind: input, shape index: {}]   ;;  %s149_s4 = inlined_call_operand.vmem [shape: bf16[32,128], index: 4, kind: output, shape index: {}]  }
   0x1   :  { %v17_v0 = vld [vmem:[%s145_s0] sm:$0xf]  ;;  %v18_v1 = vld [vmem:[%s145_s0 + $0x4] sm:$0xf]  ;;  %v19_v10 = vld [vmem:[%s145_s0 + $0x8] sm:$0xf] }
   0x2   :  { %v21_v2 = vld [vmem:[%s146_s1] sm:$0xf]  ;;  %v22_v3 = vld [vmem:[%s146_s1 + $0x4] sm:$0xf]  ;;  %v20_v13 = vld [vmem:[%s145_s0 + $0xc] sm:$0xf] }
   0x3   :  { %v25_v4 = vmax.bf16 %v21_v2, %v17_v0  ;;  %v29_v5 = vld [vmem:[%s147_s2] sm:$0xf]  ;;  %v30_v6 = vld [vmem:[%s147_s2 + $0x4] sm:$0xf]  ;;  %v26_v7 = vmax.bf16 %v22_v3, %v18_v1  ;;  %v23_v14 = vld [vmem:[%s146_s1 + $0x8] sm:$0xf] }
   0x4   :  { %v33_v8 = vld [vmem:[%s148_s3] sm:$0xf]  ;;  %v34_v9 = vld [vmem:[%s148_s3 + $0x4] sm:$0xf]  ;;  %v24_v15 = vld [vmem:[%s146_s1 + $0xc] sm:$0xf]  ;;  %v27_v16 = vmax.bf16 %v23_v14, %v19_v10 }
   0x5   :  { %v37_v11 = vmax.bf16 %v33_v8, %v29_v5  ;;  %v38_v12 = vmax.bf16 %v34_v9, %v30_v6  ;;  %v28_v17 = vmax.bf16 %v24_v15, %v20_v13  ;;  %v31_v18 = vld [vmem:[%s147_s2 + $0x8] sm:$0xf]  ;;  %v32_v19 = vld [vmem:[%s147_s2 + $0xc] sm:$0xf] }
   0x6   :  { %v35_v20 = vld [vmem:[%s148_s3 + $0x8] sm:$0xf]  ;;  %v36_v23 = vld [vmem:[%s148_s3 + $0xc] sm:$0xf] }
   0x7   :  { %v41_v21 = vmax.bf16 %v37_v11, %v25_v4  ;;  %v42_v22 = vmax.bf16 %v38_v12, %v26_v7  ;;  %v39_v24 = vmax.bf16 %v35_v20, %v31_v18  ;;  %v40_v25 = vmax.bf16 %v36_v23, %v32_v19 }
   0x9   :  { %v63_v26 = vcombine.low %v41_v21, %v42_v22  ;;  %v43_v27 = vmax.bf16 %v39_v24, %v27_v16  ;;  %v44_v28 = vmax.bf16 %v40_v25, %v28_v17 }
   0xb   :  { %57 = vst [vmem:[%s149_s4] sm:$0xff] %v63_v26   ;;  %v64_v29 = vcombine.low %v43_v27, %v44_v28 }
   0xd   :  { %65 = vst [vmem:[%s149_s4 + $0x8] sm:$0xff] %v64_v29  }

// kernel: unet_mmd_forward.21
= control target key start
LH: loop header
LB: loop body
LE: loop exit
PB: predicated region body
PF: predicated region fallthrough
CT: control target
= control target key end

     0   :  { %s2111_s12 = smov 0   ;;  %s2113_s13 = smov 0   ;;  %s2396_s0 = inlined_call_operand.vmem [shape: f32[2,40,128], index: 0, kind: input, shape index: {}]   ;;  %s2397_s1 = inlined_call_operand.vmem [shape: bf16[9,128,128], index: 1, kind: input, shape index: {}]   ;;  %s2398_s2 = inlined_call_operand.vmem [shape: f32[1,128], index: 2, kind: input, shape index: {}]   ;;  %s2399_s3 = inlined_call_operand.vmem [shape: bf16[2,24,128], index: 3, kind: output, shape index: {}]  }
   0x1   :  { %s2115_s14 = smov 0  }
   0x2 LB: > { %s25_s15 = sadd.s32 1, %s2085_s13  ;;  %p1448_p0 = scmp.ge.s32.totalorder %s2089_s14, 1  ;;  %s2089_s14 = sphi %s2115_s14, %s13_s14   ;;  %s2085_s13 = sphi %s2113_s13, %s2401_s13   ;;  %s2081_s12 = sphi %s2111_s12, %s2400_s12  }
   0x3   : > { %p27_p1 = scmp.ge.s32.totalorder %s25_s15, 2  ;;  %p168_p2 = scmp.lt.s32.totalorder %s2089_s14, 3 }
   0x5   : > { %s2403_s15 = smov (%p27_p1, %s25_s15), 0  ;;  %p169_p3 = pnand %p1448_p0, %p168_p2 }
   0x6   : > { %v1995_v0 = vld [vmem:[%s2397_s1] sm:$0xff] (!%p169_p3)   ;;  %p202_p4 = scmp.lt.s32.totalorder (!%p169_p3), %s2081_s12, 1  ;;  %v1997_v2 = vld [vmem:[%s2397_s1 + $0x8] sm:$0xff] (!%p169_p3)   ;;  %v1999_v4 = vld [vmem:[%s2397_s1 + $0x10] sm:$0xff] (!%p169_p3)  }
   0x7   : > { %172 = sbr.rel (%p169_p3) target bundleno = 390 (0x186), region = 32  ;;  %v1996_v1 = vld [vmem:[%s2397_s1 + $0x100] sm:$0xff] (!%p169_p3)   ;;  %1755 = vmatprep.subr.bf16.mxu1 (!%p169_p3), %v1995_v0  ;;  %v1998_v3 = vld [vmem:[%s2397_s1 + $0x108] sm:$0xff] (!%p169_p3)   ;;  %v2000_v5 = vld [vmem:[%s2397_s1 + $0x110] sm:$0xff] (!%p169_p3)  }
   0x8   : > { %1835 = vmatprep.subr.bf16.mxu0 (!%p169_p3), %v1996_v1  ;;  %1756 = vmatpush3.bf16.msra.mxu1 (!%p169_p3), %v1995_v0  ;;  %v2001_v6 = vld [vmem:[%s2397_s1 + $0x18] sm:$0xff] (!%p169_p3)   ;;  %v2003_v8 = vld [vmem:[%s2397_s1 + $0x20] sm:$0xff] (!%p169_p3)   ;;  %v2005_v10 = vld [vmem:[%s2397_s1 + $0x28] sm:$0xff] (!%p169_p3)  }
   0x9   : > { %1836 = vmatpush3.bf16.msra.mxu0 (!%p169_p3), %v1996_v1  ;;  %1757 = vmatprep.subr.bf16.mxu1 (!%p169_p3), %v1997_v2  ;;  %v2002_v7 = vld [vmem:[%s2397_s1 + $0x118] sm:$0xff] (!%p169_p3)   ;;  %v2004_v9 = vld [vmem:[%s2397_s1 + $0x120] sm:$0xff] (!%p169_p3)   ;;  %v2006_v13 = vld [vmem:[%s2397_s1 + $0x128] sm:$0xff] (!%p169_p3)  }
   0xa   : > { %1837 = vmatprep.subr.bf16.mxu0 (!%p169_p3), %v1998_v3  ;;  %v2007_v18 = vld [vmem:[%s2397_s1 + $0x30] sm:$0xff] (!%p169_p3)   ;;  %v2009_v20 = vld [vmem:[%s2397_s1 + $0x38] sm:$0xff] (!%p169_p3)   ;;  %v2011_v22 = vld [vmem:[%s2397_s1 + $0x40] sm:$0xff] (!%p169_p3)  }
   0xb   : > { %v2008_v19 = vld [vmem:[%s2397_s1 + $0x130] sm:$0xff] (!%p169_p3)   ;;  %v2010_v21 = vld [vmem:[%s2397_s1 + $0x138] sm:$0xff] (!%p169_p3)   ;;  %v2012_v25 = vld [vmem:[%s2397_s1 + $0x140] sm:$0xff] (!%p169_p3)  }
   0xc   : > { %1758 = vmatpush3.bf16.msra.mxu1 (!%p169_p3), %v1997_v2  ;;  %v2013_v28 = vld [vmem:[%s2397_s1 + $0x48] sm:$0xff] (!%p169_p3)   ;;  %v2015_v34 = vld [vmem:[%s2397_s1 + $0x50] sm:$0xff] (!%p169_p3)   ;;  %v2017_v36 = vld [vmem:[%s2397_s1 + $0x58] sm:$0xff] (!%p169_p3)  }
   0xd   : > { %1838 = vmatpush3.bf16.msra.mxu0 (!%p169_p3), %v1998_v3  ;;  %1759 = vmatprep.subr.bf16.mxu1 (!%p169_p3), %v1999_v4  ;;  %v2014_v29 = vld [vmem:[%s2397_s1 + $0x148] sm:$0xff] (!%p169_p3)   ;;  %v2016_v35 = vld [vmem:[%s2397_s1 + $0x150] sm:$0xff] (!%p169_p3)   ;;  %v2018_v37 = vld [vmem:[%s2397_s1 + $0x158] sm:$0xff] (!%p169_p3)  }
   0xe   : > { %s2405_s12 = smov (!%p202_p4, %s2081_s12), 1  ;;  %1839 = vmatprep.subr.bf16.mxu0 %v2000_v5  ;;  %v2019_v38 = vld [vmem:[%s2397_s1 + $0x60] sm:$0xff]   ;;  %v2021_v40 = vld [vmem:[%s2397_s1 + $0x68] sm:$0xff]   ;;  %v2023_v42 = vld [vmem:[%s2397_s1 + $0x70] sm:$0xff]  }
   0xf   : > { %s1969_s5 = smul.u32 40, %s2405_s12  ;;  %v2020_v39 = vld [vmem:[%s2397_s1 + $0x160] sm:$0xff]   ;;  %v2022_v41 = vld [vmem:[%s2397_s1 + $0x168] sm:$0xff]   ;;  %v2024_v43 = vld [vmem:[%s2397_s1 + $0x170] sm:$0xff]  }
  0x10   : > { %1760 = vmatpush3.bf16.msra.mxu1 %v1999_v4  ;;  %v2025_v44 = vld [vmem:[%s2397_s1 + $0x78] sm:$0xff]   ;;  %v2027_v46 = vld [vmem:[%s2397_s1 + $0x80] sm:$0xff]   ;;  %v2029_v56 = vld [vmem:[%s2397_s1 + $0x88] sm:$0xff]   ;;  %s1970_s6 = smul.u32 12, %s2405_s12 }
  0x11   : > { %1840 = vmatpush3.bf16.msra.mxu0 %v2000_v5  ;;  %1761 = vmatprep.subr.bf16.mxu1 %v2001_v6  ;;  %s2165_s16 = scalar_lea.vmem %s2396_s0, %s1969_s5  ;;  %v2026_v45 = vld [vmem:[%s2397_s1 + $0x178] sm:$0xff]   ;;  %v2028_v48 = vld [vmem:[%s2397_s1 + $0x180] sm:$0xff]   ;;  %v2030_v57 = vld [vmem:[%s2397_s1 + $0x188] sm:$0xff]  }
  0x12   : > { %1841 = vmatprep.subr.bf16.mxu0 %v2002_v7  ;;  %v230_v11 = vld [vmem:[%s2165_s16] sm:$0xff]  ;;  %v231_v12 = vld [vmem:[%s2165_s16 + $0x8] sm:$0xff]  ;;  %v232_v23 = vld [vmem:[%s2165_s16 + $0x10] sm:$0xff]  ;;  %s221_s8 = scalar_lea.vmem %s2399_s3, %s1970_s6 }
  0x13   : > { %v233_v14 = vpack.c.bf16 %v231_v12, %v230_v11  ;;  %v713_v15 = vld [vmem:[%s2165_s16 + $0x7] sm:$0xff]  ;;  %v714_v16 = vld [vmem:[%s2165_s16 + $0xf] sm:$0xff]  ;;  %v715_v24 = vld [vmem:[%s2165_s16 + $0x17] sm:$0xff]  ;;  %v234_v26 = vpack.c.bf16 %v232_v23, %v232_v23  ;;  %v837_v32 = vpack.c.bf16 %v232_v23, %v231_v12 }
  0x14   : > { %1762 = vmatpush3.bf16.msra.mxu1 %v2001_v6  ;;  %v716_v17 = vpack.c.bf16 %v714_v16, %v713_v15  ;;  %v717_v27 = vpack.c.bf16 %v715_v24, %v715_v24  ;;  %v350_v30 = vld [vmem:[%s2165_s16 + $0x1] sm:$0xff]  ;;  %v351_v31 = vld [vmem:[%s2165_s16 + $0x9] sm:$0xff]  ;;  %v352_v47 = vld [vmem:[%s2165_s16 + $0x11] sm:$0xff] }
  0x15   : > { %1842 = vmatpush3.bf16.msra.mxu0 %v2002_v7  ;;  %1763 = vmatprep.subr.bf16.mxu1 %v2003_v8  ;;  %v353_v33 = vpack.c.bf16 %v351_v31, %v350_v30  ;;  %v836_v49 = vld [vmem:[%s2165_s16 + $0x18] sm:$0xff]  ;;  %v471_v50 = vld [vmem:[%s2165_s16 + $0x2] sm:$0xff]  ;;  %v472_v51 = vld [vmem:[%s2165_s16 + $0xa] sm:$0xff]  ;;  %v354_v52 = vpack.c.bf16 %v352_v47, %v352_v47 }
  0x16   : > { %1843 = vmatprep.subr.bf16.mxu0 %v2004_v9  ;;  %1771 = vmatprep.mubr.bf16.mxu1 %v233_v14  ;;  %v955_v53 = vld [vmem:[%s2165_s16 + $0xc] sm:$0xff]  ;;  %v838_v54 = vpack.c.bf16 %v836_v49, %v836_v49  ;;  %v956_v55 = vld [vmem:[%s2165_s16 + $0x14] sm:$0xff]  ;;  %v474_v58 = vpack.c.bf16 %v472_v51, %v471_v50  ;;  %v2035_v0 = vld [vmem:[%s2397_s1 + $0xa0] sm:$0xff]  }
  0x17   : > { %1851 = vmatprep.mubr.bf16.mxu0 %v716_v17  ;;  %v958_v59 = vpack.c.bf16 %v956_v55, %v955_v53  ;;  %v2031_v60 = vld [vmem:[%s2397_s1 + $0x90] sm:$0xff]   ;;  %v2033_v62 = vld [vmem:[%s2397_s1 + $0x98] sm:$0xff]   ;;  %v2036_v1 = vld [vmem:[%s2397_s1 + $0x1a0] sm:$0xff]  }
  0x18   : > { %1764 = vmatpush3.bf16.msra.mxu1 %v2003_v8  ;;  %v2032_v61 = vld [vmem:[%s2397_s1 + $0x190] sm:$0xff]   ;;  %v2034_v63 = vld [vmem:[%s2397_s1 + $0x198] sm:$0xff]   ;;  %v2037_v2 = vld [vmem:[%s2397_s1 + $0xa8] sm:$0xff]  }
  0x19   : > { %1844 = vmatpush3.bf16.msra.mxu0 %v2004_v9  ;;  %1765 = vmatprep.subr.bf16.mxu1 %v2005_v10  ;;  %v2038_v3 = vld [vmem:[%s2397_s1 + $0x1a8] sm:$0xff]   ;;  %v2039_v4 = vld [vmem:[%s2397_s1 + $0xb0] sm:$0xff]   ;;  %v2041_v6 = vld [vmem:[%s2397_s1 + $0xb8] sm:$0xff]  }
  0x1a   : > { %1845 = vmatprep.subr.bf16.mxu0 %v2006_v13  ;;  %v2040_v5 = vld [vmem:[%s2397_s1 + $0x1b0] sm:$0xff]   ;;  %v2042_v7 = vld [vmem:[%s2397_s1 + $0x1b8] sm:$0xff]   ;;  %v2043_v9 = vld [vmem:[%s2397_s1 + $0xc0] sm:$0xff]  }
  0x1b   : > { %v473_v8 = vld [vmem:[%s2165_s16 + $0x12] sm:$0xff]  ;;  %v2044_v11 = vld [vmem:[%s2397_s1 + $0x1c0] sm:$0xff]  }
  0x1c   : > { %1766 = vmatpush3.bf16.msra.mxu1 %v2005_v10  ;;  %v957_v10 = vld [vmem:[%s2165_s16 + $0x1c] sm:$0xff]  ;;  %v475_v12 = vpack.c.bf16 %v473_v8, %v473_v8  ;;  %v2305_v14 = vld [vmem:[%s2165_s16 + $0xe] sm:$0xff] }
  0x1d   : > { %1846 = vmatpush3.bf16.msra.mxu0 %v2006_v13  ;;  %1767 = vmatprep.subr.bf16.mxu1 %v2007_v18  ;;  %v592_v13 = vld [vmem:[%s2165_s16 + $0x6] sm:$0xff]  ;;  %v959_v15 = vpack.c.bf16 %v957_v10, %v957_v10  ;;  %v1077_v17 = vld [vmem:[%s2165_s16 + $0x15] sm:$0xff]  ;;  %v1199_v47 = vld [vmem:[%s2165_s16 + $0x1e] sm:$0xff] }
  0x1e   : > { %1847 = vmatprep.subr.bf16.mxu0 %v2008_v19  ;;  %v1076_v16 = vld [vmem:[%s2165_s16 + $0xd] sm:$0xff]  ;;  %v2049_v24 = vld [vmem:[%s2397_s1 + $0xd8] sm:$0xff]   ;;  %v1451_v53 = vld [vmem:[%s2398_s2] ss:$0 sm:$0xff] }
  0x1f   : > { %v2048_v23 = vld [vmem:[%s2397_s1 + $0x1d0] sm:$0xff]  }
  0x20   : > { %1768 = vmatpush3.bf16.msra.mxu1 %v2007_v18  ;;  %v2045_v18 = vld [vmem:[%s2397_s1 + $0xc8] sm:$0xff]   ;;  %v2055_v30 = vld [vmem:[%s2397_s1 + $0xf0] sm:$0xff]  }
  0x21   : > { %1848 = vmatpush3.bf16.msra.mxu0 %v2008_v19  ;;  %1769 = vmatprep.subr.bf16.mxu1 %v2009_v20  ;;  %v2046_v19 = vld [vmem:[%s2397_s1 + $0x1c8] sm:$0xff]   ;;  %v2056_v31 = vld [vmem:[%s2397_s1 + $0x1f0] sm:$0xff]  }
  0x22   : > { %1849 = vmatprep.subr.bf16.mxu0 %v2010_v21 }
  0x24   : > { %1770 = vmatpush3.bf16.msra.mxu1 %v2009_v20  ;;  %v595_v20 = vpack.c.bf16 %v2305_v14, %v592_v13 }
  0x25   : > { %1850 = vmatpush3.bf16.msra.mxu0 %v2010_v21  ;;  %1775 = vmatprep.subr.bf16.mxu1 %v2011_v22  ;;  %v1079_v21 = vpack.c.bf16 %v1077_v17, %v1076_v16 }
  0x26   : > { %1855 = vmatprep.subr.bf16.mxu0 %v2012_v25 }
  0x27   : > { %1772 = vmatmul.mubr.bf16.vlgmr.msra.gmra.mrb[0].mxu1 %v234_v26  ;;  %v2051_v26 = vld [vmem:[%s2397_s1 + $0xe0] sm:$0xff]  }
  0x28   : > { %1776 = vmatpush3.bf16.msra.mxu1 %v2011_v22  ;;  %1852 = vmatmul.mubr.bf16.vlgmr.msra.gmra.mrb[0].mxu0 %v717_v27  ;;  %v2047_v22 = vld [vmem:[%s2397_s1 + $0xd0] sm:$0xff]   ;;  %v2052_v27 = vld [vmem:[%s2397_s1 + $0x1e0] sm:$0xff]  }
  0x29   : > { %1856 = vmatpush3.bf16.msra.mxu0 %v2012_v25  ;;  %1777 = vmatprep.subr.bf16.mxu1 %v2013_v28  ;;  %v2050_v25 = vld [vmem:[%s2397_s1 + $0x1d8] sm:$0xff]  }
  0x2a   : > { %1857 = vmatprep.subr.bf16.mxu0 %v2014_v29  ;;  %1791 = vmatprep.mubr.bf16.mxu1 %v353_v33  ;;  %v2058_v33 = vld [vmem:[%s2397_s1 + $0x1f8] sm:$0xff]  }
  0x2b   : > { %1871 = vmatprep.mubr.bf16.mxu0 %v837_v32  ;;  %v2057_v32 = vld [vmem:[%s2397_s1 + $0xf8] sm:$0xff]  }
  0x2c   : > { %1778 = vmatpush3.bf16.msra.mxu1 %v2013_v28  ;;  %v2053_v28 = vld [vmem:[%s2397_s1 + $0xe8] sm:$0xff]  }
  0x2d   : > { %1858 = vmatpush3.bf16.msra.mxu0 %v2014_v29  ;;  %1779 = vmatprep.subr.bf16.mxu1 %v2015_v34  ;;  %v2054_v29 = vld [vmem:[%s2397_s1 + $0x1e8] sm:$0xff]  }
  0x2e   : > { %1859 = vmatprep.subr.bf16.mxu0 %v2016_v35 }
  0x30   : > { %1780 = vmatpush3.bf16.msra.mxu1 %v2015_v34  ;;  %v594_v34 = vld [vmem:[%s2165_s16 + $0x16] sm:$0xff] }
  0x31   : > { %1860 = vmatpush3.bf16.msra.mxu0 %v2016_v35  ;;  %1781 = vmatprep.subr.bf16.mxu1 %v2017_v36  ;;  %v1078_v35 = vld [vmem:[%s2165_s16 + $0x1d] sm:$0xff] }
  0x32   : > { %1861 = vmatprep.subr.bf16.mxu0 %v2018_v37 }
  0x34   : > { %1782 = vmatpush3.bf16.msra.mxu1 %v2017_v36  ;;  %v2059_v36 = vld [vmem:[%s2397_s1 + $0x200] sm:$0xff]  }
  0x35   : > { %1862 = vmatpush3.bf16.msra.mxu0 %v2018_v37  ;;  %1783 = vmatprep.subr.bf16.mxu1 %v2019_v38  ;;  %v596_v37 = vpack.c.bf16 %v594_v34, %v594_v34 }
  0x36   : > { %1863 = vmatprep.subr.bf16.mxu0 %v2020_v39 }
  0x38   : > { %1784 = vmatpush3.bf16.msra.mxu1 %v2019_v38  ;;  %v1080_v38 = vpack.c.bf16 %v1078_v35, %v1078_v35 }
  0x39   : > { %1864 = vmatpush3.bf16.msra.mxu0 %v2020_v39  ;;  %1785 = vmatprep.subr.bf16.mxu1 %v2021_v40  ;;  %v1200_v39 = vpack.c.bf16 %v594_v34, %v2305_v14 }
  0x3a   : > { %1865 = vmatprep.subr.bf16.mxu0 %v2022_v41 }
  0x3c   : > { %1786 = vmatpush3.bf16.msra.mxu1 %v2021_v40  ;;  %v2060_v40 = vld [vmem:[%s2397_s1 + $0x208] sm:$0xff]  }
  0x3d   : > { %1866 = vmatpush3.bf16.msra.mxu0 %v2022_v41  ;;  %1787 = vmatprep.subr.bf16.mxu1 %v2023_v42  ;;  %v2061_v41 = vld [vmem:[%s2397_s1 + $0x210] sm:$0xff]  }
  0x3e   : > { %1867 = vmatprep.subr.bf16.mxu0 %v2024_v43 }
  0x40   : > { %1788 = vmatpush3.bf16.msra.mxu1 %v2023_v42  ;;  %v2062_v42 = vld [vmem:[%s2397_s1 + $0x218] sm:$0xff]  }
  0x41   : > { %1868 = vmatpush3.bf16.msra.mxu0 %v2024_v43  ;;  %1789 = vmatprep.subr.bf16.mxu1 %v2025_v44  ;;  %v2063_v43 = vld [vmem:[%s2397_s1 + $0x220] sm:$0xff]  }
  0x42   : > { %1869 = vmatprep.subr.bf16.mxu0 %v2026_v45 }
  0x44   : > { %1790 = vmatpush3.bf16.msra.mxu1 %v2025_v44  ;;  %v2064_v44 = vld [vmem:[%s2397_s1 + $0x228] sm:$0xff]  }
  0x45   : > { %1870 = vmatpush3.bf16.msra.mxu0 %v2026_v45  ;;  %1795 = vmatprep.subr.bf16.mxu1 %v2027_v46  ;;  %v2065_v45 = vld [vmem:[%s2397_s1 + $0x230] sm:$0xff]  }
  0x46   : > { %1875 = vmatprep.subr.bf16.mxu0 %v2028_v48 }
  0x47   : > { %1792 = vmatmul.mubr.bf16.vlgmr.msra.gmra.mrb[0].mxu1 %v354_v52 }
  0x48   : > { %1796 = vmatpush3.bf16.msra.mxu1 %v2027_v46  ;;  %1872 = vmatmul.mubr.bf16.vlgmr.msra.gmra.mrb[0].mxu0 %v838_v54  ;;  %v2066_v46 = vld [vmem:[%s2397_s1 + $0x238] sm:$0xff]  }
  0x49   : > { %1876 = vmatpush3.bf16.msra.mxu0 %v2028_v48  ;;  %1797 = vmatprep.subr.bf16.mxu1 %v2029_v56  ;;  %v1201_v48 = vpack.c.bf16 %v1199_v47, %v1199_v47 }
  0x4a   : > { %1877 = vmatprep.subr.bf16.mxu0 %v2030_v57  ;;  %1811 = vmatprep.mubr.bf16.mxu1 %v474_v58 }
  0x4b   : > { %1891 = vmatprep.mubr.bf16.mxu0 %v958_v59 }
  0x4c   : > { %1798 = vmatpush3.bf16.msra.mxu1 %v2029_v56 }
  0x4d   : > { %1878 = vmatpush3.bf16.msra.mxu0 %v2030_v57  ;;  %1799 = vmatprep.subr.bf16.mxu1 %v2031_v60 }
  0x4e   : > { %1879 = vmatprep.subr.bf16.mxu0 %v2032_v61 }
  0x50   : > { %1800 = vmatpush3.bf16.msra.mxu1 %v2031_v60 }
  0x51   : > { %1880 = vmatpush3.bf16.msra.mxu0 %v2032_v61  ;;  %1801 = vmatprep.subr.bf16.mxu1 %v2033_v62 }
  0x52   : > { %1881 = vmatprep.subr.bf16.mxu0 %v2034_v63 }
  0x54   : > { %1802 = vmatpush3.bf16.msra.mxu1 %v2033_v62 }
  0x55   : > { %1882 = vmatpush3.bf16.msra.mxu0 %v2034_v63  ;;  %1803 = vmatprep.subr.bf16.mxu1 %v2035_v0 }
  0x56   : > { %1883 = vmatprep.subr.bf16.mxu0 %v2036_v1 }
  0x58   : > { %1804 = vmatpush3.bf16.msra.mxu1 %v2035_v0 }
  0x59   : > { %1884 = vmatpush3.bf16.msra.mxu0 %v2036_v1  ;;  %1805 = vmatprep.subr.bf16.mxu1 %v2037_v2 }
  0x5a   : > { %1885 = vmatprep.subr.bf16.mxu0 %v2038_v3 }
  0x5c   : > { %1806 = vmatpush3.bf16.msra.mxu1 %v2037_v2 }
  0x5d   : > { %1886 = vmatpush3.bf16.msra.mxu0 %v2038_v3  ;;  %1807 = vmatprep.subr.bf16.mxu1 %v2039_v4 }
  0x5e   : > { %1887 = vmatprep.subr.bf16.mxu0 %v2040_v5 }
  0x60   : > { %1808 = vmatpush3.bf16.msra.mxu1 %v2039_v4 }
  0x61   : > { %1888 = vmatpush3.bf16.msra.mxu0 %v2040_v5  ;;  %1809 = vmatprep.subr.bf16.mxu1 %v2041_v6 }
  0x62   : > { %1889 = vmatprep.subr.bf16.mxu0 %v2042_v7 }
  0x64   : > { %1810 = vmatpush3.bf16.msra.mxu1 %v2041_v6 }
  0x65   : > { %1890 = vmatpush3.bf16.msra.mxu0 %v2042_v7  ;;  %1815 = vmatprep.subr.bf16.mxu1 %v2043_v9 }
  0x66   : > { %1895 = vmatprep.subr.bf16.mxu0 %v2044_v11 }
  0x67   : > { %1812 = vmatmul.mubr.bf16.vlgmr.msra.gmra.mrb[0].mxu1 %v475_v12 }
  0x68   : > { %1816 = vmatpush3.bf16.msra.mxu1 %v2043_v9  ;;  %1892 = vmatmul.mubr.bf16.vlgmr.msra.gmra.mrb[0].mxu0 %v959_v15 }
  0x69   : > { %1896 = vmatpush3.bf16.msra.mxu0 %v2044_v11  ;;  %1817 = vmatprep.subr.bf16.mxu1 %v2045_v18 }
  0x6a   : > { %1897 = vmatprep.subr.bf16.mxu0 %v2046_v19  ;;  %1831 = vmatprep.mubr.bf16.mxu1 %v595_v20 }
  0x6b   : > { %1911 = vmatprep.mubr.bf16.mxu0 %v1079_v21 }
  0x6c   : > { %1818 = vmatpush3.bf16.msra.mxu1 %v2045_v18 }
  0x6d   : > { %1898 = vmatpush3.bf16.msra.mxu0 %v2046_v19  ;;  %1819 = vmatprep.subr.bf16.mxu1 %v2047_v22 }
  0x6e   : > { %1899 = vmatprep.subr.bf16.mxu0 %v2048_v23 }
  0x70   : > { %1820 = vmatpush3.bf16.msra.mxu1 %v2047_v22 }
  0x71   : > { %1900 = vmatpush3.bf16.msra.mxu0 %v2048_v23  ;;  %1821 = vmatprep.subr.bf16.mxu1 %v2049_v24 }
  0x72   : > { %1901 = vmatprep.subr.bf16.mxu0 %v2050_v25 }
  0x74   : > { %1822 = vmatpush3.bf16.msra.mxu1 %v2049_v24 }
  0x75   : > { %1902 = vmatpush3.bf16.msra.mxu0 %v2050_v25  ;;  %1823 = vmatprep.subr.bf16.mxu1 %v2051_v26 }
  0x76   : > { %1903 = vmatprep.subr.bf16.mxu0 %v2052_v27 }
  0x78   : > { %1824 = vmatpush3.bf16.msra.mxu1 %v2051_v26 }
  0x79   : > { %1904 = vmatpush3.bf16.msra.mxu0 %v2052_v27  ;;  %1825 = vmatprep.subr.bf16.mxu1 %v2053_v28 }
  0x7a   : > { %1905 = vmatprep.subr.bf16.mxu0 %v2054_v29 }
  0x7c   : > { %1826 = vmatpush3.bf16.msra.mxu1 %v2053_v28 }
  0x7d   : > { %1906 = vmatpush3.bf16.msra.mxu0 %v2054_v29  ;;  %1827 = vmatprep.subr.bf16.mxu1 %v2055_v30 }
  0x7e   : > { %1907 = vmatprep.subr.bf16.mxu0 %v2056_v31 }
  0x80   : > { %1828 = vmatpush3.bf16.msra.mxu1 %v2055_v30 }
  0x81   : > { %1908 = vmatpush3.bf16.msra.mxu0 %v2056_v31  ;;  %1829 = vmatprep.subr.bf16.mxu1 %v2057_v32 }
  0x82   : > { %1909 = vmatprep.subr.bf16.mxu0 %v2058_v33 }
  0x84   : > { %1830 = vmatpush3.bf16.msra.mxu1 %v2057_v32 }
  0x85   : > { %1910 = vmatpush3.bf16.msra.mxu0 %v2058_v33 }
  0x86   : > { %1915 = vmatprep.subr.bf16.mxu0 %v2059_v36 }
  0x87   : > { %1832 = vmatmul.mubr.bf16.vlgmr.msra.gmra.mrb[0].mxu1 %v596_v37 }
  0x88   : > { %1912 = vmatmul.mubr.bf16.vlgmr.msra.gmra.mrb[0].mxu0 %v1080_v38 }
  0x89   : > { %1916 = vmatpush3.bf16.msra.mxu0 %v2059_v36  ;;  %1931 = vmatprep.mubr.bf16.mxu0 %v1200_v39 }
  0x8a   : > { %1917 = vmatprep.subr.bf16.mxu0 %v2060_v40 }
  0x8d   : > { %1918 = vmatpush3.bf16.msra.mxu0 %v2060_v40 }
  0x8e   : > { %1919 = vmatprep.subr.bf16.mxu0 %v2061_v41 }
  0x91   : > { %1920 = vmatpush3.bf16.msra.mxu0 %v2061_v41 }
  0x92   : > { %1921 = vmatprep.subr.bf16.mxu0 %v2062_v42 }
  0x95   : > { %1922 = vmatpush3.bf16.msra.mxu0 %v2062_v42 }
  0x96   : > { %1923 = vmatprep.subr.bf16.mxu0 %v2063_v43 }
  0x99   : > { %1924 = vmatpush3.bf16.msra.mxu0 %v2063_v43 }
  0x9a   : > { %1925 = vmatprep.subr.bf16.mxu0 %v2064_v44 }
  0x9d   : > { %1926 = vmatpush3.bf16.msra.mxu0 %v2064_v44 }
  0x9e   : > { %1927 = vmatprep.subr.bf16.mxu0 %v2065_v45 }
  0xa1   : > { %1928 = vmatpush3.bf16.msra.mxu0 %v2065_v45 }
  0xa2   : > { %1929 = vmatprep.subr.bf16.mxu0 %v2066_v46 }
  0xa5   : > { %1930 = vmatpush3.bf16.msra.mxu0 %v2066_v46 }
  0xa8   : > { %1932 = vmatmul.mubr.bf16.vlgmr.msra.gmra.mrb[0].mxu0 %v1201_v48 }
 0x15a   : > { %v1833_v49 = vpop.f32.mrb[0].mxu1 }
 0x15b   : > { %v696_v50 = vpop.f32.mrb[1].mxu1  ;;  %v1935_v54 = vadd.f32 %v1833_v49, %v1451_v53 }
 0x15c   : > { %v1834_v51 = vpop.f32.mrb[2].mxu1  ;;  %v1937_v55 = vadd.f32 %v1451_v53, %v696_v50 }
 0x15d   : > { %v699_v52 = vpop.f32.mrb[3].mxu1 }
 0x15e   : > { %v1939_v59 = vadd.f32 %v1451_v53, %v699_v52 }
 0x17b   : > { %v1933_v56 = vpop.f32.mrb[0].mxu0 }
 0x17c   : > { %v1936_v57 = vadd.f32 %v1935_v54, %v1933_v56  ;;  %v1301_v58 = vpop.f32.mrb[1].mxu0 }
 0x17d   : > { %v1938_v60 = vadd.f32 %v1937_v55, %v1301_v58  ;;  %v1934_v61 = vpop.f32.mrb[2].mxu0 }
 0x17e   : > { %v1320_v62 = vmax.f32 %v1936_v57, 0.0  ;;  %v1304_v63 = vpop.f32.mrb[3].mxu0 }
 0x17f   : > { %v1940_v0 = vadd.f32 %v1939_v59, %v1304_v63  ;;  %v1318_v2 = vmax.f32 %v1938_v60, 0.0 }
 0x180   : > { %v1659_v1 = vpack.c.bf16 %v1320_v62, %v1320_v62 }
 0x181   : > { %v1319_v3 = vmax.f32 %v1940_v0, 0.0 }
 0x182   : > { %1336 = vst [vmem:[%s221_s8 + $0x8] sm:$0xf] %v1659_v1 }
 0x183   : > { %v1663_v4 = vpack.c.bf16 %v1319_v3, %v1318_v2 }
 0x185   : > { %1664 = vst [vmem:[%s221_s8] sm:$0xff] %v1663_v4  }
 0x186 PF: > { %s13_s14 = sadd.s32 1, %s2089_s14   ;;  %s2400_s12 = smov %s2085_s13 }
 0x187   : > { %p10_p5 = scmp.ge.s32.totalorder %s13_s14, 4   ;;  %s2401_s13 = smov %s2403_s15 }
 0x189   :  { %12 = sbr.rel (!%p10_p5) target bundleno = 2 (0x2), region = 76 }

// kernel: unet_mmd_forward.23
= control target key start
LH: loop header
LB: loop body
LE: loop exit
PB: predicated region body
PF: predicated region fallthrough
CT: control target
= control target key end

     0   :  { %s1257_s12 = smov 0   ;;  %s1259_s13 = smov 0   ;;  %s1416_s0 = inlined_call_operand.vmem [shape: bf16[128,128], index: 0, kind: input, shape index: {}]   ;;  %s1417_s1 = inlined_call_operand.vmem [shape: bf16[128,512], index: 1, kind: input, shape index: {}]   ;;  %s1418_s2 = inlined_call_operand.vmem [shape: f32[1,512], index: 2, kind: input, shape index: {}]   ;;  %s1419_s3 = inlined_call_operand.vmem [shape: bf16[128,512], index: 3, kind: output, shape index: {}]  }
   0x1   :  { %s1261_s14 = smov 0   ;;  %s1263_s15 = smov 0  }
   0x2   :  { %s1265_s16 = smov 0  }
   0x3 LB: > { %s28_s17 = sadd.s32 1, %s1231_s15  ;;  %s967_s18 = sadd.s32 4294967295, %s1235_s16   ;;  %s1235_s16 = sphi %s1265_s16, %s13_s16   ;;  %s1231_s15 = sphi %s1263_s15, %s1424_s15   ;;  %s1227_s14 = sphi %s1261_s14, %s1423_s14   ;;  %s1223_s13 = sphi %s1259_s13, %s1422_s13   ;;  %s1219_s12 = sphi %s1257_s12, %s1421_s12  }
   0x4   : > { %p30_p0 = scmp.ge.s32.totalorder %s28_s17, 4  ;;  %p76_p1 = scmp.ne.s32.totalorder %s1223_s13, %s1219_s12 }
   0x5   : > { %p77_p2 = scmp.eq.s32.totalorder %s1235_s16, 0  ;;  %p134_p4 = scmp.eq.s32.totalorder %s967_s18, 3 }
   0x6   : > { %s1426_s17 = smov (%p30_p0, %s28_s17), 0  ;;  %s69_s20 = sadd.s32 1, %s1223_s13 }
   0x7   : > { %p78_p3 = por %p77_p2, %p76_p1  ;;  %s65_s19 = ssub.s32 %s1231_s15, %s1426_s17 }
   0x8   : > { %p67_p5 = scmp.eq.s32.totalorder %s65_s19, 0  ;;  %p1292_p6 = por %p134_p4, %p76_p1 }
   0x9   : > { %p971_p7 = scmp.ge.s32.totalorder %s1235_s16, 4 }
   0xa   : > { %s1297_s22 = scalar_select %p67_p5, %s1223_s13, %s69_s20  }
   0xb   : > { %168 = sbr.rel (%p971_p7) target bundleno = 33 (0x21), region = 20 }
  0x12   : > { %171 = sbr.rel (!%p78_p3) target bundleno = 33 (0x21), region = 24  ;;  %s173_s23 = sand.u32 (%p78_p3), 1, %s1223_s13  }
  0x13   : > { %s973_s24 = sshll.u32 (%p78_p3), %s1231_s15, 2  ;;  %s972_s25 = sshll.u32 (%p78_p3), %s173_s23, 6 }
  0x14   : > { %s1305_s28 = scalar_lea.vmem (%p78_p3), %s1417_s1, %s973_s24  ;;  %s175_s29 = scalar_lea.vmem (%p78_p3), [#allocation3], %s972_s25 }
  0x15   : > { %v196_v0 = vld [vmem:[%s1305_s28] sm:$0xf] (%p78_p3)  ;;  %v198_v1 = vld [vmem:[%s1305_s28 + $0x10] sm:$0xf] (%p78_p3) }
  0x16   : > { %197 = vst [vmem:[%s175_s29] sm:$0xf] (%p78_p3), %v196_v0  ;;  %199 = vst [vmem:[%s175_s29 + $0x4] sm:$0xf] (%p78_p3), %v198_v1  ;;  %v200_v2 = vld [vmem:[%s1305_s28 + $0x20] sm:$0xf] (%p78_p3) }
  0x17   : > { %v202_v3 = vld [vmem:[%s1305_s28 + $0x30] sm:$0xf] (%p78_p3)  ;;  %v204_v4 = vld [vmem:[%s1305_s28 + $0x40] sm:$0xf] (%p78_p3)  ;;  %201 = vst [vmem:[%s175_s29 + $0x8] sm:$0xf] (%p78_p3), %v200_v2 }
  0x18   : > { %203 = vst [vmem:[%s175_s29 + $0xc] sm:$0xf] (%p78_p3), %v202_v3  ;;  %205 = vst [vmem:[%s175_s29 + $0x10] sm:$0xf] (%p78_p3), %v204_v4  ;;  %v206_v5 = vld [vmem:[%s1305_s28 + $0x50] sm:$0xf] (%p78_p3) }
  0x19   : > { %v208_v6 = vld [vmem:[%s1305_s28 + $0x60] sm:$0xf]  ;;  %v210_v7 = vld [vmem:[%s1305_s28 + $0x70] sm:$0xf]  ;;  %207 = vst [vmem:[%s175_s29 + $0x14] sm:$0xf] %v206_v5 }
  0x1a   : > { %209 = vst [vmem:[%s175_s29 + $0x18] sm:$0xf] %v208_v6  ;;  %211 = vst [vmem:[%s175_s29 + $0x1c] sm:$0xf] %v210_v7  ;;  %v212_v8 = vld [vmem:[%s1305_s28 + $0x80] sm:$0xf] }
  0x1b   : > { %v214_v9 = vld [vmem:[%s1305_s28 + $0x90] sm:$0xf]  ;;  %v216_v10 = vld [vmem:[%s1305_s28 + $0xa0] sm:$0xf]  ;;  %213 = vst [vmem:[%s175_s29 + $0x20] sm:$0xf] %v212_v8 }
  0x1c   : > { %215 = vst [vmem:[%s175_s29 + $0x24] sm:$0xf] %v214_v9  ;;  %217 = vst [vmem:[%s175_s29 + $0x28] sm:$0xf] %v216_v10  ;;  %v218_v11 = vld [vmem:[%s1305_s28 + $0xb0] sm:$0xf] }
  0x1d   : > { %v220_v12 = vld [vmem:[%s1305_s28 + $0xc0] sm:$0xf]  ;;  %v222_v13 = vld [vmem:[%s1305_s28 + $0xd0] sm:$0xf]  ;;  %219 = vst [vmem:[%s175_s29 + $0x2c] sm:$0xf] %v218_v11 }
  0x1e   : > { %221 = vst [vmem:[%s175_s29 + $0x30] sm:$0xf] %v220_v12  ;;  %223 = vst [vmem:[%s175_s29 + $0x34] sm:$0xf] %v222_v13  ;;  %v224_v14 = vld [vmem:[%s1305_s28 + $0xe0] sm:$0xf] }
  0x1f   : > { %v226_v15 = vld [vmem:[%s1305_s28 + $0xf0] sm:$0xf]  ;;  %225 = vst [vmem:[%s175_s29 + $0x38] sm:$0xf] %v224_v14 }
  0x20   : > { %227 = vst [vmem:[%s175_s29 + $0x3c] sm:$0xf] %v226_v15 }
  0x21 PF: > { %p974_p8 = scmp.ge.s32.totalorder %s1235_s16, 1  ;;  %p287_p9 = scmp.lt.s32.totalorder %s1235_s16, 5 }
  0x23   : > { %p288_p10 = pnand %p974_p8, %p287_p9 }
  0x24   : > { %s294_s30 = sand.u32 (!%p288_p10), 1, %s1219_s12   ;;  %v1189_v16 = vld [vmem:[%s1416_s0] sm:$0xff] (!%p288_p10)   ;;  %v1191_v26 = vld [vmem:[%s1416_s0 + $0x8] sm:$0xff] (!%p288_p10)   ;;  %v1193_v28 = vld [vmem:[%s1416_s0 + $0x10] sm:$0xff] (!%p288_p10)   ;;  %p337_p11 = scmp.lt.s32.totalorder (!%p288_p10), %s1227_s14, 3 }
  0x25   : > { %291 = sbr.rel (%p288_p10) target bundleno = 311 (0x137), region = 69  ;;  %s1329_s6 = sshll.u32 (!%p288_p10), %s294_s30, 6  ;;  %v1190_v17 = vld [vmem:[%s1416_s0 + $0x20] sm:$0xff] (!%p288_p10)   ;;  %1109 = vmatprep.mubr.bf16.mxu0 (!%p288_p10), %v1189_v16  ;;  %v1192_v27 = vld [vmem:[%s1416_s0 + $0x28] sm:$0xff] (!%p288_p10)   ;;  %v1194_v29 = vld [vmem:[%s1416_s0 + $0x30] sm:$0xff] (!%p288_p10)  }
  0x26   : > { %s1335_s9 = scalar_lea.vmem (!%p288_p10), [#allocation3], %s1329_s6  ;;  %1117 = vmatprep.mubr.bf16.mxu1 (!%p288_p10), %v1190_v17  ;;  %v1195_v30 = vld [vmem:[%s1416_s0 + $0x18] sm:$0xff] (!%p288_p10)   ;;  %s1369_s7 = scalar_lea.vmem (!%p288_p10), [#allocation4], %s1329_s6 }
  0x27   : > { %v1181_v18 = vld [vmem:[%s1335_s9] sm:$0xff] (!%p288_p10)   ;;  %v1182_v19 = vld [vmem:[%s1335_s9 + $0x8] sm:$0xff] (!%p288_p10)   ;;  %v1183_v20 = vld [vmem:[%s1335_s9 + $0x10] sm:$0xff] (!%p288_p10)  }
  0x28   : > { %1093 = vmatprep.subr.bf16.mxu0 (!%p288_p10), %v1181_v18  ;;  %1125 = vmatprep.subr.bf16.mxu1 (!%p288_p10), %v1181_v18  ;;  %v1184_v21 = vld [vmem:[%s1335_s9 + $0x18] sm:$0xff] (!%p288_p10)   ;;  %v1185_v22 = vld [vmem:[%s1335_s9 + $0x20] sm:$0xff] (!%p288_p10)   ;;  %v1186_v23 = vld [vmem:[%s1335_s9 + $0x28] sm:$0xff] (!%p288_p10)  }
  0x29   : > { %1094 = vmatpush3.bf16.msra.mxu0 (!%p288_p10), %v1181_v18  ;;  %1133 = vmatpush3.bf16.msra.mxu1 (!%p288_p10), %v1181_v18  ;;  %v1187_v24 = vld [vmem:[%s1335_s9 + $0x30] sm:$0xff] (!%p288_p10)   ;;  %v1188_v25 = vld [vmem:[%s1335_s9 + $0x38] sm:$0xff] (!%p288_p10)  }
  0x2a   : > { %1095 = vmatprep.subr.bf16.mxu0 (!%p288_p10), %v1182_v19  ;;  %1126 = vmatprep.subr.bf16.mxu1 (!%p288_p10), %v1182_v19  ;;  %v1196_v31 = vld [vmem:[%s1416_s0 + $0x38] sm:$0xff] (!%p288_p10)  }
  0x2c   : > { %s338_s29 = scalar_select %p337_p11, %s1227_s14, 3 }
  0x2d   : > { %1096 = vmatpush3.bf16.msra.mxu0 %v1182_v19  ;;  %1134 = vmatpush3.bf16.msra.mxu1 %v1182_v19  ;;  %s1011_s6 = sshll.u32 (%p1292_p6), %s1227_s14, 2 }
  0x2e   : > { %1097 = vmatprep.subr.bf16.mxu0 %v1183_v20  ;;  %1127 = vmatprep.subr.bf16.mxu1 %v1183_v20  ;;  %s339_s5 = scalar_lea.vmem %s1418_s2, %s338_s29  ;;  %s768_s10 = scalar_lea.vmem (%p1292_p6), %s1419_s3, %s1011_s6 }
  0x2f   : > { %v993_v33 = vld [vmem:[%s339_s5] ss:$0 sm:$0xff] }
  0x31   : > { %1098 = vmatpush3.bf16.msra.mxu0 %v1183_v20  ;;  %1135 = vmatpush3.bf16.msra.mxu1 %v1183_v20 }
  0x32   : > { %1099 = vmatprep.subr.bf16.mxu0 %v1184_v21  ;;  %1128 = vmatprep.subr.bf16.mxu1 %v1184_v21 }
  0x35   : > { %1100 = vmatpush3.bf16.msra.mxu0 %v1184_v21  ;;  %1136 = vmatpush3.bf16.msra.mxu1 %v1184_v21 }
  0x36   : > { %1101 = vmatprep.subr.bf16.mxu0 %v1185_v22  ;;  %1129 = vmatprep.subr.bf16.mxu1 %v1185_v22 }
  0x39   : > { %1102 = vmatpush3.bf16.msra.mxu0 %v1185_v22  ;;  %1137 = vmatpush3.bf16.msra.mxu1 %v1185_v22 }
  0x3a   : > { %1103 = vmatprep.subr.bf16.mxu0 %v1186_v23  ;;  %1130 = vmatprep.subr.bf16.mxu1 %v1186_v23 }
  0x3d   : > { %1104 = vmatpush3.bf16.msra.mxu0 %v1186_v23  ;;  %1138 = vmatpush3.bf16.msra.mxu1 %v1186_v23 }
  0x3e   : > { %1105 = vmatprep.subr.bf16.mxu0 %v1187_v24  ;;  %1131 = vmatprep.subr.bf16.mxu1 %v1187_v24 }
  0x41   : > { %1106 = vmatpush3.bf16.msra.mxu0 %v1187_v24  ;;  %1139 = vmatpush3.bf16.msra.mxu1 %v1187_v24 }
  0x42   : > { %1107 = vmatprep.subr.bf16.mxu0 %v1188_v25  ;;  %1132 = vmatprep.subr.bf16.mxu1 %v1188_v25 }
  0x45   : > { %1108 = vmatpush3.bf16.msra.mxu0 %v1188_v25  ;;  %1140 = vmatpush3.bf16.msra.mxu1 %v1188_v25 }
  0x48   : > { %1110 = vmatmul.mubr.bf16.vlgmr.msra.gmra.mrb[0].mxu0 %v1191_v26  ;;  %1118 = vmatmul.mubr.bf16.vlgmr.msra.gmra.mrb[0].mxu1 %v1192_v27 }
  0x49   : > { %1113 = vmatprep.mubr.bf16.mxu0 %v1193_v28  ;;  %1121 = vmatprep.mubr.bf16.mxu1 %v1194_v29 }
  0x50   : > { %1114 = vmatmul.mubr.bf16.gmra.mrb[4].mxu0 %v1195_v30  ;;  %1122 = vmatmul.mubr.bf16.gmra.mrb[4].mxu1 %v1196_v31 }
 0x11b   : > { %v1111_v32 = vpop.f32.mrb[0].mxu0  ;;  %v1119_v34 = vpop.f32.mrb[0].mxu1 }
 0x11c   : > { %v540_v35 = vpop.f32.mrb[1].mxu0  ;;  %v572_v36 = vpop.f32.mrb[1].mxu1  ;;  %v663_v39 = vadd.f32 %v1111_v32, %v993_v33  ;;  %v671_v40 = vadd.f32 %v1119_v34, %v993_v33 }
 0x11d   : > { %v1112_v37 = vpop.f32.mrb[2].mxu0  ;;  %v1120_v38 = vpop.f32.mrb[2].mxu1  ;;  %v661_v45 = vadd.f32 %v993_v33, %v540_v35  ;;  %v669_v46 = vadd.f32 %v993_v33, %v572_v36 }
 0x11e   : > { %v664_v41 = vadd.f32 %v1112_v37, %v993_v33  ;;  %v672_v42 = vadd.f32 %v1120_v38, %v993_v33  ;;  %v543_v43 = vpop.f32.mrb[3].mxu0  ;;  %v575_v44 = vpop.f32.mrb[3].mxu1 }
 0x11f   : > { %v662_v47 = vadd.f32 %v993_v33, %v543_v43  ;;  %v670_v48 = vadd.f32 %v993_v33, %v575_v44 }
 0x120   : > { %v1038_v49 = vpack.c.bf16 %v664_v41, %v663_v39  ;;  %v1058_v50 = vpack.c.bf16 %v672_v42, %v671_v40 }
 0x121   : > { %v1033_v51 = vpack.c.bf16 %v662_v47, %v661_v45  ;;  %v1053_v52 = vpack.c.bf16 %v670_v48, %v669_v46 }
 0x122   : > { %1070 = vst [vmem:[%s1369_s7 + $0x8] sm:$0xff] %v1038_v49   ;;  %1074 = vst [vmem:[%s1369_s7 + $0x28] sm:$0xff] %v1058_v50  }
 0x123   : > { %1034 = vst [vmem:[%s1369_s7] sm:$0xff] %v1033_v51   ;;  %1073 = vst [vmem:[%s1369_s7 + $0x20] sm:$0xff] %v1053_v52   ;;  %v1115_v53 = vpop.f32.mrb[4].mxu0  ;;  %v1123_v54 = vpop.f32.mrb[4].mxu1 }
 0x124   : > { %v556_v55 = vpop.f32.mrb[5].mxu0  ;;  %v588_v56 = vpop.f32.mrb[5].mxu1  ;;  %v667_v59 = vadd.f32 %v1115_v53, %v993_v33  ;;  %v675_v60 = vadd.f32 %v1123_v54, %v993_v33 }
 0x125   : > { %v1116_v57 = vpop.f32.mrb[6].mxu0  ;;  %v1124_v58 = vpop.f32.mrb[6].mxu1  ;;  %v665_v1 = vadd.f32 %v993_v33, %v556_v55  ;;  %v673_v2 = vadd.f32 %v993_v33, %v588_v56  ;;  %763 = sbr.rel (!%p1292_p6) target bundleno = 311 (0x137), region = 85 }
 0x126   : > { %v668_v61 = vadd.f32 %v1116_v57, %v993_v33  ;;  %v676_v62 = vadd.f32 %v1124_v58, %v993_v33  ;;  %v559_v63 = vpop.f32.mrb[7].mxu0  ;;  %v591_v0 = vpop.f32.mrb[7].mxu1 }
 0x127   : > { %v666_v3 = vadd.f32 %v993_v33, %v559_v63  ;;  %v674_v4 = vadd.f32 %v993_v33, %v591_v0 }
 0x128   : > { %v1048_v5 = vpack.c.bf16 %v668_v61, %v667_v59  ;;  %v1068_v6 = vpack.c.bf16 %v676_v62, %v675_v60 }
 0x129   : > { %v1043_v7 = vpack.c.bf16 %v666_v3, %v665_v1  ;;  %v1063_v8 = vpack.c.bf16 %v674_v4, %v673_v2  ;;  %v788_v11 = vld [vmem:[%s1369_s7 + $0x8] sm:$0xf] (%p1292_p6)  ;;  %v790_v12 = vld [vmem:[%s1369_s7 + $0xc] sm:$0xf] (%p1292_p6) }
 0x12a   : > { %1072 = vst [vmem:[%s1369_s7 + $0x18] sm:$0xff] %v1048_v5   ;;  %1076 = vst [vmem:[%s1369_s7 + $0x38] sm:$0xff] %v1068_v6   ;;  %v784_v9 = vld [vmem:[%s1369_s7] sm:$0xf] (%p1292_p6)  ;;  %v786_v10 = vld [vmem:[%s1369_s7 + $0x4] sm:$0xf] (%p1292_p6) }
 0x12b   : > { %1071 = vst [vmem:[%s1369_s7 + $0x10] sm:$0xff] %v1043_v7   ;;  %1075 = vst [vmem:[%s1369_s7 + $0x30] sm:$0xff] %v1063_v8   ;;  %v800_v17 = vld [vmem:[%s1369_s7 + $0x20] sm:$0xf] (%p1292_p6)  ;;  %v802_v18 = vld [vmem:[%s1369_s7 + $0x24] sm:$0xf] (%p1292_p6) }
 0x12c   : > { %785 = vst [vmem:[%s768_s10] sm:$0xf] %v784_v9  ;;  %787 = vst [vmem:[%s768_s10 + $0x10] sm:$0xf] %v786_v10  ;;  %v804_v19 = vld [vmem:[%s1369_s7 + $0x28] sm:$0xf] }
 0x12d   : > { %789 = vst [vmem:[%s768_s10 + $0x20] sm:$0xf] %v788_v11  ;;  %791 = vst [vmem:[%s768_s10 + $0x30] sm:$0xf] %v790_v12  ;;  %v806_v20 = vld [vmem:[%s1369_s7 + $0x2c] sm:$0xf] }
 0x12e   : > { %801 = vst [vmem:[%s768_s10 + $0x80] sm:$0xf] %v800_v17  ;;  %803 = vst [vmem:[%s768_s10 + $0x90] sm:$0xf] %v802_v18 }
 0x12f   : > { %805 = vst [vmem:[%s768_s10 + $0xa0] sm:$0xf] %v804_v19  ;;  %807 = vst [vmem:[%s768_s10 + $0xb0] sm:$0xf] %v806_v20 }
 0x131   : > { %v796_v15 = vld [vmem:[%s1369_s7 + $0x18] sm:$0xf]  ;;  %v798_v16 = vld [vmem:[%s1369_s7 + $0x1c] sm:$0xf] }
 0x132   : > { %v792_v13 = vld [vmem:[%s1369_s7 + $0x10] sm:$0xf]  ;;  %v794_v14 = vld [vmem:[%s1369_s7 + $0x14] sm:$0xf]  ;;  %797 = vst [vmem:[%s768_s10 + $0x60] sm:$0xf] %v796_v15 }
 0x133   : > { %793 = vst [vmem:[%s768_s10 + $0x40] sm:$0xf] %v792_v13  ;;  %795 = vst [vmem:[%s768_s10 + $0x50] sm:$0xf] %v794_v14  ;;  %v808_v21 = vld [vmem:[%s1369_s7 + $0x30] sm:$0xf] }
 0x134   : > { %799 = vst [vmem:[%s768_s10 + $0x70] sm:$0xf] %v798_v16  ;;  %v810_v22 = vld [vmem:[%s1369_s7 + $0x34] sm:$0xf]  ;;  %809 = vst [vmem:[%s768_s10 + $0xc0] sm:$0xf] %v808_v21 }
 0x135   : > { %811 = vst [vmem:[%s768_s10 + $0xd0] sm:$0xf] %v810_v22  ;;  %v812_v23 = vld [vmem:[%s1369_s7 + $0x38] sm:$0xf]  ;;  %v814_v24 = vld [vmem:[%s1369_s7 + $0x3c] sm:$0xf] }
 0x136   : > { %813 = vst [vmem:[%s768_s10 + $0xe0] sm:$0xf] %v812_v23  ;;  %815 = vst [vmem:[%s768_s10 + $0xf0] sm:$0xf] %v814_v24 }
 0x137 PF: > { %s13_s16 = sadd.s32 1, %s1235_s16   ;;  %s1421_s12 = smov %s1223_s13 }
 0x138   : > { %p10_p12 = scmp.ge.s32.totalorder %s13_s16, 6   ;;  %s1422_s13 = smov %s1297_s22 }
 0x139   : > { %s1423_s14 = smov %s1231_s15  ;;  %s1424_s15 = smov %s1426_s17 }
 0x13a   :  { %12 = sbr.rel (!%p10_p12) target bundleno = 3 (0x3), region = 163 }

// kernel: unet_mmd_forward.29
= control target key start
LH: loop header
LB: loop body
LE: loop exit
PB: predicated region body
PF: predicated region fallthrough
CT: control target
= control target key end

     0   :  { %s1043_s12 = smov 0   ;;  %s1045_s13 = smov 0   ;;  %s1130_s0 = inlined_call_operand.vmem [shape: bf16[512,128], index: 0, kind: input, shape index: {}]   ;;  %s1131_s1 = inlined_call_operand.vmem [shape: bf16[128,128], index: 1, kind: input, shape index: {}]   ;;  %s1132_s2 = inlined_call_operand.vmem [shape: f32[1,128], index: 2, kind: input, shape index: {}]   ;;  %s1133_s3 = inlined_call_operand.vmem [shape: bf16[512,128], index: 3, kind: output, shape index: {}]  }
   0x1   :  { %s1047_s14 = smov 0  }
   0x2 LB: > { %s32_s15 = sadd.s32 1, %s1017_s13  ;;  %p792_p0 = scmp.ge.s32.totalorder %s1021_s14, 1  ;;  %s1021_s14 = sphi %s1047_s14, %s13_s14   ;;  %s1017_s13 = sphi %s1045_s13, %s1135_s13   ;;  %s1013_s12 = sphi %s1043_s12, %s1134_s12  }
   0x3   : > { %p34_p1 = scmp.ge.s32.totalorder %s32_s15, 4  ;;  %p188_p2 = scmp.lt.s32.totalorder %s1021_s14, 5 }
   0x5   : > { %s1137_s15 = smov (%p34_p1, %s32_s15), 0  ;;  %p189_p3 = pnand %p792_p0, %p188_p2 }
   0x6   : > { %v983_v0 = vld [vmem:[%s1131_s1] sm:$0xff] (!%p189_p3)   ;;  %s793_s18 = sshll.u32 (!%p189_p3), %s1013_s12, 4  ;;  %v984_v1 = vld [vmem:[%s1131_s1 + $0x8] sm:$0xff] (!%p189_p3)   ;;  %v985_v2 = vld [vmem:[%s1131_s1 + $0x10] sm:$0xff] (!%p189_p3)  }
   0x7   : > { %192 = sbr.rel (%p189_p3) target bundleno = 267 (0x10b), region = 32  ;;  %p230_p4 = scmp.lt.s32.totalorder (!%p189_p3), %s793_s18, 63  ;;  %911 = vmatprep.subr.bf16.mxu0 (!%p189_p3), %v983_v0  ;;  %943 = vmatprep.subr.bf16.mxu1 (!%p189_p3), %v983_v0  ;;  %v986_v3 = vld [vmem:[%s1131_s1 + $0x18] sm:$0xff] (!%p189_p3)   ;;  %v987_v6 = vld [vmem:[%s1131_s1 + $0x20] sm:$0xff] (!%p189_p3)   ;;  %v988_v7 = vld [vmem:[%s1131_s1 + $0x28] sm:$0xff] (!%p189_p3)  }
   0x8   : > { %912 = vmatpush3.bf16.msra.mxu0 (!%p189_p3), %v983_v0  ;;  %951 = vmatpush3.bf16.msra.mxu1 (!%p189_p3), %v983_v0  ;;  %v989_v8 = vld [vmem:[%s1131_s1 + $0x30] sm:$0xff] (!%p189_p3)   ;;  %v990_v9 = vld [vmem:[%s1131_s1 + $0x38] sm:$0xff] (!%p189_p3)   ;;  %v813_v17 = vld [vmem:[%s1132_s2] ss:$0 sm:$0xff] (!%p189_p3) }
   0x9   : > { %913 = vmatprep.subr.bf16.mxu0 (!%p189_p3), %v984_v1  ;;  %944 = vmatprep.subr.bf16.mxu1 (!%p189_p3), %v984_v1 }
   0xc   : > { %914 = vmatpush3.bf16.msra.mxu0 (!%p189_p3), %v984_v1  ;;  %952 = vmatpush3.bf16.msra.mxu1 (!%p189_p3), %v984_v1 }
   0xd   : > { %915 = vmatprep.subr.bf16.mxu0 (!%p189_p3), %v985_v2  ;;  %945 = vmatprep.subr.bf16.mxu1 (!%p189_p3), %v985_v2 }
   0xe   : > { %s1139_s18 = smov (!%p230_p4, %s793_s18), 63 }
   0xf   : > { %s794_s23 = sshll.u32 %s1139_s18, 2 }
  0x10   : > { %s1078_s26 = scalar_lea.vmem %s1130_s0, %s794_s23  ;;  %916 = vmatpush3.bf16.msra.mxu0 %v985_v2  ;;  %953 = vmatpush3.bf16.msra.mxu1 %v985_v2  ;;  %s1111_s17 = scalar_lea.vmem %s1133_s3, %s794_s23 }
  0x11   : > { %v991_v4 = vld [vmem:[%s1078_s26] sm:$0xff]   ;;  %917 = vmatprep.subr.bf16.mxu0 %v986_v3  ;;  %946 = vmatprep.subr.bf16.mxu1 %v986_v3  ;;  %v993_v10 = vld [vmem:[%s1078_s26 + $0x8] sm:$0xff]   ;;  %v995_v12 = vld [vmem:[%s1078_s26 + $0x10] sm:$0xff]  }
  0x12   : > { %v992_v5 = vld [vmem:[%s1078_s26 + $0x20] sm:$0xff]   ;;  %927 = vmatprep.mubr.bf16.mxu0 %v991_v4  ;;  %v994_v11 = vld [vmem:[%s1078_s26 + $0x28] sm:$0xff]   ;;  %v996_v13 = vld [vmem:[%s1078_s26 + $0x30] sm:$0xff]  }
  0x13   : > { %935 = vmatprep.mubr.bf16.mxu1 %v992_v5  ;;  %v997_v14 = vld [vmem:[%s1078_s26 + $0x18] sm:$0xff]  }
  0x14   : > { %918 = vmatpush3.bf16.msra.mxu0 %v986_v3  ;;  %954 = vmatpush3.bf16.msra.mxu1 %v986_v3  ;;  %v998_v15 = vld [vmem:[%s1078_s26 + $0x38] sm:$0xff]  }
  0x15   : > { %919 = vmatprep.subr.bf16.mxu0 %v987_v6  ;;  %947 = vmatprep.subr.bf16.mxu1 %v987_v6 }
  0x18   : > { %920 = vmatpush3.bf16.msra.mxu0 %v987_v6  ;;  %955 = vmatpush3.bf16.msra.mxu1 %v987_v6 }
  0x19   : > { %921 = vmatprep.subr.bf16.mxu0 %v988_v7  ;;  %948 = vmatprep.subr.bf16.mxu1 %v988_v7 }
  0x1c   : > { %922 = vmatpush3.bf16.msra.mxu0 %v988_v7  ;;  %956 = vmatpush3.bf16.msra.mxu1 %v988_v7 }
  0x1d   : > { %923 = vmatprep.subr.bf16.mxu0 %v989_v8  ;;  %949 = vmatprep.subr.bf16.mxu1 %v989_v8 }
  0x20   : > { %924 = vmatpush3.bf16.msra.mxu0 %v989_v8  ;;  %957 = vmatpush3.bf16.msra.mxu1 %v989_v8 }
  0x21   : > { %925 = vmatprep.subr.bf16.mxu0 %v990_v9  ;;  %950 = vmatprep.subr.bf16.mxu1 %v990_v9 }
  0x24   : > { %926 = vmatpush3.bf16.msra.mxu0 %v990_v9  ;;  %958 = vmatpush3.bf16.msra.mxu1 %v990_v9 }
  0x27   : > { %928 = vmatmul.mubr.bf16.vlgmr.msra.gmra.mrb[0].mxu0 %v993_v10  ;;  %936 = vmatmul.mubr.bf16.vlgmr.msra.gmra.mrb[0].mxu1 %v994_v11 }
  0x28   : > { %931 = vmatprep.mubr.bf16.mxu0 %v995_v12  ;;  %939 = vmatprep.mubr.bf16.mxu1 %v996_v13 }
  0x2f   : > { %932 = vmatmul.mubr.bf16.gmra.mrb[4].mxu0 %v997_v14  ;;  %940 = vmatmul.mubr.bf16.gmra.mrb[4].mxu1 %v998_v15 }
  0xfa   : > { %v929_v16 = vpop.f32.mrb[0].mxu0  ;;  %v937_v18 = vpop.f32.mrb[0].mxu1 }
  0xfb   : > { %v458_v19 = vpop.f32.mrb[1].mxu0  ;;  %v490_v20 = vpop.f32.mrb[1].mxu1  ;;  %v581_v23 = vadd.f32 %v929_v16, %v813_v17  ;;  %v589_v24 = vadd.f32 %v937_v18, %v813_v17 }
  0xfc   : > { %v930_v21 = vpop.f32.mrb[2].mxu0  ;;  %v938_v22 = vpop.f32.mrb[2].mxu1  ;;  %v579_v29 = vadd.f32 %v813_v17, %v458_v19  ;;  %v587_v30 = vadd.f32 %v813_v17, %v490_v20 }
  0xfd   : > { %v582_v25 = vadd.f32 %v930_v21, %v813_v17  ;;  %v590_v26 = vadd.f32 %v938_v22, %v813_v17  ;;  %v461_v27 = vpop.f32.mrb[3].mxu0  ;;  %v493_v28 = vpop.f32.mrb[3].mxu1 }
  0xfe   : > { %v580_v31 = vadd.f32 %v813_v17, %v461_v27  ;;  %v588_v32 = vadd.f32 %v813_v17, %v493_v28 }
  0xff   : > { %v856_v33 = vpack.c.bf16 %v582_v25, %v581_v23  ;;  %v876_v34 = vpack.c.bf16 %v590_v26, %v589_v24 }
 0x100   : > { %v851_v35 = vpack.c.bf16 %v580_v31, %v579_v29  ;;  %v871_v36 = vpack.c.bf16 %v588_v32, %v587_v30 }
 0x101   : > { %888 = vst [vmem:[%s1111_s17 + $0x8] sm:$0xff] %v856_v33   ;;  %892 = vst [vmem:[%s1111_s17 + $0x28] sm:$0xff] %v876_v34  }
 0x102   : > { %852 = vst [vmem:[%s1111_s17] sm:$0xff] %v851_v35   ;;  %891 = vst [vmem:[%s1111_s17 + $0x20] sm:$0xff] %v871_v36   ;;  %v933_v37 = vpop.f32.mrb[4].mxu0  ;;  %v941_v38 = vpop.f32.mrb[4].mxu1 }
 0x103   : > { %v474_v39 = vpop.f32.mrb[5].mxu0  ;;  %v506_v40 = vpop.f32.mrb[5].mxu1  ;;  %v585_v43 = vadd.f32 %v933_v37, %v813_v17  ;;  %v593_v44 = vadd.f32 %v941_v38, %v813_v17 }
 0x104   : > { %v934_v41 = vpop.f32.mrb[6].mxu0  ;;  %v942_v42 = vpop.f32.mrb[6].mxu1  ;;  %v583_v49 = vadd.f32 %v813_v17, %v474_v39  ;;  %v591_v50 = vadd.f32 %v813_v17, %v506_v40 }
 0x105   : > { %v586_v45 = vadd.f32 %v934_v41, %v813_v17  ;;  %v594_v46 = vadd.f32 %v942_v42, %v813_v17  ;;  %v477_v47 = vpop.f32.mrb[7].mxu0  ;;  %v509_v48 = vpop.f32.mrb[7].mxu1 }
 0x106   : > { %v584_v51 = vadd.f32 %v813_v17, %v477_v47  ;;  %v592_v52 = vadd.f32 %v813_v17, %v509_v48 }
 0x107   : > { %v866_v53 = vpack.c.bf16 %v586_v45, %v585_v43  ;;  %v886_v54 = vpack.c.bf16 %v594_v46, %v593_v44 }
 0x108   : > { %v861_v55 = vpack.c.bf16 %v584_v51, %v583_v49  ;;  %v881_v56 = vpack.c.bf16 %v592_v52, %v591_v50 }
 0x109   : > { %890 = vst [vmem:[%s1111_s17 + $0x18] sm:$0xff] %v866_v53   ;;  %894 = vst [vmem:[%s1111_s17 + $0x38] sm:$0xff] %v886_v54  }
 0x10a   : > { %889 = vst [vmem:[%s1111_s17 + $0x10] sm:$0xff] %v861_v55   ;;  %893 = vst [vmem:[%s1111_s17 + $0x30] sm:$0xff] %v881_v56  }
 0x10b PF: > { %s13_s14 = sadd.s32 1, %s1021_s14   ;;  %s1134_s12 = smov %s1017_s13 }
 0x10c   : > { %p10_p5 = scmp.ge.s32.totalorder %s13_s14, 6   ;;  %s1135_s13 = smov %s1137_s15 }
 0x10e   :  { %12 = sbr.rel (!%p10_p5) target bundleno = 2 (0x2), region = 76 }

// kernel: unet_mmd_forward.24
= control target key start
LH: loop header
LB: loop body
LE: loop exit
PB: predicated region body
PF: predicated region fallthrough
CT: control target
= control target key end

     0   :  { %s5310_s15 = smov 0   ;;  %s5312_s16 = smov 0   ;;  %s6424_s0 = inlined_call_operand.vmem [shape: f32[2,104,128], index: 0, kind: input, shape index: {}]   ;;  %s6425_s1 = inlined_call_operand.vmem [shape: f32[2,104,128], index: 1, kind: input, shape index: {}]   ;;  %s6426_s2 = inlined_call_operand.vmem [shape: bf16[18,128,128], index: 2, kind: input, shape index: {}]   ;;  %s6427_s3 = inlined_call_operand.vmem [shape: f32[1,128], index: 3, kind: input, shape index: {}]   ;;  %s6428_s4 = inlined_call_operand.vmem [shape: bf16[2,80,128], index: 4, kind: output, shape index: {}]  }
   0x1   :  { %s5314_s17 = smov 0  }
   0x2 LB: > { %s26_s18 = sadd.s32 1, %s5277_s16  ;;  %p3393_p0 = scmp.ge.s32.totalorder %s5281_s17, 1  ;;  %s5281_s17 = sphi %s5314_s17, %s14_s17   ;;  %s5277_s16 = sphi %s5312_s16, %s6430_s16   ;;  %s5273_s15 = sphi %s5310_s15, %s6429_s15  }
   0x3   : > { %p28_p1 = scmp.ge.s32.totalorder %s26_s18, 2  ;;  %p203_p2 = scmp.lt.s32.totalorder %s5281_s17, 3 }
   0x5   : > { %s6432_s18 = smov (%p28_p1, %s26_s18), 0  ;;  %p204_p3 = pnand %p3393_p0, %p203_p2 }
   0x6   : > { %v5115_v0 = vld [vmem:[%s6426_s2] sm:$0xff] (!%p204_p3)   ;;  %v5283_v1 = vmov (!%p204_p3), 0.0   ;;  %v5117_v3 = vld [vmem:[%s6426_s2 + $0x8] sm:$0xff] (!%p204_p3)   ;;  %vm5284_vm0 = vmmov (!%p204_p3), 0   ;;  %v5119_v5 = vld [vmem:[%s6426_s2 + $0x10] sm:$0xff] (!%p204_p3)   ;;  %p244_p4 = scmp.lt.s32.totalorder (!%p204_p3), %s5273_s15, 1 }
   0x7   : > { %207 = sbr.rel (%p204_p3) target bundleno = 614 (0x266), region = 36  ;;  %4099 = vmatprep.subr.bf16.mxu1 (!%p204_p3), %v5283_v1  ;;  %4423 = vmatprep.subr.bf16.mxu0 (!%p204_p3), %v5283_v1  ;;  %v5116_v2 = vld [vmem:[%s6426_s2 + $0x240] sm:$0xff] (!%p204_p3)   ;;  %v5118_v4 = vld [vmem:[%s6426_s2 + $0x248] sm:$0xff] (!%p204_p3)   ;;  %v5120_v6 = vld [vmem:[%s6426_s2 + $0x250] sm:$0xff] (!%p204_p3)  }
   0x8   : > { %4100 = vmatpush3.bf16.msra.mxu1 (!%p204_p3), %v5115_v0  ;;  %4115 = vmatprep.mubr.msk.bf16.mxu1 (!%p204_p3), %vm5284_vm0, %v5283_v1  ;;  %v5121_v7 = vld [vmem:[%s6426_s2 + $0x18] sm:$0xff] (!%p204_p3)   ;;  %v5123_v9 = vld [vmem:[%s6426_s2 + $0x20] sm:$0xff] (!%p204_p3)   ;;  %v5125_v11 = vld [vmem:[%s6426_s2 + $0x28] sm:$0xff] (!%p204_p3)  }
   0x9   : > { %4424 = vmatpush3.bf16.msra.mxu0 (!%p204_p3), %v5116_v2  ;;  %4101 = vmatprep.subr.bf16.mxu1 (!%p204_p3), %v5283_v1  ;;  %v5122_v8 = vld [vmem:[%s6426_s2 + $0x258] sm:$0xff] (!%p204_p3)   ;;  %v5124_v10 = vld [vmem:[%s6426_s2 + $0x260] sm:$0xff] (!%p204_p3)   ;;  %v5126_v12 = vld [vmem:[%s6426_s2 + $0x268] sm:$0xff] (!%p204_p3)  }
   0xa   : > { %4425 = vmatprep.subr.bf16.mxu0 (!%p204_p3), %v5283_v1  ;;  %4439 = vmatprep.mubr.msk.bf16.mxu0 (!%p204_p3), %vm5284_vm0, %v5283_v1  ;;  %v5127_v13 = vld [vmem:[%s6426_s2 + $0x30] sm:$0xff] (!%p204_p3)   ;;  %v5129_v15 = vld [vmem:[%s6426_s2 + $0x38] sm:$0xff] (!%p204_p3)   ;;  %v5131_v23 = vld [vmem:[%s6426_s2 + $0x40] sm:$0xff] (!%p204_p3)  }
   0xb   : > { %v5128_v14 = vld [vmem:[%s6426_s2 + $0x270] sm:$0xff] (!%p204_p3)   ;;  %v5130_v16 = vld [vmem:[%s6426_s2 + $0x278] sm:$0xff] (!%p204_p3)   ;;  %v5132_v24 = vld [vmem:[%s6426_s2 + $0x280] sm:$0xff] (!%p204_p3)  }
   0xc   : > { %4102 = vmatpush3.bf16.msra.mxu1 (!%p204_p3), %v5117_v3  ;;  %v5133_v25 = vld [vmem:[%s6426_s2 + $0x48] sm:$0xff] (!%p204_p3)   ;;  %v5135_v33 = vld [vmem:[%s6426_s2 + $0x50] sm:$0xff] (!%p204_p3)   ;;  %v5137_v37 = vld [vmem:[%s6426_s2 + $0x58] sm:$0xff] (!%p204_p3)  }
   0xd   : > { %4426 = vmatpush3.bf16.msra.mxu0 (!%p204_p3), %v5118_v4  ;;  %4103 = vmatprep.subr.bf16.mxu1 (!%p204_p3), %v5283_v1  ;;  %v5134_v30 = vld [vmem:[%s6426_s2 + $0x288] sm:$0xff] (!%p204_p3)   ;;  %v5136_v34 = vld [vmem:[%s6426_s2 + $0x290] sm:$0xff] (!%p204_p3)   ;;  %v5138_v40 = vld [vmem:[%s6426_s2 + $0x298] sm:$0xff] (!%p204_p3)  }
   0xe   : > { %4427 = vmatprep.subr.bf16.mxu0 %v5283_v1  ;;  %s6434_s15 = smov (!%p244_p4, %s5273_s15), 1  ;;  %v5139_v43 = vld [vmem:[%s6426_s2 + $0x60] sm:$0xff]   ;;  %v5141_v48 = vld [vmem:[%s6426_s2 + $0x68] sm:$0xff]   ;;  %v5143_v53 = vld [vmem:[%s6426_s2 + $0x70] sm:$0xff]  }
   0xf   : > { %s5087_s21 = smul.u32 104, %s6434_s15  ;;  %v5140_v44 = vld [vmem:[%s6426_s2 + $0x2a0] sm:$0xff]   ;;  %v5142_v50 = vld [vmem:[%s6426_s2 + $0x2a8] sm:$0xff]   ;;  %v5144_v54 = vld [vmem:[%s6426_s2 + $0x2b0] sm:$0xff]  }
  0x10   : > { %4104 = vmatpush3.bf16.msra.mxu1 %v5119_v5  ;;  %v5145_v59 = vld [vmem:[%s6426_s2 + $0x78] sm:$0xff]  }
  0x11   : > { %4428 = vmatpush3.bf16.msra.mxu0 %v5120_v6  ;;  %4105 = vmatprep.subr.bf16.mxu1 %v5283_v1  ;;  %s5397_s28 = scalar_lea.vmem %s6424_s0, %s5087_s21  ;;  %s5402_s5 = scalar_lea.vmem %s6425_s1, %s5087_s21  ;;  %v5146_v60 = vld [vmem:[%s6426_s2 + $0x2b8] sm:$0xff]   ;;  %v5147_v6 = vld [vmem:[%s6426_s2 + $0x80] sm:$0xff]  }
  0x12   : > { %4429 = vmatprep.subr.bf16.mxu0 %v5283_v1  ;;  %v277_v17 = vld [vmem:[%s5397_s28] sm:$0xff]  ;;  %v278_v18 = vld [vmem:[%s5397_s28 + $0x8] sm:$0xff]  ;;  %v279_v26 = vld [vmem:[%s5397_s28 + $0x10] sm:$0xff] }
  0x13   : > { %v1743_v19 = vld [vmem:[%s5402_s5] sm:$0xff]  ;;  %v1744_v20 = vld [vmem:[%s5402_s5 + $0x8] sm:$0xff]  ;;  %v287_v21 = vpack.c.bf16 %v278_v18, %v277_v17  ;;  %v280_v27 = vld [vmem:[%s5397_s28 + $0x18] sm:$0xff] }
  0x14   : > { %4106 = vmatpush3.bf16.msra.mxu1 %v5121_v7  ;;  %v1753_v22 = vpack.c.bf16 %v1744_v20, %v1743_v19  ;;  %v1745_v28 = vld [vmem:[%s5402_s5 + $0x10] sm:$0xff]  ;;  %v1746_v29 = vld [vmem:[%s5402_s5 + $0x18] sm:$0xff]  ;;  %v288_v31 = vpack.c.bf16 %v280_v27, %v279_v26  ;;  %v281_v35 = vld [vmem:[%s5397_s28 + $0x20] sm:$0xff] }
  0x15   : > { %4430 = vmatpush3.bf16.msra.mxu0 %v5122_v8  ;;  %4107 = vmatprep.subr.bf16.mxu1 %v5283_v1  ;;  %v1754_v32 = vpack.c.bf16 %v1746_v29, %v1745_v28  ;;  %v282_v36 = vld [vmem:[%s5397_s28 + $0x28] sm:$0xff]  ;;  %v1747_v38 = vld [vmem:[%s5402_s5 + $0x20] sm:$0xff]  ;;  %v283_v45 = vld [vmem:[%s5397_s28 + $0x30] sm:$0xff] }
  0x16   : > { %4431 = vmatprep.subr.bf16.mxu0 %v5283_v1  ;;  %v1748_v39 = vld [vmem:[%s5402_s5 + $0x28] sm:$0xff]  ;;  %v289_v41 = vpack.c.bf16 %v282_v36, %v281_v35  ;;  %v284_v46 = vld [vmem:[%s5397_s28 + $0x38] sm:$0xff]  ;;  %v1749_v47 = vld [vmem:[%s5402_s5 + $0x30] sm:$0xff] }
  0x17   : > { %v1755_v42 = vpack.c.bf16 %v1748_v39, %v1747_v38  ;;  %v1750_v49 = vld [vmem:[%s5402_s5 + $0x38] sm:$0xff]  ;;  %v290_v51 = vpack.c.bf16 %v284_v46, %v283_v45  ;;  %v285_v55 = vld [vmem:[%s5397_s28 + $0x40] sm:$0xff]  ;;  %v286_v56 = vld [vmem:[%s5397_s28 + $0x48] sm:$0xff] }
  0x18   : > { %4108 = vmatpush3.bf16.msra.mxu1 %v5123_v9  ;;  %v1756_v52 = vpack.c.bf16 %v1750_v49, %v1749_v47  ;;  %v1751_v57 = vld [vmem:[%s5402_s5 + $0x40] sm:$0xff]  ;;  %v1752_v58 = vld [vmem:[%s5402_s5 + $0x48] sm:$0xff]  ;;  %v291_v61 = vpack.c.bf16 %v286_v56, %v285_v55  ;;  %v441_v9 = vld [vmem:[%s5397_s28 + $0x11] sm:$0xff] }
  0x19   : > { %4432 = vmatpush3.bf16.msra.mxu0 %v5124_v10  ;;  %4109 = vmatprep.subr.bf16.mxu1 %v5283_v1  ;;  %v1757_v62 = vpack.c.bf16 %v1752_v58, %v1751_v57  ;;  %v439_v63 = vld [vmem:[%s5397_s28 + $0x1] sm:$0xff]  ;;  %v440_v0 = vld [vmem:[%s5397_s28 + $0x9] sm:$0xff]  ;;  %v442_v10 = vld [vmem:[%s5397_s28 + $0x19] sm:$0xff] }
  0x1a   : > { %4433 = vmatprep.subr.bf16.mxu0 %v5283_v1  ;;  %v1906_v2 = vld [vmem:[%s5402_s5 + $0x1] sm:$0xff]  ;;  %v1907_v3 = vld [vmem:[%s5402_s5 + $0x9] sm:$0xff]  ;;  %v449_v4 = vpack.c.bf16 %v440_v0, %v439_v63  ;;  %v5153_v20 = vld [vmem:[%s6426_s2 + $0x98] sm:$0xff]  }
  0x1b   : > { %v1916_v5 = vpack.c.bf16 %v1907_v3, %v1906_v2  ;;  %v5148_v7 = vld [vmem:[%s6426_s2 + $0x2c0] sm:$0xff]   ;;  %v5149_v8 = vld [vmem:[%s6426_s2 + $0x88] sm:$0xff]   ;;  %v5152_v17 = vld [vmem:[%s6426_s2 + $0x2d0] sm:$0xff]  }
  0x1c   : > { %4110 = vmatpush3.bf16.msra.mxu1 %v5125_v11  ;;  %v1908_v11 = vld [vmem:[%s5402_s5 + $0x11] sm:$0xff]  ;;  %v443_v18 = vld [vmem:[%s5397_s28 + $0x21] sm:$0xff]  ;;  %v444_v19 = vld [vmem:[%s5397_s28 + $0x29] sm:$0xff] }
  0x1d   : > { %4434 = vmatpush3.bf16.msra.mxu0 %v5126_v12  ;;  %4111 = vmatprep.subr.bf16.mxu1 %v5283_v1  ;;  %v1909_v12 = vld [vmem:[%s5402_s5 + $0x19] sm:$0xff]  ;;  %v445_v28 = vld [vmem:[%s5397_s28 + $0x31] sm:$0xff]  ;;  %v448_v39 = vld [vmem:[%s5397_s28 + $0x49] sm:$0xff] }
  0x1e   : > { %4435 = vmatprep.subr.bf16.mxu0 %v5283_v1  ;;  %v5155_v26 = vld [vmem:[%s6426_s2 + $0xa0] sm:$0xff]   ;;  %v5159_v36 = vld [vmem:[%s6426_s2 + $0xb0] sm:$0xff]   ;;  %v5169_v3 = vld [vmem:[%s6426_s2 + $0xd8] sm:$0xff]  }
  0x1f   : > { %v5156_v27 = vld [vmem:[%s6426_s2 + $0x2e0] sm:$0xff]   ;;  %v5160_v38 = vld [vmem:[%s6426_s2 + $0x2f0] sm:$0xff]  }
  0x20   : > { %4112 = vmatpush3.bf16.msra.mxu1 %v5127_v13  ;;  %v5150_v13 = vld [vmem:[%s6426_s2 + $0x2c8] sm:$0xff]   ;;  %v446_v29 = vld [vmem:[%s5397_s28 + $0x39] sm:$0xff]  ;;  %v5168_v63 = vld [vmem:[%s6426_s2 + $0x310] sm:$0xff]  }
  0x21   : > { %4436 = vmatpush3.bf16.msra.mxu0 %v5128_v14  ;;  %4113 = vmatprep.subr.bf16.mxu1 %v5283_v1  ;;  %v450_v14 = vpack.c.bf16 %v442_v10, %v441_v9  ;;  %v602_v46 = vld [vmem:[%s5397_s28 + $0x2] sm:$0xff]  ;;  %v5620_v47 = vld [vmem:[%s5397_s28 + $0xa] sm:$0xff]  ;;  %v5643_v55 = vld [vmem:[%s5397_s28 + $0x12] sm:$0xff] }
  0x22   : > { %4437 = vmatprep.subr.bf16.mxu0 %v5283_v1  ;;  %v5629_v49 = vld [vmem:[%s5402_s5 + $0xa] sm:$0xff]  ;;  %v5646_v56 = vld [vmem:[%s5397_s28 + $0x1a] sm:$0xff]  ;;  %v5650_v57 = vld [vmem:[%s5402_s5 + $0x12] sm:$0xff] }
  0x23   : > { %v5653_v58 = vld [vmem:[%s5402_s5 + $0x1a] sm:$0xff]  ;;  %v5676_v0 = vld [vmem:[%s5397_s28 + $0x22] sm:$0xff]  ;;  %v5679_v2 = vld [vmem:[%s5397_s28 + $0x2a] sm:$0xff] }
  0x24   : > { %4114 = vmatpush3.bf16.msra.mxu1 %v5129_v15  ;;  %v1917_v15 = vpack.c.bf16 %v1909_v12, %v1908_v11  ;;  %v5171_v9 = vld [vmem:[%s6426_s2 + $0xe0] sm:$0xff]   ;;  %v5712_v11 = vld [vmem:[%s5397_s28 + $0x32] sm:$0xff] }
  0x25   : > { %4438 = vmatpush3.bf16.msra.mxu0 %v5130_v16  ;;  %4135 = vmatprep.subr.bf16.mxu1 %v5283_v1  ;;  %v5151_v16 = vld [vmem:[%s6426_s2 + $0x90] sm:$0xff]   ;;  %v5172_v10 = vld [vmem:[%s6426_s2 + $0x320] sm:$0xff]  }
  0x26   : > { %4459 = vmatprep.subr.bf16.mxu0 %v5283_v1  ;;  %v5715_v12 = vld [vmem:[%s5397_s28 + $0x3a] sm:$0xff] }
  0x27   : > { %4116 = vmatmul.mubr.bf16.vlgmr.msra.gmra.mrb[0].mxu1 %v287_v21  ;;  %v1910_v21 = vld [vmem:[%s5402_s5 + $0x21] sm:$0xff] }
  0x28   : > { %4440 = vmatmul.mubr.bf16.vlgmr.msra.gmra.mrb[0].mxu0 %v1753_v22  ;;  %4136 = vmatpush3.bf16.msra.mxu1 %v5131_v23  ;;  %v1911_v22 = vld [vmem:[%s5402_s5 + $0x29] sm:$0xff]  ;;  %v5154_v23 = vld [vmem:[%s6426_s2 + $0x2d8] sm:$0xff]  }
  0x29   : > { %4460 = vmatpush3.bf16.msra.mxu0 %v5132_v24  ;;  %4137 = vmatprep.subr.bf16.mxu1 %v5283_v1  ;;  %v451_v24 = vpack.c.bf16 %v444_v19, %v443_v18  ;;  %v5175_v19 = vld [vmem:[%s6426_s2 + $0xf0] sm:$0xff]  }
  0x2a   : > { %4119 = vmatprep.mubr.msk.bf16.mxu1 %vm5284_vm0, %v5283_v1  ;;  %4443 = vmatprep.mubr.msk.bf16.mxu0 %vm5284_vm0, %v5283_v1 }
  0x2b   : > { %4461 = vmatprep.subr.bf16.mxu0 %v5283_v1 }
  0x2c   : > { %4138 = vmatpush3.bf16.msra.mxu1 %v5133_v25  ;;  %v1918_v25 = vpack.c.bf16 %v1911_v22, %v1910_v21  ;;  %v5747_v21 = vld [vmem:[%s5397_s28 + $0x42] sm:$0xff]  ;;  %v5750_v22 = vld [vmem:[%s5397_s28 + $0x4a] sm:$0xff] }
  0x2d   : > { %4462 = vmatpush3.bf16.msra.mxu0 %v5134_v30  ;;  %4139 = vmatprep.subr.bf16.mxu1 %v5283_v1  ;;  %v1912_v30 = vld [vmem:[%s5402_s5 + $0x31] sm:$0xff] }
  0x2e   : > { %4463 = vmatprep.subr.bf16.mxu0 %v5283_v1 }
  0x2f   : > { %4120 = vmatmul.mubr.bf16.gmra.mrb[4].mxu1 %v288_v31  ;;  %v5157_v31 = vld [vmem:[%s6426_s2 + $0xa8] sm:$0xff]  }
  0x30   : > { %4444 = vmatmul.mubr.bf16.gmra.mrb[4].mxu0 %v1754_v32  ;;  %4140 = vmatpush3.bf16.msra.mxu1 %v5135_v33  ;;  %v1913_v32 = vld [vmem:[%s5402_s5 + $0x39] sm:$0xff]  ;;  %v5158_v33 = vld [vmem:[%s6426_s2 + $0x2e8] sm:$0xff]  }
  0x31   : > { %4464 = vmatpush3.bf16.msra.mxu0 %v5136_v34  ;;  %4123 = vmatprep.mubr.msk.bf16.mxu1 %vm5284_vm0, %v5283_v1  ;;  %v452_v34 = vpack.c.bf16 %v446_v29, %v445_v28  ;;  %v1919_v35 = vpack.c.bf16 %v1913_v32, %v1912_v30  ;;  %v5179_v29 = vld [vmem:[%s6426_s2 + $0x100] sm:$0xff]   ;;  %v775_v30 = vpack.c.bf16 %v5643_v55, %v5620_v47 }
  0x32   : > { %4141 = vmatprep.subr.bf16.mxu1 %v5283_v1  ;;  %4447 = vmatprep.mubr.msk.bf16.mxu0 %vm5284_vm0, %v5283_v1  ;;  %v2242_v32 = vpack.c.bf16 %v5650_v57, %v5629_v49 }
  0x33   : > { %4465 = vmatprep.subr.bf16.mxu0 %v5283_v1 }
  0x34   : > { %4142 = vmatpush3.bf16.msra.mxu1 %v5137_v37  ;;  %v447_v37 = vld [vmem:[%s5397_s28 + $0x41] sm:$0xff] }
  0x35   : > { %4466 = vmatpush3.bf16.msra.mxu0 %v5138_v40  ;;  %4143 = vmatprep.subr.bf16.mxu1 %v5283_v1  ;;  %v1914_v40 = vld [vmem:[%s5402_s5 + $0x41] sm:$0xff] }
  0x36   : > { %4467 = vmatprep.subr.bf16.mxu0 %v5283_v1 }
  0x37   : > { %4124 = vmatmul.mubr.bf16.gmra.mrb[8].mxu1 %v289_v41  ;;  %v1915_v41 = vld [vmem:[%s5402_s5 + $0x49] sm:$0xff] }
  0x38   : > { %4448 = vmatmul.mubr.bf16.gmra.mrb[8].mxu0 %v1755_v42  ;;  %4144 = vmatpush3.bf16.msra.mxu1 %v5139_v43  ;;  %v5161_v42 = vld [vmem:[%s6426_s2 + $0xb8] sm:$0xff]   ;;  %v1920_v45 = vpack.c.bf16 %v1915_v41, %v1914_v40  ;;  %v5187_v41 = vld [vmem:[%s6426_s2 + $0x120] sm:$0xff]  }
  0x39   : > { %4127 = vmatprep.mubr.msk.bf16.mxu1 %vm5284_vm0, %v5283_v1  ;;  %4451 = vmatprep.mubr.msk.bf16.mxu0 %vm5284_vm0, %v5283_v1  ;;  %v5162_v43 = vld [vmem:[%s6426_s2 + $0x2f8] sm:$0xff]  }
  0x3a   : > { %4468 = vmatpush3.bf16.msra.mxu0 %v5140_v44  ;;  %4145 = vmatprep.subr.bf16.mxu1 %v5283_v1  ;;  %v453_v44 = vpack.c.bf16 %v448_v39, %v447_v37  ;;  %v5184_v37 = vld [vmem:[%s6426_s2 + $0x350] sm:$0xff]   ;;  %v5185_v39 = vld [vmem:[%s6426_s2 + $0x118] sm:$0xff]  }
  0x3b   : > { %4469 = vmatprep.subr.bf16.mxu0 %v5283_v1  ;;  %v5186_v40 = vld [vmem:[%s6426_s2 + $0x358] sm:$0xff]  }
  0x3c   : > { %4146 = vmatpush3.bf16.msra.mxu1 %v5141_v48  ;;  %v2069_v48 = vld [vmem:[%s5402_s5 + $0x2] sm:$0xff] }
  0x3d   : > { %4147 = vmatprep.subr.bf16.mxu1 %v5283_v1 }
  0x3e   : > { %4470 = vmatpush3.bf16.msra.mxu0 %v5142_v50  ;;  %v612_v50 = vpack.c.bf16 %v5620_v47, %v602_v46  ;;  %v5190_v46 = vld [vmem:[%s6426_s2 + $0x368] sm:$0xff]   ;;  %v778_v47 = vpack.c.bf16 %v5747_v21, %v5715_v12 }
  0x3f   : > { %4128 = vmatmul.mubr.bf16.gmra.mrb[12].mxu1 %v290_v51  ;;  %4471 = vmatprep.subr.bf16.mxu0 %v5283_v1  ;;  %v2079_v51 = vpack.c.bf16 %v5629_v49, %v2069_v48  ;;  %v5191_v49 = vld [vmem:[%s6426_s2 + $0x130] sm:$0xff]  }
  0x40   : > { %4452 = vmatmul.mubr.bf16.gmra.mrb[12].mxu0 %v1756_v52  ;;  %4131 = vmatprep.mubr.msk.bf16.mxu1 %vm5284_vm0, %v5283_v1  ;;  %v5163_v52 = vld [vmem:[%s6426_s2 + $0xc0] sm:$0xff]  }
  0x41   : > { %4148 = vmatpush3.bf16.msra.mxu1 %v5143_v53  ;;  %4455 = vmatprep.mubr.msk.bf16.mxu0 %vm5284_vm0, %v5283_v1  ;;  %v5164_v53 = vld [vmem:[%s6426_s2 + $0x300] sm:$0xff]  }
  0x42   : > { %4472 = vmatpush3.bf16.msra.mxu0 %v5144_v54  ;;  %4149 = vmatprep.subr.bf16.mxu1 %v5283_v1  ;;  %v5165_v54 = vld [vmem:[%s6426_s2 + $0xc8] sm:$0xff]  }
  0x43   : > { %4473 = vmatprep.subr.bf16.mxu0 %v5283_v1 }
  0x45   : > { %4150 = vmatpush3.bf16.msra.mxu1 %v5145_v59  ;;  %v5166_v59 = vld [vmem:[%s6426_s2 + $0x308] sm:$0xff]  }
  0x46   : > { %4474 = vmatpush3.bf16.msra.mxu0 %v5146_v60  ;;  %4171 = vmatprep.subr.bf16.mxu1 %v5283_v1  ;;  %v613_v60 = vpack.c.bf16 %v5646_v56, %v5643_v55 }
  0x47   : > { %4132 = vmatmul.mubr.bf16.gmra.mrb[16].mxu1 %v291_v61  ;;  %4495 = vmatprep.subr.bf16.mxu0 %v5283_v1  ;;  %v2080_v61 = vpack.c.bf16 %v5653_v58, %v5650_v57  ;;  %v928_v57 = vld [vmem:[%s5397_s28 + $0xb] sm:$0xff] }
  0x48   : > { %4456 = vmatmul.mubr.bf16.gmra.mrb[16].mxu0 %v1757_v62  ;;  %4151 = vmatprep.mubr.msk.bf16.mxu1 %vm5284_vm0, %v5283_v1  ;;  %v5167_v62 = vld [vmem:[%s6426_s2 + $0xd0] sm:$0xff]  }
  0x49   : > { %4475 = vmatprep.mubr.msk.bf16.mxu0 %vm5284_vm0, %v5283_v1 }
  0x4f   : > { %4152 = vmatmul.mubr.bf16.vlgmr.msra.gmra.mrb[0].mxu1 %v449_v4  ;;  %v5687_v4 = vld [vmem:[%s5402_s5 + $0x22] sm:$0xff] }
  0x50   : > { %4476 = vmatmul.mubr.bf16.vlgmr.msra.gmra.mrb[0].mxu0 %v1916_v5  ;;  %4172 = vmatpush3.bf16.msra.mxu1 %v5147_v6  ;;  %v5690_v5 = vld [vmem:[%s5402_s5 + $0x2a] sm:$0xff]  ;;  %v5170_v6 = vld [vmem:[%s6426_s2 + $0x318] sm:$0xff]  }
  0x51   : > { %4496 = vmatpush3.bf16.msra.mxu0 %v5148_v7  ;;  %4173 = vmatprep.subr.bf16.mxu1 %v5283_v1  ;;  %v614_v7 = vpack.c.bf16 %v5679_v2, %v5676_v0 }
  0x52   : > { %4155 = vmatprep.mubr.msk.bf16.mxu1 %vm5284_vm0, %v5283_v1  ;;  %4479 = vmatprep.mubr.msk.bf16.mxu0 %vm5284_vm0, %v5283_v1 }
  0x53   : > { %4497 = vmatprep.subr.bf16.mxu0 %v5283_v1 }
  0x54   : > { %4174 = vmatpush3.bf16.msra.mxu1 %v5149_v8  ;;  %v2081_v8 = vpack.c.bf16 %v5690_v5, %v5687_v4 }
  0x55   : > { %4498 = vmatpush3.bf16.msra.mxu0 %v5150_v13  ;;  %4175 = vmatprep.subr.bf16.mxu1 %v5283_v1  ;;  %v5718_v13 = vld [vmem:[%s5402_s5 + $0x32] sm:$0xff] }
  0x56   : > { %4499 = vmatprep.subr.bf16.mxu0 %v5283_v1 }
  0x57   : > { %4156 = vmatmul.mubr.bf16.gmra.mrb[4].mxu1 %v450_v14  ;;  %v5173_v14 = vld [vmem:[%s6426_s2 + $0xe8] sm:$0xff]  }
  0x58   : > { %4480 = vmatmul.mubr.bf16.gmra.mrb[4].mxu0 %v1917_v15  ;;  %4176 = vmatpush3.bf16.msra.mxu1 %v5151_v16  ;;  %v5728_v15 = vld [vmem:[%s5402_s5 + $0x3a] sm:$0xff]  ;;  %v5174_v16 = vld [vmem:[%s6426_s2 + $0x328] sm:$0xff]  }
  0x59   : > { %4500 = vmatpush3.bf16.msra.mxu0 %v5152_v17  ;;  %4159 = vmatprep.mubr.msk.bf16.mxu1 %vm5284_vm0, %v5283_v1  ;;  %v615_v17 = vpack.c.bf16 %v5715_v12, %v5712_v11  ;;  %v2082_v18 = vpack.c.bf16 %v5728_v15, %v5718_v13  ;;  %v932_v12 = vld [vmem:[%s5397_s28 + $0x2b] sm:$0xff] }
  0x5a   : > { %4177 = vmatprep.subr.bf16.mxu1 %v5283_v1  ;;  %4483 = vmatprep.mubr.msk.bf16.mxu0 %vm5284_vm0, %v5283_v1 }
  0x5b   : > { %4501 = vmatprep.subr.bf16.mxu0 %v5283_v1 }
  0x5c   : > { %4178 = vmatpush3.bf16.msra.mxu1 %v5153_v20  ;;  %v5176_v20 = vld [vmem:[%s6426_s2 + $0x330] sm:$0xff]  }
  0x5d   : > { %4502 = vmatpush3.bf16.msra.mxu0 %v5154_v23  ;;  %4179 = vmatprep.subr.bf16.mxu1 %v5283_v1  ;;  %v5756_v23 = vld [vmem:[%s5402_s5 + $0x42] sm:$0xff] }
  0x5e   : > { %4503 = vmatprep.subr.bf16.mxu0 %v5283_v1  ;;  %v2245_v48 = vpack.c.bf16 %v5756_v23, %v5728_v15  ;;  %v2399_v15 = vld [vmem:[%s5402_s5 + $0x2b] sm:$0xff] }
  0x5f   : > { %4160 = vmatmul.mubr.bf16.gmra.mrb[8].mxu1 %v451_v24  ;;  %v5759_v24 = vld [vmem:[%s5402_s5 + $0x4a] sm:$0xff] }
  0x60   : > { %4484 = vmatmul.mubr.bf16.gmra.mrb[8].mxu0 %v1918_v25  ;;  %4180 = vmatpush3.bf16.msra.mxu1 %v5155_v26  ;;  %v5177_v25 = vld [vmem:[%s6426_s2 + $0xf8] sm:$0xff]   ;;  %v2083_v28 = vpack.c.bf16 %v5759_v24, %v5756_v23  ;;  %v935_v23 = vld [vmem:[%s5397_s28 + $0x43] sm:$0xff] }
  0x61   : > { %4163 = vmatprep.mubr.msk.bf16.mxu1 %vm5284_vm0, %v5283_v1  ;;  %4487 = vmatprep.mubr.msk.bf16.mxu0 %vm5284_vm0, %v5283_v1  ;;  %v5178_v26 = vld [vmem:[%s6426_s2 + $0x338] sm:$0xff]  }
  0x62   : > { %4504 = vmatpush3.bf16.msra.mxu0 %v5156_v27  ;;  %4181 = vmatprep.subr.bf16.mxu1 %v5283_v1  ;;  %v616_v27 = vpack.c.bf16 %v5750_v22, %v5747_v21  ;;  %v5204_v21 = vld [vmem:[%s6426_s2 + $0x3a0] sm:$0xff]  }
  0x63   : > { %4505 = vmatprep.subr.bf16.mxu0 %v5283_v1 }
  0x64   : > { %4182 = vmatpush3.bf16.msra.mxu1 %v5157_v31  ;;  %v5180_v31 = vld [vmem:[%s6426_s2 + $0x340] sm:$0xff]  }
  0x65   : > { %4183 = vmatprep.subr.bf16.mxu1 %v5283_v1 }
  0x66   : > { %4506 = vmatpush3.bf16.msra.mxu0 %v5158_v33  ;;  %v5181_v33 = vld [vmem:[%s6426_s2 + $0x108] sm:$0xff]  }
  0x67   : > { %4164 = vmatmul.mubr.bf16.gmra.mrb[12].mxu1 %v452_v34  ;;  %4507 = vmatprep.subr.bf16.mxu0 %v5283_v1  ;;  %v5182_v34 = vld [vmem:[%s6426_s2 + $0x348] sm:$0xff]  }
  0x68   : > { %4488 = vmatmul.mubr.bf16.gmra.mrb[12].mxu0 %v1919_v35  ;;  %4167 = vmatprep.mubr.msk.bf16.mxu1 %vm5284_vm0, %v5283_v1  ;;  %v5183_v35 = vld [vmem:[%s6426_s2 + $0x110] sm:$0xff]  }
  0x69   : > { %4184 = vmatpush3.bf16.msra.mxu1 %v5159_v36  ;;  %4491 = vmatprep.mubr.msk.bf16.mxu0 %vm5284_vm0, %v5283_v1  ;;  %v776_v36 = vpack.c.bf16 %v5676_v0, %v5646_v56  ;;  %v5196_v0 = vld [vmem:[%s6426_s2 + $0x380] sm:$0xff]  }
  0x6a   : > { %4508 = vmatpush3.bf16.msra.mxu0 %v5160_v38  ;;  %4185 = vmatprep.subr.bf16.mxu1 %v5283_v1  ;;  %v2243_v38 = vpack.c.bf16 %v5687_v4, %v5653_v58  ;;  %v929_v58 = vld [vmem:[%s5397_s28 + $0x13] sm:$0xff]  ;;  %v931_v4 = vld [vmem:[%s5397_s28 + $0x23] sm:$0xff] }
  0x6b   : > { %4509 = vmatprep.subr.bf16.mxu0 %v5283_v1 }
  0x6d   : > { %4186 = vmatpush3.bf16.msra.mxu1 %v5161_v42  ;;  %v777_v42 = vpack.c.bf16 %v5712_v11, %v5679_v2  ;;  %v5197_v2 = vld [vmem:[%s6426_s2 + $0x148] sm:$0xff]   ;;  %v5200_v11 = vld [vmem:[%s6426_s2 + $0x390] sm:$0xff]  }
  0x6e   : > { %4510 = vmatpush3.bf16.msra.mxu0 %v5162_v43  ;;  %4207 = vmatprep.subr.bf16.mxu1 %v5283_v1  ;;  %v2244_v43 = vpack.c.bf16 %v5718_v13, %v5690_v5  ;;  %v2397_v5 = vld [vmem:[%s5402_s5 + $0x1b] sm:$0xff]  ;;  %v933_v13 = vld [vmem:[%s5397_s28 + $0x33] sm:$0xff] }
  0x6f   : > { %4168 = vmatmul.mubr.bf16.gmra.mrb[16].mxu1 %v453_v44  ;;  %4531 = vmatprep.subr.bf16.mxu0 %v5283_v1  ;;  %v5188_v44 = vld [vmem:[%s6426_s2 + $0x360] sm:$0xff]  }
  0x70   : > { %4492 = vmatmul.mubr.bf16.gmra.mrb[16].mxu0 %v1920_v45  ;;  %4187 = vmatprep.mubr.msk.bf16.mxu1 %vm5284_vm0, %v5283_v1  ;;  %v5189_v45 = vld [vmem:[%s6426_s2 + $0x128] sm:$0xff]  }
  0x71   : > { %4511 = vmatprep.mubr.msk.bf16.mxu0 %vm5284_vm0, %v5283_v1 }
  0x77   : > { %4188 = vmatmul.mubr.bf16.vlgmr.msra.gmra.mrb[0].mxu1 %v612_v50  ;;  %v5192_v50 = vld [vmem:[%s6426_s2 + $0x370] sm:$0xff]  }
  0x78   : > { %4512 = vmatmul.mubr.bf16.vlgmr.msra.gmra.mrb[0].mxu0 %v2079_v51  ;;  %4208 = vmatpush3.bf16.msra.mxu1 %v5163_v52  ;;  %v774_v51 = vld [vmem:[%s5397_s28 + $0x52] sm:$0xff] }
  0x79   : > { %4532 = vmatpush3.bf16.msra.mxu0 %v5164_v53  ;;  %4209 = vmatprep.subr.bf16.mxu1 %v5283_v1  ;;  %v2241_v52 = vld [vmem:[%s5402_s5 + $0x52] sm:$0xff]  ;;  %v779_v55 = vpack.c.bf16 %v774_v51, %v5750_v22  ;;  %v934_v22 = vld [vmem:[%s5397_s28 + $0x3b] sm:$0xff] }
  0x7a   : > { %4191 = vmatprep.mubr.msk.bf16.mxu1 %vm5284_vm0, %v5283_v1  ;;  %4515 = vmatprep.mubr.msk.bf16.mxu0 %vm5284_vm0, %v5283_v1  ;;  %v5193_v53 = vld [vmem:[%s6426_s2 + $0x138] sm:$0xff]   ;;  %v2246_v56 = vpack.c.bf16 %v2241_v52, %v5759_v24  ;;  %v5205_v24 = vld [vmem:[%s6426_s2 + $0x168] sm:$0xff]  }
  0x7b   : > { %4533 = vmatprep.subr.bf16.mxu0 %v5283_v1  ;;  %v6016_v51 = vld [vmem:[%s5402_s5 + $0x1c] sm:$0xff]  ;;  %v6019_v52 = vld [vmem:[%s5402_s5 + $0x24] sm:$0xff] }
  0x7c   : > { %4210 = vmatpush3.bf16.msra.mxu1 %v5165_v54  ;;  %v5194_v54 = vld [vmem:[%s6426_s2 + $0x378] sm:$0xff]  }
  0x7d   : > { %4534 = vmatpush3.bf16.msra.mxu0 %v5166_v59  ;;  %4211 = vmatprep.subr.bf16.mxu1 %v5283_v1  ;;  %v2395_v59 = vld [vmem:[%s5402_s5 + $0xb] sm:$0xff] }
  0x7e   : > { %4535 = vmatprep.subr.bf16.mxu0 %v5283_v1 }
  0x7f   : > { %4192 = vmatmul.mubr.bf16.gmra.mrb[4].mxu1 %v613_v60  ;;  %v2396_v60 = vld [vmem:[%s5402_s5 + $0x13] sm:$0xff] }
  0x80   : > { %4516 = vmatmul.mubr.bf16.gmra.mrb[4].mxu0 %v2080_v61  ;;  %4212 = vmatpush3.bf16.msra.mxu1 %v5167_v62  ;;  %v938_v61 = vpack.c.bf16 %v929_v58, %v928_v57  ;;  %v2405_v62 = vpack.c.bf16 %v2396_v60, %v2395_v59  ;;  %v5216_v57 = vld [vmem:[%s6426_s2 + $0x3d0] sm:$0xff]   ;;  %v5217_v60 = vld [vmem:[%s6426_s2 + $0x198] sm:$0xff]  }
  0x81   : > { %4536 = vmatpush3.bf16.msra.mxu0 %v5168_v63  ;;  %4195 = vmatprep.mubr.msk.bf16.mxu1 %vm5284_vm0, %v5283_v1  ;;  %v5195_v63 = vld [vmem:[%s6426_s2 + $0x140] sm:$0xff]   ;;  %v6042_v58 = vld [vmem:[%s5397_s28 + $0x2c] sm:$0xff]  ;;  %v6045_v59 = vld [vmem:[%s5397_s28 + $0x34] sm:$0xff] }
  0x82   : > { %4213 = vmatprep.subr.bf16.mxu1 %v5283_v1  ;;  %4519 = vmatprep.mubr.msk.bf16.mxu0 %vm5284_vm0, %v5283_v1 }
  0x83   : > { %4537 = vmatprep.subr.bf16.mxu0 %v5283_v1 }
  0x84   : > { %4214 = vmatpush3.bf16.msra.mxu1 %v5169_v3  ;;  %v930_v3 = vld [vmem:[%s5397_s28 + $0x1b] sm:$0xff] }
  0x85   : > { %4538 = vmatpush3.bf16.msra.mxu0 %v5170_v6  ;;  %4215 = vmatprep.subr.bf16.mxu1 %v5283_v1  ;;  %v2398_v6 = vld [vmem:[%s5402_s5 + $0x23] sm:$0xff] }
  0x86   : > { %4539 = vmatprep.subr.bf16.mxu0 %v5283_v1 }
  0x87   : > { %4196 = vmatmul.mubr.bf16.gmra.mrb[8].mxu1 %v614_v7  ;;  %v5198_v7 = vld [vmem:[%s6426_s2 + $0x388] sm:$0xff]  }
  0x88   : > { %4520 = vmatmul.mubr.bf16.gmra.mrb[8].mxu0 %v2081_v8  ;;  %4216 = vmatpush3.bf16.msra.mxu1 %v5171_v9  ;;  %v939_v8 = vpack.c.bf16 %v931_v4, %v930_v3  ;;  %v2406_v9 = vpack.c.bf16 %v2398_v6, %v2397_v5  ;;  %v5219_v3 = vld [vmem:[%s6426_s2 + $0x1a0] sm:$0xff]  }
  0x89   : > { %4199 = vmatprep.mubr.msk.bf16.mxu1 %vm5284_vm0, %v5283_v1  ;;  %4523 = vmatprep.mubr.msk.bf16.mxu0 %vm5284_vm0, %v5283_v1  ;;  %v5220_v4 = vld [vmem:[%s6426_s2 + $0x3e0] sm:$0xff]  }
  0x8a   : > { %4540 = vmatpush3.bf16.msra.mxu0 %v5172_v10  ;;  %4217 = vmatprep.subr.bf16.mxu1 %v5283_v1  ;;  %v5199_v10 = vld [vmem:[%s6426_s2 + $0x150] sm:$0xff]   ;;  %v6078_v5 = vld [vmem:[%s5397_s28 + $0x3c] sm:$0xff]  ;;  %v6081_v6 = vld [vmem:[%s5397_s28 + $0x44] sm:$0xff] }
  0x8b   : > { %4541 = vmatprep.subr.bf16.mxu0 %v5283_v1 }
  0x8c   : > { %4218 = vmatpush3.bf16.msra.mxu1 %v5173_v14  ;;  %v5201_v14 = vld [vmem:[%s6426_s2 + $0x158] sm:$0xff]  }
  0x8d   : > { %4219 = vmatprep.subr.bf16.mxu1 %v5283_v1 }
  0x8e   : > { %4542 = vmatpush3.bf16.msra.mxu0 %v5174_v16  ;;  %v2400_v16 = vld [vmem:[%s5402_s5 + $0x33] sm:$0xff] }
  0x8f   : > { %4200 = vmatmul.mubr.bf16.gmra.mrb[12].mxu1 %v615_v17  ;;  %4543 = vmatprep.subr.bf16.mxu0 %v5283_v1  ;;  %v5202_v17 = vld [vmem:[%s6426_s2 + $0x398] sm:$0xff]  }
  0x90   : > { %4524 = vmatmul.mubr.bf16.gmra.mrb[12].mxu0 %v2082_v18  ;;  %4203 = vmatprep.mubr.msk.bf16.mxu1 %vm5284_vm0, %v5283_v1  ;;  %v940_v18 = vpack.c.bf16 %v933_v13, %v932_v12  ;;  %v5223_v13 = vld [vmem:[%s6426_s2 + $0x1b0] sm:$0xff]  }
  0x91   : > { %4220 = vmatpush3.bf16.msra.mxu1 %v5175_v19  ;;  %4527 = vmatprep.mubr.msk.bf16.mxu0 %vm5284_vm0, %v5283_v1  ;;  %v2407_v19 = vpack.c.bf16 %v2400_v16, %v2399_v15  ;;  %v6116_v15 = vld [vmem:[%s5397_s28 + $0x4c] sm:$0xff]  ;;  %v6119_v16 = vld [vmem:[%s5397_s28 + $0x54] sm:$0xff] }
  0x92   : > { %4544 = vmatpush3.bf16.msra.mxu0 %v5176_v20  ;;  %4221 = vmatprep.subr.bf16.mxu1 %v5283_v1  ;;  %v5203_v20 = vld [vmem:[%s6426_s2 + $0x160] sm:$0xff]  }
  0x93   : > { %4545 = vmatprep.subr.bf16.mxu0 %v5283_v1 }
  0x95   : > { %4222 = vmatpush3.bf16.msra.mxu1 %v5177_v25  ;;  %v2401_v25 = vld [vmem:[%s5402_s5 + $0x3b] sm:$0xff] }
  0x96   : > { %4546 = vmatpush3.bf16.msra.mxu0 %v5178_v26  ;;  %4243 = vmatprep.subr.bf16.mxu1 %v5283_v1  ;;  %v2402_v26 = vld [vmem:[%s5402_s5 + $0x43] sm:$0xff] }
  0x97   : > { %4204 = vmatmul.mubr.bf16.gmra.mrb[16].mxu1 %v616_v27  ;;  %4567 = vmatprep.subr.bf16.mxu0 %v5283_v1  ;;  %v5206_v27 = vld [vmem:[%s6426_s2 + $0x3a8] sm:$0xff]  }
  0x98   : > { %4528 = vmatmul.mubr.bf16.gmra.mrb[16].mxu0 %v2083_v28  ;;  %4223 = vmatprep.mubr.msk.bf16.mxu1 %vm5284_vm0, %v5283_v1  ;;  %v941_v28 = vpack.c.bf16 %v935_v23, %v934_v22 }
  0x99   : > { %4547 = vmatprep.mubr.msk.bf16.mxu0 %vm5284_vm0, %v5283_v1 }
  0x9f   : > { %4224 = vmatmul.mubr.bf16.vlgmr.msra.gmra.mrb[0].mxu1 %v775_v30  ;;  %v5207_v30 = vld [vmem:[%s6426_s2 + $0x170] sm:$0xff]  }
  0xa0   : > { %4548 = vmatmul.mubr.bf16.vlgmr.msra.gmra.mrb[0].mxu0 %v2242_v32  ;;  %4244 = vmatpush3.bf16.msra.mxu1 %v5179_v29  ;;  %v2408_v29 = vpack.c.bf16 %v2402_v26, %v2401_v25  ;;  %v936_v32 = vld [vmem:[%s5397_s28 + $0x4b] sm:$0xff]  ;;  %v5227_v25 = vld [vmem:[%s6426_s2 + $0x1c0] sm:$0xff]  }
  0xa1   : > { %4568 = vmatpush3.bf16.msra.mxu0 %v5180_v31  ;;  %4245 = vmatprep.subr.bf16.mxu1 %v5283_v1  ;;  %v5208_v31 = vld [vmem:[%s6426_s2 + $0x3b0] sm:$0xff]   ;;  %v5228_v26 = vld [vmem:[%s6426_s2 + $0x400] sm:$0xff]  }
  0xa2   : > { %4227 = vmatprep.mubr.msk.bf16.mxu1 %vm5284_vm0, %v5283_v1  ;;  %4551 = vmatprep.mubr.msk.bf16.mxu0 %vm5284_vm0, %v5283_v1 }
  0xa3   : > { %4569 = vmatprep.subr.bf16.mxu0 %v5283_v1 }
  0xa4   : > { %4246 = vmatpush3.bf16.msra.mxu1 %v5181_v33  ;;  %v937_v33 = vld [vmem:[%s5397_s28 + $0x53] sm:$0xff] }
  0xa5   : > { %4570 = vmatpush3.bf16.msra.mxu0 %v5182_v34  ;;  %4247 = vmatprep.subr.bf16.mxu1 %v5283_v1  ;;  %v2403_v34 = vld [vmem:[%s5402_s5 + $0x4b] sm:$0xff] }
  0xa6   : > { %4571 = vmatprep.subr.bf16.mxu0 %v5283_v1 }
  0xa7   : > { %4228 = vmatmul.mubr.bf16.gmra.mrb[4].mxu1 %v776_v36  ;;  %v5209_v36 = vld [vmem:[%s6426_s2 + $0x178] sm:$0xff]  }
  0xa8   : > { %4552 = vmatmul.mubr.bf16.gmra.mrb[4].mxu0 %v2243_v38  ;;  %4248 = vmatpush3.bf16.msra.mxu1 %v5183_v35  ;;  %v2404_v35 = vld [vmem:[%s5402_s5 + $0x53] sm:$0xff]  ;;  %v942_v38 = vpack.c.bf16 %v937_v33, %v936_v32 }
  0xa9   : > { %4572 = vmatpush3.bf16.msra.mxu0 %v5184_v37  ;;  %4231 = vmatprep.mubr.msk.bf16.mxu1 %vm5284_vm0, %v5283_v1  ;;  %v5210_v37 = vld [vmem:[%s6426_s2 + $0x3b8] sm:$0xff]   ;;  %v5232_v32 = vld [vmem:[%s6426_s2 + $0x410] sm:$0xff]  }
  0xaa   : > { %4249 = vmatprep.subr.bf16.mxu1 %v5283_v1  ;;  %4555 = vmatprep.mubr.msk.bf16.mxu0 %vm5284_vm0, %v5283_v1  ;;  %v5233_v33 = vld [vmem:[%s6426_s2 + $0x1d8] sm:$0xff]  }
  0xab   : > { %4573 = vmatprep.subr.bf16.mxu0 %v5283_v1 }
  0xac   : > { %4250 = vmatpush3.bf16.msra.mxu1 %v5185_v39  ;;  %v2409_v39 = vpack.c.bf16 %v2404_v35, %v2403_v34  ;;  %v5234_v34 = vld [vmem:[%s6426_s2 + $0x418] sm:$0xff]   ;;  %v1266_v35 = vpack.c.bf16 %v6078_v5, %v6045_v59 }
  0xad   : > { %4574 = vmatpush3.bf16.msra.mxu0 %v5186_v40  ;;  %4251 = vmatprep.subr.bf16.mxu1 %v5283_v1  ;;  %v1091_v40 = vld [vmem:[%s5397_s28 + $0xc] sm:$0xff] }
  0xae   : > { %4575 = vmatprep.subr.bf16.mxu0 %v5283_v1 }
  0xaf   : > { %4232 = vmatmul.mubr.bf16.gmra.mrb[8].mxu1 %v777_v42  ;;  %v2558_v42 = vld [vmem:[%s5402_s5 + $0xc] sm:$0xff] }
  0xb0   : > { %4556 = vmatmul.mubr.bf16.gmra.mrb[8].mxu0 %v2244_v43  ;;  %4252 = vmatpush3.bf16.msra.mxu1 %v5187_v41  ;;  %v5989_v41 = vld [vmem:[%s5397_s28 + $0x14] sm:$0xff] }
  0xb1   : > { %4235 = vmatprep.mubr.msk.bf16.mxu1 %vm5284_vm0, %v5283_v1  ;;  %4559 = vmatprep.mubr.msk.bf16.mxu0 %vm5284_vm0, %v5283_v1  ;;  %v5995_v43 = vld [vmem:[%s5402_s5 + $0x14] sm:$0xff] }
  0xb2   : > { %4576 = vmatpush3.bf16.msra.mxu0 %v5188_v44  ;;  %4253 = vmatprep.subr.bf16.mxu1 %v5283_v1  ;;  %v1101_v44 = vpack.c.bf16 %v5989_v41, %v1091_v40  ;;  %v5238_v40 = vld [vmem:[%s6426_s2 + $0x428] sm:$0xff]  }
  0xb3   : > { %4577 = vmatprep.subr.bf16.mxu0 %v5283_v1 }
  0xb4   : > { %4254 = vmatpush3.bf16.msra.mxu1 %v5189_v45  ;;  %v2568_v45 = vpack.c.bf16 %v5995_v43, %v2558_v42 }
  0xb5   : > { %4255 = vmatprep.subr.bf16.mxu1 %v5283_v1 }
  0xb6   : > { %4578 = vmatpush3.bf16.msra.mxu0 %v5190_v46  ;;  %v5211_v46 = vld [vmem:[%s6426_s2 + $0x180] sm:$0xff]  }
  0xb7   : > { %4236 = vmatmul.mubr.bf16.gmra.mrb[12].mxu1 %v778_v47  ;;  %4579 = vmatprep.subr.bf16.mxu0 %v5283_v1  ;;  %v5212_v47 = vld [vmem:[%s6426_s2 + $0x3c0] sm:$0xff]  }
  0xb8   : > { %4560 = vmatmul.mubr.bf16.gmra.mrb[12].mxu0 %v2245_v48  ;;  %4239 = vmatprep.mubr.msk.bf16.mxu1 %vm5284_vm0, %v5283_v1  ;;  %v5213_v48 = vld [vmem:[%s6426_s2 + $0x188] sm:$0xff]  }
  0xb9   : > { %4256 = vmatpush3.bf16.msra.mxu1 %v5191_v49  ;;  %4563 = vmatprep.mubr.msk.bf16.mxu0 %vm5284_vm0, %v5283_v1  ;;  %v6009_v49 = vld [vmem:[%s5397_s28 + $0x1c] sm:$0xff] }
  0xba   : > { %4580 = vmatpush3.bf16.msra.mxu0 %v5192_v50  ;;  %4257 = vmatprep.subr.bf16.mxu1 %v5283_v1  ;;  %v6012_v50 = vld [vmem:[%s5397_s28 + $0x24] sm:$0xff]  ;;  %v1264_v23 = vpack.c.bf16 %v6009_v49, %v5989_v41  ;;  %v1267_v41 = vpack.c.bf16 %v6116_v15, %v6081_v6 }
  0xbb   : > { %4581 = vmatprep.subr.bf16.mxu0 %v5283_v1 }
  0xbd   : > { %4258 = vmatpush3.bf16.msra.mxu1 %v5193_v53  ;;  %v5214_v53 = vld [vmem:[%s6426_s2 + $0x3c8] sm:$0xff]  }
  0xbe   : > { %4582 = vmatpush3.bf16.msra.mxu0 %v5194_v54  ;;  %4279 = vmatprep.subr.bf16.mxu1 %v5283_v1  ;;  %v1102_v54 = vpack.c.bf16 %v6012_v50, %v6009_v49 }
  0xbf   : > { %4240 = vmatmul.mubr.bf16.gmra.mrb[16].mxu1 %v779_v55  ;;  %4603 = vmatprep.subr.bf16.mxu0 %v5283_v1  ;;  %v2569_v55 = vpack.c.bf16 %v6019_v52, %v6016_v51 }
  0xc0   : > { %4564 = vmatmul.mubr.bf16.gmra.mrb[16].mxu0 %v2246_v56  ;;  %4259 = vmatprep.mubr.msk.bf16.mxu1 %vm5284_vm0, %v5283_v1  ;;  %v5215_v56 = vld [vmem:[%s6426_s2 + $0x190] sm:$0xff]  }
  0xc1   : > { %4583 = vmatprep.mubr.msk.bf16.mxu0 %vm5284_vm0, %v5283_v1 }
  0xc7   : > { %4260 = vmatmul.mubr.bf16.vlgmr.msra.gmra.mrb[0].mxu1 %v938_v61  ;;  %v6053_v61 = vld [vmem:[%s5402_s5 + $0x2c] sm:$0xff] }
  0xc8   : > { %4584 = vmatmul.mubr.bf16.vlgmr.msra.gmra.mrb[0].mxu0 %v2405_v62  ;;  %4280 = vmatpush3.bf16.msra.mxu1 %v5195_v63  ;;  %v6056_v62 = vld [vmem:[%s5402_s5 + $0x34] sm:$0xff] }
  0xc9   : > { %4604 = vmatpush3.bf16.msra.mxu0 %v5196_v0  ;;  %4281 = vmatprep.subr.bf16.mxu1 %v5283_v1  ;;  %v5218_v63 = vld [vmem:[%s6426_s2 + $0x3d8] sm:$0xff]   ;;  %v1103_v0 = vpack.c.bf16 %v6045_v59, %v6042_v58  ;;  %v5245_v59 = vld [vmem:[%s6426_s2 + $0x208] sm:$0xff]  }
  0xca   : > { %4263 = vmatprep.mubr.msk.bf16.mxu1 %vm5284_vm0, %v5283_v1  ;;  %4587 = vmatprep.mubr.msk.bf16.mxu0 %vm5284_vm0, %v5283_v1 }
  0xcb   : > { %4605 = vmatprep.subr.bf16.mxu0 %v5283_v1 }
  0xcc   : > { %4282 = vmatpush3.bf16.msra.mxu1 %v5197_v2  ;;  %v2570_v2 = vpack.c.bf16 %v6056_v62, %v6053_v61 }
  0xcd   : > { %4606 = vmatpush3.bf16.msra.mxu0 %v5198_v7  ;;  %4283 = vmatprep.subr.bf16.mxu1 %v5283_v1  ;;  %v5221_v7 = vld [vmem:[%s6426_s2 + $0x1a8] sm:$0xff]  }
  0xce   : > { %4607 = vmatprep.subr.bf16.mxu0 %v5283_v1 }
  0xcf   : > { %4264 = vmatmul.mubr.bf16.gmra.mrb[4].mxu1 %v939_v8  ;;  %v6091_v8 = vld [vmem:[%s5402_s5 + $0x3c] sm:$0xff] }
  0xd0   : > { %4588 = vmatmul.mubr.bf16.gmra.mrb[4].mxu0 %v2406_v9  ;;  %4284 = vmatpush3.bf16.msra.mxu1 %v5199_v10  ;;  %v6094_v9 = vld [vmem:[%s5402_s5 + $0x44] sm:$0xff] }
  0xd1   : > { %4608 = vmatpush3.bf16.msra.mxu0 %v5200_v11  ;;  %4267 = vmatprep.mubr.msk.bf16.mxu1 %vm5284_vm0, %v5283_v1  ;;  %v5222_v10 = vld [vmem:[%s6426_s2 + $0x3e8] sm:$0xff]   ;;  %v1104_v11 = vpack.c.bf16 %v6081_v6, %v6078_v5  ;;  %v2571_v12 = vpack.c.bf16 %v6094_v9, %v6091_v8  ;;  %v5248_v5 = vld [vmem:[%s6426_s2 + $0x450] sm:$0xff]  }
  0xd2   : > { %4285 = vmatprep.subr.bf16.mxu1 %v5283_v1  ;;  %4591 = vmatprep.mubr.msk.bf16.mxu0 %vm5284_vm0, %v5283_v1  ;;  %v1421_v6 = vld [vmem:[%s5397_s28 + $0x35] sm:$0xff] }
  0xd3   : > { %4609 = vmatprep.subr.bf16.mxu0 %v5283_v1 }
  0xd4   : > { %4286 = vmatpush3.bf16.msra.mxu1 %v5201_v14  ;;  %v5224_v14 = vld [vmem:[%s6426_s2 + $0x3f0] sm:$0xff]  }
  0xd5   : > { %4610 = vmatpush3.bf16.msra.mxu0 %v5202_v17  ;;  %4287 = vmatprep.subr.bf16.mxu1 %v5283_v1  ;;  %v6124_v17 = vld [vmem:[%s5402_s5 + $0x4c] sm:$0xff] }
  0xd6   : > { %4611 = vmatprep.subr.bf16.mxu0 %v5283_v1  ;;  %v2734_v42 = vpack.c.bf16 %v6124_v17, %v6094_v9  ;;  %v2888_v9 = vld [vmem:[%s5402_s5 + $0x35] sm:$0xff] }
  0xd7   : > { %4268 = vmatmul.mubr.bf16.gmra.mrb[8].mxu1 %v940_v18  ;;  %v6127_v18 = vld [vmem:[%s5402_s5 + $0x54] sm:$0xff] }
  0xd8   : > { %4592 = vmatmul.mubr.bf16.gmra.mrb[8].mxu0 %v2407_v19  ;;  %4288 = vmatpush3.bf16.msra.mxu1 %v5203_v20  ;;  %v5225_v19 = vld [vmem:[%s6426_s2 + $0x1b8] sm:$0xff]   ;;  %v2572_v22 = vpack.c.bf16 %v6127_v18, %v6124_v17  ;;  %v1424_v17 = vld [vmem:[%s5397_s28 + $0x4d] sm:$0xff] }
  0xd9   : > { %4271 = vmatprep.mubr.msk.bf16.mxu1 %vm5284_vm0, %v5283_v1  ;;  %4595 = vmatprep.mubr.msk.bf16.mxu0 %vm5284_vm0, %v5283_v1  ;;  %v5226_v20 = vld [vmem:[%s6426_s2 + $0x3f8] sm:$0xff]  }
  0xda   : > { %4612 = vmatpush3.bf16.msra.mxu0 %v5204_v21  ;;  %4289 = vmatprep.subr.bf16.mxu1 %v5283_v1  ;;  %v1105_v21 = vpack.c.bf16 %v6119_v16, %v6116_v15  ;;  %v5252_v15 = vld [vmem:[%s6426_s2 + $0x460] sm:$0xff]  }
  0xdb   : > { %4613 = vmatprep.subr.bf16.mxu0 %v5283_v1 }
  0xdc   : > { %4290 = vmatpush3.bf16.msra.mxu1 %v5205_v24  ;;  %v2731_v24 = vpack.c.bf16 %v6016_v51, %v5995_v43  ;;  %v5239_v43 = vld [vmem:[%s6426_s2 + $0x1f0] sm:$0xff]  }
  0xdd   : > { %4291 = vmatprep.subr.bf16.mxu1 %v5283_v1  ;;  %v1417_v51 = vld [vmem:[%s5397_s28 + $0x15] sm:$0xff] }
  0xde   : > { %4614 = vmatpush3.bf16.msra.mxu0 %v5206_v27  ;;  %v5229_v27 = vld [vmem:[%s6426_s2 + $0x1c8] sm:$0xff]  }
  0xdf   : > { %4272 = vmatmul.mubr.bf16.gmra.mrb[12].mxu1 %v941_v28  ;;  %4615 = vmatprep.subr.bf16.mxu0 %v5283_v1  ;;  %v5230_v28 = vld [vmem:[%s6426_s2 + $0x408] sm:$0xff]  }
  0xe0   : > { %4596 = vmatmul.mubr.bf16.gmra.mrb[12].mxu0 %v2408_v29  ;;  %4275 = vmatprep.mubr.msk.bf16.mxu1 %vm5284_vm0, %v5283_v1  ;;  %v1265_v29 = vpack.c.bf16 %v6042_v58, %v6012_v50  ;;  %v5244_v58 = vld [vmem:[%s6426_s2 + $0x440] sm:$0xff]  }
  0xe1   : > { %4292 = vmatpush3.bf16.msra.mxu1 %v5207_v30  ;;  %4599 = vmatprep.mubr.msk.bf16.mxu0 %vm5284_vm0, %v5283_v1  ;;  %v2732_v30 = vpack.c.bf16 %v6053_v61, %v6019_v52  ;;  %v1418_v52 = vld [vmem:[%s5397_s28 + $0x1d] sm:$0xff]  ;;  %v1420_v61 = vld [vmem:[%s5397_s28 + $0x2d] sm:$0xff] }
  0xe2   : > { %4616 = vmatpush3.bf16.msra.mxu0 %v5208_v31  ;;  %4293 = vmatprep.subr.bf16.mxu1 %v5283_v1  ;;  %v5231_v31 = vld [vmem:[%s6426_s2 + $0x1d0] sm:$0xff]  }
  0xe3   : > { %4617 = vmatprep.subr.bf16.mxu0 %v5283_v1 }
  0xe5   : > { %4294 = vmatpush3.bf16.msra.mxu1 %v5209_v36  ;;  %v2733_v36 = vpack.c.bf16 %v6091_v8, %v6056_v62  ;;  %v2886_v62 = vld [vmem:[%s5402_s5 + $0x25] sm:$0xff]  ;;  %v5249_v8 = vld [vmem:[%s6426_s2 + $0x218] sm:$0xff]  }
  0xe6   : > { %4618 = vmatpush3.bf16.msra.mxu0 %v5210_v37  ;;  %4315 = vmatprep.subr.bf16.mxu1 %v5283_v1  ;;  %v5235_v37 = vld [vmem:[%s6426_s2 + $0x1e0] sm:$0xff]  }
  0xe7   : > { %4276 = vmatmul.mubr.bf16.gmra.mrb[16].mxu1 %v942_v38  ;;  %4639 = vmatprep.subr.bf16.mxu0 %v5283_v1  ;;  %v5236_v38 = vld [vmem:[%s6426_s2 + $0x420] sm:$0xff]  }
  0xe8   : > { %4600 = vmatmul.mubr.bf16.gmra.mrb[16].mxu0 %v2409_v39  ;;  %4295 = vmatprep.mubr.msk.bf16.mxu1 %vm5284_vm0, %v5283_v1  ;;  %v5237_v39 = vld [vmem:[%s6426_s2 + $0x1e8] sm:$0xff]  }
  0xe9   : > { %4619 = vmatprep.mubr.msk.bf16.mxu0 %vm5284_vm0, %v5283_v1 }
  0xef   : > { %4296 = vmatmul.mubr.bf16.vlgmr.msra.gmra.mrb[0].mxu1 %v1101_v44  ;;  %v5240_v44 = vld [vmem:[%s6426_s2 + $0x430] sm:$0xff]  }
  0xf0   : > { %4620 = vmatmul.mubr.bf16.vlgmr.msra.gmra.mrb[0].mxu0 %v2568_v45  ;;  %4316 = vmatpush3.bf16.msra.mxu1 %v5211_v46  ;;  %v1263_v45 = vld [vmem:[%s5397_s28 + $0x5c] sm:$0xff] }
  0xf1   : > { %4640 = vmatpush3.bf16.msra.mxu0 %v5212_v47  ;;  %4317 = vmatprep.subr.bf16.mxu1 %v5283_v1  ;;  %v2730_v46 = vld [vmem:[%s5402_s5 + $0x5c] sm:$0xff]  ;;  %v1268_v49 = vpack.c.bf16 %v1263_v45, %v6119_v16  ;;  %v1423_v16 = vld [vmem:[%s5397_s28 + $0x45] sm:$0xff] }
  0xf2   : > { %4299 = vmatprep.mubr.msk.bf16.mxu1 %vm5284_vm0, %v5283_v1  ;;  %4623 = vmatprep.mubr.msk.bf16.mxu0 %vm5284_vm0, %v5283_v1  ;;  %v5241_v47 = vld [vmem:[%s6426_s2 + $0x1f8] sm:$0xff]   ;;  %v2735_v50 = vpack.c.bf16 %v2730_v46, %v6127_v18  ;;  %v5253_v18 = vld [vmem:[%s6426_s2 + $0x228] sm:$0xff]  }
  0xf3   : > { %4641 = vmatprep.subr.bf16.mxu0 %v5283_v1  ;;  %v1584_v46 = vld [vmem:[%s5397_s28 + $0x36] sm:$0xff] }
  0xf4   : > { %4318 = vmatpush3.bf16.msra.mxu1 %v5213_v48  ;;  %v5242_v48 = vld [vmem:[%s6426_s2 + $0x438] sm:$0xff]  }
  0xf5   : > { %4642 = vmatpush3.bf16.msra.mxu0 %v5214_v53  ;;  %4319 = vmatprep.subr.bf16.mxu1 %v5283_v1  ;;  %v2884_v53 = vld [vmem:[%s5402_s5 + $0x15] sm:$0xff] }
  0xf6   : > { %4643 = vmatprep.subr.bf16.mxu0 %v5283_v1 }
  0xf7   : > { %4300 = vmatmul.mubr.bf16.gmra.mrb[4].mxu1 %v1102_v54  ;;  %v2885_v54 = vld [vmem:[%s5402_s5 + $0x1d] sm:$0xff] }
  0xf8   : > { %4624 = vmatmul.mubr.bf16.gmra.mrb[4].mxu0 %v2569_v55  ;;  %4320 = vmatpush3.bf16.msra.mxu1 %v5215_v56  ;;  %v1427_v55 = vpack.c.bf16 %v1418_v52, %v1417_v51  ;;  %v2894_v56 = vpack.c.bf16 %v2885_v54, %v2884_v53  ;;  %v1586_v52 = vld [vmem:[%s5397_s28 + $0x46] sm:$0xff]  ;;  %v1587_v53 = vld [vmem:[%s5397_s28 + $0x4e] sm:$0xff] }
  0xf9   : > { %4644 = vmatpush3.bf16.msra.mxu0 %v5216_v57  ;;  %4303 = vmatprep.mubr.msk.bf16.mxu1 %vm5284_vm0, %v5283_v1  ;;  %v5243_v57 = vld [vmem:[%s6426_s2 + $0x200] sm:$0xff]  }
  0xfa   : > { %4321 = vmatprep.subr.bf16.mxu1 %v5283_v1  ;;  %4627 = vmatprep.mubr.msk.bf16.mxu0 %vm5284_vm0, %v5283_v1  ;;  %v3053_v54 = vld [vmem:[%s5402_s5 + $0x46] sm:$0xff] }
  0xfb   : > { %4645 = vmatprep.subr.bf16.mxu0 %v5283_v1 }
  0xfc   : > { %4322 = vmatpush3.bf16.msra.mxu1 %v5217_v60  ;;  %v1419_v60 = vld [vmem:[%s5397_s28 + $0x25] sm:$0xff] }
  0xfd   : > { %4646 = vmatpush3.bf16.msra.mxu0 %v5218_v63  ;;  %4323 = vmatprep.subr.bf16.mxu1 %v5283_v1  ;;  %v2887_v63 = vld [vmem:[%s5402_s5 + $0x2d] sm:$0xff] }
  0xfe   : > { %4647 = vmatprep.subr.bf16.mxu0 %v5283_v1 }
  0xff   : > { %4304 = vmatmul.mubr.bf16.gmra.mrb[8].mxu1 %v1103_v0  ;;  %v5246_v0 = vld [vmem:[%s6426_s2 + $0x448] sm:$0xff]  }
 0x100   : > { %4628 = vmatmul.mubr.bf16.gmra.mrb[8].mxu0 %v2570_v2  ;;  %4324 = vmatpush3.bf16.msra.mxu1 %v5219_v3  ;;  %v1428_v2 = vpack.c.bf16 %v1420_v61, %v1419_v60  ;;  %v2895_v3 = vpack.c.bf16 %v2887_v63, %v2886_v62  ;;  %v3055_v60 = vld [vmem:[%s5402_s5 + $0x56] sm:$0xff]  ;;  %v3056_v61 = vld [vmem:[%s5402_s5 + $0x5e] sm:$0xff] }
 0x101   : > { %4307 = vmatprep.mubr.msk.bf16.mxu1 %vm5284_vm0, %v5283_v1  ;;  %4631 = vmatprep.mubr.msk.bf16.mxu0 %vm5284_vm0, %v5283_v1  ;;  %v3061_v63 = vpack.c.bf16 %v3056_v61, %v3055_v60 }
 0x102   : > { %4648 = vmatpush3.bf16.msra.mxu0 %v5220_v4  ;;  %4325 = vmatprep.subr.bf16.mxu1 %v5283_v1  ;;  %v5247_v4 = vld [vmem:[%s6426_s2 + $0x210] sm:$0xff]  }
 0x103   : > { %4649 = vmatprep.subr.bf16.mxu0 %v5283_v1 }
 0x104   : > { %4326 = vmatpush3.bf16.msra.mxu1 %v5221_v7  ;;  %v1422_v7 = vld [vmem:[%s5397_s28 + $0x3d] sm:$0xff] }
 0x105   : > { %4327 = vmatprep.subr.bf16.mxu1 %v5283_v1 }
 0x106   : > { %4650 = vmatpush3.bf16.msra.mxu0 %v5222_v10  ;;  %v2889_v10 = vld [vmem:[%s5402_s5 + $0x3d] sm:$0xff] }
 0x107   : > { %4308 = vmatmul.mubr.bf16.gmra.mrb[12].mxu1 %v1104_v11  ;;  %4651 = vmatprep.subr.bf16.mxu0 %v5283_v1  ;;  %v5250_v11 = vld [vmem:[%s6426_s2 + $0x458] sm:$0xff]  }
 0x108   : > { %4632 = vmatmul.mubr.bf16.gmra.mrb[12].mxu0 %v2571_v12  ;;  %4311 = vmatprep.mubr.msk.bf16.mxu1 %vm5284_vm0, %v5283_v1  ;;  %v1429_v12 = vpack.c.bf16 %v1422_v7, %v1421_v6 }
 0x109   : > { %4328 = vmatpush3.bf16.msra.mxu1 %v5223_v13  ;;  %4635 = vmatprep.mubr.msk.bf16.mxu0 %vm5284_vm0, %v5283_v1  ;;  %v2896_v13 = vpack.c.bf16 %v2889_v10, %v2888_v9 }
 0x10a   : > { %4652 = vmatpush3.bf16.msra.mxu0 %v5224_v14  ;;  %4329 = vmatprep.subr.bf16.mxu1 %v5283_v1  ;;  %v5251_v14 = vld [vmem:[%s6426_s2 + $0x220] sm:$0xff]  }
 0x10b   : > { %4653 = vmatprep.subr.bf16.mxu0 %v5283_v1 }
 0x10d   : > { %4330 = vmatpush3.bf16.msra.mxu1 %v5225_v19  ;;  %v2890_v19 = vld [vmem:[%s5402_s5 + $0x45] sm:$0xff] }
 0x10e   : > { %4654 = vmatpush3.bf16.msra.mxu0 %v5226_v20  ;;  %4351 = vmatprep.subr.bf16.mxu1 %v5283_v1  ;;  %v2891_v20 = vld [vmem:[%s5402_s5 + $0x4d] sm:$0xff] }
 0x10f   : > { %4312 = vmatmul.mubr.bf16.gmra.mrb[16].mxu1 %v1105_v21  ;;  %4675 = vmatprep.subr.bf16.mxu0 %v5283_v1  ;;  %v5254_v21 = vld [vmem:[%s6426_s2 + $0x468] sm:$0xff]  }
 0x110   : > { %4636 = vmatmul.mubr.bf16.gmra.mrb[16].mxu0 %v2572_v22  ;;  %4331 = vmatprep.mubr.msk.bf16.mxu1 %vm5284_vm0, %v5283_v1  ;;  %v1430_v22 = vpack.c.bf16 %v1424_v17, %v1423_v16 }
 0x111   : > { %4655 = vmatprep.mubr.msk.bf16.mxu0 %vm5284_vm0, %v5283_v1 }
 0x117   : > { %4332 = vmatmul.mubr.bf16.vlgmr.msra.gmra.mrb[0].mxu1 %v1264_v23  ;;  %v2897_v23 = vpack.c.bf16 %v2891_v20, %v2890_v19 }
 0x118   : > { %4656 = vmatmul.mubr.bf16.vlgmr.msra.gmra.mrb[0].mxu0 %v2731_v24  ;;  %4352 = vmatpush3.bf16.msra.mxu1 %v5227_v25  ;;  %v5255_v24 = vld [vmem:[%s6426_s2 + $0x230] sm:$0xff]  }
 0x119   : > { %4676 = vmatpush3.bf16.msra.mxu0 %v5228_v26  ;;  %4353 = vmatprep.subr.bf16.mxu1 %v5283_v1  ;;  %v5256_v25 = vld [vmem:[%s6426_s2 + $0x470] sm:$0xff]  }
 0x11a   : > { %4335 = vmatprep.mubr.msk.bf16.mxu1 %vm5284_vm0, %v5283_v1  ;;  %4659 = vmatprep.mubr.msk.bf16.mxu0 %vm5284_vm0, %v5283_v1  ;;  %v1425_v26 = vld [vmem:[%s5397_s28 + $0x55] sm:$0xff] }
 0x11b   : > { %4677 = vmatprep.subr.bf16.mxu0 %v5283_v1 }
 0x11c   : > { %4354 = vmatpush3.bf16.msra.mxu1 %v5229_v27  ;;  %v1426_v27 = vld [vmem:[%s5397_s28 + $0x5d] sm:$0xff] }
 0x11d   : > { %4678 = vmatpush3.bf16.msra.mxu0 %v5230_v28  ;;  %4355 = vmatprep.subr.bf16.mxu1 %v5283_v1  ;;  %v2892_v28 = vld [vmem:[%s5402_s5 + $0x55] sm:$0xff] }
 0x11e   : > { %4679 = vmatprep.subr.bf16.mxu0 %v5283_v1 }
 0x11f   : > { %4336 = vmatmul.mubr.bf16.gmra.mrb[4].mxu1 %v1265_v29  ;;  %v2893_v29 = vld [vmem:[%s5402_s5 + $0x5d] sm:$0xff] }
 0x120   : > { %4660 = vmatmul.mubr.bf16.gmra.mrb[4].mxu0 %v2732_v30  ;;  %4356 = vmatpush3.bf16.msra.mxu1 %v5231_v31  ;;  %v5257_v30 = vld [vmem:[%s6426_s2 + $0x238] sm:$0xff]  }
 0x121   : > { %4680 = vmatpush3.bf16.msra.mxu0 %v5232_v32  ;;  %4339 = vmatprep.mubr.msk.bf16.mxu1 %vm5284_vm0, %v5283_v1  ;;  %v5258_v31 = vld [vmem:[%s6426_s2 + $0x478] sm:$0xff]   ;;  %v1431_v32 = vpack.c.bf16 %v1426_v27, %v1425_v26 }
 0x122   : > { %4357 = vmatprep.subr.bf16.mxu1 %v5283_v1  ;;  %4663 = vmatprep.mubr.msk.bf16.mxu0 %vm5284_vm0, %v5283_v1 }
 0x123   : > { %4681 = vmatprep.subr.bf16.mxu0 %v5283_v1 }
 0x124   : > { %4358 = vmatpush3.bf16.msra.mxu1 %v5233_v33  ;;  %v2898_v33 = vpack.c.bf16 %v2893_v29, %v2892_v28 }
 0x125   : > { %4682 = vmatpush3.bf16.msra.mxu0 %v5234_v34  ;;  %4359 = vmatprep.subr.bf16.mxu1 %v5283_v1  ;;  %v1580_v34 = vld [vmem:[%s5397_s28 + $0x16] sm:$0xff] }
 0x126   : > { %4683 = vmatprep.subr.bf16.mxu0 %v5283_v1 }
 0x127   : > { %4340 = vmatmul.mubr.bf16.gmra.mrb[8].mxu1 %v1266_v35  ;;  %v1581_v35 = vld [vmem:[%s5397_s28 + $0x1e] sm:$0xff] }
 0x128   : > { %4664 = vmatmul.mubr.bf16.gmra.mrb[8].mxu0 %v2733_v36  ;;  %4360 = vmatpush3.bf16.msra.mxu1 %v5235_v37  ;;  %v3047_v36 = vld [vmem:[%s5402_s5 + $0x16] sm:$0xff]  ;;  %v3048_v37 = vld [vmem:[%s5402_s5 + $0x1e] sm:$0xff] }
 0x129   : > { %4343 = vmatprep.mubr.msk.bf16.mxu1 %vm5284_vm0, %v5283_v1  ;;  %4667 = vmatprep.mubr.msk.bf16.mxu0 %vm5284_vm0, %v5283_v1 }
 0x12a   : > { %4684 = vmatpush3.bf16.msra.mxu0 %v5236_v38  ;;  %4361 = vmatprep.subr.bf16.mxu1 %v5283_v1  ;;  %v1590_v38 = vpack.c.bf16 %v1581_v35, %v1580_v34 }
 0x12b   : > { %4685 = vmatprep.subr.bf16.mxu0 %v5283_v1 }
 0x12c   : > { %4362 = vmatpush3.bf16.msra.mxu1 %v5237_v39  ;;  %v3057_v39 = vpack.c.bf16 %v3048_v37, %v3047_v36 }
 0x12d   : > { %4363 = vmatprep.subr.bf16.mxu1 %v5283_v1 }
 0x12e   : > { %4686 = vmatpush3.bf16.msra.mxu0 %v5238_v40  ;;  %v1582_v40 = vld [vmem:[%s5397_s28 + $0x26] sm:$0xff] }
 0x12f   : > { %4344 = vmatmul.mubr.bf16.gmra.mrb[12].mxu1 %v1267_v41  ;;  %4687 = vmatprep.subr.bf16.mxu0 %v5283_v1  ;;  %v1583_v41 = vld [vmem:[%s5397_s28 + $0x2e] sm:$0xff] }
 0x130   : > { %4668 = vmatmul.mubr.bf16.gmra.mrb[12].mxu0 %v2734_v42  ;;  %4347 = vmatprep.mubr.msk.bf16.mxu1 %vm5284_vm0, %v5283_v1  ;;  %v3049_v42 = vld [vmem:[%s5402_s5 + $0x26] sm:$0xff] }
 0x131   : > { %4364 = vmatpush3.bf16.msra.mxu1 %v5239_v43  ;;  %4671 = vmatprep.mubr.msk.bf16.mxu0 %vm5284_vm0, %v5283_v1  ;;  %v3050_v43 = vld [vmem:[%s5402_s5 + $0x2e] sm:$0xff] }
 0x132   : > { %4688 = vmatpush3.bf16.msra.mxu0 %v5240_v44  ;;  %4365 = vmatprep.subr.bf16.mxu1 %v5283_v1  ;;  %v1591_v44 = vpack.c.bf16 %v1583_v41, %v1582_v40  ;;  %v3058_v45 = vpack.c.bf16 %v3050_v43, %v3049_v42 }
 0x133   : > { %4689 = vmatprep.subr.bf16.mxu0 %v5283_v1 }
 0x135   : > { %4366 = vmatpush3.bf16.msra.mxu1 %v5241_v47  ;;  %v1585_v47 = vld [vmem:[%s5397_s28 + $0x3e] sm:$0xff] }
 0x136   : > { %4690 = vmatpush3.bf16.msra.mxu0 %v5242_v48  ;;  %4387 = vmatprep.subr.bf16.mxu1 %v5283_v1  ;;  %v3051_v48 = vld [vmem:[%s5402_s5 + $0x36] sm:$0xff] }
 0x137   : > { %4348 = vmatmul.mubr.bf16.gmra.mrb[16].mxu1 %v1268_v49  ;;  %4711 = vmatprep.subr.bf16.mxu0 %v5283_v1  ;;  %v3052_v49 = vld [vmem:[%s5402_s5 + $0x3e] sm:$0xff] }
 0x138   : > { %4672 = vmatmul.mubr.bf16.gmra.mrb[16].mxu0 %v2735_v50  ;;  %4367 = vmatprep.mubr.msk.bf16.mxu1 %vm5284_vm0, %v5283_v1  ;;  %v1592_v50 = vpack.c.bf16 %v1585_v47, %v1584_v46  ;;  %v3059_v51 = vpack.c.bf16 %v3052_v49, %v3051_v48 }
 0x139   : > { %4691 = vmatprep.mubr.msk.bf16.mxu0 %vm5284_vm0, %v5283_v1 }
 0x13f   : > { %4368 = vmatmul.mubr.bf16.vlgmr.msra.gmra.mrb[0].mxu1 %v1427_v55  ;;  %v3054_v55 = vld [vmem:[%s5402_s5 + $0x4e] sm:$0xff] }
 0x140   : > { %4692 = vmatmul.mubr.bf16.vlgmr.msra.gmra.mrb[0].mxu0 %v2894_v56  ;;  %4388 = vmatpush3.bf16.msra.mxu1 %v5243_v57  ;;  %v1593_v56 = vpack.c.bf16 %v1587_v53, %v1586_v52  ;;  %v3060_v57 = vpack.c.bf16 %v3054_v55, %v3053_v54 }
 0x141   : > { %4712 = vmatpush3.bf16.msra.mxu0 %v5244_v58  ;;  %4389 = vmatprep.subr.bf16.mxu1 %v5283_v1  ;;  %v1588_v58 = vld [vmem:[%s5397_s28 + $0x56] sm:$0xff] }
 0x142   : > { %4371 = vmatprep.mubr.msk.bf16.mxu1 %vm5284_vm0, %v5283_v1  ;;  %4695 = vmatprep.mubr.msk.bf16.mxu0 %vm5284_vm0, %v5283_v1 }
 0x143   : > { %4713 = vmatprep.subr.bf16.mxu0 %v5283_v1 }
 0x144   : > { %4390 = vmatpush3.bf16.msra.mxu1 %v5245_v59  ;;  %v1589_v59 = vld [vmem:[%s5397_s28 + $0x5e] sm:$0xff]  ;;  %s5088_s28 = smul.u32 40, %s6434_s15 }
 0x145   : > { %4714 = vmatpush3.bf16.msra.mxu0 %v5246_v0  ;;  %4391 = vmatprep.subr.bf16.mxu1 %v5283_v1  ;;  %v1594_v62 = vpack.c.bf16 %v1589_v59, %v1588_v58  ;;  %v6392_v0 = vld [vmem:[%s6427_s3] ss:$0 sm:$0xff] }
 0x146   : > { %4715 = vmatprep.subr.bf16.mxu0 %v5283_v1  ;;  %s6400_s9 = scalar_lea.vmem %s6428_s4, %s5088_s28 }
 0x147   : > { %4372 = vmatmul.mubr.bf16.gmra.mrb[4].mxu1 %v1428_v2 }
 0x148   : > { %4696 = vmatmul.mubr.bf16.gmra.mrb[4].mxu0 %v2895_v3  ;;  %4392 = vmatpush3.bf16.msra.mxu1 %v5247_v4 }
 0x149   : > { %4716 = vmatpush3.bf16.msra.mxu0 %v5248_v5  ;;  %4375 = vmatprep.mubr.msk.bf16.mxu1 %vm5284_vm0, %v5283_v1 }
 0x14a   : > { %4393 = vmatprep.subr.bf16.mxu1 %v5283_v1  ;;  %4699 = vmatprep.mubr.msk.bf16.mxu0 %vm5284_vm0, %v5283_v1 }
 0x14b   : > { %4717 = vmatprep.subr.bf16.mxu0 %v5283_v1 }
 0x14c   : > { %4394 = vmatpush3.bf16.msra.mxu1 %v5249_v8 }
 0x14d   : > { %4718 = vmatpush3.bf16.msra.mxu0 %v5250_v11  ;;  %4395 = vmatprep.subr.bf16.mxu1 %v5283_v1 }
 0x14e   : > { %4719 = vmatprep.subr.bf16.mxu0 %v5283_v1 }
 0x14f   : > { %4376 = vmatmul.mubr.bf16.gmra.mrb[8].mxu1 %v1429_v12 }
 0x150   : > { %4700 = vmatmul.mubr.bf16.gmra.mrb[8].mxu0 %v2896_v13  ;;  %4396 = vmatpush3.bf16.msra.mxu1 %v5251_v14 }
 0x151   : > { %4379 = vmatprep.mubr.msk.bf16.mxu1 %vm5284_vm0, %v5283_v1  ;;  %4703 = vmatprep.mubr.msk.bf16.mxu0 %vm5284_vm0, %v5283_v1 }
 0x152   : > { %4720 = vmatpush3.bf16.msra.mxu0 %v5252_v15  ;;  %4397 = vmatprep.subr.bf16.mxu1 %v5283_v1 }
 0x153   : > { %4721 = vmatprep.subr.bf16.mxu0 %v5283_v1 }
 0x154   : > { %4398 = vmatpush3.bf16.msra.mxu1 %v5253_v18 }
 0x155   : > { %4399 = vmatprep.subr.bf16.mxu1 %v5283_v1 }
 0x156   : > { %4722 = vmatpush3.bf16.msra.mxu0 %v5254_v21 }
 0x157   : > { %4380 = vmatmul.mubr.bf16.gmra.mrb[12].mxu1 %v1430_v22  ;;  %4723 = vmatprep.subr.bf16.mxu0 %v5283_v1 }
 0x158   : > { %4704 = vmatmul.mubr.bf16.gmra.mrb[12].mxu0 %v2897_v23  ;;  %4383 = vmatprep.mubr.msk.bf16.mxu1 %vm5284_vm0, %v5283_v1 }
 0x159   : > { %4400 = vmatpush3.bf16.msra.mxu1 %v5255_v24  ;;  %4707 = vmatprep.mubr.msk.bf16.mxu0 %vm5284_vm0, %v5283_v1 }
 0x15a   : > { %4724 = vmatpush3.bf16.msra.mxu0 %v5256_v25  ;;  %4401 = vmatprep.subr.bf16.mxu1 %v5283_v1 }
 0x15b   : > { %4725 = vmatprep.subr.bf16.mxu0 %v5283_v1 }
 0x15d   : > { %4402 = vmatpush3.bf16.msra.mxu1 %v5257_v30 }
 0x15e   : > { %4726 = vmatpush3.bf16.msra.mxu0 %v5258_v31 }
 0x15f   : > { %4384 = vmatmul.mubr.bf16.gmra.mrb[16].mxu1 %v1431_v32 }
 0x160   : > { %4708 = vmatmul.mubr.bf16.gmra.mrb[16].mxu0 %v2898_v33  ;;  %4403 = vmatprep.mubr.msk.bf16.mxu1 %vm5284_vm0, %v5283_v1 }
 0x161   : > { %4727 = vmatprep.mubr.msk.bf16.mxu0 %vm5284_vm0, %v5283_v1 }
 0x167   : > { %4404 = vmatmul.mubr.bf16.vlgmr.msra.gmra.mrb[0].mxu1 %v1590_v38 }
 0x168   : > { %4728 = vmatmul.mubr.bf16.vlgmr.msra.gmra.mrb[0].mxu0 %v3057_v39  ;;  %4407 = vmatprep.mubr.msk.bf16.mxu1 %vm5284_vm0, %v5283_v1 }
 0x169   : > { %4731 = vmatprep.mubr.msk.bf16.mxu0 %vm5284_vm0, %v5283_v1 }
 0x16f   : > { %4408 = vmatmul.mubr.bf16.gmra.mrb[4].mxu1 %v1591_v44 }
 0x170   : > { %4732 = vmatmul.mubr.bf16.gmra.mrb[4].mxu0 %v3058_v45  ;;  %4411 = vmatprep.mubr.msk.bf16.mxu1 %vm5284_vm0, %v5283_v1 }
 0x171   : > { %4735 = vmatprep.mubr.msk.bf16.mxu0 %vm5284_vm0, %v5283_v1 }
 0x177   : > { %4412 = vmatmul.mubr.bf16.gmra.mrb[8].mxu1 %v1592_v50 }
 0x178   : > { %4736 = vmatmul.mubr.bf16.gmra.mrb[8].mxu0 %v3059_v51  ;;  %4415 = vmatprep.mubr.msk.bf16.mxu1 %vm5284_vm0, %v5283_v1 }
 0x179   : > { %4739 = vmatprep.mubr.msk.bf16.mxu0 %vm5284_vm0, %v5283_v1 }
 0x17f   : > { %4416 = vmatmul.mubr.bf16.gmra.mrb[12].mxu1 %v1593_v56 }
 0x180   : > { %4740 = vmatmul.mubr.bf16.gmra.mrb[12].mxu0 %v3060_v57  ;;  %4419 = vmatprep.mubr.msk.bf16.mxu1 %vm5284_vm0, %v5283_v1 }
 0x181   : > { %4743 = vmatprep.mubr.msk.bf16.mxu0 %vm5284_vm0, %v5283_v1 }
 0x187   : > { %4420 = vmatmul.mubr.bf16.gmra.mrb[16].mxu1 %v1594_v62 }
 0x188   : > { %4744 = vmatmul.mubr.bf16.gmra.mrb[16].mxu0 %v3061_v63 }
 0x23a   : > { %v1694_v2 = vpop.f32.mrb[0].mxu1 }
 0x23b   : > { %v4747_v3 = vadd.f32 %v6392_v0, %v1694_v2  ;;  %v3161_v4 = vpop.f32.mrb[0].mxu0  ;;  %v4405_v5 = vpop.f32.mrb[1].mxu1 }
 0x23c   : > { %v4729_v6 = vpop.f32.mrb[1].mxu0  ;;  %v1697_v7 = vpop.f32.mrb[2].mxu1 }
 0x23d   : > { %v4748_v1 = vadd.f32 %v4747_v3, %v3161_v4  ;;  %v4749_v8 = vadd.f32 %v6392_v0, %v1697_v7  ;;  %v3164_v9 = vpop.f32.mrb[2].mxu0  ;;  %v4406_v10 = vpop.f32.mrb[3].mxu1 }
 0x23e   : > { %v4730_v11 = vpop.f32.mrb[3].mxu0 }
 0x23f   : > { %v4750_v12 = vadd.f32 %v4749_v8, %v3164_v9  ;;  %v3210_v13 = vmax.f32 %v4748_v1, 0.0 }
 0x241   : > { %v3211_v14 = vmax.f32 %v4750_v12, 0.0 }
 0x242   : > { %v1702_v15 = vpop.f32.mrb[4].mxu1 }
 0x243   : > { %v3839_v16 = vpack.c.bf16 %v3211_v14, %v3210_v13  ;;  %v4751_v17 = vadd.f32 %v6392_v0, %v1702_v15  ;;  %v3169_v18 = vpop.f32.mrb[4].mxu0  ;;  %v4409_v19 = vpop.f32.mrb[5].mxu1 }
 0x244   : > { %v4733_v20 = vpop.f32.mrb[5].mxu0  ;;  %v1705_v21 = vpop.f32.mrb[6].mxu1 }
 0x245   : > { %3840 = vst [vmem:[%s6400_s9] sm:$0xff] %v3839_v16   ;;  %v4752_v22 = vadd.f32 %v4751_v17, %v3169_v18  ;;  %v4753_v23 = vadd.f32 %v6392_v0, %v1705_v21  ;;  %v3172_v24 = vpop.f32.mrb[6].mxu0  ;;  %v4410_v25 = vpop.f32.mrb[7].mxu1 }
 0x246   : > { %v4734_v26 = vpop.f32.mrb[7].mxu0 }
 0x247   : > { %v4754_v27 = vadd.f32 %v4753_v23, %v3172_v24  ;;  %v3212_v28 = vmax.f32 %v4752_v22, 0.0 }
 0x249   : > { %v3213_v29 = vmax.f32 %v4754_v27, 0.0 }
 0x24a   : > { %v1710_v30 = vpop.f32.mrb[8].mxu1 }
 0x24b   : > { %v3844_v31 = vpack.c.bf16 %v3213_v29, %v3212_v28  ;;  %v4755_v32 = vadd.f32 %v6392_v0, %v1710_v30  ;;  %v3177_v33 = vpop.f32.mrb[8].mxu0  ;;  %v4413_v34 = vpop.f32.mrb[9].mxu1 }
 0x24c   : > { %v4737_v35 = vpop.f32.mrb[9].mxu0  ;;  %v1713_v36 = vpop.f32.mrb[10].mxu1 }
 0x24d   : > { %3861 = vst [vmem:[%s6400_s9 + $0x8] sm:$0xff] %v3844_v31   ;;  %v4756_v37 = vadd.f32 %v4755_v32, %v3177_v33  ;;  %v4757_v38 = vadd.f32 %v6392_v0, %v1713_v36  ;;  %v3180_v39 = vpop.f32.mrb[10].mxu0  ;;  %v4414_v40 = vpop.f32.mrb[11].mxu1 }
 0x24e   : > { %v4738_v41 = vpop.f32.mrb[11].mxu0 }
 0x24f   : > { %v4758_v42 = vadd.f32 %v4757_v38, %v3180_v39  ;;  %v3214_v43 = vmax.f32 %v4756_v37, 0.0 }
 0x251   : > { %v3215_v44 = vmax.f32 %v4758_v42, 0.0 }
 0x252   : > { %v1718_v45 = vpop.f32.mrb[12].mxu1 }
 0x253   : > { %v3849_v46 = vpack.c.bf16 %v3215_v44, %v3214_v43  ;;  %v4759_v47 = vadd.f32 %v6392_v0, %v1718_v45  ;;  %v3185_v48 = vpop.f32.mrb[12].mxu0  ;;  %v4417_v49 = vpop.f32.mrb[13].mxu1 }
 0x254   : > { %v4741_v50 = vpop.f32.mrb[13].mxu0  ;;  %v1721_v51 = vpop.f32.mrb[14].mxu1 }
 0x255   : > { %3862 = vst [vmem:[%s6400_s9 + $0x10] sm:$0xff] %v3849_v46   ;;  %v4760_v52 = vadd.f32 %v4759_v47, %v3185_v48  ;;  %v4761_v53 = vadd.f32 %v6392_v0, %v1721_v51  ;;  %v3188_v54 = vpop.f32.mrb[14].mxu0  ;;  %v4418_v55 = vpop.f32.mrb[15].mxu1 }
 0x256   : > { %v4742_v56 = vpop.f32.mrb[15].mxu0 }
 0x257   : > { %v4762_v57 = vadd.f32 %v4761_v53, %v3188_v54  ;;  %v3216_v58 = vmax.f32 %v4760_v52, 0.0 }
 0x259   : > { %v3217_v59 = vmax.f32 %v4762_v57, 0.0 }
 0x25a   : > { %v1726_v60 = vpop.f32.mrb[16].mxu1 }
 0x25b   : > { %v3854_v61 = vpack.c.bf16 %v3217_v59, %v3216_v58  ;;  %v4763_v62 = vadd.f32 %v6392_v0, %v1726_v60  ;;  %v3193_v63 = vpop.f32.mrb[16].mxu0  ;;  %v4421_v2 = vpop.f32.mrb[17].mxu1 }
 0x25c   : > { %v4745_v3 = vpop.f32.mrb[17].mxu0  ;;  %v1729_v4 = vpop.f32.mrb[18].mxu1 }
 0x25d   : > { %3863 = vst [vmem:[%s6400_s9 + $0x18] sm:$0xff] %v3854_v61   ;;  %v4764_v5 = vadd.f32 %v4763_v62, %v3193_v63  ;;  %v4765_v6 = vadd.f32 %v6392_v0, %v1729_v4  ;;  %v3196_v7 = vpop.f32.mrb[18].mxu0  ;;  %v4422_v1 = vpop.f32.mrb[19].mxu1 }
 0x25e   : > { %v4746_v8 = vpop.f32.mrb[19].mxu0 }
 0x25f   : > { %v4766_v9 = vadd.f32 %v4765_v6, %v3196_v7  ;;  %v3218_v10 = vmax.f32 %v4764_v5, 0.0 }
 0x261   : > { %v3219_v11 = vmax.f32 %v4766_v9, 0.0 }
 0x263   : > { %v3859_v12 = vpack.c.bf16 %v3219_v11, %v3218_v10 }
 0x265   : > { %3864 = vst [vmem:[%s6400_s9 + $0x20] sm:$0xff] %v3859_v12  }
 0x266 PF: > { %s14_s17 = sadd.s32 1, %s5281_s17   ;;  %s6429_s15 = smov %s5277_s16 }
 0x267   : > { %p11_p5 = scmp.ge.s32.totalorder %s14_s17, 4   ;;  %s6430_s16 = smov %s6432_s18 }
 0x269   :  { %13 = sbr.rel (!%p11_p5) target bundleno = 2 (0x2), region = 92 }

// kernel: unet_mmd_forward.27
= control target key start
LH: loop header
LB: loop body
LE: loop exit
PB: predicated region body
PF: predicated region fallthrough
CT: control target
= control target key end

     0   :  { %s9464_s15 = smov 0   ;;  %s9466_s16 = smov 0   ;;  %s10825_s0 = inlined_call_operand.vmem [shape: f32[2,328,128], index: 0, kind: input, shape index: {}]   ;;  %s10826_s1 = inlined_call_operand.vmem [shape: f32[2,328,128], index: 1, kind: input, shape index: {}]   ;;  %s10827_s2 = inlined_call_operand.vmem [shape: bf16[18,128,128], index: 2, kind: input, shape index: {}]   ;;  %s10828_s3 = inlined_call_operand.vmem [shape: f32[1,128], index: 3, kind: input, shape index: {}]   ;;  %s10829_s4 = inlined_call_operand.vmem [shape: bf16[2,288,128], index: 4, kind: output, shape index: {}]  }
   0x1   :  { %s9468_s17 = smov 0  }
   0x2 LB: > { %s26_s18 = sadd.s32 1, %s9433_s16  ;;  %p6591_p0 = scmp.ge.s32.totalorder %s9437_s17, 1  ;;  %s9437_s17 = sphi %s9468_s17, %s14_s17   ;;  %s9433_s16 = sphi %s9466_s16, %s10831_s16   ;;  %s9429_s15 = sphi %s9464_s15, %s10830_s15  }
   0x3   : > { %p28_p1 = scmp.ge.s32.totalorder %s26_s18, 2  ;;  %p203_p2 = scmp.lt.s32.totalorder %s9437_s17, 3 }
   0x5   : > { %s10833_s18 = smov (%p28_p1, %s26_s18), 0  ;;  %p204_p3 = pnand %p6591_p0, %p203_p2 }
   0x6   : > { %v9271_v0 = vld [vmem:[%s10827_s2] sm:$0xff] (!%p204_p3)   ;;  %p244_p4 = scmp.lt.s32.totalorder (!%p204_p3), %s9429_s15, 1  ;;  %v9273_v2 = vld [vmem:[%s10827_s2 + $0x8] sm:$0xff] (!%p204_p3)   ;;  %v9275_v4 = vld [vmem:[%s10827_s2 + $0x10] sm:$0xff] (!%p204_p3)  }
   0x7   : > { %207 = sbr.rel (%p204_p3) target bundleno = 903 (0x387), region = 36  ;;  %v9272_v1 = vld [vmem:[%s10827_s2 + $0x240] sm:$0xff] (!%p204_p3)   ;;  %7661 = vmatprep.subr.bf16.mxu1 (!%p204_p3), %v9271_v0  ;;  %v9274_v3 = vld [vmem:[%s10827_s2 + $0x248] sm:$0xff] (!%p204_p3)   ;;  %v9276_v5 = vld [vmem:[%s10827_s2 + $0x250] sm:$0xff] (!%p204_p3)  }
   0x8   : > { %8129 = vmatprep.subr.bf16.mxu0 (!%p204_p3), %v9272_v1  ;;  %7662 = vmatpush3.bf16.msra.mxu1 (!%p204_p3), %v9271_v0  ;;  %v9277_v6 = vld [vmem:[%s10827_s2 + $0x18] sm:$0xff] (!%p204_p3)   ;;  %v9279_v8 = vld [vmem:[%s10827_s2 + $0x20] sm:$0xff] (!%p204_p3)   ;;  %v9281_v10 = vld [vmem:[%s10827_s2 + $0x28] sm:$0xff] (!%p204_p3)  }
   0x9   : > { %8130 = vmatpush3.bf16.msra.mxu0 (!%p204_p3), %v9272_v1  ;;  %7663 = vmatprep.subr.bf16.mxu1 (!%p204_p3), %v9273_v2  ;;  %v9278_v7 = vld [vmem:[%s10827_s2 + $0x258] sm:$0xff] (!%p204_p3)   ;;  %v9280_v9 = vld [vmem:[%s10827_s2 + $0x260] sm:$0xff] (!%p204_p3)   ;;  %v9282_v14 = vld [vmem:[%s10827_s2 + $0x268] sm:$0xff] (!%p204_p3)  }
   0xa   : > { %8131 = vmatprep.subr.bf16.mxu0 (!%p204_p3), %v9274_v3  ;;  %v9283_v18 = vld [vmem:[%s10827_s2 + $0x30] sm:$0xff] (!%p204_p3)   ;;  %v9285_v20 = vld [vmem:[%s10827_s2 + $0x38] sm:$0xff] (!%p204_p3)   ;;  %v9287_v24 = vld [vmem:[%s10827_s2 + $0x40] sm:$0xff] (!%p204_p3)  }
   0xb   : > { %v9284_v19 = vld [vmem:[%s10827_s2 + $0x270] sm:$0xff] (!%p204_p3)   ;;  %v9286_v21 = vld [vmem:[%s10827_s2 + $0x278] sm:$0xff] (!%p204_p3)   ;;  %v9288_v27 = vld [vmem:[%s10827_s2 + $0x280] sm:$0xff] (!%p204_p3)  }
   0xc   : > { %7664 = vmatpush3.bf16.msra.mxu1 (!%p204_p3), %v9273_v2  ;;  %v9289_v38 = vld [vmem:[%s10827_s2 + $0x48] sm:$0xff] (!%p204_p3)   ;;  %v9291_v46 = vld [vmem:[%s10827_s2 + $0x50] sm:$0xff] (!%p204_p3)   ;;  %v9293_v54 = vld [vmem:[%s10827_s2 + $0x58] sm:$0xff] (!%p204_p3)  }
   0xd   : > { %8132 = vmatpush3.bf16.msra.mxu0 (!%p204_p3), %v9274_v3  ;;  %7665 = vmatprep.subr.bf16.mxu1 (!%p204_p3), %v9275_v4  ;;  %v9290_v40 = vld [vmem:[%s10827_s2 + $0x288] sm:$0xff] (!%p204_p3)   ;;  %v9292_v47 = vld [vmem:[%s10827_s2 + $0x290] sm:$0xff] (!%p204_p3)   ;;  %v9294_v55 = vld [vmem:[%s10827_s2 + $0x298] sm:$0xff] (!%p204_p3)  }
   0xe   : > { %s10835_s15 = smov (!%p244_p4, %s9429_s15), 1  ;;  %8133 = vmatprep.subr.bf16.mxu0 %v9276_v5  ;;  %v9295_v62 = vld [vmem:[%s10827_s2 + $0x60] sm:$0xff]  }
   0xf   : > { %s9245_s9 = smul.u32 328, %s10835_s15  ;;  %v9296_v0 = vld [vmem:[%s10827_s2 + $0x2a0] sm:$0xff]  }
  0x10   : > { %7666 = vmatpush3.bf16.msra.mxu1 %v9275_v4 }
  0x11   : > { %8134 = vmatpush3.bf16.msra.mxu0 %v9276_v5  ;;  %7667 = vmatprep.subr.bf16.mxu1 %v9277_v6  ;;  %s9518_s20 = scalar_lea.vmem %s10825_s0, %s9245_s9  ;;  %s9523_s23 = scalar_lea.vmem %s10826_s1, %s9245_s9 }
  0x12   : > { %8135 = vmatprep.subr.bf16.mxu0 %v9278_v7  ;;  %v277_v11 = vld [vmem:[%s9518_s20] sm:$0xff]  ;;  %v278_v12 = vld [vmem:[%s9518_s20 + $0x8] sm:$0xff]  ;;  %v279_v22 = vld [vmem:[%s9518_s20 + $0x10] sm:$0xff] }
  0x13   : > { %v3264_v13 = vld [vmem:[%s9523_s23] sm:$0xff]  ;;  %v313_v15 = vpack.c.bf16 %v278_v12, %v277_v11  ;;  %v3265_v16 = vld [vmem:[%s9523_s23 + $0x8] sm:$0xff]  ;;  %v280_v23 = vld [vmem:[%s9518_s20 + $0x18] sm:$0xff] }
  0x14   : > { %7668 = vmatpush3.bf16.msra.mxu1 %v9277_v6  ;;  %v3300_v17 = vpack.c.bf16 %v3265_v16, %v3264_v13  ;;  %v3266_v25 = vld [vmem:[%s9523_s23 + $0x10] sm:$0xff]  ;;  %v3267_v26 = vld [vmem:[%s9523_s23 + $0x18] sm:$0xff]  ;;  %v281_v28 = vld [vmem:[%s9518_s20 + $0x20] sm:$0xff]  ;;  %v314_v30 = vpack.c.bf16 %v280_v23, %v279_v22 }
  0x15   : > { %8136 = vmatpush3.bf16.msra.mxu0 %v9278_v7  ;;  %7669 = vmatprep.subr.bf16.mxu1 %v9279_v8  ;;  %v282_v29 = vld [vmem:[%s9518_s20 + $0x28] sm:$0xff]  ;;  %v3268_v31 = vld [vmem:[%s9523_s23 + $0x20] sm:$0xff]  ;;  %v3301_v33 = vpack.c.bf16 %v3267_v26, %v3266_v25  ;;  %v283_v36 = vld [vmem:[%s9518_s20 + $0x30] sm:$0xff] }
  0x16   : > { %8137 = vmatprep.subr.bf16.mxu0 %v9280_v9  ;;  %7677 = vmatprep.mubr.bf16.mxu1 %v313_v15  ;;  %v3269_v32 = vld [vmem:[%s9523_s23 + $0x28] sm:$0xff]  ;;  %v315_v34 = vpack.c.bf16 %v282_v29, %v281_v28  ;;  %v284_v37 = vld [vmem:[%s9518_s20 + $0x38] sm:$0xff]  ;;  %v3270_v39 = vld [vmem:[%s9523_s23 + $0x30] sm:$0xff] }
  0x17   : > { %8145 = vmatprep.mubr.bf16.mxu0 %v3300_v17  ;;  %v3302_v35 = vpack.c.bf16 %v3269_v32, %v3268_v31  ;;  %v3271_v41 = vld [vmem:[%s9523_s23 + $0x38] sm:$0xff]  ;;  %v285_v42 = vld [vmem:[%s9518_s20 + $0x40] sm:$0xff]  ;;  %v286_v43 = vld [vmem:[%s9518_s20 + $0x48] sm:$0xff]  ;;  %v316_v48 = vpack.c.bf16 %v284_v37, %v283_v36 }
  0x18   : > { %7670 = vmatpush3.bf16.msra.mxu1 %v9279_v8  ;;  %v3272_v44 = vld [vmem:[%s9523_s23 + $0x40] sm:$0xff]  ;;  %v3273_v45 = vld [vmem:[%s9523_s23 + $0x48] sm:$0xff]  ;;  %v3303_v49 = vpack.c.bf16 %v3271_v41, %v3270_v39  ;;  %v317_v50 = vpack.c.bf16 %v286_v43, %v285_v42  ;;  %v287_v52 = vld [vmem:[%s9518_s20 + $0x50] sm:$0xff] }
  0x19   : > { %8138 = vmatpush3.bf16.msra.mxu0 %v9280_v9  ;;  %7671 = vmatprep.subr.bf16.mxu1 %v9281_v10  ;;  %v3304_v51 = vpack.c.bf16 %v3273_v45, %v3272_v44  ;;  %v288_v53 = vld [vmem:[%s9518_s20 + $0x58] sm:$0xff]  ;;  %v3274_v56 = vld [vmem:[%s9523_s23 + $0x50] sm:$0xff]  ;;  %v289_v58 = vld [vmem:[%s9518_s20 + $0x60] sm:$0xff] }
  0x1a   : > { %8139 = vmatprep.subr.bf16.mxu0 %v9282_v14  ;;  %v3275_v57 = vld [vmem:[%s9523_s23 + $0x58] sm:$0xff]  ;;  %v290_v59 = vld [vmem:[%s9518_s20 + $0x68] sm:$0xff]  ;;  %v3276_v60 = vld [vmem:[%s9523_s23 + $0x60] sm:$0xff]  ;;  %v318_v63 = vpack.c.bf16 %v288_v53, %v287_v52 }
  0x1b   : > { %v3277_v61 = vld [vmem:[%s9523_s23 + $0x68] sm:$0xff]  ;;  %v3305_v1 = vpack.c.bf16 %v3275_v57, %v3274_v56  ;;  %v319_v2 = vpack.c.bf16 %v290_v59, %v289_v58  ;;  %v291_v4 = vld [vmem:[%s9518_s20 + $0x70] sm:$0xff]  ;;  %v292_v5 = vld [vmem:[%s9518_s20 + $0x78] sm:$0xff] }
  0x1c   : > { %7672 = vmatpush3.bf16.msra.mxu1 %v9281_v10  ;;  %v3306_v3 = vpack.c.bf16 %v3277_v61, %v3276_v60  ;;  %v9297_v6 = vld [vmem:[%s10827_s2 + $0x68] sm:$0xff]   ;;  %v3278_v8 = vld [vmem:[%s9523_s23 + $0x70] sm:$0xff]  ;;  %v3279_v9 = vld [vmem:[%s9523_s23 + $0x78] sm:$0xff]  ;;  %v320_v15 = vpack.c.bf16 %v292_v5, %v291_v4 }
  0x1d   : > { %8140 = vmatpush3.bf16.msra.mxu0 %v9282_v14  ;;  %7673 = vmatprep.subr.bf16.mxu1 %v9283_v18  ;;  %v9298_v7 = vld [vmem:[%s10827_s2 + $0x2a8] sm:$0xff]   ;;  %v293_v10 = vld [vmem:[%s9518_s20 + $0x80] sm:$0xff]  ;;  %v9299_v14 = vld [vmem:[%s10827_s2 + $0x70] sm:$0xff]   ;;  %v3307_v17 = vpack.c.bf16 %v3279_v9, %v3278_v8 }
  0x1e   : > { %8141 = vmatprep.subr.bf16.mxu0 %v9284_v19  ;;  %v294_v11 = vld [vmem:[%s9518_s20 + $0x88] sm:$0xff]  ;;  %v3280_v12 = vld [vmem:[%s9523_s23 + $0x80] sm:$0xff]  ;;  %v9300_v16 = vld [vmem:[%s10827_s2 + $0x2b0] sm:$0xff]  }
  0x1f   : > { %v3281_v13 = vld [vmem:[%s9523_s23 + $0x88] sm:$0xff]  ;;  %v9301_v22 = vld [vmem:[%s10827_s2 + $0x78] sm:$0xff]   ;;  %v297_v26 = vld [vmem:[%s9518_s20 + $0xa0] sm:$0xff] }
  0x20   : > { %7674 = vmatpush3.bf16.msra.mxu1 %v9283_v18  ;;  %v321_v18 = vpack.c.bf16 %v294_v11, %v293_v10  ;;  %v9302_v23 = vld [vmem:[%s10827_s2 + $0x2b8] sm:$0xff]   ;;  %v3284_v28 = vld [vmem:[%s9523_s23 + $0xa0] sm:$0xff]  ;;  %v3285_v29 = vld [vmem:[%s9523_s23 + $0xa8] sm:$0xff] }
  0x21   : > { %8142 = vmatpush3.bf16.msra.mxu0 %v9284_v19  ;;  %7675 = vmatprep.subr.bf16.mxu1 %v9285_v20  ;;  %v3308_v19 = vpack.c.bf16 %v3281_v13, %v3280_v12  ;;  %v3283_v25 = vld [vmem:[%s9523_s23 + $0x98] sm:$0xff]  ;;  %v9643_v32 = vld [vmem:[%s10827_s2 + $0x2c0] sm:$0xff]   ;;  %v299_v36 = vld [vmem:[%s9518_s20 + $0xb0] sm:$0xff] }
  0x22   : > { %8143 = vmatprep.subr.bf16.mxu0 %v9286_v21  ;;  %v300_v37 = vld [vmem:[%s9518_s20 + $0xb8] sm:$0xff]  ;;  %v302_v41 = vld [vmem:[%s9518_s20 + $0xc8] sm:$0xff]  ;;  %v3288_v42 = vld [vmem:[%s9523_s23 + $0xc0] sm:$0xff] }
  0x23   : > { %v3287_v39 = vld [vmem:[%s9523_s23 + $0xb8] sm:$0xff]  ;;  %v3289_v43 = vld [vmem:[%s9523_s23 + $0xc8] sm:$0xff]  ;;  %v324_v44 = vpack.c.bf16 %v300_v37, %v299_v36  ;;  %v305_v52 = vld [vmem:[%s9518_s20 + $0xe0] sm:$0xff] }
  0x24   : > { %7676 = vmatpush3.bf16.msra.mxu1 %v9285_v20  ;;  %v295_v20 = vld [vmem:[%s9518_s20 + $0x90] sm:$0xff]  ;;  %v306_v53 = vld [vmem:[%s9518_s20 + $0xe8] sm:$0xff]  ;;  %v308_v61 = vld [vmem:[%s9518_s20 + $0xf8] sm:$0xff] }
  0x25   : > { %8144 = vmatpush3.bf16.msra.mxu0 %v9286_v21  ;;  %7713 = vmatprep.subr.bf16.mxu1 %v9287_v24  ;;  %v296_v21 = vld [vmem:[%s9518_s20 + $0x98] sm:$0xff]  ;;  %v327_v58 = vpack.c.bf16 %v306_v53, %v305_v52  ;;  %v307_v60 = vld [vmem:[%s9518_s20 + $0xf0] sm:$0xff]  ;;  %v608_v12 = vld [vmem:[%s9518_s20 + $0x1] sm:$0xff] }
  0x26   : > { %8181 = vmatprep.subr.bf16.mxu0 %v9288_v27  ;;  %v322_v31 = vpack.c.bf16 %v296_v21, %v295_v20  ;;  %v328_v4 = vpack.c.bf16 %v308_v61, %v307_v60  ;;  %v311_v8 = vld [vmem:[%s9518_s20 + $0x110] sm:$0xff]  ;;  %v312_v9 = vld [vmem:[%s9518_s20 + $0x118] sm:$0xff]  ;;  %v9305_v36 = vld [vmem:[%s10827_s2 + $0x88] sm:$0xff]  }
  0x27   : > { %7678 = vmatmul.mubr.bf16.vlgmr.msra.gmra.mrb[0].mxu1 %v314_v30  ;;  %v9638_v30 = vld [vmem:[%s10827_s2 + $0x80] sm:$0xff]   ;;  %v3298_v10 = vld [vmem:[%s9523_s23 + $0x110] sm:$0xff]  ;;  %v3299_v11 = vld [vmem:[%s9523_s23 + $0x118] sm:$0xff] }
  0x28   : > { %8146 = vmatmul.mubr.bf16.vlgmr.msra.gmra.mrb[0].mxu0 %v3301_v33  ;;  %7714 = vmatpush3.bf16.msra.mxu1 %v9287_v24  ;;  %v3282_v24 = vld [vmem:[%s9523_s23 + $0x90] sm:$0xff]  ;;  %v611_v21 = vld [vmem:[%s9518_s20 + $0x19] sm:$0xff] }
  0x29   : > { %8182 = vmatpush3.bf16.msra.mxu0 %v9288_v27  ;;  %7681 = vmatprep.mubr.bf16.mxu1 %v315_v34  ;;  %v298_v27 = vld [vmem:[%s9518_s20 + $0xa8] sm:$0xff]  ;;  %v3309_v33 = vpack.c.bf16 %v3283_v25, %v3282_v24  ;;  %v610_v20 = vld [vmem:[%s9518_s20 + $0x11] sm:$0xff]  ;;  %v3607_v53 = vld [vmem:[%s9523_s23 + $0x59] sm:$0xff] }
  0x2a   : > { %8149 = vmatprep.mubr.bf16.mxu0 %v3302_v35  ;;  %7715 = vmatprep.subr.bf16.mxu1 %v9289_v38  ;;  %v323_v34 = vpack.c.bf16 %v298_v27, %v297_v26  ;;  %v3310_v35 = vpack.c.bf16 %v3285_v29, %v3284_v28  ;;  %v609_v13 = vld [vmem:[%s9518_s20 + $0x9] sm:$0xff]  ;;  %v612_v24 = vld [vmem:[%s9518_s20 + $0x21] sm:$0xff]  ;;  %v645_v26 = vpack.c.bf16 %v611_v21, %v610_v20  ;;  %v3602_v37 = vld [vmem:[%s9523_s23 + $0x31] sm:$0xff] }
  0x2b   : > { %8183 = vmatprep.subr.bf16.mxu0 %v9290_v40  ;;  %v613_v25 = vld [vmem:[%s9518_s20 + $0x29] sm:$0xff]  ;;  %v3600_v27 = vld [vmem:[%s9523_s23 + $0x21] sm:$0xff]  ;;  %v3606_v52 = vld [vmem:[%s9523_s23 + $0x51] sm:$0xff] }
  0x2c   : > { %7716 = vmatpush3.bf16.msra.mxu1 %v9289_v38  ;;  %v3286_v38 = vld [vmem:[%s9523_s23 + $0xb0] sm:$0xff]  ;;  %v9312_v60 = vld [vmem:[%s10827_s2 + $0x2e0] sm:$0xff]   ;;  %v3637_v61 = vpack.c.bf16 %v3607_v53, %v3606_v52 }
  0x2d   : > { %8184 = vmatpush3.bf16.msra.mxu0 %v9290_v40  ;;  %7717 = vmatprep.subr.bf16.mxu1 %v9291_v46  ;;  %v301_v40 = vld [vmem:[%s9518_s20 + $0xc0] sm:$0xff]  ;;  %v3311_v45 = vpack.c.bf16 %v3287_v39, %v3286_v38  ;;  %v3601_v28 = vld [vmem:[%s9523_s23 + $0x29] sm:$0xff]  ;;  %v3614_v20 = vld [vmem:[%s9523_s23 + $0x91] sm:$0xff] }
  0x2e   : > { %8185 = vmatprep.subr.bf16.mxu0 %v9292_v47  ;;  %v3603_v38 = vld [vmem:[%s9523_s23 + $0x39] sm:$0xff]  ;;  %v9306_v39 = vld [vmem:[%s10827_s2 + $0x2c8] sm:$0xff]  }
  0x2f   : > { %7682 = vmatmul.mubr.bf16.gmra.mrb[4].mxu1 %v316_v48  ;;  %v303_v48 = vld [vmem:[%s9518_s20 + $0xd0] sm:$0xff]  ;;  %v3615_v21 = vld [vmem:[%s9523_s23 + $0x99] sm:$0xff] }
  0x30   : > { %8150 = vmatmul.mubr.bf16.gmra.mrb[4].mxu0 %v3303_v49  ;;  %7685 = vmatprep.mubr.bf16.mxu1 %v317_v50  ;;  %v304_v49 = vld [vmem:[%s9518_s20 + $0xd8] sm:$0xff]  ;;  %v3290_v50 = vld [vmem:[%s9523_s23 + $0xd0] sm:$0xff] }
  0x31   : > { %8153 = vmatprep.mubr.bf16.mxu0 %v3304_v51  ;;  %7718 = vmatpush3.bf16.msra.mxu1 %v9291_v46  ;;  %v325_v46 = vpack.c.bf16 %v302_v41, %v301_v40  ;;  %v3291_v51 = vld [vmem:[%s9523_s23 + $0xd8] sm:$0xff]  ;;  %v326_v56 = vpack.c.bf16 %v304_v49, %v303_v48  ;;  %v616_v40 = vld [vmem:[%s9518_s20 + $0x41] sm:$0xff]  ;;  %v617_v41 = vld [vmem:[%s9518_s20 + $0x49] sm:$0xff] }
  0x32   : > { %8186 = vmatpush3.bf16.msra.mxu0 %v9292_v47  ;;  %7719 = vmatprep.subr.bf16.mxu1 %v9293_v54  ;;  %v3312_v47 = vpack.c.bf16 %v3289_v43, %v3288_v42  ;;  %v3313_v57 = vpack.c.bf16 %v3291_v51, %v3290_v50  ;;  %v3604_v42 = vld [vmem:[%s9523_s23 + $0x41] sm:$0xff]  ;;  %v3605_v43 = vld [vmem:[%s9523_s23 + $0x49] sm:$0xff]  ;;  %v618_v48 = vld [vmem:[%s9518_s20 + $0x51] sm:$0xff] }
  0x33   : > { %8187 = vmatprep.subr.bf16.mxu0 %v9294_v55  ;;  %v9309_v49 = vld [vmem:[%s10827_s2 + $0x98] sm:$0xff]  }
  0x34   : > { %v619_v50 = vld [vmem:[%s9518_s20 + $0x59] sm:$0xff] }
  0x35   : > { %7720 = vmatpush3.bf16.msra.mxu1 %v9293_v54  ;;  %v3292_v54 = vld [vmem:[%s9523_s23 + $0xe0] sm:$0xff]  ;;  %v9310_v51 = vld [vmem:[%s10827_s2 + $0x2d8] sm:$0xff]  }
  0x36   : > { %8188 = vmatpush3.bf16.msra.mxu0 %v9294_v55  ;;  %7721 = vmatprep.subr.bf16.mxu1 %v9295_v62  ;;  %v3293_v55 = vld [vmem:[%s9523_s23 + $0xe8] sm:$0xff] }
  0x37   : > { %7686 = vmatmul.mubr.bf16.gmra.mrb[8].mxu1 %v318_v63  ;;  %8189 = vmatprep.subr.bf16.mxu0 %v9296_v0  ;;  %v3314_v59 = vpack.c.bf16 %v3293_v55, %v3292_v54  ;;  %v3295_v63 = vld [vmem:[%s9523_s23 + $0xf8] sm:$0xff]  ;;  %v620_v54 = vld [vmem:[%s9518_s20 + $0x61] sm:$0xff]  ;;  %v621_v55 = vld [vmem:[%s9518_s20 + $0x69] sm:$0xff] }
  0x38   : > { %8154 = vmatmul.mubr.bf16.gmra.mrb[8].mxu0 %v3305_v1  ;;  %7689 = vmatprep.mubr.bf16.mxu1 %v319_v2  ;;  %v310_v1 = vld [vmem:[%s9518_s20 + $0x108] sm:$0xff]  ;;  %v3296_v2 = vld [vmem:[%s9523_s23 + $0x100] sm:$0xff] }
  0x39   : > { %8157 = vmatprep.mubr.bf16.mxu0 %v3306_v3  ;;  %7722 = vmatpush3.bf16.msra.mxu1 %v9295_v62  ;;  %v3294_v62 = vld [vmem:[%s9523_s23 + $0xf0] sm:$0xff]  ;;  %v3297_v3 = vld [vmem:[%s9523_s23 + $0x108] sm:$0xff] }
  0x3a   : > { %8190 = vmatpush3.bf16.msra.mxu0 %v9296_v0  ;;  %7723 = vmatprep.subr.bf16.mxu1 %v9297_v6  ;;  %v309_v0 = vld [vmem:[%s9518_s20 + $0x100] sm:$0xff]  ;;  %v3315_v5 = vpack.c.bf16 %v3295_v63, %v3294_v62  ;;  %v650_v62 = vpack.c.bf16 %v621_v55, %v620_v54 }
  0x3b   : > { %8191 = vmatprep.subr.bf16.mxu0 %v9298_v7 }
  0x3d   : > { %7724 = vmatpush3.bf16.msra.mxu1 %v9297_v6  ;;  %v329_v6 = vpack.c.bf16 %v310_v1, %v309_v0  ;;  %v622_v0 = vld [vmem:[%s9518_s20 + $0x71] sm:$0xff]  ;;  %v623_v1 = vld [vmem:[%s9518_s20 + $0x79] sm:$0xff] }
  0x3e   : > { %8192 = vmatpush3.bf16.msra.mxu0 %v9298_v7  ;;  %7725 = vmatprep.subr.bf16.mxu1 %v9299_v14  ;;  %v3316_v7 = vpack.c.bf16 %v3297_v3, %v3296_v2  ;;  %v9313_v2 = vld [vmem:[%s10827_s2 + $0xa8] sm:$0xff]  }
  0x3f   : > { %7690 = vmatmul.mubr.bf16.gmra.mrb[12].mxu1 %v320_v15  ;;  %8193 = vmatprep.subr.bf16.mxu0 %v9300_v16  ;;  %v3597_v15 = vld [vmem:[%s9523_s23 + $0x9] sm:$0xff] }
  0x40   : > { %8158 = vmatmul.mubr.bf16.gmra.mrb[12].mxu0 %v3307_v17  ;;  %7693 = vmatprep.mubr.bf16.mxu1 %v321_v18  ;;  %v3317_v17 = vpack.c.bf16 %v3299_v11, %v3298_v10  ;;  %v644_v18 = vpack.c.bf16 %v609_v13, %v608_v12  ;;  %v9314_v3 = vld [vmem:[%s10827_s2 + $0x2e8] sm:$0xff]   ;;  %v9315_v10 = vld [vmem:[%s10827_s2 + $0xb0] sm:$0xff]   ;;  %v651_v11 = vpack.c.bf16 %v623_v1, %v622_v0 }
  0x41   : > { %8161 = vmatprep.mubr.bf16.mxu0 %v3308_v19  ;;  %7726 = vmatpush3.bf16.msra.mxu1 %v9299_v14  ;;  %v3596_v14 = vld [vmem:[%s9523_s23 + $0x1] sm:$0xff]  ;;  %v9316_v12 = vld [vmem:[%s10827_s2 + $0x2f0] sm:$0xff]  }
  0x42   : > { %8194 = vmatpush3.bf16.msra.mxu0 %v9300_v16  ;;  %7727 = vmatprep.subr.bf16.mxu1 %v9301_v22  ;;  %v330_v16 = vpack.c.bf16 %v312_v9, %v311_v8  ;;  %v3632_v19 = vpack.c.bf16 %v3597_v15, %v3596_v14  ;;  %v3612_v8 = vld [vmem:[%s9523_s23 + $0x81] sm:$0xff]  ;;  %v3613_v9 = vld [vmem:[%s9523_s23 + $0x89] sm:$0xff] }
  0x43   : > { %8195 = vmatprep.subr.bf16.mxu0 %v9302_v23  ;;  %v3640_v15 = vpack.c.bf16 %v3613_v9, %v3612_v8  ;;  %v940_v8 = vld [vmem:[%s9518_s20 + $0x2] sm:$0xff]  ;;  %v941_v9 = vld [vmem:[%s9518_s20 + $0xa] sm:$0xff] }
  0x45   : > { %7728 = vmatpush3.bf16.msra.mxu1 %v9301_v22  ;;  %v3598_v22 = vld [vmem:[%s9523_s23 + $0x11] sm:$0xff] }
  0x46   : > { %8196 = vmatpush3.bf16.msra.mxu0 %v9302_v23  ;;  %7765 = vmatprep.subr.bf16.mxu1 %v9638_v30  ;;  %v3599_v23 = vld [vmem:[%s9523_s23 + $0x19] sm:$0xff] }
  0x47   : > { %7694 = vmatmul.mubr.bf16.gmra.mrb[16].mxu1 %v322_v31  ;;  %8233 = vmatprep.subr.bf16.mxu0 %v9643_v32  ;;  %v3633_v29 = vpack.c.bf16 %v3599_v23, %v3598_v22  ;;  %v646_v31 = vpack.c.bf16 %v613_v25, %v612_v24  ;;  %v628_v22 = vld [vmem:[%s9518_s20 + $0xa1] sm:$0xff]  ;;  %v629_v23 = vld [vmem:[%s9518_s20 + $0xa9] sm:$0xff] }
  0x48   : > { %8162 = vmatmul.mubr.bf16.gmra.mrb[16].mxu0 %v3309_v33  ;;  %7697 = vmatprep.mubr.bf16.mxu1 %v323_v34  ;;  %v3634_v33 = vpack.c.bf16 %v3601_v28, %v3600_v27  ;;  %v614_v34 = vld [vmem:[%s9518_s20 + $0x31] sm:$0xff]  ;;  %v3616_v24 = vld [vmem:[%s9523_s23 + $0xa1] sm:$0xff]  ;;  %v3617_v25 = vld [vmem:[%s9523_s23 + $0xa9] sm:$0xff] }
  0x49   : > { %8165 = vmatprep.mubr.bf16.mxu0 %v3310_v35  ;;  %v615_v35 = vld [vmem:[%s9518_s20 + $0x39] sm:$0xff] }
  0x4a   : > { %v9771_v28 = vld [vmem:[%s10827_s2 + $0x300] sm:$0xff]  }
  0x4f   : > { %7698 = vmatmul.mubr.bf16.gmra.mrb[20].mxu1 %v324_v44  ;;  %v9307_v44 = vld [vmem:[%s10827_s2 + $0x90] sm:$0xff]  }
  0x50   : > { %8166 = vmatmul.mubr.bf16.gmra.mrb[20].mxu0 %v3311_v45  ;;  %7701 = vmatprep.mubr.bf16.mxu1 %v325_v46  ;;  %v9308_v45 = vld [vmem:[%s10827_s2 + $0x2d0] sm:$0xff]   ;;  %v647_v46 = vpack.c.bf16 %v615_v35, %v614_v34  ;;  %v631_v35 = vld [vmem:[%s9518_s20 + $0xb9] sm:$0xff] }
  0x51   : > { %8169 = vmatprep.mubr.bf16.mxu0 %v3312_v47  ;;  %v3636_v47 = vpack.c.bf16 %v3605_v43, %v3604_v42  ;;  %v630_v34 = vld [vmem:[%s9518_s20 + $0xb1] sm:$0xff] }
  0x52   : > { %v655_v42 = vpack.c.bf16 %v631_v35, %v630_v34  ;;  %v946_v34 = vld [vmem:[%s9518_s20 + $0x32] sm:$0xff]  ;;  %v947_v35 = vld [vmem:[%s9518_s20 + $0x3a] sm:$0xff] }
  0x57   : > { %7702 = vmatmul.mubr.bf16.gmra.mrb[24].mxu1 %v326_v56  ;;  %v3608_v56 = vld [vmem:[%s9523_s23 + $0x61] sm:$0xff] }
  0x58   : > { %8170 = vmatmul.mubr.bf16.gmra.mrb[24].mxu0 %v3313_v57  ;;  %7705 = vmatprep.mubr.bf16.mxu1 %v327_v58  ;;  %v3609_v57 = vld [vmem:[%s9523_s23 + $0x69] sm:$0xff]  ;;  %v9311_v58 = vld [vmem:[%s10827_s2 + $0xa0] sm:$0xff]  }
  0x59   : > { %8173 = vmatprep.mubr.bf16.mxu0 %v3314_v59  ;;  %v649_v59 = vpack.c.bf16 %v619_v50, %v618_v48  ;;  %v3638_v63 = vpack.c.bf16 %v3609_v57, %v3608_v56  ;;  %v636_v48 = vld [vmem:[%s9518_s20 + $0xe1] sm:$0xff]  ;;  %v638_v56 = vld [vmem:[%s9518_s20 + $0xf1] sm:$0xff]  ;;  %v639_v57 = vld [vmem:[%s9518_s20 + $0xf9] sm:$0xff] }
  0x5a   : > { %v3624_v50 = vld [vmem:[%s9523_s23 + $0xe1] sm:$0xff]  ;;  %v659_v0 = vpack.c.bf16 %v639_v57, %v638_v56 }
  0x5f   : > { %7706 = vmatmul.mubr.bf16.gmra.mrb[28].mxu1 %v328_v4  ;;  %v3610_v4 = vld [vmem:[%s9523_s23 + $0x71] sm:$0xff] }
  0x60   : > { %8174 = vmatmul.mubr.bf16.gmra.mrb[28].mxu0 %v3315_v5  ;;  %7709 = vmatprep.mubr.bf16.mxu1 %v329_v6  ;;  %v3611_v5 = vld [vmem:[%s9523_s23 + $0x79] sm:$0xff]  ;;  %v624_v6 = vld [vmem:[%s9518_s20 + $0x81] sm:$0xff] }
  0x61   : > { %8177 = vmatprep.mubr.bf16.mxu0 %v3316_v7  ;;  %v625_v7 = vld [vmem:[%s9518_s20 + $0x89] sm:$0xff]  ;;  %v3639_v13 = vpack.c.bf16 %v3611_v5, %v3610_v4  ;;  %v642_v4 = vld [vmem:[%s9518_s20 + $0x111] sm:$0xff]  ;;  %v643_v5 = vld [vmem:[%s9518_s20 + $0x119] sm:$0xff] }
  0x62   : > { %v652_v14 = vpack.c.bf16 %v625_v7, %v624_v6  ;;  %v3630_v6 = vld [vmem:[%s9523_s23 + $0x111] sm:$0xff]  ;;  %v3631_v7 = vld [vmem:[%s9523_s23 + $0x119] sm:$0xff] }
  0x67   : > { %7710 = vmatmul.mubr.bf16.gmra.mrb[32].mxu1 %v330_v16  ;;  %v626_v16 = vld [vmem:[%s9518_s20 + $0x91] sm:$0xff] }
  0x68   : > { %8178 = vmatmul.mubr.bf16.gmra.mrb[32].mxu0 %v3317_v17  ;;  %7729 = vmatprep.mubr.bf16.mxu1 %v644_v18  ;;  %v627_v17 = vld [vmem:[%s9518_s20 + $0x99] sm:$0xff] }
  0x69   : > { %8197 = vmatprep.mubr.bf16.mxu0 %v3632_v19  ;;  %v9317_v18 = vld [vmem:[%s10827_s2 + $0xb8] sm:$0xff]   ;;  %v653_v27 = vpack.c.bf16 %v627_v17, %v626_v16 }
  0x6a   : > { %v9318_v19 = vld [vmem:[%s10827_s2 + $0x2f8] sm:$0xff]  }
  0x6b   : > { %v942_v16 = vld [vmem:[%s9518_s20 + $0x12] sm:$0xff]  ;;  %v943_v17 = vld [vmem:[%s9518_s20 + $0x1a] sm:$0xff] }
  0x6f   : > { %7730 = vmatmul.mubr.bf16.vlgmr.msra.gmra.mrb[0].mxu1 %v645_v26  ;;  %v9766_v26 = vld [vmem:[%s10827_s2 + $0xc0] sm:$0xff]  }
  0x70   : > { %8198 = vmatmul.mubr.bf16.vlgmr.msra.gmra.mrb[0].mxu0 %v3633_v29  ;;  %7766 = vmatpush3.bf16.msra.mxu1 %v9638_v30  ;;  %v3635_v30 = vpack.c.bf16 %v3603_v38, %v3602_v37  ;;  %v3641_v29 = vpack.c.bf16 %v3615_v21, %v3614_v20  ;;  %v3619_v37 = vld [vmem:[%s9523_s23 + $0xb9] sm:$0xff]  ;;  %v632_v38 = vld [vmem:[%s9518_s20 + $0xc1] sm:$0xff]  ;;  %v945_v21 = vld [vmem:[%s9518_s20 + $0x2a] sm:$0xff] }
  0x71   : > { %8234 = vmatpush3.bf16.msra.mxu0 %v9643_v32  ;;  %7733 = vmatprep.mubr.bf16.mxu1 %v646_v31  ;;  %v648_v32 = vpack.c.bf16 %v617_v41, %v616_v40  ;;  %v654_v31 = vpack.c.bf16 %v629_v23, %v628_v22  ;;  %v3620_v40 = vld [vmem:[%s9523_s23 + $0xc1] sm:$0xff]  ;;  %v3621_v41 = vld [vmem:[%s9523_s23 + $0xc9] sm:$0xff] }
  0x72   : > { %8201 = vmatprep.mubr.bf16.mxu0 %v3634_v33  ;;  %7767 = vmatprep.subr.bf16.mxu1 %v9305_v36  ;;  %v3642_v33 = vpack.c.bf16 %v3617_v25, %v3616_v24  ;;  %v944_v20 = vld [vmem:[%s9518_s20 + $0x22] sm:$0xff]  ;;  %v3933_v23 = vld [vmem:[%s9523_s23 + $0x2a] sm:$0xff]  ;;  %v9815_v24 = vpack.c.bf16 %v943_v17, %v942_v16  ;;  %v3946_v16 = vld [vmem:[%s9523_s23 + $0x92] sm:$0xff] }
  0x73   : > { %8235 = vmatprep.subr.bf16.mxu0 %v9306_v39  ;;  %v3932_v22 = vld [vmem:[%s9523_s23 + $0x22] sm:$0xff]  ;;  %v3947_v17 = vld [vmem:[%s9523_s23 + $0x9a] sm:$0xff] }
  0x74   : > { %7768 = vmatpush3.bf16.msra.mxu1 %v9305_v36  ;;  %v3618_v36 = vld [vmem:[%s9523_s23 + $0xb1] sm:$0xff] }
  0x75   : > { %8236 = vmatpush3.bf16.msra.mxu0 %v9306_v39  ;;  %7769 = vmatprep.subr.bf16.mxu1 %v9307_v44  ;;  %v633_v39 = vld [vmem:[%s9518_s20 + $0xc9] sm:$0xff]  ;;  %v3643_v43 = vpack.c.bf16 %v3619_v37, %v3618_v36  ;;  %v3934_v36 = vld [vmem:[%s9523_s23 + $0x32] sm:$0xff]  ;;  %v3935_v37 = vld [vmem:[%s9523_s23 + $0x3a] sm:$0xff] }
  0x76   : > { %8237 = vmatprep.subr.bf16.mxu0 %v9308_v45 }
  0x77   : > { %7734 = vmatmul.mubr.bf16.gmra.mrb[4].mxu1 %v647_v46  ;;  %v634_v46 = vld [vmem:[%s9518_s20 + $0xd1] sm:$0xff] }
  0x78   : > { %8202 = vmatmul.mubr.bf16.gmra.mrb[4].mxu0 %v3635_v30  ;;  %7737 = vmatprep.mubr.bf16.mxu1 %v648_v32  ;;  %v635_v30 = vld [vmem:[%s9518_s20 + $0xd9] sm:$0xff]  ;;  %v3622_v32 = vld [vmem:[%s9523_s23 + $0xd1] sm:$0xff] }
  0x79   : > { %8205 = vmatprep.mubr.bf16.mxu0 %v3636_v47  ;;  %7770 = vmatpush3.bf16.msra.mxu1 %v9307_v44  ;;  %v656_v44 = vpack.c.bf16 %v633_v39, %v632_v38  ;;  %v3623_v47 = vld [vmem:[%s9523_s23 + $0xd9] sm:$0xff]  ;;  %v657_v52 = vpack.c.bf16 %v635_v30, %v634_v46  ;;  %v948_v38 = vld [vmem:[%s9518_s20 + $0x42] sm:$0xff]  ;;  %v949_v39 = vld [vmem:[%s9518_s20 + $0x4a] sm:$0xff] }
  0x7a   : > { %8238 = vmatpush3.bf16.msra.mxu0 %v9308_v45  ;;  %7771 = vmatprep.subr.bf16.mxu1 %v9309_v49  ;;  %v3644_v45 = vpack.c.bf16 %v3621_v41, %v3620_v40  ;;  %v3645_v53 = vpack.c.bf16 %v3623_v47, %v3622_v32  ;;  %v3936_v40 = vld [vmem:[%s9523_s23 + $0x42] sm:$0xff]  ;;  %v3937_v41 = vld [vmem:[%s9523_s23 + $0x4a] sm:$0xff]  ;;  %v9325_v46 = vld [vmem:[%s10827_s2 + $0xd8] sm:$0xff]  }
  0x7b   : > { %8239 = vmatprep.subr.bf16.mxu0 %v9310_v51  ;;  %v9326_v30 = vld [vmem:[%s10827_s2 + $0x318] sm:$0xff]  }
  0x7c   : > { %v950_v32 = vld [vmem:[%s9518_s20 + $0x52] sm:$0xff]  ;;  %v951_v47 = vld [vmem:[%s9518_s20 + $0x5a] sm:$0xff] }
  0x7d   : > { %7772 = vmatpush3.bf16.msra.mxu1 %v9309_v49  ;;  %v637_v49 = vld [vmem:[%s9518_s20 + $0xe9] sm:$0xff]  ;;  %v9881_v56 = vpack.c.bf16 %v951_v47, %v950_v32 }
  0x7e   : > { %8240 = vmatpush3.bf16.msra.mxu0 %v9310_v51  ;;  %7773 = vmatprep.subr.bf16.mxu1 %v9311_v58  ;;  %v3625_v51 = vld [vmem:[%s9523_s23 + $0xe9] sm:$0xff]  ;;  %v658_v54 = vpack.c.bf16 %v637_v49, %v636_v48  ;;  %v3938_v48 = vld [vmem:[%s9523_s23 + $0x52] sm:$0xff]  ;;  %v3939_v49 = vld [vmem:[%s9523_s23 + $0x5a] sm:$0xff] }
  0x7f   : > { %7738 = vmatmul.mubr.bf16.gmra.mrb[8].mxu1 %v649_v59  ;;  %8241 = vmatprep.subr.bf16.mxu0 %v9312_v60  ;;  %v3646_v55 = vpack.c.bf16 %v3625_v51, %v3624_v50  ;;  %v3627_v59 = vld [vmem:[%s9523_s23 + $0xf9] sm:$0xff]  ;;  %v952_v50 = vld [vmem:[%s9518_s20 + $0x62] sm:$0xff]  ;;  %v953_v51 = vld [vmem:[%s9518_s20 + $0x6a] sm:$0xff]  ;;  %v9883_v57 = vpack.c.bf16 %v3939_v49, %v3938_v48 }
  0x80   : > { %8206 = vmatmul.mubr.bf16.gmra.mrb[8].mxu0 %v3637_v61  ;;  %7741 = vmatprep.mubr.bf16.mxu1 %v650_v62  ;;  %v641_v61 = vld [vmem:[%s9518_s20 + $0x109] sm:$0xff]  ;;  %v3628_v62 = vld [vmem:[%s9523_s23 + $0x101] sm:$0xff]  ;;  %v966_v48 = vld [vmem:[%s9518_s20 + $0xd2] sm:$0xff] }
  0x81   : > { %8209 = vmatprep.mubr.bf16.mxu0 %v3638_v63  ;;  %7774 = vmatpush3.bf16.msra.mxu1 %v9311_v58  ;;  %v3626_v58 = vld [vmem:[%s9523_s23 + $0xf1] sm:$0xff]  ;;  %v3629_v63 = vld [vmem:[%s9523_s23 + $0x109] sm:$0xff]  ;;  %v967_v49 = vld [vmem:[%s9518_s20 + $0xda] sm:$0xff] }
  0x82   : > { %8242 = vmatpush3.bf16.msra.mxu0 %v9312_v60  ;;  %7775 = vmatprep.subr.bf16.mxu1 %v9313_v2  ;;  %v640_v60 = vld [vmem:[%s9518_s20 + $0x101] sm:$0xff]  ;;  %v3647_v1 = vpack.c.bf16 %v3627_v59, %v3626_v58  ;;  %v9885_v58 = vpack.c.bf16 %v953_v51, %v952_v50  ;;  %v3954_v50 = vld [vmem:[%s9523_s23 + $0xd2] sm:$0xff] }
  0x83   : > { %8243 = vmatprep.subr.bf16.mxu0 %v9314_v3  ;;  %v3955_v51 = vld [vmem:[%s9523_s23 + $0xda] sm:$0xff] }
  0x85   : > { %7776 = vmatpush3.bf16.msra.mxu1 %v9313_v2  ;;  %v660_v2 = vpack.c.bf16 %v641_v61, %v640_v60  ;;  %v9329_v60 = vld [vmem:[%s10827_s2 + $0xe8] sm:$0xff]   ;;  %v954_v61 = vld [vmem:[%s9518_s20 + $0x72] sm:$0xff] }
  0x86   : > { %8244 = vmatpush3.bf16.msra.mxu0 %v9314_v3  ;;  %7777 = vmatprep.subr.bf16.mxu1 %v9315_v10  ;;  %v3648_v3 = vpack.c.bf16 %v3629_v63, %v3628_v62  ;;  %v955_v62 = vld [vmem:[%s9518_s20 + $0x7a] sm:$0xff]  ;;  %v3942_v63 = vld [vmem:[%s9523_s23 + $0x72] sm:$0xff] }
  0x87   : > { %7742 = vmatmul.mubr.bf16.gmra.mrb[12].mxu1 %v651_v11  ;;  %8245 = vmatprep.subr.bf16.mxu0 %v9316_v12  ;;  %v3929_v11 = vld [vmem:[%s9523_s23 + $0xa] sm:$0xff] }
  0x88   : > { %8210 = vmatmul.mubr.bf16.gmra.mrb[12].mxu0 %v3639_v13  ;;  %7745 = vmatprep.mubr.bf16.mxu1 %v652_v14  ;;  %v3649_v13 = vpack.c.bf16 %v3631_v7, %v3630_v6  ;;  %v976_v14 = vpack.c.bf16 %v941_v9, %v940_v8  ;;  %v9331_v6 = vld [vmem:[%s10827_s2 + $0xf0] sm:$0xff]   ;;  %v9913_v8 = vpack.c.bf16 %v955_v62, %v954_v61 }
  0x89   : > { %8213 = vmatprep.mubr.bf16.mxu0 %v3640_v15  ;;  %7778 = vmatpush3.bf16.msra.mxu1 %v9315_v10  ;;  %v3928_v10 = vld [vmem:[%s9523_s23 + $0x2] sm:$0xff]  ;;  %v9332_v7 = vld [vmem:[%s10827_s2 + $0x330] sm:$0xff]   ;;  %v9993_v61 = vpack.c.bf16 %v3955_v51, %v3954_v50 }
  0x8a   : > { %8246 = vmatpush3.bf16.msra.mxu0 %v9316_v12  ;;  %7779 = vmatprep.subr.bf16.mxu1 %v9317_v18  ;;  %v661_v12 = vpack.c.bf16 %v643_v5, %v642_v4  ;;  %v3964_v15 = vpack.c.bf16 %v3929_v11, %v3928_v10  ;;  %v3944_v4 = vld [vmem:[%s9523_s23 + $0x82] sm:$0xff]  ;;  %v3945_v5 = vld [vmem:[%s9523_s23 + $0x8a] sm:$0xff] }
  0x8b   : > { %8247 = vmatprep.subr.bf16.mxu0 %v9318_v19  ;;  %v9919_v11 = vpack.c.bf16 %v3945_v5, %v3944_v4  ;;  %v972_v4 = vld [vmem:[%s9518_s20 + $0x102] sm:$0xff]  ;;  %v973_v5 = vld [vmem:[%s9518_s20 + $0x10a] sm:$0xff] }
  0x8c   : > { %v4597_v50 = vld [vmem:[%s9523_s23 + $0x3b] sm:$0xff] }
  0x8d   : > { %7780 = vmatpush3.bf16.msra.mxu1 %v9317_v18  ;;  %v3930_v18 = vld [vmem:[%s9523_s23 + $0x12] sm:$0xff] }
  0x8e   : > { %8248 = vmatpush3.bf16.msra.mxu0 %v9318_v19  ;;  %7817 = vmatprep.subr.bf16.mxu1 %v9766_v26  ;;  %v3931_v19 = vld [vmem:[%s9523_s23 + $0x1a] sm:$0xff] }
  0x8f   : > { %7746 = vmatmul.mubr.bf16.gmra.mrb[16].mxu1 %v653_v27  ;;  %8285 = vmatprep.subr.bf16.mxu0 %v9771_v28  ;;  %v9817_v25 = vpack.c.bf16 %v3931_v19, %v3930_v18  ;;  %v9321_v27 = vld [vmem:[%s10827_s2 + $0xc8] sm:$0xff]  }
  0x90   : > { %8214 = vmatmul.mubr.bf16.gmra.mrb[16].mxu0 %v3641_v29  ;;  %7749 = vmatprep.mubr.bf16.mxu1 %v654_v31  ;;  %v9822_v29 = vpack.c.bf16 %v945_v21, %v944_v20  ;;  %v9322_v31 = vld [vmem:[%s10827_s2 + $0x308] sm:$0xff]  }
  0x91   : > { %8217 = vmatprep.mubr.bf16.mxu0 %v3642_v33  ;;  %v9827_v33 = vpack.c.bf16 %v3933_v23, %v3932_v22  ;;  %v960_v18 = vld [vmem:[%s9518_s20 + $0xa2] sm:$0xff]  ;;  %v961_v19 = vld [vmem:[%s9518_s20 + $0xaa] sm:$0xff] }
  0x92   : > { %v3948_v20 = vld [vmem:[%s9523_s23 + $0xa2] sm:$0xff]  ;;  %v3949_v21 = vld [vmem:[%s9523_s23 + $0xaa] sm:$0xff] }
  0x93   : > { %v9942_v22 = vld [vmem:[%s10827_s2 + $0x100] sm:$0xff]  }
  0x97   : > { %7750 = vmatmul.mubr.bf16.gmra.mrb[20].mxu1 %v655_v42  ;;  %v9323_v42 = vld [vmem:[%s10827_s2 + $0xd0] sm:$0xff]  }
  0x98   : > { %8218 = vmatmul.mubr.bf16.gmra.mrb[20].mxu0 %v3643_v43  ;;  %7753 = vmatprep.mubr.bf16.mxu1 %v656_v44  ;;  %v9324_v43 = vld [vmem:[%s10827_s2 + $0x310] sm:$0xff]   ;;  %v9853_v44 = vpack.c.bf16 %v949_v39, %v948_v38  ;;  %v3951_v39 = vld [vmem:[%s9523_s23 + $0xba] sm:$0xff] }
  0x99   : > { %8221 = vmatprep.mubr.bf16.mxu0 %v3644_v45  ;;  %v9855_v45 = vpack.c.bf16 %v3937_v41, %v3936_v40  ;;  %v3950_v38 = vld [vmem:[%s9523_s23 + $0xb2] sm:$0xff]  ;;  %v964_v40 = vld [vmem:[%s9518_s20 + $0xc2] sm:$0xff]  ;;  %v965_v41 = vld [vmem:[%s9518_s20 + $0xca] sm:$0xff] }
  0x9a   : > { %v9975_v32 = vpack.c.bf16 %v965_v41, %v964_v40 }
  0x9f   : > { %7754 = vmatmul.mubr.bf16.gmra.mrb[24].mxu1 %v657_v52  ;;  %v3940_v52 = vld [vmem:[%s9523_s23 + $0x62] sm:$0xff] }
  0xa0   : > { %8222 = vmatmul.mubr.bf16.gmra.mrb[24].mxu0 %v3645_v53  ;;  %7757 = vmatprep.mubr.bf16.mxu1 %v658_v54  ;;  %v3941_v53 = vld [vmem:[%s9523_s23 + $0x6a] sm:$0xff]  ;;  %v9327_v54 = vld [vmem:[%s10827_s2 + $0xe0] sm:$0xff]  }
  0xa1   : > { %8225 = vmatprep.mubr.bf16.mxu0 %v3646_v55  ;;  %v9328_v55 = vld [vmem:[%s10827_s2 + $0x320] sm:$0xff]   ;;  %v9887_v59 = vpack.c.bf16 %v3941_v53, %v3940_v52  ;;  %v969_v53 = vld [vmem:[%s9518_s20 + $0xea] sm:$0xff] }
  0xa2   : > { %v968_v52 = vld [vmem:[%s9518_s20 + $0xe2] sm:$0xff] }
  0xa3   : > { %v9995_v62 = vpack.c.bf16 %v969_v53, %v968_v52 }
  0xa7   : > { %7758 = vmatmul.mubr.bf16.gmra.mrb[28].mxu1 %v659_v0  ;;  %v9330_v0 = vld [vmem:[%s10827_s2 + $0x328] sm:$0xff]  }
  0xa8   : > { %8226 = vmatmul.mubr.bf16.gmra.mrb[28].mxu0 %v3647_v1  ;;  %7761 = vmatprep.mubr.bf16.mxu1 %v660_v2  ;;  %v3943_v1 = vld [vmem:[%s9523_s23 + $0x7a] sm:$0xff]  ;;  %v956_v2 = vld [vmem:[%s9518_s20 + $0x82] sm:$0xff] }
  0xa9   : > { %8229 = vmatprep.mubr.bf16.mxu0 %v3648_v3  ;;  %v957_v3 = vld [vmem:[%s9518_s20 + $0x8a] sm:$0xff]  ;;  %v9915_v9 = vpack.c.bf16 %v3943_v1, %v3942_v63  ;;  %v971_v1 = vld [vmem:[%s9518_s20 + $0xfa] sm:$0xff] }
  0xaa   : > { %v9917_v10 = vpack.c.bf16 %v957_v3, %v956_v2  ;;  %v3958_v2 = vld [vmem:[%s9523_s23 + $0xf2] sm:$0xff]  ;;  %v3959_v3 = vld [vmem:[%s9523_s23 + $0xfa] sm:$0xff] }
  0xaf   : > { %7762 = vmatmul.mubr.bf16.gmra.mrb[32].mxu1 %v661_v12  ;;  %v9333_v12 = vld [vmem:[%s10827_s2 + $0xf8] sm:$0xff]  }
  0xb0   : > { %8230 = vmatmul.mubr.bf16.gmra.mrb[32].mxu0 %v3649_v13  ;;  %7781 = vmatprep.mubr.bf16.mxu1 %v976_v14  ;;  %v9334_v13 = vld [vmem:[%s10827_s2 + $0x338] sm:$0xff]  }
  0xb1   : > { %8249 = vmatprep.mubr.bf16.mxu0 %v3964_v15  ;;  %v958_v14 = vld [vmem:[%s9518_s20 + $0x92] sm:$0xff]  ;;  %v959_v15 = vld [vmem:[%s9518_s20 + $0x9a] sm:$0xff] }
  0xb2   : > { %v9944_v23 = vpack.c.bf16 %v959_v15, %v958_v14  ;;  %v10015_v14 = vpack.c.bf16 %v973_v5, %v972_v4  ;;  %v4601_v4 = vld [vmem:[%s9523_s23 + $0x5b] sm:$0xff]  ;;  %v9356_v5 = vld [vmem:[%s10827_s2 + $0x390] sm:$0xff]  }
  0xb7   : > { %7782 = vmatmul.mubr.bf16.vlgmr.msra.gmra.mrb[0].mxu1 %v9815_v24 }
  0xb8   : > { %8250 = vmatmul.mubr.bf16.vlgmr.msra.gmra.mrb[0].mxu0 %v9817_v25  ;;  %7818 = vmatpush3.bf16.msra.mxu1 %v9766_v26  ;;  %v9849_v26 = vpack.c.bf16 %v947_v35, %v946_v34  ;;  %v9953_v34 = vpack.c.bf16 %v961_v19, %v960_v18  ;;  %v9955_v35 = vpack.c.bf16 %v3949_v21, %v3948_v20  ;;  %v3962_v18 = vld [vmem:[%s9523_s23 + $0x112] sm:$0xff]  ;;  %v3963_v19 = vld [vmem:[%s9523_s23 + $0x11a] sm:$0xff] }
  0xb9   : > { %8286 = vmatpush3.bf16.msra.mxu0 %v9771_v28  ;;  %7785 = vmatprep.mubr.bf16.mxu1 %v9822_v29  ;;  %v9851_v28 = vpack.c.bf16 %v3935_v37, %v3934_v36  ;;  %v962_v36 = vld [vmem:[%s9518_s20 + $0xb2] sm:$0xff]  ;;  %v963_v37 = vld [vmem:[%s9518_s20 + $0xba] sm:$0xff]  ;;  %v10029_v21 = vpack.c.bf16 %v3963_v19, %v3962_v18  ;;  %v4602_v18 = vld [vmem:[%s9523_s23 + $0x63] sm:$0xff] }
  0xba   : > { %8253 = vmatprep.mubr.bf16.mxu0 %v9827_v33  ;;  %7819 = vmatprep.subr.bf16.mxu1 %v9321_v27  ;;  %v4603_v19 = vld [vmem:[%s9523_s23 + $0x6b] sm:$0xff] }
  0xbb   : > { %8287 = vmatprep.subr.bf16.mxu0 %v9322_v31 }
  0xbc   : > { %7820 = vmatpush3.bf16.msra.mxu1 %v9321_v27  ;;  %v9949_v27 = vld [vmem:[%s10827_s2 + $0x340] sm:$0xff]  }
  0xbd   : > { %8288 = vmatpush3.bf16.msra.mxu0 %v9322_v31  ;;  %7821 = vmatprep.subr.bf16.mxu1 %v9323_v42  ;;  %v9951_v31 = vpack.c.bf16 %v3947_v17, %v3946_v16  ;;  %v974_v16 = vld [vmem:[%s9518_s20 + $0x112] sm:$0xff]  ;;  %v975_v17 = vld [vmem:[%s9518_s20 + $0x11a] sm:$0xff] }
  0xbe   : > { %8289 = vmatprep.subr.bf16.mxu0 %v9324_v43  ;;  %v10027_v20 = vpack.c.bf16 %v975_v17, %v974_v16  ;;  %v1614_v16 = vld [vmem:[%s9518_s20 + $0x63] sm:$0xff]  ;;  %v1615_v17 = vld [vmem:[%s9518_s20 + $0x6b] sm:$0xff] }
  0xbf   : > { %7786 = vmatmul.mubr.bf16.gmra.mrb[4].mxu1 %v9849_v26 }
  0xc0   : > { %8254 = vmatmul.mubr.bf16.gmra.mrb[4].mxu0 %v9851_v28  ;;  %7789 = vmatprep.mubr.bf16.mxu1 %v9853_v44 }
  0xc1   : > { %8257 = vmatprep.mubr.bf16.mxu0 %v9855_v45  ;;  %7822 = vmatpush3.bf16.msra.mxu1 %v9323_v42  ;;  %v3952_v42 = vld [vmem:[%s9523_s23 + $0xc2] sm:$0xff] }
  0xc2   : > { %8290 = vmatpush3.bf16.msra.mxu0 %v9324_v43  ;;  %7823 = vmatprep.subr.bf16.mxu1 %v9325_v46  ;;  %v3953_v43 = vld [vmem:[%s9523_s23 + $0xca] sm:$0xff] }
  0xc3   : > { %8291 = vmatprep.subr.bf16.mxu0 %v9326_v30  ;;  %v9977_v47 = vpack.c.bf16 %v3953_v43, %v3952_v42  ;;  %v1606_v42 = vld [vmem:[%s9518_s20 + $0x23] sm:$0xff]  ;;  %v1607_v43 = vld [vmem:[%s9518_s20 + $0x2b] sm:$0xff] }
  0xc5   : > { %7824 = vmatpush3.bf16.msra.mxu1 %v9325_v46  ;;  %v9971_v46 = vpack.c.bf16 %v963_v37, %v962_v36  ;;  %v9337_v36 = vld [vmem:[%s10827_s2 + $0x108] sm:$0xff]  }
  0xc6   : > { %8292 = vmatpush3.bf16.msra.mxu0 %v9326_v30  ;;  %7825 = vmatprep.subr.bf16.mxu1 %v9327_v54  ;;  %v9973_v30 = vpack.c.bf16 %v3951_v39, %v3950_v38  ;;  %v9338_v37 = vld [vmem:[%s10827_s2 + $0x348] sm:$0xff]  }
  0xc7   : > { %7790 = vmatmul.mubr.bf16.gmra.mrb[8].mxu1 %v9881_v56  ;;  %8293 = vmatprep.subr.bf16.mxu0 %v9328_v55 }
  0xc8   : > { %8258 = vmatmul.mubr.bf16.gmra.mrb[8].mxu0 %v9883_v57  ;;  %7793 = vmatprep.mubr.bf16.mxu1 %v9885_v58 }
  0xc9   : > { %8261 = vmatprep.mubr.bf16.mxu0 %v9887_v59  ;;  %7826 = vmatpush3.bf16.msra.mxu1 %v9327_v54  ;;  %v3956_v54 = vld [vmem:[%s9523_s23 + $0xe2] sm:$0xff] }
  0xca   : > { %8294 = vmatpush3.bf16.msra.mxu0 %v9328_v55  ;;  %7827 = vmatprep.subr.bf16.mxu1 %v9329_v60  ;;  %v3957_v55 = vld [vmem:[%s9523_s23 + $0xea] sm:$0xff] }
  0xcb   : > { %8295 = vmatprep.subr.bf16.mxu0 %v9330_v0  ;;  %v9997_v63 = vpack.c.bf16 %v3957_v55, %v3956_v54  ;;  %v9353_v54 = vld [vmem:[%s10827_s2 + $0x148] sm:$0xff]  }
  0xcc   : > { %v1610_v55 = vld [vmem:[%s9518_s20 + $0x43] sm:$0xff] }
  0xcd   : > { %7828 = vmatpush3.bf16.msra.mxu1 %v9329_v60  ;;  %v9991_v60 = vpack.c.bf16 %v967_v49, %v966_v48  ;;  %v1641_v48 = vpack.c.bf16 %v1607_v43, %v1606_v42  ;;  %v4596_v49 = vld [vmem:[%s9523_s23 + $0x33] sm:$0xff]  ;;  %v4610_v42 = vld [vmem:[%s9523_s23 + $0xa3] sm:$0xff]  ;;  %v4611_v43 = vld [vmem:[%s9523_s23 + $0xab] sm:$0xff] }
  0xce   : > { %8296 = vmatpush3.bf16.msra.mxu0 %v9330_v0  ;;  %7829 = vmatprep.subr.bf16.mxu1 %v9331_v6  ;;  %v970_v0 = vld [vmem:[%s9518_s20 + $0xf2] sm:$0xff]  ;;  %v4630_v53 = vpack.c.bf16 %v4597_v50, %v4596_v49  ;;  %v10215_v50 = vld [vmem:[%s10827_s2 + $0x3c0] sm:$0xff]  }
  0xcf   : > { %7794 = vmatmul.mubr.bf16.gmra.mrb[12].mxu1 %v9913_v8  ;;  %8297 = vmatprep.subr.bf16.mxu0 %v9332_v7 }
  0xd0   : > { %8262 = vmatmul.mubr.bf16.gmra.mrb[12].mxu0 %v9915_v9  ;;  %7797 = vmatprep.mubr.bf16.mxu1 %v9917_v10 }
  0xd1   : > { %8265 = vmatprep.mubr.bf16.mxu0 %v9919_v11  ;;  %7830 = vmatpush3.bf16.msra.mxu1 %v9331_v6  ;;  %v3960_v6 = vld [vmem:[%s9523_s23 + $0x102] sm:$0xff] }
  0xd2   : > { %8298 = vmatpush3.bf16.msra.mxu0 %v9332_v7  ;;  %7831 = vmatprep.subr.bf16.mxu1 %v9333_v12  ;;  %v3961_v7 = vld [vmem:[%s9523_s23 + $0x10a] sm:$0xff] }
  0xd3   : > { %8299 = vmatprep.subr.bf16.mxu0 %v9334_v13  ;;  %v10017_v15 = vpack.c.bf16 %v3961_v7, %v3960_v6 }
  0xd5   : > { %7832 = vmatpush3.bf16.msra.mxu1 %v9333_v12  ;;  %v10011_v12 = vpack.c.bf16 %v971_v1, %v970_v0  ;;  %v1612_v0 = vld [vmem:[%s9518_s20 + $0x53] sm:$0xff]  ;;  %v1613_v1 = vld [vmem:[%s9518_s20 + $0x5b] sm:$0xff] }
  0xd6   : > { %8300 = vmatpush3.bf16.msra.mxu0 %v9334_v13  ;;  %7869 = vmatprep.subr.bf16.mxu1 %v9942_v22  ;;  %v10013_v13 = vpack.c.bf16 %v3959_v3, %v3958_v2  ;;  %v9355_v2 = vld [vmem:[%s10827_s2 + $0x150] sm:$0xff]  }
  0xd7   : > { %7798 = vmatmul.mubr.bf16.gmra.mrb[16].mxu1 %v9944_v23  ;;  %8337 = vmatprep.subr.bf16.mxu0 %v9949_v27  ;;  %v4600_v3 = vld [vmem:[%s9523_s23 + $0x53] sm:$0xff] }
  0xd8   : > { %8266 = vmatmul.mubr.bf16.gmra.mrb[16].mxu0 %v9951_v31  ;;  %7801 = vmatprep.mubr.bf16.mxu1 %v9953_v34 }
  0xd9   : > { %8269 = vmatprep.mubr.bf16.mxu0 %v9955_v35 }
  0xdf   : > { %7802 = vmatmul.mubr.bf16.gmra.mrb[20].mxu1 %v9971_v46 }
  0xe0   : > { %8270 = vmatmul.mubr.bf16.gmra.mrb[20].mxu0 %v9973_v30  ;;  %7805 = vmatprep.mubr.bf16.mxu1 %v9975_v32 }
  0xe1   : > { %8273 = vmatprep.mubr.bf16.mxu0 %v9977_v47 }
  0xe7   : > { %7806 = vmatmul.mubr.bf16.gmra.mrb[24].mxu1 %v9991_v60 }
  0xe8   : > { %8274 = vmatmul.mubr.bf16.gmra.mrb[24].mxu0 %v9993_v61  ;;  %7809 = vmatprep.mubr.bf16.mxu1 %v9995_v62 }
  0xe9   : > { %8277 = vmatprep.mubr.bf16.mxu0 %v9997_v63 }
  0xef   : > { %7810 = vmatmul.mubr.bf16.gmra.mrb[28].mxu1 %v10011_v12 }
  0xf0   : > { %8278 = vmatmul.mubr.bf16.gmra.mrb[28].mxu0 %v10013_v13  ;;  %7813 = vmatprep.mubr.bf16.mxu1 %v10015_v14 }
  0xf1   : > { %8281 = vmatprep.mubr.bf16.mxu0 %v10017_v15 }
  0xf7   : > { %7814 = vmatmul.mubr.bf16.gmra.mrb[32].mxu1 %v10027_v20 }
  0xf8   : > { %8282 = vmatmul.mubr.bf16.gmra.mrb[32].mxu0 %v10029_v21  ;;  %7833 = vmatprep.mubr.bf16.mxu1 %v9815_v24  ;;  %v9339_v24 = vld [vmem:[%s10827_s2 + $0x110] sm:$0xff]  }
  0xf9   : > { %8301 = vmatprep.mubr.bf16.mxu0 %v9817_v25  ;;  %v9340_v25 = vld [vmem:[%s10827_s2 + $0x350] sm:$0xff]  }
  0xff   : > { %7834 = vmatmul.mubr.bf16.vlgmr.msra.gmra.mrb[0].mxu1 %v9822_v29  ;;  %v9341_v29 = vld [vmem:[%s10827_s2 + $0x118] sm:$0xff]  }
 0x100   : > { %8302 = vmatmul.mubr.bf16.vlgmr.msra.gmra.mrb[0].mxu0 %v9827_v33  ;;  %7870 = vmatpush3.bf16.msra.mxu1 %v9942_v22  ;;  %v9342_v33 = vld [vmem:[%s10827_s2 + $0x358] sm:$0xff]   ;;  %v4294_v22 = vld [vmem:[%s9523_s23 + $0x122] sm:$0xff] }
 0x101   : > { %8338 = vmatpush3.bf16.msra.mxu0 %v9949_v27  ;;  %7837 = vmatprep.mubr.bf16.mxu1 %v9849_v26  ;;  %v9343_v26 = vld [vmem:[%s10827_s2 + $0x120] sm:$0xff]   ;;  %v1604_v27 = vld [vmem:[%s9518_s20 + $0x13] sm:$0xff] }
 0x102   : > { %8305 = vmatprep.mubr.bf16.mxu0 %v9851_v28  ;;  %7871 = vmatprep.subr.bf16.mxu1 %v9337_v36  ;;  %v9344_v28 = vld [vmem:[%s10827_s2 + $0x360] sm:$0xff]  }
 0x103   : > { %8339 = vmatprep.subr.bf16.mxu0 %v9338_v37 }
 0x104   : > { %7872 = vmatpush3.bf16.msra.mxu1 %v9337_v36  ;;  %v4604_v36 = vld [vmem:[%s9523_s23 + $0x73] sm:$0xff] }
 0x105   : > { %8340 = vmatpush3.bf16.msra.mxu0 %v9338_v37  ;;  %7873 = vmatprep.subr.bf16.mxu1 %v9339_v24  ;;  %v4605_v37 = vld [vmem:[%s9523_s23 + $0x7b] sm:$0xff] }
 0x106   : > { %8341 = vmatprep.subr.bf16.mxu0 %v9340_v25 }
 0x107   : > { %7838 = vmatmul.mubr.bf16.gmra.mrb[4].mxu1 %v9853_v44  ;;  %v9345_v44 = vld [vmem:[%s10827_s2 + $0x128] sm:$0xff]  }
 0x108   : > { %8306 = vmatmul.mubr.bf16.gmra.mrb[4].mxu0 %v9855_v45  ;;  %7841 = vmatprep.mubr.bf16.mxu1 %v9881_v56  ;;  %v9346_v45 = vld [vmem:[%s10827_s2 + $0x368] sm:$0xff]   ;;  %v9347_v56 = vld [vmem:[%s10827_s2 + $0x130] sm:$0xff]  }
 0x109   : > { %8309 = vmatprep.mubr.bf16.mxu0 %v9883_v57  ;;  %7874 = vmatpush3.bf16.msra.mxu1 %v9339_v24  ;;  %v9348_v57 = vld [vmem:[%s10827_s2 + $0x370] sm:$0xff]   ;;  %v9359_v24 = vld [vmem:[%s10827_s2 + $0x160] sm:$0xff]  }
 0x10a   : > { %8342 = vmatpush3.bf16.msra.mxu0 %v9340_v25  ;;  %7875 = vmatprep.subr.bf16.mxu1 %v9341_v29  ;;  %v1645_v25 = vpack.c.bf16 %v1615_v17, %v1614_v16  ;;  %v4620_v16 = vld [vmem:[%s9523_s23 + $0xf3] sm:$0xff]  ;;  %v4621_v17 = vld [vmem:[%s9523_s23 + $0xfb] sm:$0xff] }
 0x10b   : > { %8343 = vmatprep.subr.bf16.mxu0 %v9342_v33 }
 0x10d   : > { %7876 = vmatpush3.bf16.msra.mxu1 %v9341_v29  ;;  %v9360_v29 = vld [vmem:[%s10827_s2 + $0x3a0] sm:$0xff]  }
 0x10e   : > { %8344 = vmatpush3.bf16.msra.mxu0 %v9342_v33  ;;  %7877 = vmatprep.subr.bf16.mxu1 %v9343_v26  ;;  %v4633_v33 = vpack.c.bf16 %v4603_v19, %v4602_v18 }
 0x10f   : > { %7842 = vmatmul.mubr.bf16.gmra.mrb[8].mxu1 %v9885_v58  ;;  %8345 = vmatprep.subr.bf16.mxu0 %v9344_v28  ;;  %v9349_v58 = vld [vmem:[%s10827_s2 + $0x138] sm:$0xff]  }
 0x110   : > { %8310 = vmatmul.mubr.bf16.gmra.mrb[8].mxu0 %v9887_v59  ;;  %7845 = vmatprep.mubr.bf16.mxu1 %v9913_v8  ;;  %v9350_v59 = vld [vmem:[%s10827_s2 + $0x378] sm:$0xff]   ;;  %v9351_v8 = vld [vmem:[%s10827_s2 + $0x140] sm:$0xff]  }
 0x111   : > { %8313 = vmatprep.mubr.bf16.mxu0 %v9915_v9  ;;  %7878 = vmatpush3.bf16.msra.mxu1 %v9343_v26  ;;  %v9352_v9 = vld [vmem:[%s10827_s2 + $0x380] sm:$0xff]  }
 0x112   : > { %8346 = vmatpush3.bf16.msra.mxu0 %v9344_v28  ;;  %7879 = vmatprep.subr.bf16.mxu1 %v9345_v44  ;;  %v4634_v28 = vpack.c.bf16 %v4605_v37, %v4604_v36  ;;  %v1634_v36 = vld [vmem:[%s9518_s20 + $0x103] sm:$0xff]  ;;  %v1635_v37 = vld [vmem:[%s9518_s20 + $0x10b] sm:$0xff] }
 0x113   : > { %8347 = vmatprep.subr.bf16.mxu0 %v9346_v45 }
 0x115   : > { %7880 = vmatpush3.bf16.msra.mxu1 %v9345_v44  ;;  %v9361_v44 = vld [vmem:[%s10827_s2 + $0x168] sm:$0xff]  }
 0x116   : > { %8348 = vmatpush3.bf16.msra.mxu0 %v9346_v45  ;;  %7881 = vmatprep.subr.bf16.mxu1 %v9347_v56  ;;  %v9362_v45 = vld [vmem:[%s10827_s2 + $0x3a8] sm:$0xff]  }
 0x117   : > { %7846 = vmatmul.mubr.bf16.gmra.mrb[12].mxu1 %v9917_v10  ;;  %8349 = vmatprep.subr.bf16.mxu0 %v9348_v57  ;;  %v1306_v10 = vld [vmem:[%s9518_s20 + $0x122] sm:$0xff] }
 0x118   : > { %8314 = vmatmul.mubr.bf16.gmra.mrb[12].mxu0 %v9919_v11  ;;  %7849 = vmatprep.mubr.bf16.mxu1 %v9944_v23  ;;  %v1307_v11 = vld [vmem:[%s9518_s20 + $0x12a] sm:$0xff] }
 0x119   : > { %8317 = vmatprep.mubr.bf16.mxu0 %v9951_v31  ;;  %7882 = vmatpush3.bf16.msra.mxu1 %v9347_v56  ;;  %v4295_v23 = vld [vmem:[%s9523_s23 + $0x12a] sm:$0xff]  ;;  %v1605_v31 = vld [vmem:[%s9518_s20 + $0x1b] sm:$0xff]  ;;  %v1325_v38 = vpack.c.bf16 %v1307_v11, %v1306_v10  ;;  %v4608_v10 = vld [vmem:[%s9523_s23 + $0x93] sm:$0xff] }
 0x11a   : > { %8350 = vmatpush3.bf16.msra.mxu0 %v9348_v57  ;;  %7883 = vmatprep.subr.bf16.mxu1 %v9349_v58  ;;  %v4313_v39 = vpack.c.bf16 %v4295_v23, %v4294_v22  ;;  %v1640_v40 = vpack.c.bf16 %v1605_v31, %v1604_v27  ;;  %v1618_v56 = vld [vmem:[%s9518_s20 + $0x83] sm:$0xff]  ;;  %v1619_v57 = vld [vmem:[%s9518_s20 + $0x8b] sm:$0xff]  ;;  %v4609_v11 = vld [vmem:[%s9523_s23 + $0x9b] sm:$0xff] }
 0x11b   : > { %8351 = vmatprep.subr.bf16.mxu0 %v9350_v59  ;;  %v9363_v22 = vld [vmem:[%s10827_s2 + $0x170] sm:$0xff]   ;;  %v1647_v23 = vpack.c.bf16 %v1619_v57, %v1618_v56 }
 0x11c   : > { %v9364_v27 = vld [vmem:[%s10827_s2 + $0x3b0] sm:$0xff]  }
 0x11d   : > { %7884 = vmatpush3.bf16.msra.mxu1 %v9349_v58  ;;  %v4606_v58 = vld [vmem:[%s9523_s23 + $0x83] sm:$0xff] }
 0x11e   : > { %8352 = vmatpush3.bf16.msra.mxu0 %v9350_v59  ;;  %7921 = vmatprep.subr.bf16.mxu1 %v9351_v8  ;;  %v4607_v59 = vld [vmem:[%s9523_s23 + $0x8b] sm:$0xff] }
 0x11f   : > { %7850 = vmatmul.mubr.bf16.gmra.mrb[16].mxu1 %v9953_v34  ;;  %8389 = vmatprep.subr.bf16.mxu0 %v9352_v9  ;;  %v4592_v34 = vld [vmem:[%s9523_s23 + $0x13] sm:$0xff]  ;;  %v4635_v31 = vpack.c.bf16 %v4607_v59, %v4606_v58  ;;  %v1638_v58 = vld [vmem:[%s9518_s20 + $0x123] sm:$0xff]  ;;  %v1639_v59 = vld [vmem:[%s9518_s20 + $0x12b] sm:$0xff] }
 0x120   : > { %8318 = vmatmul.mubr.bf16.gmra.mrb[16].mxu0 %v9955_v35  ;;  %7853 = vmatprep.mubr.bf16.mxu1 %v9971_v46  ;;  %v4593_v35 = vld [vmem:[%s9523_s23 + $0x1b] sm:$0xff]  ;;  %v4594_v46 = vld [vmem:[%s9523_s23 + $0x23] sm:$0xff] }
 0x121   : > { %8321 = vmatprep.mubr.bf16.mxu0 %v9973_v30  ;;  %v4628_v41 = vpack.c.bf16 %v4593_v35, %v4592_v34  ;;  %v4595_v30 = vld [vmem:[%s9523_s23 + $0x2b] sm:$0xff]  ;;  %v4636_v35 = vpack.c.bf16 %v4609_v11, %v4608_v10  ;;  %v1936_v10 = vld [vmem:[%s9518_s20 + $0x14] sm:$0xff]  ;;  %v1937_v11 = vld [vmem:[%s9518_s20 + $0x1c] sm:$0xff] }
 0x122   : > { %v4629_v51 = vpack.c.bf16 %v4595_v30, %v4594_v46  ;;  %v1624_v46 = vld [vmem:[%s9518_s20 + $0xb3] sm:$0xff]  ;;  %v1625_v30 = vld [vmem:[%s9518_s20 + $0xbb] sm:$0xff] }
 0x127   : > { %7854 = vmatmul.mubr.bf16.gmra.mrb[20].mxu1 %v9975_v32  ;;  %v1608_v32 = vld [vmem:[%s9518_s20 + $0x33] sm:$0xff] }
 0x128   : > { %8322 = vmatmul.mubr.bf16.gmra.mrb[20].mxu0 %v9977_v47  ;;  %7857 = vmatprep.mubr.bf16.mxu1 %v9991_v60  ;;  %v1609_v47 = vld [vmem:[%s9518_s20 + $0x3b] sm:$0xff]  ;;  %v9354_v60 = vld [vmem:[%s10827_s2 + $0x388] sm:$0xff]  }
 0x129   : > { %8325 = vmatprep.mubr.bf16.mxu0 %v9993_v61  ;;  %v1642_v52 = vpack.c.bf16 %v1609_v47, %v1608_v32  ;;  %v1611_v61 = vld [vmem:[%s9518_s20 + $0x4b] sm:$0xff]  ;;  %v4612_v32 = vld [vmem:[%s9523_s23 + $0xb3] sm:$0xff]  ;;  %v4613_v47 = vld [vmem:[%s9523_s23 + $0xbb] sm:$0xff] }
 0x12a   : > { %v1643_v6 = vpack.c.bf16 %v1611_v61, %v1610_v55  ;;  %v1627_v55 = vld [vmem:[%s9518_s20 + $0xcb] sm:$0xff] }
 0x12b   : > { %v4615_v61 = vld [vmem:[%s9523_s23 + $0xcb] sm:$0xff] }
 0x12f   : > { %7858 = vmatmul.mubr.bf16.gmra.mrb[24].mxu1 %v9995_v62  ;;  %v4598_v62 = vld [vmem:[%s9523_s23 + $0x43] sm:$0xff] }
 0x130   : > { %8326 = vmatmul.mubr.bf16.gmra.mrb[24].mxu0 %v9997_v63  ;;  %7861 = vmatprep.mubr.bf16.mxu1 %v10011_v12  ;;  %v4599_v63 = vld [vmem:[%s9523_s23 + $0x4b] sm:$0xff]  ;;  %v1644_v12 = vpack.c.bf16 %v1613_v1, %v1612_v0  ;;  %v4616_v0 = vld [vmem:[%s9523_s23 + $0xd3] sm:$0xff]  ;;  %v4617_v1 = vld [vmem:[%s9523_s23 + $0xdb] sm:$0xff] }
 0x131   : > { %8329 = vmatprep.mubr.bf16.mxu0 %v10013_v13  ;;  %v4631_v7 = vpack.c.bf16 %v4599_v63, %v4598_v62  ;;  %v4632_v13 = vpack.c.bf16 %v4601_v4, %v4600_v3  ;;  %v1628_v62 = vld [vmem:[%s9518_s20 + $0xd3] sm:$0xff]  ;;  %v1629_v63 = vld [vmem:[%s9518_s20 + $0xdb] sm:$0xff] }
 0x132   : > { %v1652_v4 = vpack.c.bf16 %v1629_v63, %v1628_v62  ;;  %v1944_v62 = vld [vmem:[%s9518_s20 + $0x54] sm:$0xff]  ;;  %v1945_v63 = vld [vmem:[%s9518_s20 + $0x5c] sm:$0xff] }
 0x137   : > { %7862 = vmatmul.mubr.bf16.gmra.mrb[28].mxu1 %v10015_v14  ;;  %v9357_v14 = vld [vmem:[%s10827_s2 + $0x158] sm:$0xff]  }
 0x138   : > { %8330 = vmatmul.mubr.bf16.gmra.mrb[28].mxu0 %v10017_v15  ;;  %7865 = vmatprep.mubr.bf16.mxu1 %v10027_v20  ;;  %v9358_v15 = vld [vmem:[%s10827_s2 + $0x398] sm:$0xff]  }
 0x139   : > { %8333 = vmatprep.mubr.bf16.mxu0 %v10029_v21  ;;  %v1616_v20 = vld [vmem:[%s9518_s20 + $0x73] sm:$0xff]  ;;  %v1617_v21 = vld [vmem:[%s9518_s20 + $0x7b] sm:$0xff] }
 0x13a   : > { %v1646_v26 = vpack.c.bf16 %v1617_v21, %v1616_v20  ;;  %v4642_v21 = vpack.c.bf16 %v4621_v17, %v4620_v16  ;;  %v1948_v16 = vld [vmem:[%s9518_s20 + $0x74] sm:$0xff]  ;;  %v1949_v17 = vld [vmem:[%s9518_s20 + $0x7c] sm:$0xff] }
 0x13f   : > { %7866 = vmatmul.mubr.bf16.gmra.mrb[32].mxu1 %v1325_v38  ;;  %v9365_v38 = vld [vmem:[%s10827_s2 + $0x178] sm:$0xff]  }
 0x140   : > { %8334 = vmatmul.mubr.bf16.gmra.mrb[32].mxu0 %v4313_v39  ;;  %7885 = vmatprep.mubr.bf16.mxu1 %v1640_v40  ;;  %v9366_v39 = vld [vmem:[%s10827_s2 + $0x3b8] sm:$0xff]   ;;  %v1622_v40 = vld [vmem:[%s9518_s20 + $0xa3] sm:$0xff] }
 0x141   : > { %8353 = vmatprep.mubr.bf16.mxu0 %v4628_v41  ;;  %v1623_v41 = vld [vmem:[%s9518_s20 + $0xab] sm:$0xff] }
 0x142   : > { %v1649_v49 = vpack.c.bf16 %v1623_v41, %v1622_v40  ;;  %v4926_v40 = vld [vmem:[%s9523_s23 + $0x24] sm:$0xff]  ;;  %v4927_v41 = vld [vmem:[%s9523_s23 + $0x2c] sm:$0xff] }
 0x147   : > { %7886 = vmatmul.mubr.bf16.vlgmr.msra.gmra.mrb[0].mxu1 %v1641_v48  ;;  %v10210_v48 = vld [vmem:[%s10827_s2 + $0x180] sm:$0xff]  }
 0x148   : > { %8354 = vmatmul.mubr.bf16.vlgmr.msra.gmra.mrb[0].mxu0 %v4629_v51  ;;  %7922 = vmatpush3.bf16.msra.mxu1 %v9351_v8  ;;  %v1620_v8 = vld [vmem:[%s9518_s20 + $0x93] sm:$0xff]  ;;  %v4637_v51 = vpack.c.bf16 %v4611_v43, %v4610_v42  ;;  %v1941_v43 = vld [vmem:[%s9518_s20 + $0x3c] sm:$0xff] }
 0x149   : > { %8390 = vmatpush3.bf16.msra.mxu0 %v9352_v9  ;;  %7889 = vmatprep.mubr.bf16.mxu1 %v1642_v52  ;;  %v1621_v9 = vld [vmem:[%s9518_s20 + $0x9b] sm:$0xff]  ;;  %v1650_v52 = vpack.c.bf16 %v1625_v30, %v1624_v46 }
 0x14a   : > { %8357 = vmatprep.mubr.bf16.mxu0 %v4630_v53  ;;  %7923 = vmatprep.subr.bf16.mxu1 %v9353_v54  ;;  %v1648_v34 = vpack.c.bf16 %v1621_v9, %v1620_v8  ;;  %v4638_v53 = vpack.c.bf16 %v4613_v47, %v4612_v32  ;;  %v4626_v8 = vld [vmem:[%s9523_s23 + $0x123] sm:$0xff]  ;;  %v4627_v9 = vld [vmem:[%s9523_s23 + $0x12b] sm:$0xff]  ;;  %v1940_v42 = vld [vmem:[%s9518_s20 + $0x34] sm:$0xff]  ;;  %v10261_v47 = vpack.c.bf16 %v4927_v41, %v4926_v40 }
 0x14b   : > { %8391 = vmatprep.subr.bf16.mxu0 %v9354_v60  ;;  %v4928_v30 = vld [vmem:[%s9523_s23 + $0x34] sm:$0xff]  ;;  %v4929_v32 = vld [vmem:[%s9523_s23 + $0x3c] sm:$0xff] }
 0x14c   : > { %7924 = vmatpush3.bf16.msra.mxu1 %v9353_v54  ;;  %v1626_v54 = vld [vmem:[%s9518_s20 + $0xc3] sm:$0xff]  ;;  %v1956_v40 = vld [vmem:[%s9518_s20 + $0xb4] sm:$0xff] }
 0x14d   : > { %8392 = vmatpush3.bf16.msra.mxu0 %v9354_v60  ;;  %7925 = vmatprep.subr.bf16.mxu1 %v9355_v2  ;;  %v4614_v60 = vld [vmem:[%s9523_s23 + $0xc3] sm:$0xff] }
 0x14e   : > { %8393 = vmatprep.subr.bf16.mxu0 %v9356_v5  ;;  %v4639_v3 = vpack.c.bf16 %v4615_v61, %v4614_v60  ;;  %v4930_v60 = vld [vmem:[%s9523_s23 + $0x44] sm:$0xff]  ;;  %v4931_v61 = vld [vmem:[%s9523_s23 + $0x4c] sm:$0xff]  ;;  %v1957_v41 = vld [vmem:[%s9518_s20 + $0xbc] sm:$0xff] }
 0x14f   : > { %7890 = vmatmul.mubr.bf16.gmra.mrb[4].mxu1 %v1643_v6  ;;  %v1630_v6 = vld [vmem:[%s9518_s20 + $0xe3] sm:$0xff] }
 0x150   : > { %8358 = vmatmul.mubr.bf16.gmra.mrb[4].mxu0 %v4631_v7  ;;  %7893 = vmatprep.mubr.bf16.mxu1 %v1644_v12  ;;  %v1631_v7 = vld [vmem:[%s9518_s20 + $0xeb] sm:$0xff]  ;;  %v4618_v12 = vld [vmem:[%s9523_s23 + $0xe3] sm:$0xff] }
 0x151   : > { %8361 = vmatprep.mubr.bf16.mxu0 %v4632_v13  ;;  %7926 = vmatpush3.bf16.msra.mxu1 %v9355_v2  ;;  %v1651_v2 = vpack.c.bf16 %v1627_v55, %v1626_v54  ;;  %v4619_v13 = vld [vmem:[%s9523_s23 + $0xeb] sm:$0xff]  ;;  %v1653_v18 = vpack.c.bf16 %v1631_v7, %v1630_v6  ;;  %v9373_v6 = vld [vmem:[%s10827_s2 + $0x198] sm:$0xff]  }
 0x152   : > { %8394 = vmatpush3.bf16.msra.mxu0 %v9356_v5  ;;  %7927 = vmatprep.subr.bf16.mxu1 %v9357_v14  ;;  %v4640_v5 = vpack.c.bf16 %v4617_v1, %v4616_v0  ;;  %v4641_v19 = vpack.c.bf16 %v4619_v13, %v4618_v12  ;;  %v9370_v54 = vld [vmem:[%s10827_s2 + $0x3c8] sm:$0xff]   ;;  %v9371_v0 = vld [vmem:[%s10827_s2 + $0x190] sm:$0xff]   ;;  %v9374_v7 = vld [vmem:[%s10827_s2 + $0x3d8] sm:$0xff]  }
 0x153   : > { %8395 = vmatprep.subr.bf16.mxu0 %v9358_v15  ;;  %v1943_v55 = vld [vmem:[%s9518_s20 + $0x4c] sm:$0xff]  ;;  %v4932_v1 = vld [vmem:[%s9523_s23 + $0x54] sm:$0xff]  ;;  %v1946_v12 = vld [vmem:[%s9518_s20 + $0x64] sm:$0xff] }
 0x154   : > { %v1947_v13 = vld [vmem:[%s9518_s20 + $0x6c] sm:$0xff] }
 0x155   : > { %7928 = vmatpush3.bf16.msra.mxu1 %v9357_v14  ;;  %v1632_v14 = vld [vmem:[%s9518_s20 + $0xf3] sm:$0xff] }
 0x156   : > { %8396 = vmatpush3.bf16.msra.mxu0 %v9358_v15  ;;  %7929 = vmatprep.subr.bf16.mxu1 %v9359_v24  ;;  %v1633_v15 = vld [vmem:[%s9518_s20 + $0xfb] sm:$0xff] }
 0x157   : > { %7894 = vmatmul.mubr.bf16.gmra.mrb[8].mxu1 %v1645_v25  ;;  %8397 = vmatprep.subr.bf16.mxu0 %v9360_v29  ;;  %v1654_v20 = vpack.c.bf16 %v1633_v15, %v1632_v14  ;;  %v4623_v25 = vld [vmem:[%s9523_s23 + $0x10b] sm:$0xff] }
 0x158   : > { %8362 = vmatmul.mubr.bf16.gmra.mrb[8].mxu0 %v4633_v33  ;;  %7897 = vmatprep.mubr.bf16.mxu1 %v1646_v26  ;;  %v1637_v33 = vld [vmem:[%s9518_s20 + $0x11b] sm:$0xff]  ;;  %v4624_v26 = vld [vmem:[%s9523_s23 + $0x113] sm:$0xff]  ;;  %v4934_v14 = vld [vmem:[%s9523_s23 + $0x64] sm:$0xff] }
 0x159   : > { %8365 = vmatprep.mubr.bf16.mxu0 %v4634_v28  ;;  %7930 = vmatpush3.bf16.msra.mxu1 %v9359_v24  ;;  %v4622_v24 = vld [vmem:[%s9523_s23 + $0x103] sm:$0xff]  ;;  %v4625_v28 = vld [vmem:[%s9523_s23 + $0x11b] sm:$0xff]  ;;  %v4935_v15 = vld [vmem:[%s9523_s23 + $0x6c] sm:$0xff] }
 0x15a   : > { %8398 = vmatpush3.bf16.msra.mxu0 %v9360_v29  ;;  %7931 = vmatprep.subr.bf16.mxu1 %v9361_v44  ;;  %v1636_v29 = vld [vmem:[%s9518_s20 + $0x113] sm:$0xff]  ;;  %v4644_v57 = vpack.c.bf16 %v4625_v28, %v4624_v26  ;;  %v1950_v26 = vld [vmem:[%s9518_s20 + $0x84] sm:$0xff] }
 0x15b   : > { %8399 = vmatprep.subr.bf16.mxu0 %v9362_v45  ;;  %v1656_v56 = vpack.c.bf16 %v1637_v33, %v1636_v29  ;;  %v9377_v29 = vld [vmem:[%s10827_s2 + $0x1a8] sm:$0xff]  }
 0x15c   : > { %v9378_v33 = vld [vmem:[%s10827_s2 + $0x3e8] sm:$0xff]  }
 0x15d   : > { %7932 = vmatpush3.bf16.msra.mxu1 %v9361_v44  ;;  %v1655_v44 = vpack.c.bf16 %v1635_v37, %v1634_v36  ;;  %v9376_v36 = vld [vmem:[%s10827_s2 + $0x3e0] sm:$0xff]   ;;  %v10327_v37 = vpack.c.bf16 %v4935_v15, %v4934_v14  ;;  %v1951_v28 = vld [vmem:[%s9518_s20 + $0x8c] sm:$0xff] }
 0x15e   : > { %8400 = vmatpush3.bf16.msra.mxu0 %v9362_v45  ;;  %7933 = vmatprep.subr.bf16.mxu1 %v9363_v22  ;;  %v4643_v45 = vpack.c.bf16 %v4623_v25, %v4622_v24  ;;  %v10329_v24 = vpack.c.bf16 %v1949_v17, %v1948_v16  ;;  %v1962_v14 = vld [vmem:[%s9518_s20 + $0xe4] sm:$0xff]  ;;  %v1963_v15 = vld [vmem:[%s9518_s20 + $0xec] sm:$0xff] }
 0x15f   : > { %7898 = vmatmul.mubr.bf16.gmra.mrb[12].mxu1 %v1647_v23  ;;  %8401 = vmatprep.subr.bf16.mxu0 %v9364_v27  ;;  %v4925_v23 = vld [vmem:[%s9523_s23 + $0x1c] sm:$0xff]  ;;  %v4950_v16 = vld [vmem:[%s9523_s23 + $0xe4] sm:$0xff]  ;;  %v4951_v17 = vld [vmem:[%s9523_s23 + $0xec] sm:$0xff] }
 0x160   : > { %8366 = vmatmul.mubr.bf16.gmra.mrb[12].mxu0 %v4635_v31  ;;  %7901 = vmatprep.mubr.bf16.mxu1 %v1648_v34  ;;  %v4645_v31 = vpack.c.bf16 %v4627_v9, %v4626_v8  ;;  %v1972_v34 = vpack.c.bf16 %v1937_v11, %v1936_v10  ;;  %v9379_v8 = vld [vmem:[%s10827_s2 + $0x1b0] sm:$0xff]   ;;  %v10354_v9 = vpack.c.bf16 %v1951_v28, %v1950_v26 }
 0x161   : > { %8369 = vmatprep.mubr.bf16.mxu0 %v4636_v35  ;;  %7934 = vmatpush3.bf16.msra.mxu1 %v9363_v22  ;;  %v4924_v22 = vld [vmem:[%s9523_s23 + $0x14] sm:$0xff] }
 0x162   : > { %8402 = vmatpush3.bf16.msra.mxu0 %v9364_v27  ;;  %7935 = vmatprep.subr.bf16.mxu1 %v9365_v38  ;;  %v1657_v27 = vpack.c.bf16 %v1639_v59, %v1638_v58  ;;  %v4960_v35 = vpack.c.bf16 %v4925_v23, %v4924_v22  ;;  %v4940_v58 = vld [vmem:[%s9523_s23 + $0x94] sm:$0xff]  ;;  %v4941_v59 = vld [vmem:[%s9523_s23 + $0x9c] sm:$0xff] }
 0x163   : > { %8403 = vmatprep.subr.bf16.mxu0 %v9366_v39  ;;  %v9380_v10 = vld [vmem:[%s10827_s2 + $0x3f0] sm:$0xff]   ;;  %v10363_v23 = vpack.c.bf16 %v4941_v59, %v4940_v58  ;;  %v1969_v59 = vld [vmem:[%s9518_s20 + $0x11c] sm:$0xff] }
 0x164   : > { %v1968_v58 = vld [vmem:[%s9518_s20 + $0x114] sm:$0xff] }
 0x165   : > { %7936 = vmatpush3.bf16.msra.mxu1 %v9365_v38  ;;  %v1938_v38 = vld [vmem:[%s9518_s20 + $0x24] sm:$0xff] }
 0x166   : > { %8404 = vmatpush3.bf16.msra.mxu0 %v9366_v39  ;;  %7973 = vmatprep.subr.bf16.mxu1 %v10210_v48  ;;  %v1939_v39 = vld [vmem:[%s9518_s20 + $0x2c] sm:$0xff] }
 0x167   : > { %7902 = vmatmul.mubr.bf16.gmra.mrb[16].mxu1 %v1649_v49  ;;  %8441 = vmatprep.subr.bf16.mxu0 %v10215_v50  ;;  %v10257_v46 = vpack.c.bf16 %v1939_v39, %v1938_v38  ;;  %v10263_v49 = vpack.c.bf16 %v1941_v43, %v1940_v42  ;;  %v4942_v38 = vld [vmem:[%s9523_s23 + $0xa4] sm:$0xff]  ;;  %v4943_v39 = vld [vmem:[%s9523_s23 + $0xac] sm:$0xff]  ;;  %v4944_v42 = vld [vmem:[%s9523_s23 + $0xb4] sm:$0xff] }
 0x168   : > { %8370 = vmatmul.mubr.bf16.gmra.mrb[16].mxu0 %v4637_v51  ;;  %7905 = vmatprep.mubr.bf16.mxu1 %v1650_v52  ;;  %v10265_v51 = vpack.c.bf16 %v4929_v32, %v4928_v30  ;;  %v9369_v52 = vld [vmem:[%s10827_s2 + $0x188] sm:$0xff]   ;;  %v4945_v43 = vld [vmem:[%s9523_s23 + $0xbc] sm:$0xff] }
 0x169   : > { %8373 = vmatprep.mubr.bf16.mxu0 %v4638_v53  ;;  %v1942_v53 = vld [vmem:[%s9518_s20 + $0x44] sm:$0xff] }
 0x16a   : > { %v10386_v30 = vld [vmem:[%s10827_s2 + $0x1c0] sm:$0xff]  }
 0x16f   : > { %7906 = vmatmul.mubr.bf16.gmra.mrb[20].mxu1 %v1651_v2  ;;  %v4933_v2 = vld [vmem:[%s9523_s23 + $0x5c] sm:$0xff] }
 0x170   : > { %8374 = vmatmul.mubr.bf16.gmra.mrb[20].mxu0 %v4639_v3  ;;  %7909 = vmatprep.mubr.bf16.mxu1 %v1652_v4  ;;  %v10295_v3 = vpack.c.bf16 %v4931_v61, %v4930_v60  ;;  %v10297_v4 = vpack.c.bf16 %v1945_v63, %v1944_v62  ;;  %v1958_v60 = vld [vmem:[%s9518_s20 + $0xc4] sm:$0xff]  ;;  %v1959_v61 = vld [vmem:[%s9518_s20 + $0xcc] sm:$0xff] }
 0x171   : > { %8377 = vmatprep.mubr.bf16.mxu0 %v4640_v5  ;;  %v10299_v5 = vpack.c.bf16 %v4933_v2, %v4932_v1  ;;  %v4946_v62 = vld [vmem:[%s9523_s23 + $0xc4] sm:$0xff]  ;;  %v4947_v63 = vld [vmem:[%s9523_s23 + $0xcc] sm:$0xff]  ;;  %v1961_v1 = vld [vmem:[%s9518_s20 + $0xdc] sm:$0xff] }
 0x172   : > { %v4948_v2 = vld [vmem:[%s9523_s23 + $0xd4] sm:$0xff] }
 0x177   : > { %7910 = vmatmul.mubr.bf16.gmra.mrb[24].mxu1 %v1653_v18  ;;  %v4936_v18 = vld [vmem:[%s9523_s23 + $0x74] sm:$0xff] }
 0x178   : > { %8378 = vmatmul.mubr.bf16.gmra.mrb[24].mxu0 %v4641_v19  ;;  %7913 = vmatprep.mubr.bf16.mxu1 %v1654_v20  ;;  %v4937_v19 = vld [vmem:[%s9523_s23 + $0x7c] sm:$0xff] }
 0x179   : > { %8381 = vmatprep.mubr.bf16.mxu0 %v4642_v21  ;;  %v9375_v20 = vld [vmem:[%s10827_s2 + $0x1a0] sm:$0xff]   ;;  %v10322_v21 = vpack.c.bf16 %v1947_v13, %v1946_v12  ;;  %v10331_v25 = vpack.c.bf16 %v4937_v19, %v4936_v18  ;;  %v1964_v18 = vld [vmem:[%s9518_s20 + $0xf4] sm:$0xff] }
 0x17a   : > { %v1965_v19 = vld [vmem:[%s9518_s20 + $0xfc] sm:$0xff] }
 0x17b   : > { %v10439_v26 = vpack.c.bf16 %v1965_v19, %v1964_v18 }
 0x17f   : > { %7914 = vmatmul.mubr.bf16.gmra.mrb[28].mxu1 %v1655_v44  ;;  %v4938_v44 = vld [vmem:[%s9523_s23 + $0x84] sm:$0xff] }
 0x180   : > { %8382 = vmatmul.mubr.bf16.gmra.mrb[28].mxu0 %v4643_v45  ;;  %7917 = vmatprep.mubr.bf16.mxu1 %v1656_v56  ;;  %v4939_v45 = vld [vmem:[%s9523_s23 + $0x8c] sm:$0xff]  ;;  %v1952_v56 = vld [vmem:[%s9518_s20 + $0x94] sm:$0xff] }
 0x181   : > { %8385 = vmatprep.mubr.bf16.mxu0 %v4644_v57  ;;  %v1953_v57 = vld [vmem:[%s9518_s20 + $0x9c] sm:$0xff]  ;;  %v10359_v11 = vpack.c.bf16 %v4939_v45, %v4938_v44  ;;  %v1966_v44 = vld [vmem:[%s9518_s20 + $0x104] sm:$0xff]  ;;  %v1967_v45 = vld [vmem:[%s9518_s20 + $0x10c] sm:$0xff] }
 0x182   : > { %v10361_v22 = vpack.c.bf16 %v1953_v57, %v1952_v56  ;;  %v4954_v56 = vld [vmem:[%s9523_s23 + $0x104] sm:$0xff]  ;;  %v4955_v57 = vld [vmem:[%s9523_s23 + $0x10c] sm:$0xff] }
 0x187   : > { %7918 = vmatmul.mubr.bf16.gmra.mrb[32].mxu1 %v1657_v27  ;;  %v9381_v27 = vld [vmem:[%s10827_s2 + $0x1b8] sm:$0xff]  }
 0x188   : > { %8386 = vmatmul.mubr.bf16.gmra.mrb[32].mxu0 %v4645_v31  ;;  %7937 = vmatprep.mubr.bf16.mxu1 %v1972_v34  ;;  %v9382_v31 = vld [vmem:[%s10827_s2 + $0x3f8] sm:$0xff]   ;;  %v1954_v34 = vld [vmem:[%s9518_s20 + $0xa4] sm:$0xff] }
 0x189   : > { %8405 = vmatprep.mubr.bf16.mxu0 %v4960_v35  ;;  %v1955_v35 = vld [vmem:[%s9518_s20 + $0xac] sm:$0xff] }
 0x18a   : > { %v10388_v32 = vpack.c.bf16 %v1955_v35, %v1954_v34  ;;  %v10459_v34 = vpack.c.bf16 %v1969_v59, %v1968_v58  ;;  %v5597_v58 = vld [vmem:[%s9523_s23 + $0x6d] sm:$0xff] }
 0x18b   : > { %v9404_v59 = vld [vmem:[%s10827_s2 + $0x450] sm:$0xff]  }
 0x18f   : > { %7938 = vmatmul.mubr.bf16.vlgmr.msra.gmra.mrb[0].mxu1 %v10257_v46 }
 0x190   : > { %8406 = vmatmul.mubr.bf16.vlgmr.msra.gmra.mrb[0].mxu0 %v10261_v47  ;;  %7974 = vmatpush3.bf16.msra.mxu1 %v10210_v48  ;;  %v9372_v48 = vld [vmem:[%s10827_s2 + $0x3d0] sm:$0xff]  }
 0x191   : > { %8442 = vmatpush3.bf16.msra.mxu0 %v10215_v50  ;;  %7941 = vmatprep.mubr.bf16.mxu1 %v10263_v49  ;;  %v10293_v50 = vpack.c.bf16 %v1943_v55, %v1942_v53  ;;  %v10395_v53 = vpack.c.bf16 %v4943_v39, %v4942_v38  ;;  %v10399_v55 = vpack.c.bf16 %v4945_v43, %v4944_v42  ;;  %v1970_v38 = vld [vmem:[%s9518_s20 + $0x124] sm:$0xff]  ;;  %v1971_v39 = vld [vmem:[%s9518_s20 + $0x12c] sm:$0xff] }
 0x192   : > { %8409 = vmatprep.mubr.bf16.mxu0 %v10265_v51  ;;  %7975 = vmatprep.subr.bf16.mxu1 %v9369_v52  ;;  %v10471_v42 = vpack.c.bf16 %v1971_v39, %v1970_v38  ;;  %v2610_v38 = vld [vmem:[%s9518_s20 + $0x75] sm:$0xff]  ;;  %v2611_v39 = vld [vmem:[%s9518_s20 + $0x7d] sm:$0xff] }
 0x193   : > { %8443 = vmatprep.subr.bf16.mxu0 %v9370_v54 }
 0x194   : > { %7976 = vmatpush3.bf16.msra.mxu1 %v9369_v52  ;;  %v10393_v52 = vld [vmem:[%s10827_s2 + $0x400] sm:$0xff]  }
 0x195   : > { %8444 = vmatpush3.bf16.msra.mxu0 %v9370_v54  ;;  %7977 = vmatprep.subr.bf16.mxu1 %v9371_v0  ;;  %v10397_v54 = vpack.c.bf16 %v1957_v41, %v1956_v40  ;;  %v4958_v40 = vld [vmem:[%s9523_s23 + $0x124] sm:$0xff]  ;;  %v4959_v41 = vld [vmem:[%s9523_s23 + $0x12c] sm:$0xff] }
 0x196   : > { %8445 = vmatprep.subr.bf16.mxu0 %v9372_v48  ;;  %v10473_v43 = vpack.c.bf16 %v4959_v41, %v4958_v40  ;;  %v5598_v40 = vld [vmem:[%s9523_s23 + $0x75] sm:$0xff]  ;;  %v5599_v41 = vld [vmem:[%s9523_s23 + $0x7d] sm:$0xff] }
 0x197   : > { %7942 = vmatmul.mubr.bf16.gmra.mrb[4].mxu1 %v10293_v50 }
 0x198   : > { %8410 = vmatmul.mubr.bf16.gmra.mrb[4].mxu0 %v10295_v3  ;;  %7945 = vmatprep.mubr.bf16.mxu1 %v10297_v4 }
 0x199   : > { %8413 = vmatprep.mubr.bf16.mxu0 %v10299_v5  ;;  %7978 = vmatpush3.bf16.msra.mxu1 %v9371_v0  ;;  %v1960_v0 = vld [vmem:[%s9518_s20 + $0xd4] sm:$0xff] }
 0x19a   : > { %8446 = vmatpush3.bf16.msra.mxu0 %v9372_v48  ;;  %7979 = vmatprep.subr.bf16.mxu1 %v9373_v6  ;;  %v4949_v48 = vld [vmem:[%s9523_s23 + $0xdc] sm:$0xff]  ;;  %v10419_v12 = vpack.c.bf16 %v1961_v1, %v1960_v0 }
 0x19b   : > { %8447 = vmatprep.subr.bf16.mxu0 %v9374_v7  ;;  %v10421_v13 = vpack.c.bf16 %v4949_v48, %v4948_v2  ;;  %v2602_v2 = vld [vmem:[%s9518_s20 + $0x35] sm:$0xff]  ;;  %v2603_v48 = vld [vmem:[%s9518_s20 + $0x3d] sm:$0xff] }
 0x19d   : > { %7980 = vmatpush3.bf16.msra.mxu1 %v9373_v6  ;;  %v10415_v6 = vpack.c.bf16 %v1959_v61, %v1958_v60  ;;  %v9385_v60 = vld [vmem:[%s10827_s2 + $0x1c8] sm:$0xff]  }
 0x19e   : > { %8448 = vmatpush3.bf16.msra.mxu0 %v9374_v7  ;;  %7981 = vmatprep.subr.bf16.mxu1 %v9375_v20  ;;  %v10417_v7 = vpack.c.bf16 %v4947_v63, %v4946_v62  ;;  %v9386_v61 = vld [vmem:[%s10827_s2 + $0x408] sm:$0xff]  }
 0x19f   : > { %7946 = vmatmul.mubr.bf16.gmra.mrb[8].mxu1 %v10322_v21  ;;  %8449 = vmatprep.subr.bf16.mxu0 %v9376_v36 }
 0x1a0   : > { %8414 = vmatmul.mubr.bf16.gmra.mrb[8].mxu0 %v10327_v37  ;;  %7949 = vmatprep.mubr.bf16.mxu1 %v10329_v24 }
 0x1a1   : > { %8417 = vmatprep.mubr.bf16.mxu0 %v10331_v25  ;;  %7982 = vmatpush3.bf16.msra.mxu1 %v9375_v20  ;;  %v4952_v20 = vld [vmem:[%s9523_s23 + $0xf4] sm:$0xff] }
 0x1a2   : > { %8450 = vmatpush3.bf16.msra.mxu0 %v9376_v36  ;;  %7983 = vmatprep.subr.bf16.mxu1 %v9377_v29  ;;  %v4953_v36 = vld [vmem:[%s9523_s23 + $0xfc] sm:$0xff] }
 0x1a3   : > { %8451 = vmatprep.subr.bf16.mxu0 %v9378_v33  ;;  %v10441_v28 = vpack.c.bf16 %v4953_v36, %v4952_v20  ;;  %v9401_v20 = vld [vmem:[%s10827_s2 + $0x208] sm:$0xff]   ;;  %v2606_v36 = vld [vmem:[%s9518_s20 + $0x55] sm:$0xff] }
 0x1a5   : > { %7984 = vmatpush3.bf16.msra.mxu1 %v9377_v29  ;;  %v10435_v29 = vpack.c.bf16 %v1963_v15, %v1962_v14  ;;  %v2637_v14 = vpack.c.bf16 %v2603_v48, %v2602_v2  ;;  %v5592_v15 = vld [vmem:[%s9523_s23 + $0x45] sm:$0xff]  ;;  %v5606_v2 = vld [vmem:[%s9523_s23 + $0xb5] sm:$0xff]  ;;  %v5607_v48 = vld [vmem:[%s9523_s23 + $0xbd] sm:$0xff] }
 0x1a6   : > { %8452 = vmatpush3.bf16.msra.mxu0 %v9378_v33  ;;  %7985 = vmatprep.subr.bf16.mxu1 %v9379_v8  ;;  %v10437_v33 = vpack.c.bf16 %v4951_v17, %v4950_v16  ;;  %v5593_v16 = vld [vmem:[%s9523_s23 + $0x4d] sm:$0xff] }
 0x1a7   : > { %7950 = vmatmul.mubr.bf16.gmra.mrb[12].mxu1 %v10354_v9  ;;  %8453 = vmatprep.subr.bf16.mxu0 %v9380_v10  ;;  %v5626_v19 = vpack.c.bf16 %v5593_v16, %v5592_v15  ;;  %v5633_v15 = vpack.c.bf16 %v5607_v48, %v5606_v2  ;;  %v5924_v2 = vld [vmem:[%s9523_s23 + $0x46] sm:$0xff]  ;;  %v5925_v48 = vld [vmem:[%s9523_s23 + $0x4e] sm:$0xff] }
 0x1a8   : > { %8418 = vmatmul.mubr.bf16.gmra.mrb[12].mxu0 %v10359_v11  ;;  %7953 = vmatprep.mubr.bf16.mxu1 %v10361_v22 }
 0x1a9   : > { %8421 = vmatprep.mubr.bf16.mxu0 %v10363_v23  ;;  %7986 = vmatpush3.bf16.msra.mxu1 %v9379_v8  ;;  %v4956_v8 = vld [vmem:[%s9523_s23 + $0x114] sm:$0xff] }
 0x1aa   : > { %8454 = vmatpush3.bf16.msra.mxu0 %v9380_v10  ;;  %7987 = vmatprep.subr.bf16.mxu1 %v9381_v27  ;;  %v4957_v10 = vld [vmem:[%s9523_s23 + $0x11c] sm:$0xff] }
 0x1ab   : > { %8455 = vmatprep.subr.bf16.mxu0 %v9382_v31  ;;  %v10461_v35 = vpack.c.bf16 %v4957_v10, %v4956_v8 }
 0x1ad   : > { %7988 = vmatpush3.bf16.msra.mxu1 %v9381_v27  ;;  %v10455_v27 = vpack.c.bf16 %v1967_v45, %v1966_v44  ;;  %v2608_v44 = vld [vmem:[%s9518_s20 + $0x65] sm:$0xff]  ;;  %v2609_v45 = vld [vmem:[%s9518_s20 + $0x6d] sm:$0xff] }
 0x1ae   : > { %8456 = vmatpush3.bf16.msra.mxu0 %v9382_v31  ;;  %8025 = vmatprep.subr.bf16.mxu1 %v10386_v30  ;;  %v10457_v31 = vpack.c.bf16 %v4955_v57, %v4954_v56  ;;  %v9403_v56 = vld [vmem:[%s10827_s2 + $0x210] sm:$0xff]   ;;  %v5596_v57 = vld [vmem:[%s9523_s23 + $0x65] sm:$0xff] }
 0x1af   : > { %7954 = vmatmul.mubr.bf16.gmra.mrb[16].mxu1 %v10388_v32  ;;  %8493 = vmatprep.subr.bf16.mxu0 %v10393_v52 }
 0x1b0   : > { %8422 = vmatmul.mubr.bf16.gmra.mrb[16].mxu0 %v10395_v53  ;;  %7957 = vmatprep.mubr.bf16.mxu1 %v10397_v54 }
 0x1b1   : > { %8425 = vmatprep.mubr.bf16.mxu0 %v10399_v55 }
 0x1b7   : > { %7958 = vmatmul.mubr.bf16.gmra.mrb[20].mxu1 %v10415_v6 }
 0x1b8   : > { %8426 = vmatmul.mubr.bf16.gmra.mrb[20].mxu0 %v10417_v7  ;;  %7961 = vmatprep.mubr.bf16.mxu1 %v10419_v12 }
 0x1b9   : > { %8429 = vmatprep.mubr.bf16.mxu0 %v10421_v13 }
 0x1bf   : > { %7962 = vmatmul.mubr.bf16.gmra.mrb[24].mxu1 %v10435_v29 }
 0x1c0   : > { %8430 = vmatmul.mubr.bf16.gmra.mrb[24].mxu0 %v10437_v33  ;;  %7965 = vmatprep.mubr.bf16.mxu1 %v10439_v26 }
 0x1c1   : > { %8433 = vmatprep.mubr.bf16.mxu0 %v10441_v28 }
 0x1c7   : > { %7966 = vmatmul.mubr.bf16.gmra.mrb[28].mxu1 %v10455_v27 }
 0x1c8   : > { %8434 = vmatmul.mubr.bf16.gmra.mrb[28].mxu0 %v10457_v31  ;;  %7969 = vmatprep.mubr.bf16.mxu1 %v10459_v34 }
 0x1c9   : > { %8437 = vmatprep.mubr.bf16.mxu0 %v10461_v35 }
 0x1cf   : > { %7970 = vmatmul.mubr.bf16.gmra.mrb[32].mxu1 %v10471_v42 }
 0x1d0   : > { %8438 = vmatmul.mubr.bf16.gmra.mrb[32].mxu0 %v10473_v43  ;;  %7989 = vmatprep.mubr.bf16.mxu1 %v10257_v46  ;;  %v9387_v46 = vld [vmem:[%s10827_s2 + $0x1d0] sm:$0xff]  }
 0x1d1   : > { %8457 = vmatprep.mubr.bf16.mxu0 %v10261_v47  ;;  %v9388_v47 = vld [vmem:[%s10827_s2 + $0x410] sm:$0xff]  }
 0x1d7   : > { %7990 = vmatmul.mubr.bf16.vlgmr.msra.gmra.mrb[0].mxu1 %v10263_v49  ;;  %v9389_v49 = vld [vmem:[%s10827_s2 + $0x1d8] sm:$0xff]  }
 0x1d8   : > { %8458 = vmatmul.mubr.bf16.vlgmr.msra.gmra.mrb[0].mxu0 %v10265_v51  ;;  %8026 = vmatpush3.bf16.msra.mxu1 %v10386_v30  ;;  %v9390_v51 = vld [vmem:[%s10827_s2 + $0x418] sm:$0xff]  }
 0x1d9   : > { %8494 = vmatpush3.bf16.msra.mxu0 %v10393_v52  ;;  %7993 = vmatprep.mubr.bf16.mxu1 %v10293_v50  ;;  %v9391_v50 = vld [vmem:[%s10827_s2 + $0x1e0] sm:$0xff]   ;;  %v5290_v30 = vld [vmem:[%s9523_s23 + $0x134] sm:$0xff] }
 0x1da   : > { %8461 = vmatprep.mubr.bf16.mxu0 %v10295_v3  ;;  %8027 = vmatprep.subr.bf16.mxu1 %v9385_v60  ;;  %v9392_v3 = vld [vmem:[%s10827_s2 + $0x420] sm:$0xff]  }
 0x1db   : > { %8495 = vmatprep.subr.bf16.mxu0 %v9386_v61  ;;  %v2600_v52 = vld [vmem:[%s9518_s20 + $0x25] sm:$0xff] }
 0x1dc   : > { %8028 = vmatpush3.bf16.msra.mxu1 %v9385_v60  ;;  %v5600_v60 = vld [vmem:[%s9523_s23 + $0x85] sm:$0xff] }
 0x1dd   : > { %8496 = vmatpush3.bf16.msra.mxu0 %v9386_v61  ;;  %8029 = vmatprep.subr.bf16.mxu1 %v9387_v46  ;;  %v5601_v61 = vld [vmem:[%s9523_s23 + $0x8d] sm:$0xff] }
 0x1de   : > { %8497 = vmatprep.subr.bf16.mxu0 %v9388_v47 }
 0x1df   : > { %7994 = vmatmul.mubr.bf16.gmra.mrb[4].mxu1 %v10297_v4  ;;  %v9393_v4 = vld [vmem:[%s10827_s2 + $0x1e8] sm:$0xff]  }
 0x1e0   : > { %8462 = vmatmul.mubr.bf16.gmra.mrb[4].mxu0 %v10299_v5  ;;  %7997 = vmatprep.mubr.bf16.mxu1 %v10322_v21  ;;  %v9394_v5 = vld [vmem:[%s10827_s2 + $0x428] sm:$0xff]   ;;  %v9395_v21 = vld [vmem:[%s10827_s2 + $0x1f0] sm:$0xff]  }
 0x1e1   : > { %8465 = vmatprep.mubr.bf16.mxu0 %v10327_v37  ;;  %8030 = vmatpush3.bf16.msra.mxu1 %v9387_v46  ;;  %v9396_v37 = vld [vmem:[%s10827_s2 + $0x430] sm:$0xff]   ;;  %v9407_v46 = vld [vmem:[%s10827_s2 + $0x220] sm:$0xff]  }
 0x1e2   : > { %8498 = vmatpush3.bf16.msra.mxu0 %v9388_v47  ;;  %8031 = vmatprep.subr.bf16.mxu1 %v9389_v49  ;;  %v2641_v47 = vpack.c.bf16 %v2611_v39, %v2610_v38 }
 0x1e3   : > { %8499 = vmatprep.subr.bf16.mxu0 %v9390_v51 }
 0x1e5   : > { %8032 = vmatpush3.bf16.msra.mxu1 %v9389_v49  ;;  %v9408_v49 = vld [vmem:[%s10827_s2 + $0x460] sm:$0xff]  }
 0x1e6   : > { %8500 = vmatpush3.bf16.msra.mxu0 %v9390_v51  ;;  %8033 = vmatprep.subr.bf16.mxu1 %v9391_v50  ;;  %v5629_v51 = vpack.c.bf16 %v5599_v41, %v5598_v40 }
 0x1e7   : > { %7998 = vmatmul.mubr.bf16.gmra.mrb[8].mxu1 %v10329_v24  ;;  %8501 = vmatprep.subr.bf16.mxu0 %v9392_v3  ;;  %v9397_v24 = vld [vmem:[%s10827_s2 + $0x1f8] sm:$0xff]  }
 0x1e8   : > { %8466 = vmatmul.mubr.bf16.gmra.mrb[8].mxu0 %v10331_v25  ;;  %8001 = vmatprep.mubr.bf16.mxu1 %v10354_v9  ;;  %v9398_v25 = vld [vmem:[%s10827_s2 + $0x438] sm:$0xff]   ;;  %v9399_v9 = vld [vmem:[%s10827_s2 + $0x200] sm:$0xff]  }
 0x1e9   : > { %8469 = vmatprep.mubr.bf16.mxu0 %v10359_v11  ;;  %8034 = vmatpush3.bf16.msra.mxu1 %v9391_v50  ;;  %v9400_v11 = vld [vmem:[%s10827_s2 + $0x440] sm:$0xff]  }
 0x1ea   : > { %8502 = vmatpush3.bf16.msra.mxu0 %v9392_v3  ;;  %8035 = vmatprep.subr.bf16.mxu1 %v9393_v4  ;;  %v5630_v3 = vpack.c.bf16 %v5601_v61, %v5600_v60  ;;  %v5618_v60 = vld [vmem:[%s9523_s23 + $0x115] sm:$0xff]  ;;  %v5619_v61 = vld [vmem:[%s9523_s23 + $0x11d] sm:$0xff] }
 0x1eb   : > { %8503 = vmatprep.subr.bf16.mxu0 %v9394_v5 }
 0x1ed   : > { %8036 = vmatpush3.bf16.msra.mxu1 %v9393_v4  ;;  %v9409_v4 = vld [vmem:[%s10827_s2 + $0x228] sm:$0xff]  }
 0x1ee   : > { %8504 = vmatpush3.bf16.msra.mxu0 %v9394_v5  ;;  %8037 = vmatprep.subr.bf16.mxu1 %v9395_v21  ;;  %v9410_v5 = vld [vmem:[%s10827_s2 + $0x468] sm:$0xff]  }
 0x1ef   : > { %8002 = vmatmul.mubr.bf16.gmra.mrb[12].mxu1 %v10361_v22  ;;  %8505 = vmatprep.subr.bf16.mxu0 %v9396_v37  ;;  %v2302_v22 = vld [vmem:[%s9518_s20 + $0x134] sm:$0xff] }
 0x1f0   : > { %8470 = vmatmul.mubr.bf16.gmra.mrb[12].mxu0 %v10363_v23  ;;  %8005 = vmatprep.mubr.bf16.mxu1 %v10388_v32  ;;  %v2303_v23 = vld [vmem:[%s9518_s20 + $0x13c] sm:$0xff] }
 0x1f1   : > { %8473 = vmatprep.mubr.bf16.mxu0 %v10395_v53  ;;  %8038 = vmatpush3.bf16.msra.mxu1 %v9395_v21  ;;  %v5291_v32 = vld [vmem:[%s9523_s23 + $0x13c] sm:$0xff]  ;;  %v2601_v53 = vld [vmem:[%s9518_s20 + $0x2d] sm:$0xff]  ;;  %v2321_v62 = vpack.c.bf16 %v2303_v23, %v2302_v22  ;;  %v5604_v22 = vld [vmem:[%s9523_s23 + $0xa5] sm:$0xff] }
 0x1f2   : > { %8506 = vmatpush3.bf16.msra.mxu0 %v9396_v37  ;;  %8039 = vmatprep.subr.bf16.mxu1 %v9397_v24  ;;  %v5309_v63 = vpack.c.bf16 %v5291_v32, %v5290_v30  ;;  %v2636_v0 = vpack.c.bf16 %v2601_v53, %v2600_v52  ;;  %v2614_v21 = vld [vmem:[%s9518_s20 + $0x95] sm:$0xff]  ;;  %v2615_v37 = vld [vmem:[%s9518_s20 + $0x9d] sm:$0xff]  ;;  %v5605_v23 = vld [vmem:[%s9523_s23 + $0xad] sm:$0xff] }
 0x1f3   : > { %8507 = vmatprep.subr.bf16.mxu0 %v9398_v25  ;;  %v9411_v30 = vld [vmem:[%s10827_s2 + $0x230] sm:$0xff]   ;;  %v2643_v32 = vpack.c.bf16 %v2615_v37, %v2614_v21  ;;  %v2635_v37 = vld [vmem:[%s9518_s20 + $0x13d] sm:$0xff] }
 0x1f4   : > { %v9412_v52 = vld [vmem:[%s10827_s2 + $0x470] sm:$0xff]  }
 0x1f5   : > { %8040 = vmatpush3.bf16.msra.mxu1 %v9397_v24  ;;  %v5602_v24 = vld [vmem:[%s9523_s23 + $0x95] sm:$0xff] }
 0x1f6   : > { %8508 = vmatpush3.bf16.msra.mxu0 %v9398_v25  ;;  %8077 = vmatprep.subr.bf16.mxu1 %v9399_v9  ;;  %v5603_v25 = vld [vmem:[%s9523_s23 + $0x9d] sm:$0xff]  ;;  %v2634_v21 = vld [vmem:[%s9518_s20 + $0x135] sm:$0xff] }
 0x1f7   : > { %8006 = vmatmul.mubr.bf16.gmra.mrb[16].mxu1 %v10397_v54  ;;  %8545 = vmatprep.subr.bf16.mxu0 %v9400_v11  ;;  %v5588_v54 = vld [vmem:[%s9523_s23 + $0x25] sm:$0xff]  ;;  %v5631_v53 = vpack.c.bf16 %v5603_v25, %v5602_v24  ;;  %v5622_v24 = vld [vmem:[%s9523_s23 + $0x135] sm:$0xff]  ;;  %v5623_v25 = vld [vmem:[%s9523_s23 + $0x13d] sm:$0xff] }
 0x1f8   : > { %8474 = vmatmul.mubr.bf16.gmra.mrb[16].mxu0 %v10399_v55  ;;  %8009 = vmatprep.mubr.bf16.mxu1 %v10415_v6  ;;  %v5589_v55 = vld [vmem:[%s9523_s23 + $0x2d] sm:$0xff]  ;;  %v5590_v6 = vld [vmem:[%s9523_s23 + $0x35] sm:$0xff] }
 0x1f9   : > { %8477 = vmatprep.mubr.bf16.mxu0 %v10417_v7  ;;  %v5624_v1 = vpack.c.bf16 %v5589_v55, %v5588_v54  ;;  %v5591_v7 = vld [vmem:[%s9523_s23 + $0x3d] sm:$0xff]  ;;  %v5632_v55 = vpack.c.bf16 %v5605_v23, %v5604_v22  ;;  %v5920_v22 = vld [vmem:[%s9523_s23 + $0x26] sm:$0xff]  ;;  %v5921_v23 = vld [vmem:[%s9523_s23 + $0x2e] sm:$0xff] }
 0x1fa   : > { %v5625_v17 = vpack.c.bf16 %v5591_v7, %v5590_v6  ;;  %v2620_v6 = vld [vmem:[%s9518_s20 + $0xc5] sm:$0xff]  ;;  %v2621_v7 = vld [vmem:[%s9518_s20 + $0xcd] sm:$0xff] }
 0x1fb   : > { %v2646_v16 = vpack.c.bf16 %v2621_v7, %v2620_v6 }
 0x1ff   : > { %8010 = vmatmul.mubr.bf16.gmra.mrb[20].mxu1 %v10419_v12  ;;  %v2604_v12 = vld [vmem:[%s9518_s20 + $0x45] sm:$0xff] }
 0x200   : > { %8478 = vmatmul.mubr.bf16.gmra.mrb[20].mxu0 %v10421_v13  ;;  %8013 = vmatprep.mubr.bf16.mxu1 %v10435_v29  ;;  %v2605_v13 = vld [vmem:[%s9518_s20 + $0x4d] sm:$0xff] }
 0x201   : > { %8481 = vmatprep.mubr.bf16.mxu0 %v10437_v33  ;;  %v2638_v18 = vpack.c.bf16 %v2605_v13, %v2604_v12  ;;  %v9402_v29 = vld [vmem:[%s10827_s2 + $0x448] sm:$0xff]   ;;  %v2607_v33 = vld [vmem:[%s9518_s20 + $0x5d] sm:$0xff] }
 0x202   : > { %v2639_v8 = vpack.c.bf16 %v2607_v33, %v2606_v36  ;;  %v5608_v12 = vld [vmem:[%s9523_s23 + $0xc5] sm:$0xff]  ;;  %v5609_v13 = vld [vmem:[%s9523_s23 + $0xcd] sm:$0xff]  ;;  %v5611_v36 = vld [vmem:[%s9523_s23 + $0xdd] sm:$0xff] }
 0x203   : > { %v2625_v33 = vld [vmem:[%s9518_s20 + $0xed] sm:$0xff] }
 0x207   : > { %8014 = vmatmul.mubr.bf16.gmra.mrb[24].mxu1 %v10439_v26  ;;  %v5594_v26 = vld [vmem:[%s9523_s23 + $0x55] sm:$0xff] }
 0x208   : > { %8482 = vmatmul.mubr.bf16.gmra.mrb[24].mxu0 %v10441_v28  ;;  %8017 = vmatprep.mubr.bf16.mxu1 %v10455_v27  ;;  %v5595_v28 = vld [vmem:[%s9523_s23 + $0x5d] sm:$0xff]  ;;  %v2640_v27 = vpack.c.bf16 %v2609_v45, %v2608_v44 }
 0x209   : > { %8485 = vmatprep.mubr.bf16.mxu0 %v10457_v31  ;;  %v5627_v10 = vpack.c.bf16 %v5595_v28, %v5594_v26  ;;  %v5628_v31 = vpack.c.bf16 %v5597_v58, %v5596_v57  ;;  %v5612_v26 = vld [vmem:[%s9523_s23 + $0xe5] sm:$0xff]  ;;  %v5613_v28 = vld [vmem:[%s9523_s23 + $0xed] sm:$0xff]  ;;  %v2626_v58 = vld [vmem:[%s9518_s20 + $0xf5] sm:$0xff] }
 0x20a   : > { %v5636_v57 = vpack.c.bf16 %v5613_v28, %v5612_v26 }
 0x20f   : > { %8018 = vmatmul.mubr.bf16.gmra.mrb[28].mxu1 %v10459_v34  ;;  %v9405_v34 = vld [vmem:[%s10827_s2 + $0x218] sm:$0xff]  }
 0x210   : > { %8486 = vmatmul.mubr.bf16.gmra.mrb[28].mxu0 %v10461_v35  ;;  %8021 = vmatprep.mubr.bf16.mxu1 %v10471_v42  ;;  %v9406_v35 = vld [vmem:[%s10827_s2 + $0x458] sm:$0xff]   ;;  %v2612_v42 = vld [vmem:[%s9518_s20 + $0x85] sm:$0xff] }
 0x211   : > { %8489 = vmatprep.mubr.bf16.mxu0 %v10473_v43  ;;  %v2613_v43 = vld [vmem:[%s9518_s20 + $0x8d] sm:$0xff] }
 0x212   : > { %v2642_v50 = vpack.c.bf16 %v2613_v43, %v2612_v42  ;;  %v2630_v42 = vld [vmem:[%s9518_s20 + $0x115] sm:$0xff]  ;;  %v2631_v43 = vld [vmem:[%s9518_s20 + $0x11d] sm:$0xff] }
 0x217   : > { %8022 = vmatmul.mubr.bf16.gmra.mrb[32].mxu1 %v2321_v62  ;;  %v9413_v62 = vld [vmem:[%s10827_s2 + $0x238] sm:$0xff]  }
 0x218   : > { %8490 = vmatmul.mubr.bf16.gmra.mrb[32].mxu0 %v5309_v63  ;;  %8041 = vmatprep.mubr.bf16.mxu1 %v2636_v0  ;;  %v9414_v63 = vld [vmem:[%s10827_s2 + $0x478] sm:$0xff]  }
 0x219   : > { %8509 = vmatprep.mubr.bf16.mxu0 %v5624_v1  ;;  %v2618_v0 = vld [vmem:[%s9518_s20 + $0xb5] sm:$0xff]  ;;  %v2619_v1 = vld [vmem:[%s9518_s20 + $0xbd] sm:$0xff] }
 0x21f   : > { %8042 = vmatmul.mubr.bf16.vlgmr.msra.gmra.mrb[0].mxu1 %v2637_v14  ;;  %v2645_v14 = vpack.c.bf16 %v2619_v1, %v2618_v0  ;;  %v2936_v0 = vld [vmem:[%s9518_s20 + $0x46] sm:$0xff]  ;;  %v2937_v1 = vld [vmem:[%s9518_s20 + $0x4e] sm:$0xff] }
 0x220   : > { %8510 = vmatmul.mubr.bf16.vlgmr.msra.gmra.mrb[0].mxu0 %v5625_v17  ;;  %8078 = vmatpush3.bf16.msra.mxu1 %v9399_v9  ;;  %v2616_v9 = vld [vmem:[%s9518_s20 + $0xa5] sm:$0xff]  ;;  %v5634_v17 = vpack.c.bf16 %v5609_v13, %v5608_v12  ;;  %v2970_v12 = vpack.c.bf16 %v2937_v1, %v2936_v0  ;;  %v5958_v13 = vpack.c.bf16 %v5925_v48, %v5924_v2 }
 0x221   : > { %8546 = vmatpush3.bf16.msra.mxu0 %v9400_v11  ;;  %8045 = vmatprep.mubr.bf16.mxu1 %v2638_v18  ;;  %v2617_v11 = vld [vmem:[%s9518_s20 + $0xad] sm:$0xff]  ;;  %v2622_v18 = vld [vmem:[%s9518_s20 + $0xd5] sm:$0xff] }
 0x222   : > { %8513 = vmatprep.mubr.bf16.mxu0 %v5626_v19  ;;  %8079 = vmatprep.subr.bf16.mxu1 %v9401_v20  ;;  %v2644_v54 = vpack.c.bf16 %v2617_v11, %v2616_v9  ;;  %v2623_v19 = vld [vmem:[%s9518_s20 + $0xdd] sm:$0xff]  ;;  %v2932_v9 = vld [vmem:[%s9518_s20 + $0x26] sm:$0xff]  ;;  %v2933_v11 = vld [vmem:[%s9518_s20 + $0x2e] sm:$0xff] }
 0x223   : > { %8547 = vmatprep.subr.bf16.mxu0 %v9402_v29  ;;  %v2647_v44 = vpack.c.bf16 %v2623_v19, %v2622_v18  ;;  %v2940_v18 = vld [vmem:[%s9518_s20 + $0x66] sm:$0xff]  ;;  %v2941_v19 = vld [vmem:[%s9518_s20 + $0x6e] sm:$0xff] }
 0x224   : > { %8080 = vmatpush3.bf16.msra.mxu1 %v9401_v20  ;;  %v5610_v20 = vld [vmem:[%s9523_s23 + $0xd5] sm:$0xff]  ;;  %v2972_v26 = vpack.c.bf16 %v2941_v19, %v2940_v18 }
 0x225   : > { %8548 = vmatpush3.bf16.msra.mxu0 %v9402_v29  ;;  %8081 = vmatprep.subr.bf16.mxu1 %v9403_v56  ;;  %v2624_v29 = vld [vmem:[%s9518_s20 + $0xe5] sm:$0xff]  ;;  %v5635_v45 = vpack.c.bf16 %v5611_v36, %v5610_v20  ;;  %v5929_v36 = vld [vmem:[%s9523_s23 + $0x6e] sm:$0xff] }
 0x226   : > { %8549 = vmatprep.subr.bf16.mxu0 %v9404_v59  ;;  %v5928_v20 = vld [vmem:[%s9523_s23 + $0x66] sm:$0xff] }
 0x227   : > { %8046 = vmatmul.mubr.bf16.gmra.mrb[4].mxu1 %v2639_v8  ;;  %v5614_v8 = vld [vmem:[%s9523_s23 + $0xf5] sm:$0xff]  ;;  %v5960_v28 = vpack.c.bf16 %v5929_v36, %v5928_v20 }
 0x228   : > { %8514 = vmatmul.mubr.bf16.gmra.mrb[4].mxu0 %v5627_v10  ;;  %8049 = vmatprep.mubr.bf16.mxu1 %v2640_v27  ;;  %v5615_v10 = vld [vmem:[%s9523_s23 + $0xfd] sm:$0xff]  ;;  %v2628_v27 = vld [vmem:[%s9518_s20 + $0x105] sm:$0xff] }
 0x229   : > { %8517 = vmatprep.mubr.bf16.mxu0 %v5628_v31  ;;  %8082 = vmatpush3.bf16.msra.mxu1 %v9403_v56  ;;  %v2648_v56 = vpack.c.bf16 %v2625_v33, %v2624_v29  ;;  %v2629_v31 = vld [vmem:[%s9518_s20 + $0x10d] sm:$0xff]  ;;  %v5637_v39 = vpack.c.bf16 %v5615_v10, %v5614_v8 }
 0x22a   : > { %8550 = vmatpush3.bf16.msra.mxu0 %v9404_v59  ;;  %8083 = vmatprep.subr.bf16.mxu1 %v9405_v34  ;;  %v2627_v59 = vld [vmem:[%s9518_s20 + $0xfd] sm:$0xff]  ;;  %v2650_v40 = vpack.c.bf16 %v2629_v31, %v2628_v27  ;;  %v5932_v8 = vld [vmem:[%s9523_s23 + $0x86] sm:$0xff]  ;;  %v5933_v10 = vld [vmem:[%s9523_s23 + $0x8e] sm:$0xff] }
 0x22b   : > { %8551 = vmatprep.subr.bf16.mxu0 %v9406_v35  ;;  %v2649_v38 = vpack.c.bf16 %v2627_v59, %v2626_v58  ;;  %v2944_v58 = vld [vmem:[%s9518_s20 + $0x86] sm:$0xff]  ;;  %v2945_v59 = vld [vmem:[%s9518_s20 + $0x8e] sm:$0xff] }
 0x22d   : > { %8084 = vmatpush3.bf16.msra.mxu1 %v9405_v34  ;;  %v5616_v34 = vld [vmem:[%s9523_s23 + $0x105] sm:$0xff] }
 0x22e   : > { %8552 = vmatpush3.bf16.msra.mxu0 %v9406_v35  ;;  %8085 = vmatprep.subr.bf16.mxu1 %v9407_v46  ;;  %v5617_v35 = vld [vmem:[%s9523_s23 + $0x10d] sm:$0xff] }
 0x22f   : > { %8050 = vmatmul.mubr.bf16.gmra.mrb[8].mxu1 %v2641_v47  ;;  %8553 = vmatprep.subr.bf16.mxu0 %v9408_v49  ;;  %v5638_v41 = vpack.c.bf16 %v5617_v35, %v5616_v34  ;;  %v2633_v47 = vld [vmem:[%s9518_s20 + $0x12d] sm:$0xff]  ;;  %v2974_v34 = vpack.c.bf16 %v2945_v59, %v2944_v58  ;;  %v5962_v35 = vpack.c.bf16 %v5933_v10, %v5932_v8 }
 0x230   : > { %8518 = vmatmul.mubr.bf16.gmra.mrb[8].mxu0 %v5629_v51  ;;  %8053 = vmatprep.mubr.bf16.mxu1 %v2642_v50  ;;  %v5621_v51 = vld [vmem:[%s9523_s23 + $0x12d] sm:$0xff]  ;;  %v2651_v50 = vpack.c.bf16 %v2631_v43, %v2630_v42 }
 0x231   : > { %8521 = vmatprep.mubr.bf16.mxu0 %v5630_v3  ;;  %8086 = vmatpush3.bf16.msra.mxu1 %v9407_v46  ;;  %v2632_v46 = vld [vmem:[%s9518_s20 + $0x125] sm:$0xff]  ;;  %v5639_v3 = vpack.c.bf16 %v5619_v61, %v5618_v60  ;;  %v2949_v43 = vld [vmem:[%s9518_s20 + $0xae] sm:$0xff] }
 0x232   : > { %8554 = vmatpush3.bf16.msra.mxu0 %v9408_v49  ;;  %8087 = vmatprep.subr.bf16.mxu1 %v9409_v4  ;;  %v5620_v49 = vld [vmem:[%s9523_s23 + $0x125] sm:$0xff]  ;;  %v5937_v61 = vld [vmem:[%s9523_s23 + $0xae] sm:$0xff] }
 0x233   : > { %8555 = vmatprep.subr.bf16.mxu0 %v9410_v5  ;;  %v2948_v42 = vld [vmem:[%s9518_s20 + $0xa6] sm:$0xff] }
 0x234   : > { %v5936_v60 = vld [vmem:[%s9523_s23 + $0xa6] sm:$0xff] }
 0x235   : > { %8088 = vmatpush3.bf16.msra.mxu1 %v9409_v4  ;;  %v2652_v4 = vpack.c.bf16 %v2633_v47, %v2632_v46 }
 0x236   : > { %8556 = vmatpush3.bf16.msra.mxu0 %v9410_v5  ;;  %8089 = vmatprep.subr.bf16.mxu1 %v9411_v30  ;;  %v5640_v5 = vpack.c.bf16 %v5621_v51, %v5620_v49  ;;  %v2976_v49 = vpack.c.bf16 %v2949_v43, %v2948_v42  ;;  %v5964_v51 = vpack.c.bf16 %v5937_v61, %v5936_v60 }
 0x237   : > { %8054 = vmatmul.mubr.bf16.gmra.mrb[12].mxu1 %v2643_v32  ;;  %8557 = vmatprep.subr.bf16.mxu0 %v9412_v52  ;;  %v5641_v32 = vpack.c.bf16 %v5623_v25, %v5622_v24  ;;  %v5940_v24 = vld [vmem:[%s9523_s23 + $0xc6] sm:$0xff]  ;;  %v5941_v25 = vld [vmem:[%s9523_s23 + $0xce] sm:$0xff] }
 0x238   : > { %8522 = vmatmul.mubr.bf16.gmra.mrb[12].mxu0 %v5631_v53  ;;  %8057 = vmatprep.mubr.bf16.mxu1 %v2644_v54  ;;  %v5956_v53 = vpack.c.bf16 %v5921_v23, %v5920_v22  ;;  %v2934_v54 = vld [vmem:[%s9518_s20 + $0x36] sm:$0xff]  ;;  %v5966_v23 = vpack.c.bf16 %v5941_v25, %v5940_v24 }
 0x239   : > { %8525 = vmatprep.mubr.bf16.mxu0 %v5632_v55  ;;  %8090 = vmatpush3.bf16.msra.mxu1 %v9411_v30  ;;  %v2653_v30 = vpack.c.bf16 %v2635_v37, %v2634_v21  ;;  %v2935_v55 = vld [vmem:[%s9518_s20 + $0x3e] sm:$0xff]  ;;  %v2952_v21 = vld [vmem:[%s9518_s20 + $0xc6] sm:$0xff]  ;;  %v2953_v37 = vld [vmem:[%s9518_s20 + $0xce] sm:$0xff] }
 0x23a   : > { %8558 = vmatpush3.bf16.msra.mxu0 %v9412_v52  ;;  %8091 = vmatprep.subr.bf16.mxu1 %v9413_v62  ;;  %v2968_v52 = vpack.c.bf16 %v2933_v11, %v2932_v9  ;;  %v2969_v6 = vpack.c.bf16 %v2935_v55, %v2934_v54  ;;  %v2978_v22 = vpack.c.bf16 %v2953_v37, %v2952_v21  ;;  %v2956_v54 = vld [vmem:[%s9518_s20 + $0xe6] sm:$0xff]  ;;  %v2957_v55 = vld [vmem:[%s9518_s20 + $0xee] sm:$0xff] }
 0x23b   : > { %8559 = vmatprep.subr.bf16.mxu0 %v9414_v63  ;;  %v2980_v2 = vpack.c.bf16 %v2957_v55, %v2956_v54 }
 0x23d   : > { %8092 = vmatpush3.bf16.msra.mxu1 %v9413_v62  ;;  %v5922_v62 = vld [vmem:[%s9523_s23 + $0x36] sm:$0xff] }
 0x23e   : > { %8560 = vmatpush3.bf16.msra.mxu0 %v9414_v63  ;;  %v5923_v63 = vld [vmem:[%s9523_s23 + $0x3e] sm:$0xff] }
 0x23f   : > { %8058 = vmatmul.mubr.bf16.gmra.mrb[16].mxu1 %v2645_v14  ;;  %v5957_v7 = vpack.c.bf16 %v5923_v63, %v5922_v62  ;;  %v2938_v14 = vld [vmem:[%s9518_s20 + $0x56] sm:$0xff]  ;;  %v5944_v62 = vld [vmem:[%s9523_s23 + $0xe6] sm:$0xff]  ;;  %v5945_v63 = vld [vmem:[%s9523_s23 + $0xee] sm:$0xff] }
 0x240   : > { %8526 = vmatmul.mubr.bf16.gmra.mrb[16].mxu0 %v5633_v15  ;;  %8061 = vmatprep.mubr.bf16.mxu1 %v2646_v16  ;;  %v2939_v15 = vld [vmem:[%s9518_s20 + $0x5e] sm:$0xff]  ;;  %v5926_v16 = vld [vmem:[%s9523_s23 + $0x56] sm:$0xff]  ;;  %v5968_v48 = vpack.c.bf16 %v5945_v63, %v5944_v62 }
 0x241   : > { %8529 = vmatprep.mubr.bf16.mxu0 %v5634_v17  ;;  %v5927_v17 = vld [vmem:[%s9523_s23 + $0x5e] sm:$0xff]  ;;  %v2971_v29 = vpack.c.bf16 %v2939_v15, %v2938_v14  ;;  %v2960_v14 = vld [vmem:[%s9518_s20 + $0x106] sm:$0xff]  ;;  %v2961_v15 = vld [vmem:[%s9518_s20 + $0x10e] sm:$0xff] }
 0x242   : > { %v5959_v33 = vpack.c.bf16 %v5927_v17, %v5926_v16  ;;  %v5948_v16 = vld [vmem:[%s9523_s23 + $0x106] sm:$0xff]  ;;  %v5949_v17 = vld [vmem:[%s9523_s23 + $0x10e] sm:$0xff]  ;;  %v2982_v20 = vpack.c.bf16 %v2961_v15, %v2960_v14 }
 0x243   : > { %v5970_v36 = vpack.c.bf16 %v5949_v17, %v5948_v16 }
 0x247   : > { %8062 = vmatmul.mubr.bf16.gmra.mrb[20].mxu1 %v2647_v44  ;;  %v2942_v44 = vld [vmem:[%s9518_s20 + $0x76] sm:$0xff] }
 0x248   : > { %8530 = vmatmul.mubr.bf16.gmra.mrb[20].mxu0 %v5635_v45  ;;  %8065 = vmatprep.mubr.bf16.mxu1 %v2648_v56  ;;  %v2943_v45 = vld [vmem:[%s9518_s20 + $0x7e] sm:$0xff]  ;;  %v5930_v56 = vld [vmem:[%s9523_s23 + $0x76] sm:$0xff] }
 0x249   : > { %8533 = vmatprep.mubr.bf16.mxu0 %v5636_v57  ;;  %v5931_v57 = vld [vmem:[%s9523_s23 + $0x7e] sm:$0xff]  ;;  %v2973_v27 = vpack.c.bf16 %v2943_v45, %v2942_v44  ;;  %v2964_v44 = vld [vmem:[%s9518_s20 + $0x126] sm:$0xff]  ;;  %v2965_v45 = vld [vmem:[%s9518_s20 + $0x12e] sm:$0xff] }
 0x24a   : > { %v5961_v31 = vpack.c.bf16 %v5931_v57, %v5930_v56  ;;  %v5952_v56 = vld [vmem:[%s9523_s23 + $0x126] sm:$0xff]  ;;  %v5953_v57 = vld [vmem:[%s9523_s23 + $0x12e] sm:$0xff]  ;;  %v2984_v8 = vpack.c.bf16 %v2965_v45, %v2964_v44 }
 0x24b   : > { %v5972_v10 = vpack.c.bf16 %v5953_v57, %v5952_v56 }
 0x24f   : > { %8066 = vmatmul.mubr.bf16.gmra.mrb[24].mxu1 %v2649_v38  ;;  %v2946_v38 = vld [vmem:[%s9518_s20 + $0x96] sm:$0xff] }
 0x250   : > { %8534 = vmatmul.mubr.bf16.gmra.mrb[24].mxu0 %v5637_v39  ;;  %8069 = vmatprep.mubr.bf16.mxu1 %v2650_v40  ;;  %v2947_v39 = vld [vmem:[%s9518_s20 + $0x9e] sm:$0xff]  ;;  %v5934_v40 = vld [vmem:[%s9523_s23 + $0x96] sm:$0xff] }
 0x251   : > { %8537 = vmatprep.mubr.bf16.mxu0 %v5638_v41  ;;  %v5935_v41 = vld [vmem:[%s9523_s23 + $0x9e] sm:$0xff]  ;;  %v2975_v46 = vpack.c.bf16 %v2947_v39, %v2946_v38 }
 0x252   : > { %v5963_v47 = vpack.c.bf16 %v5935_v41, %v5934_v40  ;;  %v10754_v40 = vld [vmem:[%s10828_s3] ss:$0 sm:$0xff] }
 0x257   : > { %8070 = vmatmul.mubr.bf16.gmra.mrb[28].mxu1 %v2651_v50  ;;  %v2950_v50 = vld [vmem:[%s9518_s20 + $0xb6] sm:$0xff] }
 0x258   : > { %8538 = vmatmul.mubr.bf16.gmra.mrb[28].mxu0 %v5639_v3  ;;  %8073 = vmatprep.mubr.bf16.mxu1 %v2652_v4  ;;  %v2951_v3 = vld [vmem:[%s9518_s20 + $0xbe] sm:$0xff]  ;;  %v5938_v4 = vld [vmem:[%s9523_s23 + $0xb6] sm:$0xff] }
 0x259   : > { %8541 = vmatprep.mubr.bf16.mxu0 %v5640_v5  ;;  %v5939_v5 = vld [vmem:[%s9523_s23 + $0xbe] sm:$0xff]  ;;  %v2977_v9 = vpack.c.bf16 %v2951_v3, %v2950_v50 }
 0x25a   : > { %v5965_v11 = vpack.c.bf16 %v5939_v5, %v5938_v4 }
 0x25f   : > { %8074 = vmatmul.mubr.bf16.gmra.mrb[32].mxu1 %v2653_v30  ;;  %v2954_v30 = vld [vmem:[%s9518_s20 + $0xd6] sm:$0xff] }
 0x260   : > { %8542 = vmatmul.mubr.bf16.gmra.mrb[32].mxu0 %v5641_v32  ;;  %8093 = vmatprep.mubr.bf16.mxu1 %v2968_v52  ;;  %v2955_v32 = vld [vmem:[%s9518_s20 + $0xde] sm:$0xff]  ;;  %v5942_v52 = vld [vmem:[%s9523_s23 + $0xd6] sm:$0xff] }
 0x261   : > { %8561 = vmatprep.mubr.bf16.mxu0 %v5956_v53  ;;  %v5943_v53 = vld [vmem:[%s9523_s23 + $0xde] sm:$0xff]  ;;  %v2979_v0 = vpack.c.bf16 %v2955_v32, %v2954_v30 }
 0x262   : > { %v5967_v1 = vpack.c.bf16 %v5943_v53, %v5942_v52 }
 0x267   : > { %8094 = vmatmul.mubr.bf16.vlgmr.msra.gmra.mrb[0].mxu1 %v2969_v6  ;;  %v2958_v6 = vld [vmem:[%s9518_s20 + $0xf6] sm:$0xff] }
 0x268   : > { %8562 = vmatmul.mubr.bf16.vlgmr.msra.gmra.mrb[0].mxu0 %v5957_v7  ;;  %8097 = vmatprep.mubr.bf16.mxu1 %v2970_v12  ;;  %v2959_v7 = vld [vmem:[%s9518_s20 + $0xfe] sm:$0xff]  ;;  %v5946_v12 = vld [vmem:[%s9523_s23 + $0xf6] sm:$0xff] }
 0x269   : > { %8565 = vmatprep.mubr.bf16.mxu0 %v5958_v13  ;;  %v5947_v13 = vld [vmem:[%s9523_s23 + $0xfe] sm:$0xff]  ;;  %v2981_v18 = vpack.c.bf16 %v2959_v7, %v2958_v6 }
 0x26a   : > { %v5969_v19 = vpack.c.bf16 %v5947_v13, %v5946_v12 }
 0x26f   : > { %8098 = vmatmul.mubr.bf16.gmra.mrb[4].mxu1 %v2971_v29  ;;  %v2962_v29 = vld [vmem:[%s9518_s20 + $0x116] sm:$0xff] }
 0x270   : > { %8566 = vmatmul.mubr.bf16.gmra.mrb[4].mxu0 %v5959_v33  ;;  %8101 = vmatprep.mubr.bf16.mxu1 %v2972_v26  ;;  %v2963_v33 = vld [vmem:[%s9518_s20 + $0x11e] sm:$0xff]  ;;  %v5950_v26 = vld [vmem:[%s9523_s23 + $0x116] sm:$0xff] }
 0x271   : > { %8569 = vmatprep.mubr.bf16.mxu0 %v5960_v28  ;;  %v5951_v28 = vld [vmem:[%s9523_s23 + $0x11e] sm:$0xff]  ;;  %v2983_v58 = vpack.c.bf16 %v2963_v33, %v2962_v29 }
 0x272   : > { %v5971_v59 = vpack.c.bf16 %v5951_v28, %v5950_v26 }
 0x277   : > { %8102 = vmatmul.mubr.bf16.gmra.mrb[8].mxu1 %v2973_v27  ;;  %v2966_v27 = vld [vmem:[%s9518_s20 + $0x136] sm:$0xff] }
 0x278   : > { %8570 = vmatmul.mubr.bf16.gmra.mrb[8].mxu0 %v5961_v31  ;;  %8105 = vmatprep.mubr.bf16.mxu1 %v2974_v34  ;;  %v2967_v31 = vld [vmem:[%s9518_s20 + $0x13e] sm:$0xff]  ;;  %v5954_v34 = vld [vmem:[%s9523_s23 + $0x136] sm:$0xff]  ;;  %s9246_s20 = smul.u32 144, %s10835_s15 }
 0x279   : > { %8573 = vmatprep.mubr.bf16.mxu0 %v5962_v35  ;;  %v5955_v35 = vld [vmem:[%s9523_s23 + $0x13e] sm:$0xff]  ;;  %v2985_v38 = vpack.c.bf16 %v2967_v31, %v2966_v27 }
 0x27a   : > { %v5973_v39 = vpack.c.bf16 %v5955_v35, %v5954_v34  ;;  %s10764_s9 = scalar_lea.vmem %s10829_s4, %s9246_s20 }
 0x27f   : > { %8106 = vmatmul.mubr.bf16.gmra.mrb[12].mxu1 %v2975_v46 }
 0x280   : > { %8574 = vmatmul.mubr.bf16.gmra.mrb[12].mxu0 %v5963_v47  ;;  %8109 = vmatprep.mubr.bf16.mxu1 %v2976_v49 }
 0x281   : > { %8577 = vmatprep.mubr.bf16.mxu0 %v5964_v51 }
 0x287   : > { %8110 = vmatmul.mubr.bf16.gmra.mrb[16].mxu1 %v2977_v9 }
 0x288   : > { %8578 = vmatmul.mubr.bf16.gmra.mrb[16].mxu0 %v5965_v11  ;;  %8113 = vmatprep.mubr.bf16.mxu1 %v2978_v22 }
 0x289   : > { %8581 = vmatprep.mubr.bf16.mxu0 %v5966_v23 }
 0x28f   : > { %8114 = vmatmul.mubr.bf16.gmra.mrb[20].mxu1 %v2979_v0 }
 0x290   : > { %8582 = vmatmul.mubr.bf16.gmra.mrb[20].mxu0 %v5967_v1  ;;  %8117 = vmatprep.mubr.bf16.mxu1 %v2980_v2 }
 0x291   : > { %8585 = vmatprep.mubr.bf16.mxu0 %v5968_v48 }
 0x297   : > { %8118 = vmatmul.mubr.bf16.gmra.mrb[24].mxu1 %v2981_v18 }
 0x298   : > { %8586 = vmatmul.mubr.bf16.gmra.mrb[24].mxu0 %v5969_v19  ;;  %8121 = vmatprep.mubr.bf16.mxu1 %v2982_v20 }
 0x299   : > { %8589 = vmatprep.mubr.bf16.mxu0 %v5970_v36 }
 0x29f   : > { %8122 = vmatmul.mubr.bf16.gmra.mrb[28].mxu1 %v2983_v58 }
 0x2a0   : > { %8590 = vmatmul.mubr.bf16.gmra.mrb[28].mxu0 %v5971_v59  ;;  %8125 = vmatprep.mubr.bf16.mxu1 %v2984_v8 }
 0x2a1   : > { %8593 = vmatprep.mubr.bf16.mxu0 %v5972_v10 }
 0x2a7   : > { %8126 = vmatmul.mubr.bf16.gmra.mrb[32].mxu1 %v2985_v38 }
 0x2a8   : > { %8594 = vmatmul.mubr.bf16.gmra.mrb[32].mxu0 %v5973_v39 }
 0x33a   : > { %v8095_v41 = vpop.f32.mrb[0].mxu1 }
 0x33b   : > { %v8597_v42 = vadd.f32 %v8095_v41, %v10754_v40  ;;  %v8563_v43 = vpop.f32.mrb[0].mxu0  ;;  %v3085_v60 = vpop.f32.mrb[1].mxu1 }
 0x33c   : > { %v8599_v61 = vadd.f32 %v10754_v40, %v3085_v60  ;;  %v6073_v46 = vpop.f32.mrb[1].mxu0  ;;  %v8096_v47 = vpop.f32.mrb[2].mxu1 }
 0x33d   : > { %v8598_v49 = vadd.f32 %v8597_v42, %v8563_v43  ;;  %v8601_v51 = vadd.f32 %v8096_v47, %v10754_v40  ;;  %v8564_v50 = vpop.f32.mrb[2].mxu0  ;;  %v3088_v3 = vpop.f32.mrb[3].mxu1 }
 0x33e   : > { %v8600_v4 = vadd.f32 %v8599_v61, %v6073_v46  ;;  %v8603_v5 = vadd.f32 %v10754_v40, %v3088_v3  ;;  %v6076_v21 = vpop.f32.mrb[3].mxu0 }
 0x33f   : > { %v8602_v37 = vadd.f32 %v8601_v51, %v8564_v50  ;;  %v6254_v25 = vmax.f32 %v8598_v49, 0.0 }
 0x340   : > { %v8604_v24 = vadd.f32 %v8603_v5, %v6076_v21  ;;  %v6252_v11 = vmax.f32 %v8600_v4, 0.0 }
 0x341   : > { %v6255_v9 = vmax.f32 %v8602_v37, 0.0 }
 0x342   : > { %v6253_v22 = vmax.f32 %v8604_v24, 0.0  ;;  %v8099_v23 = vpop.f32.mrb[4].mxu1 }
 0x343   : > { %v7094_v30 = vpack.c.bf16 %v6255_v9, %v6254_v25  ;;  %v8605_v32 = vadd.f32 %v8099_v23, %v10754_v40  ;;  %v8567_v52 = vpop.f32.mrb[4].mxu0  ;;  %v3101_v53 = vpop.f32.mrb[5].mxu1 }
 0x344   : > { %v7089_v54 = vpack.c.bf16 %v6253_v22, %v6252_v11  ;;  %v8607_v55 = vadd.f32 %v10754_v40, %v3101_v53  ;;  %v6089_v62 = vpop.f32.mrb[5].mxu0  ;;  %v8100_v63 = vpop.f32.mrb[6].mxu1 }
 0x345   : > { %7176 = vst [vmem:[%s10764_s9 + $0x8] sm:$0xff] %v7094_v30   ;;  %v8606_v0 = vadd.f32 %v8605_v32, %v8567_v52  ;;  %v8609_v1 = vadd.f32 %v8100_v63, %v10754_v40  ;;  %v8568_v2 = vpop.f32.mrb[6].mxu0  ;;  %v3104_v48 = vpop.f32.mrb[7].mxu1 }
 0x346   : > { %7090 = vst [vmem:[%s10764_s9] sm:$0xff] %v7089_v54   ;;  %v8608_v6 = vadd.f32 %v8607_v55, %v6089_v62  ;;  %v8611_v7 = vadd.f32 %v10754_v40, %v3104_v48  ;;  %v6092_v12 = vpop.f32.mrb[7].mxu0 }
 0x347   : > { %v8610_v13 = vadd.f32 %v8609_v1, %v8568_v2  ;;  %v6258_v15 = vmax.f32 %v8606_v0, 0.0 }
 0x348   : > { %v8612_v14 = vadd.f32 %v8611_v7, %v6092_v12  ;;  %v6256_v17 = vmax.f32 %v8608_v6, 0.0 }
 0x349   : > { %v6259_v16 = vmax.f32 %v8610_v13, 0.0 }
 0x34a   : > { %v6257_v18 = vmax.f32 %v8612_v14, 0.0  ;;  %v8103_v19 = vpop.f32.mrb[8].mxu1 }
 0x34b   : > { %v7104_v20 = vpack.c.bf16 %v6259_v16, %v6258_v15  ;;  %v8613_v36 = vadd.f32 %v8103_v19, %v10754_v40  ;;  %v8571_v29 = vpop.f32.mrb[8].mxu0  ;;  %v3117_v33 = vpop.f32.mrb[9].mxu1 }
 0x34c   : > { %v7099_v26 = vpack.c.bf16 %v6257_v18, %v6256_v17  ;;  %v8615_v28 = vadd.f32 %v10754_v40, %v3117_v33  ;;  %v6105_v44 = vpop.f32.mrb[9].mxu0  ;;  %v8104_v45 = vpop.f32.mrb[10].mxu1 }
 0x34d   : > { %7178 = vst [vmem:[%s10764_s9 + $0x18] sm:$0xff] %v7104_v20   ;;  %v8614_v56 = vadd.f32 %v8613_v36, %v8571_v29  ;;  %v8617_v57 = vadd.f32 %v8104_v45, %v10754_v40  ;;  %v8572_v58 = vpop.f32.mrb[10].mxu0  ;;  %v3120_v59 = vpop.f32.mrb[11].mxu1 }
 0x34e   : > { %7177 = vst [vmem:[%s10764_s9 + $0x10] sm:$0xff] %v7099_v26   ;;  %v8616_v8 = vadd.f32 %v8615_v28, %v6105_v44  ;;  %v8619_v10 = vadd.f32 %v10754_v40, %v3120_v59  ;;  %v6108_v27 = vpop.f32.mrb[11].mxu0 }
 0x34f   : > { %v8618_v31 = vadd.f32 %v8617_v57, %v8572_v58  ;;  %v6262_v35 = vmax.f32 %v8614_v56, 0.0 }
 0x350   : > { %v8620_v34 = vadd.f32 %v8619_v10, %v6108_v27  ;;  %v6260_v39 = vmax.f32 %v8616_v8, 0.0 }
 0x351   : > { %v6263_v38 = vmax.f32 %v8618_v31, 0.0 }
 0x352   : > { %v6261_v41 = vmax.f32 %v8620_v34, 0.0  ;;  %v8107_v42 = vpop.f32.mrb[12].mxu1 }
 0x353   : > { %v7114_v43 = vpack.c.bf16 %v6263_v38, %v6262_v35  ;;  %v8621_v60 = vadd.f32 %v8107_v42, %v10754_v40  ;;  %v8575_v61 = vpop.f32.mrb[12].mxu0  ;;  %v3133_v46 = vpop.f32.mrb[13].mxu1 }
 0x354   : > { %v7109_v47 = vpack.c.bf16 %v6261_v41, %v6260_v39  ;;  %v8623_v49 = vadd.f32 %v10754_v40, %v3133_v46  ;;  %v6121_v51 = vpop.f32.mrb[13].mxu0  ;;  %v8108_v50 = vpop.f32.mrb[14].mxu1 }
 0x355   : > { %7180 = vst [vmem:[%s10764_s9 + $0x28] sm:$0xff] %v7114_v43   ;;  %v8622_v3 = vadd.f32 %v8621_v60, %v8575_v61  ;;  %v8625_v4 = vadd.f32 %v8108_v50, %v10754_v40  ;;  %v8576_v5 = vpop.f32.mrb[14].mxu0  ;;  %v3136_v21 = vpop.f32.mrb[15].mxu1 }
 0x356   : > { %7179 = vst [vmem:[%s10764_s9 + $0x20] sm:$0xff] %v7109_v47   ;;  %v8624_v37 = vadd.f32 %v8623_v49, %v6121_v51  ;;  %v8627_v24 = vadd.f32 %v10754_v40, %v3136_v21  ;;  %v6124_v25 = vpop.f32.mrb[15].mxu0 }
 0x357   : > { %v8626_v9 = vadd.f32 %v8625_v4, %v8576_v5  ;;  %v6266_v22 = vmax.f32 %v8622_v3, 0.0 }
 0x358   : > { %v8628_v11 = vadd.f32 %v8627_v24, %v6124_v25  ;;  %v6264_v30 = vmax.f32 %v8624_v37, 0.0 }
 0x359   : > { %v6267_v23 = vmax.f32 %v8626_v9, 0.0 }
 0x35a   : > { %v6265_v32 = vmax.f32 %v8628_v11, 0.0  ;;  %v8111_v52 = vpop.f32.mrb[16].mxu1 }
 0x35b   : > { %v7124_v53 = vpack.c.bf16 %v6267_v23, %v6266_v22  ;;  %v8629_v54 = vadd.f32 %v8111_v52, %v10754_v40  ;;  %v8579_v55 = vpop.f32.mrb[16].mxu0  ;;  %v3149_v62 = vpop.f32.mrb[17].mxu1 }
 0x35c   : > { %v7119_v63 = vpack.c.bf16 %v6265_v32, %v6264_v30  ;;  %v8631_v0 = vadd.f32 %v10754_v40, %v3149_v62  ;;  %v6137_v1 = vpop.f32.mrb[17].mxu0  ;;  %v8112_v2 = vpop.f32.mrb[18].mxu1 }
 0x35d   : > { %7182 = vst [vmem:[%s10764_s9 + $0x38] sm:$0xff] %v7124_v53   ;;  %v8630_v48 = vadd.f32 %v8629_v54, %v8579_v55  ;;  %v8633_v6 = vadd.f32 %v8112_v2, %v10754_v40  ;;  %v8580_v7 = vpop.f32.mrb[18].mxu0  ;;  %v3152_v12 = vpop.f32.mrb[19].mxu1 }
 0x35e   : > { %7181 = vst [vmem:[%s10764_s9 + $0x30] sm:$0xff] %v7119_v63   ;;  %v8632_v13 = vadd.f32 %v8631_v0, %v6137_v1  ;;  %v8635_v14 = vadd.f32 %v10754_v40, %v3152_v12  ;;  %v6140_v15 = vpop.f32.mrb[19].mxu0 }
 0x35f   : > { %v8634_v16 = vadd.f32 %v8633_v6, %v8580_v7  ;;  %v6270_v18 = vmax.f32 %v8630_v48, 0.0 }
 0x360   : > { %v8636_v17 = vadd.f32 %v8635_v14, %v6140_v15  ;;  %v6268_v20 = vmax.f32 %v8632_v13, 0.0 }
 0x361   : > { %v6271_v19 = vmax.f32 %v8634_v16, 0.0 }
 0x362   : > { %v6269_v36 = vmax.f32 %v8636_v17, 0.0  ;;  %v8115_v29 = vpop.f32.mrb[20].mxu1 }
 0x363   : > { %v7134_v33 = vpack.c.bf16 %v6271_v19, %v6270_v18  ;;  %v8637_v26 = vadd.f32 %v8115_v29, %v10754_v40  ;;  %v8583_v28 = vpop.f32.mrb[20].mxu0  ;;  %v3165_v44 = vpop.f32.mrb[21].mxu1 }
 0x364   : > { %v7129_v45 = vpack.c.bf16 %v6269_v36, %v6268_v20  ;;  %v8639_v56 = vadd.f32 %v10754_v40, %v3165_v44  ;;  %v6153_v57 = vpop.f32.mrb[21].mxu0  ;;  %v8116_v58 = vpop.f32.mrb[22].mxu1 }
 0x365   : > { %7184 = vst [vmem:[%s10764_s9 + $0x48] sm:$0xff] %v7134_v33   ;;  %v8638_v59 = vadd.f32 %v8637_v26, %v8583_v28  ;;  %v8641_v8 = vadd.f32 %v8116_v58, %v10754_v40  ;;  %v8584_v10 = vpop.f32.mrb[22].mxu0  ;;  %v3168_v27 = vpop.f32.mrb[23].mxu1 }
 0x366   : > { %7183 = vst [vmem:[%s10764_s9 + $0x40] sm:$0xff] %v7129_v45   ;;  %v8640_v31 = vadd.f32 %v8639_v56, %v6153_v57  ;;  %v8643_v34 = vadd.f32 %v10754_v40, %v3168_v27  ;;  %v6156_v35 = vpop.f32.mrb[23].mxu0 }
 0x367   : > { %v8642_v38 = vadd.f32 %v8641_v8, %v8584_v10  ;;  %v6274_v41 = vmax.f32 %v8638_v59, 0.0 }
 0x368   : > { %v8644_v39 = vadd.f32 %v8643_v34, %v6156_v35  ;;  %v6272_v43 = vmax.f32 %v8640_v31, 0.0 }
 0x369   : > { %v6275_v42 = vmax.f32 %v8642_v38, 0.0 }
 0x36a   : > { %v6273_v60 = vmax.f32 %v8644_v39, 0.0  ;;  %v8119_v61 = vpop.f32.mrb[24].mxu1 }
 0x36b   : > { %v7144_v46 = vpack.c.bf16 %v6275_v42, %v6274_v41  ;;  %v8645_v47 = vadd.f32 %v8119_v61, %v10754_v40  ;;  %v8587_v49 = vpop.f32.mrb[24].mxu0  ;;  %v3181_v51 = vpop.f32.mrb[25].mxu1 }
 0x36c   : > { %v7139_v50 = vpack.c.bf16 %v6273_v60, %v6272_v43  ;;  %v8647_v3 = vadd.f32 %v10754_v40, %v3181_v51  ;;  %v6169_v4 = vpop.f32.mrb[25].mxu0  ;;  %v8120_v5 = vpop.f32.mrb[26].mxu1 }
 0x36d   : > { %7186 = vst [vmem:[%s10764_s9 + $0x58] sm:$0xff] %v7144_v46   ;;  %v8646_v21 = vadd.f32 %v8645_v47, %v8587_v49  ;;  %v8649_v37 = vadd.f32 %v8120_v5, %v10754_v40  ;;  %v8588_v24 = vpop.f32.mrb[26].mxu0  ;;  %v3184_v25 = vpop.f32.mrb[27].mxu1 }
 0x36e   : > { %7185 = vst [vmem:[%s10764_s9 + $0x50] sm:$0xff] %v7139_v50   ;;  %v8648_v9 = vadd.f32 %v8647_v3, %v6169_v4  ;;  %v8651_v11 = vadd.f32 %v10754_v40, %v3184_v25  ;;  %v6172_v22 = vpop.f32.mrb[27].mxu0 }
 0x36f   : > { %v8650_v23 = vadd.f32 %v8649_v37, %v8588_v24  ;;  %v6278_v32 = vmax.f32 %v8646_v21, 0.0 }
 0x370   : > { %v8652_v30 = vadd.f32 %v8651_v11, %v6172_v22  ;;  %v6276_v53 = vmax.f32 %v8648_v9, 0.0 }
 0x371   : > { %v6279_v52 = vmax.f32 %v8650_v23, 0.0 }
 0x372   : > { %v6277_v54 = vmax.f32 %v8652_v30, 0.0  ;;  %v8123_v55 = vpop.f32.mrb[28].mxu1 }
 0x373   : > { %v7154_v62 = vpack.c.bf16 %v6279_v52, %v6278_v32  ;;  %v8653_v63 = vadd.f32 %v8123_v55, %v10754_v40  ;;  %v8591_v0 = vpop.f32.mrb[28].mxu0  ;;  %v3197_v1 = vpop.f32.mrb[29].mxu1 }
 0x374   : > { %v7149_v2 = vpack.c.bf16 %v6277_v54, %v6276_v53  ;;  %v8655_v48 = vadd.f32 %v10754_v40, %v3197_v1  ;;  %v6185_v6 = vpop.f32.mrb[29].mxu0  ;;  %v8124_v7 = vpop.f32.mrb[30].mxu1 }
 0x375   : > { %7188 = vst [vmem:[%s10764_s9 + $0x68] sm:$0xff] %v7154_v62   ;;  %v8654_v12 = vadd.f32 %v8653_v63, %v8591_v0  ;;  %v8657_v13 = vadd.f32 %v8124_v7, %v10754_v40  ;;  %v8592_v14 = vpop.f32.mrb[30].mxu0  ;;  %v3200_v15 = vpop.f32.mrb[31].mxu1 }
 0x376   : > { %7187 = vst [vmem:[%s10764_s9 + $0x60] sm:$0xff] %v7149_v2   ;;  %v8656_v16 = vadd.f32 %v8655_v48, %v6185_v6  ;;  %v8659_v17 = vadd.f32 %v10754_v40, %v3200_v15  ;;  %v6188_v18 = vpop.f32.mrb[31].mxu0 }
 0x377   : > { %v8658_v19 = vadd.f32 %v8657_v13, %v8592_v14  ;;  %v6282_v36 = vmax.f32 %v8654_v12, 0.0 }
 0x378   : > { %v8660_v20 = vadd.f32 %v8659_v17, %v6188_v18  ;;  %v6280_v33 = vmax.f32 %v8656_v16, 0.0 }
 0x379   : > { %v6283_v29 = vmax.f32 %v8658_v19, 0.0 }
 0x37a   : > { %v6281_v26 = vmax.f32 %v8660_v20, 0.0  ;;  %v8127_v28 = vpop.f32.mrb[32].mxu1 }
 0x37b   : > { %v7164_v44 = vpack.c.bf16 %v6283_v29, %v6282_v36  ;;  %v8661_v45 = vadd.f32 %v8127_v28, %v10754_v40  ;;  %v8595_v56 = vpop.f32.mrb[32].mxu0  ;;  %v3213_v57 = vpop.f32.mrb[33].mxu1 }
 0x37c   : > { %v7159_v58 = vpack.c.bf16 %v6281_v26, %v6280_v33  ;;  %v8663_v59 = vadd.f32 %v10754_v40, %v3213_v57  ;;  %v6201_v8 = vpop.f32.mrb[33].mxu0  ;;  %v8128_v10 = vpop.f32.mrb[34].mxu1 }
 0x37d   : > { %7190 = vst [vmem:[%s10764_s9 + $0x78] sm:$0xff] %v7164_v44   ;;  %v8662_v27 = vadd.f32 %v8661_v45, %v8595_v56  ;;  %v8665_v31 = vadd.f32 %v8128_v10, %v10754_v40  ;;  %v8596_v34 = vpop.f32.mrb[34].mxu0  ;;  %v3216_v35 = vpop.f32.mrb[35].mxu1 }
 0x37e   : > { %7189 = vst [vmem:[%s10764_s9 + $0x70] sm:$0xff] %v7159_v58   ;;  %v8664_v38 = vadd.f32 %v8663_v59, %v6201_v8  ;;  %v8667_v39 = vadd.f32 %v10754_v40, %v3216_v35  ;;  %v6204_v41 = vpop.f32.mrb[35].mxu0 }
 0x37f   : > { %v8666_v42 = vadd.f32 %v8665_v31, %v8596_v34  ;;  %v6286_v60 = vmax.f32 %v8662_v27, 0.0 }
 0x380   : > { %v8668_v43 = vadd.f32 %v8667_v39, %v6204_v41  ;;  %v6284_v46 = vmax.f32 %v8664_v38, 0.0 }
 0x381   : > { %v6287_v61 = vmax.f32 %v8666_v42, 0.0 }
 0x382   : > { %v6285_v47 = vmax.f32 %v8668_v43, 0.0 }
 0x383   : > { %v7174_v49 = vpack.c.bf16 %v6287_v61, %v6286_v60 }
 0x384   : > { %v7169_v51 = vpack.c.bf16 %v6285_v47, %v6284_v46 }
 0x385   : > { %7192 = vst [vmem:[%s10764_s9 + $0x88] sm:$0xff] %v7174_v49  }
 0x386   : > { %7191 = vst [vmem:[%s10764_s9 + $0x80] sm:$0xff] %v7169_v51  }
 0x387 PF: > { %s14_s17 = sadd.s32 1, %s9437_s17   ;;  %s10830_s15 = smov %s9433_s16 }
 0x388   : > { %p11_p5 = scmp.ge.s32.totalorder %s14_s17, 4   ;;  %s10831_s16 = smov %s10833_s18 }
 0x38a   :  { %13 = sbr.rel (!%p11_p5) target bundleno = 2 (0x2), region = 92 }

</bundles_post_ra>
